<compile_context>
chip_gen: v7x
topology: tpu7x:2x2x1
jax: 0.10.0
libtpu: 0.0.40
codegen_flags: <defaults>
</compile_context>

<pallas_src>
import jax
import jax.numpy as jnp
from jax.experimental import pallas as pl
from jax.experimental.pallas import tpu as pltpu


# ------------------------- Pallas kernels -------------------------

def _conv_relu_pool_kernel(p_ref, w_ref, b_ref, o_ref):
    # p_ref: (4*N, K) bf16 im2col patches; rows [t*N, (t+1)*N) hold pool offset t=2*dh+dw
    # w_ref: (K, Cout) bf16, b_ref: (1, Cout) f32, o_ref: (N, Cout) bf16
    n = o_ref.shape[0]
    # One MXU matmul covering all 4 pool-window positions (4x M rows).
    y = jnp.dot(p_ref[...], w_ref[...], preferred_element_type=jnp.float32)  # (4N, Cout)
    # Max-pool over the 4 row groups; bias + relu hoisted out of the pool (they commute).
    m = jnp.maximum(jnp.maximum(y[0:n], y[n:2 * n]),
                    jnp.maximum(y[2 * n:3 * n], y[3 * n:4 * n]))
    o_ref[...] = jnp.maximum(m + b_ref[...], 0.0).astype(o_ref.dtype)


def conv_relu_pool(patches, w, b):
    # patches: (4*N, K) bf16, w: (K, Cout) bf16, b: (1, Cout) f32 -> (N, Cout) bf16
    M, K = patches.shape
    N = M // 4
    Cout = w.shape[1]
    return pl.pallas_call(
        _conv_relu_pool_kernel,
        out_shape=jax.ShapeDtypeStruct((N, Cout), jnp.bfloat16),
        grid_spec=pltpu.PrefetchScalarGridSpec(
            num_scalar_prefetch=0,
            grid=(1,),  # whole problem in one step: N<=512 here, per-step overhead dominates otherwise
            in_specs=[
                pl.BlockSpec((M, K), lambda i: (0, 0)),
                pl.BlockSpec((K, Cout), lambda i: (0, 0)),
                pl.BlockSpec((1, Cout), lambda i: (0, 0)),
            ],
            out_specs=pl.BlockSpec((N, Cout), lambda i: (0, 0)),
        ),
        compiler_params=pltpu.CompilerParams(
            dimension_semantics=("arbitrary",)),
    )(patches, w, b)


def _fc_head_kernel(x_ref, w1_ref, b1_ref, w2_ref, b2_ref, o_ref):
    # x: (Bp, D) bf16, w1: (D, H) bf16, b1: (1, H) f32, w2: (H, Cp) bf16, b2: (1, Cp) f32
    h = jnp.dot(x_ref[...], w1_ref[...],
                preferred_element_type=jnp.float32) + b1_ref[...]
    h = h.astype(x_ref.dtype)  # back to bf16 for the second MXU matmul
    o_ref[...] = jnp.dot(h, w2_ref[...],
                         preferred_element_type=jnp.float32) + b2_ref[...]


def fc_head(x, w1, b1, w2, b2):
    # x: (Bp, D), w1: (D, H), b1: (1, H), w2: (H, Cp), b2: (1, Cp) -> (Bp, Cp) f32
    Bp, D = x.shape
    H = w1.shape[1]
    Cp = w2.shape[1]
    return pl.pallas_call(
        _fc_head_kernel,
        out_shape=jax.ShapeDtypeStruct((Bp, Cp), jnp.float32),
        grid_spec=pltpu.PrefetchScalarGridSpec(
            num_scalar_prefetch=0,
            grid=(1,),  # whole fc1 weight (4 MiB bf16) fits in VMEM; no accumulation passes
            in_specs=[
                pl.BlockSpec((Bp, D), lambda i: (0, 0)),
                pl.BlockSpec((D, H), lambda i: (0, 0)),
                pl.BlockSpec((1, H), lambda i: (0, 0)),
                pl.BlockSpec((H, Cp), lambda i: (0, 0)),
                pl.BlockSpec((1, Cp), lambda i: (0, 0)),
            ],
            out_specs=pl.BlockSpec((Bp, Cp), lambda i: (0, 0)),
        ),
        compiler_params=pltpu.CompilerParams(
            dimension_semantics=("arbitrary",),
            vmem_limit_bytes=32 * 1024 * 1024,  # headroom on v5e's 16 MiB default scoped limit
        ),
    )(x, w1, b1, w2, b2)


# ------------------------- plain-JAX glue (layout only) -------------------------

def _im2col(x, k):
    # x: (B, H, W, C) -> (B, Ho, Wo, k*k*C) with feature order (kh, kw, ci)
    B, H, W, C = x.shape
    Ho, Wo = H - k + 1, W - k + 1
    cols = []
    for kh in range(k):
        for kw in range(k):
            cols.append(x[:, kh:kh + Ho, kw:kw + Wo, :])
    return jnp.concatenate(cols, axis=-1)


def _pool_group(patches):
    # (B, Ho, Wo, K) -> (4*B*(Ho//2)*(Wo//2), K): rows grouped by 2x2 pool window position
    B, Ho, Wo, K = patches.shape
    Hp, Wp = Ho // 2, Wo // 2
    p = patches.reshape(B, Hp, 2, Wp, 2, K)
    p = p.transpose(2, 4, 0, 1, 3, 5)      # (2, 2, B, Hp, Wp, K)
    return p.reshape(4 * B * Hp * Wp, K)


def conv_layer(x, w, b):
    # x: (B, H, W, Cin) bf16, w: (5,5,Cin,Cout) bf16 HWIO, b: (Cout,) f32
    B, H, W, Cin = x.shape
    k = w.shape[0]
    Cout = w.shape[3]
    Hp, Wp = (H - k + 1) // 2, (W - k + 1) // 2
    patches = _pool_group(_im2col(x, k))               # (4*N, k*k*Cin)
    wm = w.reshape(k * k * Cin, Cout)
    out = conv_relu_pool(patches, wm, b.reshape(1, Cout))  # (N, Cout) bf16
    return out.reshape(B, Hp, Wp, Cout)


def client_model_forward(x_nchw, params, num_classes):
    # params are pre-processed once (bf16 weights, fc1 rows reordered to NHWC-flatten
    # order, fc2 output padded to 128 lanes).
    w1, b1, w2, b2, wf1_hwc, bf1, wf2_p, bf2_p = params
    B = x_nchw.shape[0]
    x = jnp.transpose(x_nchw, (0, 2, 3, 1)).astype(jnp.bfloat16)   # NCHW -> NHWC
    h1 = conv_layer(x, w1, b1)                       # (B, 12, 12, 32) bf16
    h2 = conv_layer(h1, w2, b2)                      # (B, 4, 4, 64)  bf16
    flat = h2.reshape(B, 64 * 16)                    # NHWC flatten (fc1 rows pre-reordered)
    Bp = ((B + 7) // 8) * 8                          # sublane-dense fc output store
    flat_p = jnp.pad(flat, ((0, Bp - B), (0, 0)))
    logits_p = fc_head(flat_p, wf1_hwc, bf1.reshape(1, -1),
                       wf2_p, bf2_p.reshape(1, -1))  # (Bp, 128) f32
    return logits_p[:B, :num_classes]


# ------------------------- pure-JAX reference for verification -------------------------

def reference_forward(x_nchw, raw_params):
    # Mirrors the bf16-input / f32-accumulate arithmetic of the kernels, in torch layout.
    w1, b1, w2, b2, wf1, bf1, wf2, bf2 = raw_params

    def conv_block(x, w, b):
        y = jax.lax.conv_general_dilated(
            x.astype(jnp.bfloat16), w.astype(jnp.bfloat16), (1, 1), 'VALID',
            dimension_numbers=('NHWC', 'HWIO', 'NHWC'),
            preferred_element_type=jnp.float32) + b
        y = jnp.maximum(y, 0.0)
        B, H, W, C = y.shape
        return y.reshape(B, H // 2, 2, W // 2, 2, C).max(axis=(2, 4)).astype(jnp.bfloat16)

    x = jnp.transpose(x_nchw, (0, 2, 3, 1))
    h = conv_block(conv_block(x, w1, b1), w2, b2)
    # torch.flatten(x, 1) on NCHW flattens in (c, h, w) order
    flat = jnp.transpose(h, (0, 3, 1, 2)).reshape(x.shape[0], 64 * 16)
    h1 = jnp.dot(flat.astype(jnp.bfloat16), wf1.astype(jnp.bfloat16),
                 preferred_element_type=jnp.float32) + bf1
    return jnp.dot(h1.astype(jnp.bfloat16), wf2.astype(jnp.bfloat16),
                   preferred_element_type=jnp.float32) + bf2


# ------------------------- main -------------------------

if __name__ == "__main__":
    num_classes = 62  # FEMNIST
    B = 2
    key = jax.random.PRNGKey(0)
    ks = jax.random.split(key, 9)

    # PyTorch-style NCHW input, 28x28 single channel (required by fc1 = 64*16)
    x_nchw = jax.random.normal(ks[0], (B, 1, 28, 28), jnp.float32)

    # Deterministic synthetic parameters (shapes from the module's __init__)
    w1 = jax.random.normal(ks[1], (5, 5, 1, 32), jnp.float32) * 0.10
    b1 = jax.random.normal(ks[2], (32,), jnp.float32) * 0.10
    w2 = jax.random.normal(ks[3], (5, 5, 32, 64), jnp.float32) * 0.05
    b2 = jax.random.normal(ks[4], (64,), jnp.float32) * 0.10
    wf1 = jax.random.normal(ks[5], (64 * 16, 2048), jnp.float32) * 0.02
    bf1 = jax.random.normal(ks[6], (2048,), jnp.float32) * 0.02
    wf2 = jax.random.normal(ks[7], (2048, num_classes), jnp.float32) * 0.02
    bf2 = jax.random.normal(ks[8], (num_classes,), jnp.float32) * 0.02

    raw_params = (w1, b1, w2, b2, wf1, bf1, wf2, bf2)

    # --- one-time parameter preprocessing (layout + dtype), outside the forward ---
    # fc1 rows reordered from torch's (c,h,w) flatten order to NHWC (h,w,c) flatten order.
    wf1_hwc = wf1.reshape(64, 4, 4, 2048).transpose(1, 2, 0, 3).reshape(64 * 16, 2048)
    # fc2 output padded to a full 128-lane slab (dense stores); logits sliced afterwards.
    C_PAD = 128
    wf2_pad = jnp.zeros((2048, C_PAD), jnp.float32).at[:, :num_classes].set(wf2)
    bf2_pad = jnp.zeros((C_PAD,), jnp.float32).at[:num_classes].set(bf2)
    params = (
        w1.astype(jnp.bfloat16), b1,
        w2.astype(jnp.bfloat16), b2,
        wf1_hwc.astype(jnp.bfloat16), bf1,
        wf2_pad.astype(jnp.bfloat16), bf2_pad,
    )

    @jax.jit
    def fwd(x, p):
        return client_model_forward(x, p, num_classes)

    logits = jax.block_until_ready(fwd(x_nchw, params))
    assert logits.shape == (B, num_classes), logits.shape

    ref = jax.block_until_ready(reference_forward(x_nchw, raw_params))
    max_err = float(jnp.max(jnp.abs(logits - ref)))
    assert jnp.allclose(logits, ref, rtol=3e-2, atol=3e-2), max_err

    print("KERNEL_OK")
</pallas_src>

<mosaic_0001>
module attributes {stable_mosaic.version = 11 : i64} {
  func.func @_conv_relu_pool_kernel(%arg0: i32, %arg1: memref<1152x25xbf16, #tpu.memory_space<vmem>>, %arg2: memref<25x32xbf16, #tpu.memory_space<vmem>>, %arg3: memref<1x32xf32, #tpu.memory_space<vmem>>, %arg4: memref<288x32xbf16, #tpu.memory_space<vmem>>) attributes {dimension_semantics = [#tpu.dimension_semantics<arbitrary>], iteration_bounds = array<i64: 1>, scalar_prefetch = 0 : i64, scratch_operands = 0 : i64, tpu.core_type = #tpu.core_type<tc>, window_params = [{pipeline_mode = #tpu.pipeline_mode<synchronous>, transform_indices = @transform_0, window_bounds = array<i64: 1152, 25>}, {pipeline_mode = #tpu.pipeline_mode<synchronous>, transform_indices = @transform_1, window_bounds = array<i64: 25, 32>}, {pipeline_mode = #tpu.pipeline_mode<synchronous>, transform_indices = @transform_2, window_bounds = array<i64: 1, 32>}, {pipeline_mode = #tpu.pipeline_mode<synchronous>, transform_indices = @transform_3, window_bounds = array<i64: 288, 32>}]} {
    %c0 = arith.constant 0 : index
    %c0_0 = arith.constant 0 : index
    %0 = vector.load %arg1[%c0, %c0_0] : memref<1152x25xbf16, #tpu.memory_space<vmem>>, vector<1152x25xbf16>
    %c0_1 = arith.constant 0 : index
    %c0_2 = arith.constant 0 : index
    %1 = vector.load %arg2[%c0_1, %c0_2] : memref<25x32xbf16, #tpu.memory_space<vmem>>, vector<25x32xbf16>
    %cst = arith.constant dense<0.000000e+00> : vector<1152x32xf32>
    %2 = tpu.matmul %0, %1, %cst {dimension_numbers = #tpu.dot_dimension_numbers<[1], [0], [0], [1], [0, 0, 1, 1], [], []>} : vector<1152x25xbf16>, vector<25x32xbf16>, vector<1152x32xf32> -> vector<1152x32xf32>
    %3 = vector.extract_strided_slice %2 {offsets = [0, 0], sizes = [288, 32], strides = [1, 1]} : vector<1152x32xf32> to vector<288x32xf32>
    %4 = vector.extract_strided_slice %2 {offsets = [288, 0], sizes = [288, 32], strides = [1, 1]} : vector<1152x32xf32> to vector<288x32xf32>
    %5 = arith.maximumf %3, %4 : vector<288x32xf32>
    %6 = vector.extract_strided_slice %2 {offsets = [576, 0], sizes = [288, 32], strides = [1, 1]} : vector<1152x32xf32> to vector<288x32xf32>
    %7 = vector.extract_strided_slice %2 {offsets = [864, 0], sizes = [288, 32], strides = [1, 1]} : vector<1152x32xf32> to vector<288x32xf32>
    %8 = arith.maximumf %6, %7 : vector<288x32xf32>
    %9 = arith.maximumf %5, %8 : vector<288x32xf32>
    %c0_3 = arith.constant 0 : index
    %c0_4 = arith.constant 0 : index
    %10 = vector.load %arg3[%c0_3, %c0_4] : memref<1x32xf32, #tpu.memory_space<vmem>>, vector<1x32xf32>
    %11 = vector.broadcast %10 : vector<1x32xf32> to vector<288x32xf32>
    %12 = arith.addf %9, %11 : vector<288x32xf32>
    %cst_5 = arith.constant 0.000000e+00 : f32
    %13 = vector.broadcast %cst_5 : f32 to vector<288x32xf32>
    %14 = arith.maximumf %12, %13 : vector<288x32xf32>
    %15 = arith.truncf %14 : vector<288x32xf32> to vector<288x32xbf16>
    %c0_6 = arith.constant 0 : index
    %c0_7 = arith.constant 0 : index
    %16 = vector.load %arg4[%c0_6, %c0_7] : memref<288x32xbf16, #tpu.memory_space<vmem>>, vector<288x32xbf16>
    tpu.vector_store %arg4[%c0_6, %c0_7], %15 {strides = array<i32>} : memref<288x32xbf16, #tpu.memory_space<vmem>>, vector<288x32xbf16>,
    return
  }
  func.func @transform_0(%arg0: i32) -> (i32, i32) {
    %c0_i32 = arith.constant 0 : i32
    %c0_i32_0 = arith.constant 0 : i32
    %c0_i32_1 = arith.constant 0 : i32
    return %c0_i32, %c0_i32_0 : i32, i32
  }
  func.func @transform_1(%arg0: i32) -> (i32, i32) {
    %c0_i32 = arith.constant 0 : i32
    %c0_i32_0 = arith.constant 0 : i32
    %c0_i32_1 = arith.constant 0 : i32
    return %c0_i32, %c0_i32_0 : i32, i32
  }
  func.func @transform_2(%arg0: i32) -> (i32, i32) {
    %c0_i32 = arith.constant 0 : i32
    %c0_i32_0 = arith.constant 0 : i32
    %c0_i32_1 = arith.constant 0 : i32
    return %c0_i32, %c0_i32_0 : i32, i32
  }
  func.func @transform_3(%arg0: i32) -> (i32, i32) {
    %c0_i32 = arith.constant 0 : i32
    %c0_i32_0 = arith.constant 0 : i32
    %c0_i32_1 = arith.constant 0 : i32
    return %c0_i32, %c0_i32_0 : i32, i32
  }
}

module attributes {stable_mosaic.version = 11 : i64} {
  func.func @_conv_relu_pool_kernel(%arg0: i32, %arg1: memref<128x800xbf16, #tpu.memory_space<vmem>>, %arg2: memref<800x64xbf16, #tpu.memory_space<vmem>>, %arg3: memref<1x64xf32, #tpu.memory_space<vmem>>, %arg4: memref<32x64xbf16, #tpu.memory_space<vmem>>) attributes {dimension_semantics = [#tpu.dimension_semantics<arbitrary>], iteration_bounds = array<i64: 1>, scalar_prefetch = 0 : i64, scratch_operands = 0 : i64, tpu.core_type = #tpu.core_type<tc>, window_params = [{pipeline_mode = #tpu.pipeline_mode<synchronous>, transform_indices = @transform_0, window_bounds = array<i64: 128, 800>}, {pipeline_mode = #tpu.pipeline_mode<synchronous>, transform_indices = @transform_1, window_bounds = array<i64: 800, 64>}, {pipeline_mode = #tpu.pipeline_mode<synchronous>, transform_indices = @transform_2, window_bounds = array<i64: 1, 64>}, {pipeline_mode = #tpu.pipeline_mode<synchronous>, transform_indices = @transform_3, window_bounds = array<i64: 32, 64>}]} {
    %c0 = arith.constant 0 : index
    %c0_0 = arith.constant 0 : index
    %0 = vector.load %arg1[%c0, %c0_0] : memref<128x800xbf16, #tpu.memory_space<vmem>>, vector<128x800xbf16>
    %c0_1 = arith.constant 0 : index
    %c0_2 = arith.constant 0 : index
    %1 = vector.load %arg2[%c0_1, %c0_2] : memref<800x64xbf16, #tpu.memory_space<vmem>>, vector<800x64xbf16>
    %cst = arith.constant dense<0.000000e+00> : vector<128x64xf32>
    %2 = tpu.matmul %0, %1, %cst {dimension_numbers = #tpu.dot_dimension_numbers<[1], [0], [0], [1], [0, 0, 1, 1], [], []>} : vector<128x800xbf16>, vector<800x64xbf16>, vector<128x64xf32> -> vector<128x64xf32>
    %3 = vector.extract_strided_slice %2 {offsets = [0, 0], sizes = [32, 64], strides = [1, 1]} : vector<128x64xf32> to vector<32x64xf32>
    %4 = vector.extract_strided_slice %2 {offsets = [32, 0], sizes = [32, 64], strides = [1, 1]} : vector<128x64xf32> to vector<32x64xf32>
    %5 = arith.maximumf %3, %4 : vector<32x64xf32>
    %6 = vector.extract_strided_slice %2 {offsets = [64, 0], sizes = [32, 64], strides = [1, 1]} : vector<128x64xf32> to vector<32x64xf32>
    %7 = vector.extract_strided_slice %2 {offsets = [96, 0], sizes = [32, 64], strides = [1, 1]} : vector<128x64xf32> to vector<32x64xf32>
    %8 = arith.maximumf %6, %7 : vector<32x64xf32>
    %9 = arith.maximumf %5, %8 : vector<32x64xf32>
    %c0_3 = arith.constant 0 : index
    %c0_4 = arith.constant 0 : index
    %10 = vector.load %arg3[%c0_3, %c0_4] : memref<1x64xf32, #tpu.memory_space<vmem>>, vector<1x64xf32>
    %11 = vector.broadcast %10 : vector<1x64xf32> to vector<32x64xf32>
    %12 = arith.addf %9, %11 : vector<32x64xf32>
    %cst_5 = arith.constant 0.000000e+00 : f32
    %13 = vector.broadcast %cst_5 : f32 to vector<32x64xf32>
    %14 = arith.maximumf %12, %13 : vector<32x64xf32>
    %15 = arith.truncf %14 : vector<32x64xf32> to vector<32x64xbf16>
    %c0_6 = arith.constant 0 : index
    %c0_7 = arith.constant 0 : index
    %16 = vector.load %arg4[%c0_6, %c0_7] : memref<32x64xbf16, #tpu.memory_space<vmem>>, vector<32x64xbf16>
    tpu.vector_store %arg4[%c0_6, %c0_7], %15 {strides = array<i32>} : memref<32x64xbf16, #tpu.memory_space<vmem>>, vector<32x64xbf16>,
    return
  }
  func.func @transform_0(%arg0: i32) -> (i32, i32) {
    %c0_i32 = arith.constant 0 : i32
    %c0_i32_0 = arith.constant 0 : i32
    %c0_i32_1 = arith.constant 0 : i32
    return %c0_i32, %c0_i32_0 : i32, i32
  }
  func.func @transform_1(%arg0: i32) -> (i32, i32) {
    %c0_i32 = arith.constant 0 : i32
    %c0_i32_0 = arith.constant 0 : i32
    %c0_i32_1 = arith.constant 0 : i32
    return %c0_i32, %c0_i32_0 : i32, i32
  }
  func.func @transform_2(%arg0: i32) -> (i32, i32) {
    %c0_i32 = arith.constant 0 : i32
    %c0_i32_0 = arith.constant 0 : i32
    %c0_i32_1 = arith.constant 0 : i32
    return %c0_i32, %c0_i32_0 : i32, i32
  }
  func.func @transform_3(%arg0: i32) -> (i32, i32) {
    %c0_i32 = arith.constant 0 : i32
    %c0_i32_0 = arith.constant 0 : i32
    %c0_i32_1 = arith.constant 0 : i32
    return %c0_i32, %c0_i32_0 : i32, i32
  }
}

module attributes {stable_mosaic.version = 11 : i64} {
  func.func @_fc_head_kernel(%arg0: i32, %arg1: memref<8x1024xbf16, #tpu.memory_space<vmem>>, %arg2: memref<1024x2048xbf16, #tpu.memory_space<vmem>>, %arg3: memref<1x2048xf32, #tpu.memory_space<vmem>>, %arg4: memref<2048x128xbf16, #tpu.memory_space<vmem>>, %arg5: memref<1x128xf32, #tpu.memory_space<vmem>>, %arg6: memref<8x128xf32, #tpu.memory_space<vmem>>) attributes {dimension_semantics = [#tpu.dimension_semantics<arbitrary>], iteration_bounds = array<i64: 1>, scalar_prefetch = 0 : i64, scratch_operands = 0 : i64, tpu.core_type = #tpu.core_type<tc>, window_params = [{pipeline_mode = #tpu.pipeline_mode<synchronous>, transform_indices = @transform_0, window_bounds = array<i64: 8, 1024>}, {pipeline_mode = #tpu.pipeline_mode<synchronous>, transform_indices = @transform_1, window_bounds = array<i64: 1024, 2048>}, {pipeline_mode = #tpu.pipeline_mode<synchronous>, transform_indices = @transform_2, window_bounds = array<i64: 1, 2048>}, {pipeline_mode = #tpu.pipeline_mode<synchronous>, transform_indices = @transform_3, window_bounds = array<i64: 2048, 128>}, {pipeline_mode = #tpu.pipeline_mode<synchronous>, transform_indices = @transform_4, window_bounds = array<i64: 1, 128>}, {pipeline_mode = #tpu.pipeline_mode<synchronous>, transform_indices = @transform_5, window_bounds = array<i64: 8, 128>}]} {
    %c0 = arith.constant 0 : index
    %c0_0 = arith.constant 0 : index
    %0 = vector.load %arg1[%c0, %c0_0] : memref<8x1024xbf16, #tpu.memory_space<vmem>>, vector<8x1024xbf16>
    %c0_1 = arith.constant 0 : index
    %c0_2 = arith.constant 0 : index
    %1 = vector.load %arg2[%c0_1, %c0_2] : memref<1024x2048xbf16, #tpu.memory_space<vmem>>, vector<1024x2048xbf16>
    %cst = arith.constant dense<0.000000e+00> : vector<8x2048xf32>
    %2 = tpu.matmul %0, %1, %cst {dimension_numbers = #tpu.dot_dimension_numbers<[1], [0], [0], [1], [0, 0, 1, 1], [], []>} : vector<8x1024xbf16>, vector<1024x2048xbf16>, vector<8x2048xf32> -> vector<8x2048xf32>
    %c0_3 = arith.constant 0 : index
    %c0_4 = arith.constant 0 : index
    %3 = vector.load %arg3[%c0_3, %c0_4] : memref<1x2048xf32, #tpu.memory_space<vmem>>, vector<1x2048xf32>
    %4 = vector.broadcast %3 : vector<1x2048xf32> to vector<8x2048xf32>
    %5 = arith.addf %2, %4 : vector<8x2048xf32>
    %6 = arith.truncf %5 : vector<8x2048xf32> to vector<8x2048xbf16>
    %c0_5 = arith.constant 0 : index
    %c0_6 = arith.constant 0 : index
    %7 = vector.load %arg4[%c0_5, %c0_6] : memref<2048x128xbf16, #tpu.memory_space<vmem>>, vector<2048x128xbf16>
    %cst_7 = arith.constant dense<0.000000e+00> : vector<8x128xf32>
    %8 = tpu.matmul %6, %7, %cst_7 {dimension_numbers = #tpu.dot_dimension_numbers<[1], [0], [0], [1], [0, 0, 1, 1], [], []>} : vector<8x2048xbf16>, vector<2048x128xbf16>, vector<8x128xf32> -> vector<8x128xf32>
    %c0_8 = arith.constant 0 : index
    %c0_9 = arith.constant 0 : index
    %9 = vector.load %arg5[%c0_8, %c0_9] : memref<1x128xf32, #tpu.memory_space<vmem>>, vector<1x128xf32>
    %10 = vector.broadcast %9 : vector<1x128xf32> to vector<8x128xf32>
    %11 = arith.addf %8, %10 : vector<8x128xf32>
    %c0_10 = arith.constant 0 : index
    %c0_11 = arith.constant 0 : index
    %12 = vector.load %arg6[%c0_10, %c0_11] : memref<8x128xf32, #tpu.memory_space<vmem>>, vector<8x128xf32>
    tpu.vector_store %arg6[%c0_10, %c0_11], %11 {strides = array<i32>} : memref<8x128xf32, #tpu.memory_space<vmem>>, vector<8x128xf32>,
    return
  }
  func.func @transform_0(%arg0: i32) -> (i32, i32) {
    %c0_i32 = arith.constant 0 : i32
    %c0_i32_0 = arith.constant 0 : i32
    %c0_i32_1 = arith.constant 0 : i32
    return %c0_i32, %c0_i32_0 : i32, i32
  }
  func.func @transform_1(%arg0: i32) -> (i32, i32) {
    %c0_i32 = arith.constant 0 : i32
    %c0_i32_0 = arith.constant 0 : i32
    %c0_i32_1 = arith.constant 0 : i32
    return %c0_i32, %c0_i32_0 : i32, i32
  }
  func.func @transform_2(%arg0: i32) -> (i32, i32) {
    %c0_i32 = arith.constant 0 : i32
    %c0_i32_0 = arith.constant 0 : i32
    %c0_i32_1 = arith.constant 0 : i32
    return %c0_i32, %c0_i32_0 : i32, i32
  }
  func.func @transform_3(%arg0: i32) -> (i32, i32) {
    %c0_i32 = arith.constant 0 : i32
    %c0_i32_0 = arith.constant 0 : i32
    %c0_i32_1 = arith.constant 0 : i32
    return %c0_i32, %c0_i32_0 : i32, i32
  }
  func.func @transform_4(%arg0: i32) -> (i32, i32) {
    %c0_i32 = arith.constant 0 : i32
    %c0_i32_0 = arith.constant 0 : i32
    %c0_i32_1 = arith.constant 0 : i32
    return %c0_i32, %c0_i32_0 : i32, i32
  }
  func.func @transform_5(%arg0: i32) -> (i32, i32) {
    %c0_i32 = arith.constant 0 : i32
    %c0_i32_0 = arith.constant 0 : i32
    %c0_i32_1 = arith.constant 0 : i32
    return %c0_i32, %c0_i32_0 : i32, i32
  }
}

</mosaic_0001>

<bundles_post_ra>
// kernel: fwd.3
= control target key start
LH: loop header
LB: loop body
LE: loop exit
PB: predicated region body
PF: predicated region fallthrough
CT: control target
= control target key end

     0   :  { %8 = vsyncpa [#allocation3], 0  ;;  %s2297_s12 = smov [#allocation2]   ;;  %s3023_s0 = inlined_call_operand.vmem [shape: bf16[1152,25], index: 0, kind: input, shape index: {}]   ;;  %s3024_s1 = inlined_call_operand.vmem [shape: bf16[25,32], index: 1, kind: input, shape index: {}]   ;;  %s3025_s2 = inlined_call_operand.hbm [shape: f32[1,32], index: 2, kind: input, shape index: {}]   ;;  %s3026_s3 = inlined_call_operand.vmem [shape: bf16[288,32], index: 3, kind: output, shape index: {}]  }
   0x1   :  { %s19_s13 = sshll.u32 %s2297_s12, 4  ;;  %s2273_s16 = scalar_lea.hbm %s3025_s2, 16  ;;  %s20_s13 = int_to_ptr.vmem [resolvable:$true] %s19_s13 }
   0x2   :  { %p2274_p0 = scmp.ne.s32.totalorder %s3025_s2, %s2273_s16  ;;  %p2277_p1 = scmp.lt.u32.totalorder %s2273_s16, %s3025_s2 }
   0x4   :  { %p2279_p2 = pnand %p2277_p1, %p2274_p0 }
   0x6   :  { %2282 = shalt.err (!%p2279_p2)
}
   0x7   :  { %s2283_s21 = scalar_lea.vmem %s20_s13, 16  ;;  %s2287_s22 = scalar_lea.vmem %s20_s13, 32 }
   0x8   :  { %p2284_p3 = scmp.ne.s32.totalorder %s20_s13, %s2283_s21  ;;  %p2288_p4 = scmp.lt.s32.totalorder %s20_s13, %s20_s13 }
   0x9   :  { %p2289_p5 = scmp.lt.s32.totalorder %s2287_s22, %s2283_s21 }
   0xb   :  { %p2290_p6 = por %p2289_p5, %p2288_p4 }
   0xd   :  { %p2291_p7 = pnand %p2290_p6, %p2284_p3 }
   0xf   :  { %2294 = shalt.err (!%p2291_p7)
}
  0x10   :  { %22 = dma.hbm_to_vmem [thread:$0]  %s3025_s2, 16, %s20_s13, [#allocation3]  }
  0x11   :  { %2295 = dma.done.wait [#allocation3], 16  }
  0x12   :  { %2296 = vsyncadd [#allocation3], 4294967280  ;;  %vm763_vm0 = vcmask 1043456   ;;  %vm764_vm1 = vcmask 1044480   ;;  %v2298_v0 = vmov 65535   ;;  %vm546_vm2 = vcmask 203776  }
  0x13   :  { %v765_v1 = vsel %vm763_vm0, 4294967295, %v2298_v0  ;;  %v2199_v2 = vld [vmem:[%s3024_s1] sm:$0xff]   ;;  %v2200_v4 = vld [vmem:[%s3024_s1 + $0x8] sm:$0x1f]   ;;  %v2205_v10 = vld [vmem:[%s3023_s0 + $0x10] sm:$0xff]   ;;  %vm1710_vm3 = vcmask 257024  }
  0x14   :  { %v766_v3 = vsel %vm764_vm1, %v765_v1, 0  ;;  %2045 = vmatprep.subr.bf16.mxu0 %v2199_v2  ;;  %2193 = vmatprep.subr.bf16.mxu1 %v2199_v2  ;;  %v2201_v5 = vld [vmem:[%s3023_s0] sm:$0xff]   ;;  %v2203_v8 = vld [vmem:[%s3023_s0 + $0x8] sm:$0xff]   ;;  %v2206_v11 = vld [vmem:[%s3023_s0 + $0x130] sm:$0xff]  }
  0x15   :  { %2046 = vmatpush3.bf16.msra.mxu0 %v2199_v2  ;;  %2195 = vmatpush3.bf16.msra.mxu1 %v2199_v2  ;;  %v768_v6 = vand.u32 %v2200_v4, %v766_v3  ;;  %v2202_v7 = vld [vmem:[%s3023_s0 + $0x120] sm:$0xff]   ;;  %v2204_v9 = vld [vmem:[%s3023_s0 + $0x128] sm:$0xff]   ;;  %v2207_v12 = vld [vmem:[%s3023_s0 + $0x18] sm:$0xff]  }
  0x16   :  { %2049 = vmatprep.mubr.msk.bf16.mxu0 %vm546_vm2, %v2201_v5  ;;  %2121 = vmatprep.mubr.msk.bf16.mxu1 %vm546_vm2, %v2202_v7  ;;  %v2208_v13 = vld [vmem:[%s3023_s0 + $0x138] sm:$0xff]   ;;  %v2209_v14 = vld [vmem:[%s3023_s0 + $0x20] sm:$0xff]   ;;  %v2211_v16 = vld [vmem:[%s3023_s0 + $0x28] sm:$0xff]  }
  0x17   :  { %2047 = vmatprep.subr.bf16.mxu0 %v768_v6  ;;  %2194 = vmatprep.subr.bf16.mxu1 %v768_v6  ;;  %v2210_v15 = vld [vmem:[%s3023_s0 + $0x140] sm:$0xff]   ;;  %v2212_v17 = vld [vmem:[%s3023_s0 + $0x148] sm:$0xff]   ;;  %v2213_v18 = vld [vmem:[%s3023_s0 + $0x30] sm:$0xff]  }
  0x18   :  { %v2214_v19 = vld [vmem:[%s3023_s0 + $0x150] sm:$0xff]   ;;  %v2215_v20 = vld [vmem:[%s3023_s0 + $0x38] sm:$0xff]   ;;  %v2217_v22 = vld [vmem:[%s3023_s0 + $0x40] sm:$0xff]  }
  0x19   :  { %2048 = vmatpush3.bf16.msra.mxu0 %v768_v6  ;;  %2196 = vmatpush3.bf16.msra.mxu1 %v768_v6  ;;  %v2216_v21 = vld [vmem:[%s3023_s0 + $0x158] sm:$0xff]   ;;  %v2218_v23 = vld [vmem:[%s3023_s0 + $0x160] sm:$0xff]   ;;  %v2219_v24 = vld [vmem:[%s3023_s0 + $0x48] sm:$0xff]  }
  0x1a   :  { %v2220_v25 = vld [vmem:[%s3023_s0 + $0x168] sm:$0xff]   ;;  %v2221_v26 = vld [vmem:[%s3023_s0 + $0x50] sm:$0xff]   ;;  %v2223_v28 = vld [vmem:[%s3023_s0 + $0x58] sm:$0xff]  }
  0x1b   :  { %v2222_v27 = vld [vmem:[%s3023_s0 + $0x170] sm:$0xff]   ;;  %v2224_v29 = vld [vmem:[%s3023_s0 + $0x178] sm:$0xff]   ;;  %v2225_v30 = vld [vmem:[%s3023_s0 + $0x60] sm:$0xff]  }
  0x1c   :  { %2050 = vmatmul.mubr.msk.bf16.vlgmr.msra.gmra.mrb[0].mxu0 %vm546_vm2, %v2203_v8  ;;  %2122 = vmatmul.mubr.msk.bf16.vlgmr.msra.gmra.mrb[0].mxu1 %vm546_vm2, %v2204_v9  ;;  %v2226_v31 = vld [vmem:[%s3023_s0 + $0x180] sm:$0xff]   ;;  %v2227_v32 = vld [vmem:[%s3023_s0 + $0x68] sm:$0xff]   ;;  %v2229_v34 = vld [vmem:[%s3023_s0 + $0x70] sm:$0xff]  }
  0x1d   :  { %2053 = vmatprep.mubr.msk.bf16.mxu0 %vm546_vm2, %v2205_v10  ;;  %2125 = vmatprep.mubr.msk.bf16.mxu1 %vm546_vm2, %v2206_v11  ;;  %v2228_v33 = vld [vmem:[%s3023_s0 + $0x188] sm:$0xff]   ;;  %v2230_v35 = vld [vmem:[%s3023_s0 + $0x190] sm:$0xff]   ;;  %v2231_v36 = vld [vmem:[%s3023_s0 + $0x78] sm:$0xff]  }
  0x1e   :  { %v2232_v37 = vld [vmem:[%s3023_s0 + $0x198] sm:$0xff]   ;;  %v2233_v38 = vld [vmem:[%s3023_s0 + $0x80] sm:$0xff]   ;;  %v2235_v40 = vld [vmem:[%s3023_s0 + $0x88] sm:$0xff]  }
  0x1f   :  { %v2234_v39 = vld [vmem:[%s3023_s0 + $0x1a0] sm:$0xff]   ;;  %v2236_v41 = vld [vmem:[%s3023_s0 + $0x1a8] sm:$0xff]   ;;  %v2237_v42 = vld [vmem:[%s3023_s0 + $0x90] sm:$0xff]  }
  0x20   :  { %v2238_v43 = vld [vmem:[%s3023_s0 + $0x1b0] sm:$0xff]   ;;  %v2239_v44 = vld [vmem:[%s3023_s0 + $0x98] sm:$0xff]   ;;  %v2241_v46 = vld [vmem:[%s3023_s0 + $0xa0] sm:$0xff]  }
  0x21   :  { %v2240_v45 = vld [vmem:[%s3023_s0 + $0x1b8] sm:$0xff]   ;;  %v2242_v47 = vld [vmem:[%s3023_s0 + $0x1c0] sm:$0xff]   ;;  %v2243_v48 = vld [vmem:[%s3023_s0 + $0xa8] sm:$0xff]  }
  0x22   :  { %v2244_v49 = vld [vmem:[%s3023_s0 + $0x1c8] sm:$0xff]   ;;  %v2245_v50 = vld [vmem:[%s3023_s0 + $0xb0] sm:$0xff]   ;;  %v2247_v52 = vld [vmem:[%s3023_s0 + $0xb8] sm:$0xff]  }
  0x23   :  { %v2246_v51 = vld [vmem:[%s3023_s0 + $0x1d0] sm:$0xff]   ;;  %v2248_v53 = vld [vmem:[%s3023_s0 + $0x1d8] sm:$0xff]   ;;  %v2249_v54 = vld [vmem:[%s3023_s0 + $0xc0] sm:$0xff]  }
  0x24   :  { %2054 = vmatmul.mubr.msk.bf16.gmra.mrb[4].mxu0 %vm546_vm2, %v2207_v12  ;;  %2126 = vmatmul.mubr.msk.bf16.gmra.mrb[4].mxu1 %vm546_vm2, %v2208_v13  ;;  %v2250_v55 = vld [vmem:[%s3023_s0 + $0x1e0] sm:$0xff]   ;;  %v2251_v56 = vld [vmem:[%s3023_s0 + $0xc8] sm:$0xff]   ;;  %v2253_v58 = vld [vmem:[%s3023_s0 + $0xd0] sm:$0xff]  }
  0x25   :  { %2057 = vmatprep.mubr.msk.bf16.mxu0 %vm546_vm2, %v2209_v14  ;;  %2129 = vmatprep.mubr.msk.bf16.mxu1 %vm546_vm2, %v2210_v15  ;;  %v2252_v57 = vld [vmem:[%s3023_s0 + $0x1e8] sm:$0xff]   ;;  %v2254_v59 = vld [vmem:[%s3023_s0 + $0x1f0] sm:$0xff]   ;;  %v2255_v60 = vld [vmem:[%s3023_s0 + $0xd8] sm:$0xff]  }
  0x26   :  { %v2256_v61 = vld [vmem:[%s3023_s0 + $0x1f8] sm:$0xff]   ;;  %v2257_v62 = vld [vmem:[%s3023_s0 + $0xe0] sm:$0xff]   ;;  %v2259_v0 = vld [vmem:[%s3023_s0 + $0xe8] sm:$0xff]  }
  0x27   :  { %v2258_v63 = vld [vmem:[%s3023_s0 + $0x200] sm:$0xff]   ;;  %v2260_v1 = vld [vmem:[%s3023_s0 + $0x208] sm:$0xff]   ;;  %v2261_v2 = vld [vmem:[%s3023_s0 + $0xf0] sm:$0xff]  }
  0x28   :  { %v2262_v3 = vld [vmem:[%s3023_s0 + $0x210] sm:$0xff]   ;;  %v2263_v4 = vld [vmem:[%s3023_s0 + $0xf8] sm:$0xff]   ;;  %v2265_v6 = vld [vmem:[%s3023_s0 + $0x100] sm:$0xff]  }
  0x29   :  { %v2264_v5 = vld [vmem:[%s3023_s0 + $0x218] sm:$0xff]   ;;  %v2266_v7 = vld [vmem:[%s3023_s0 + $0x220] sm:$0xff]   ;;  %v2267_v8 = vld [vmem:[%s3023_s0 + $0x108] sm:$0xff]  }
  0x2a   :  { %v2268_v9 = vld [vmem:[%s3023_s0 + $0x228] sm:$0xff]   ;;  %v2269_v10 = vld [vmem:[%s3023_s0 + $0x110] sm:$0xff]   ;;  %v2271_v12 = vld [vmem:[%s3023_s0 + $0x118] sm:$0xff]  }
  0x2b   :  { %v2270_v11 = vld [vmem:[%s3023_s0 + $0x230] sm:$0xff]   ;;  %v2272_v13 = vld [vmem:[%s3023_s0 + $0x238] sm:$0xff]  }
  0x2c   :  { %2058 = vmatmul.mubr.msk.bf16.gmra.mrb[8].mxu0 %vm546_vm2, %v2211_v16  ;;  %2130 = vmatmul.mubr.msk.bf16.gmra.mrb[8].mxu1 %vm546_vm2, %v2212_v17 }
  0x2d   :  { %2061 = vmatprep.mubr.msk.bf16.mxu0 %vm546_vm2, %v2213_v18  ;;  %2133 = vmatprep.mubr.msk.bf16.mxu1 %vm546_vm2, %v2214_v19 }
  0x34   :  { %2062 = vmatmul.mubr.msk.bf16.gmra.mrb[12].mxu0 %vm546_vm2, %v2215_v20  ;;  %2134 = vmatmul.mubr.msk.bf16.gmra.mrb[12].mxu1 %vm546_vm2, %v2216_v21 }
  0x35   :  { %2065 = vmatprep.mubr.msk.bf16.mxu0 %vm546_vm2, %v2217_v22  ;;  %2137 = vmatprep.mubr.msk.bf16.mxu1 %vm546_vm2, %v2218_v23 }
  0x3c   :  { %2066 = vmatmul.mubr.msk.bf16.gmra.mrb[16].mxu0 %vm546_vm2, %v2219_v24  ;;  %2138 = vmatmul.mubr.msk.bf16.gmra.mrb[16].mxu1 %vm546_vm2, %v2220_v25 }
  0x3d   :  { %2069 = vmatprep.mubr.msk.bf16.mxu0 %vm546_vm2, %v2221_v26  ;;  %2141 = vmatprep.mubr.msk.bf16.mxu1 %vm546_vm2, %v2222_v27 }
  0x44   :  { %2070 = vmatmul.mubr.msk.bf16.gmra.mrb[20].mxu0 %vm546_vm2, %v2223_v28  ;;  %2142 = vmatmul.mubr.msk.bf16.gmra.mrb[20].mxu1 %vm546_vm2, %v2224_v29 }
  0x45   :  { %2073 = vmatprep.mubr.msk.bf16.mxu0 %vm546_vm2, %v2225_v30  ;;  %2145 = vmatprep.mubr.msk.bf16.mxu1 %vm546_vm2, %v2226_v31 }
  0x4c   :  { %2074 = vmatmul.mubr.msk.bf16.gmra.mrb[24].mxu0 %vm546_vm2, %v2227_v32  ;;  %2146 = vmatmul.mubr.msk.bf16.gmra.mrb[24].mxu1 %vm546_vm2, %v2228_v33 }
  0x4d   :  { %2077 = vmatprep.mubr.msk.bf16.mxu0 %vm546_vm2, %v2229_v34  ;;  %2149 = vmatprep.mubr.msk.bf16.mxu1 %vm546_vm2, %v2230_v35 }
  0x54   :  { %2078 = vmatmul.mubr.msk.bf16.gmra.mrb[28].mxu0 %vm546_vm2, %v2231_v36  ;;  %2150 = vmatmul.mubr.msk.bf16.gmra.mrb[28].mxu1 %vm546_vm2, %v2232_v37 }
  0x55   :  { %2081 = vmatprep.mubr.msk.bf16.mxu0 %vm546_vm2, %v2233_v38  ;;  %2153 = vmatprep.mubr.msk.bf16.mxu1 %vm546_vm2, %v2234_v39 }
  0x5c   :  { %2082 = vmatmul.mubr.msk.bf16.gmra.mrb[32].mxu0 %vm546_vm2, %v2235_v40  ;;  %2154 = vmatmul.mubr.msk.bf16.gmra.mrb[32].mxu1 %vm546_vm2, %v2236_v41 }
  0x5d   :  { %2085 = vmatprep.mubr.msk.bf16.mxu0 %vm546_vm2, %v2237_v42  ;;  %2157 = vmatprep.mubr.msk.bf16.mxu1 %vm546_vm2, %v2238_v43 }
  0x64   :  { %2086 = vmatmul.mubr.msk.bf16.gmra.mrb[36].mxu0 %vm546_vm2, %v2239_v44  ;;  %2158 = vmatmul.mubr.msk.bf16.gmra.mrb[36].mxu1 %vm546_vm2, %v2240_v45 }
  0x65   :  { %2089 = vmatprep.mubr.msk.bf16.mxu0 %vm546_vm2, %v2241_v46  ;;  %2161 = vmatprep.mubr.msk.bf16.mxu1 %vm546_vm2, %v2242_v47 }
  0x6c   :  { %2090 = vmatmul.mubr.msk.bf16.gmra.mrb[40].mxu0 %vm546_vm2, %v2243_v48  ;;  %2162 = vmatmul.mubr.msk.bf16.gmra.mrb[40].mxu1 %vm546_vm2, %v2244_v49 }
  0x6d   :  { %2093 = vmatprep.mubr.msk.bf16.mxu0 %vm546_vm2, %v2245_v50  ;;  %2165 = vmatprep.mubr.msk.bf16.mxu1 %vm546_vm2, %v2246_v51 }
  0x74   :  { %2094 = vmatmul.mubr.msk.bf16.gmra.mrb[44].mxu0 %vm546_vm2, %v2247_v52  ;;  %2166 = vmatmul.mubr.msk.bf16.gmra.mrb[44].mxu1 %vm546_vm2, %v2248_v53 }
  0x75   :  { %2097 = vmatprep.mubr.msk.bf16.mxu0 %vm546_vm2, %v2249_v54  ;;  %2169 = vmatprep.mubr.msk.bf16.mxu1 %vm546_vm2, %v2250_v55 }
  0x7c   :  { %2098 = vmatmul.mubr.msk.bf16.gmra.mrb[48].mxu0 %vm546_vm2, %v2251_v56  ;;  %2170 = vmatmul.mubr.msk.bf16.gmra.mrb[48].mxu1 %vm546_vm2, %v2252_v57 }
  0x7d   :  { %2101 = vmatprep.mubr.msk.bf16.mxu0 %vm546_vm2, %v2253_v58  ;;  %2173 = vmatprep.mubr.msk.bf16.mxu1 %vm546_vm2, %v2254_v59 }
  0x84   :  { %2102 = vmatmul.mubr.msk.bf16.gmra.mrb[52].mxu0 %vm546_vm2, %v2255_v60  ;;  %2174 = vmatmul.mubr.msk.bf16.gmra.mrb[52].mxu1 %vm546_vm2, %v2256_v61 }
  0x85   :  { %2105 = vmatprep.mubr.msk.bf16.mxu0 %vm546_vm2, %v2257_v62  ;;  %2177 = vmatprep.mubr.msk.bf16.mxu1 %vm546_vm2, %v2258_v63 }
  0x8c   :  { %2106 = vmatmul.mubr.msk.bf16.gmra.mrb[56].mxu0 %vm546_vm2, %v2259_v0  ;;  %2178 = vmatmul.mubr.msk.bf16.gmra.mrb[56].mxu1 %vm546_vm2, %v2260_v1 }
  0x8d   :  { %2109 = vmatprep.mubr.msk.bf16.mxu0 %vm546_vm2, %v2261_v2  ;;  %2181 = vmatprep.mubr.msk.bf16.mxu1 %vm546_vm2, %v2262_v3 }
  0x94   :  { %2110 = vmatmul.mubr.msk.bf16.gmra.mrb[60].mxu0 %vm546_vm2, %v2263_v4  ;;  %2182 = vmatmul.mubr.msk.bf16.gmra.mrb[60].mxu1 %vm546_vm2, %v2264_v5 }
  0x95   :  { %2113 = vmatprep.mubr.msk.bf16.mxu0 %vm546_vm2, %v2265_v6  ;;  %2185 = vmatprep.mubr.msk.bf16.mxu1 %vm546_vm2, %v2266_v7 }
  0x9c   :  { %2114 = vmatmul.mubr.msk.bf16.gmra.mrb[64].mxu0 %vm546_vm2, %v2267_v8  ;;  %2186 = vmatmul.mubr.msk.bf16.gmra.mrb[64].mxu1 %vm546_vm2, %v2268_v9 }
  0x9d   :  { %2117 = vmatprep.mubr.msk.bf16.mxu0 %vm546_vm2, %v2269_v10  ;;  %2189 = vmatprep.mubr.msk.bf16.mxu1 %vm546_vm2, %v2270_v11 }
  0xa4   :  { %2118 = vmatmul.mubr.msk.bf16.gmra.mrb[68].mxu0 %vm546_vm2, %v2271_v12  ;;  %2190 = vmatmul.mubr.msk.bf16.gmra.mrb[68].mxu1 %vm546_vm2, %v2272_v13 }
  0xef   :  { %v2625_v14 = vpop.f32.mrb[0].mxu0  ;;  %v2627_v15 = vpop.f32.mrb[0].mxu1 }
  0xf0   :  { %v2629_v16 = vpop.f32.mrb[1].mxu0  ;;  %v2631_v17 = vpop.f32.mrb[1].mxu1 }
  0xf1   :  { %v2633_v18 = vpop.f32.mrb[2].mxu0  ;;  %v2635_v19 = vpop.f32.mrb[2].mxu1 }
  0xf2   :  { %v2637_v20 = vpop.f32.mrb[3].mxu0  ;;  %v2639_v21 = vpop.f32.mrb[3].mxu1 }
  0xf7   :  { %v2641_v22 = vpop.f32.mrb[4].mxu0  ;;  %v2643_v23 = vpop.f32.mrb[4].mxu1 }
  0xf8   :  { %v2645_v24 = vpop.f32.mrb[5].mxu0  ;;  %v2647_v25 = vpop.f32.mrb[5].mxu1 }
  0xf9   :  { %v2649_v26 = vpop.f32.mrb[6].mxu0  ;;  %v2651_v27 = vpop.f32.mrb[6].mxu1 }
  0xfa   :  { %v2653_v28 = vpop.f32.mrb[7].mxu0  ;;  %v2655_v29 = vpop.f32.mrb[7].mxu1 }
  0xff   :  { %v2657_v30 = vpop.f32.mrb[8].mxu0  ;;  %v2659_v31 = vpop.f32.mrb[8].mxu1 }
 0x100   :  { %v2661_v32 = vpop.f32.mrb[9].mxu0  ;;  %v2663_v33 = vpop.f32.mrb[9].mxu1 }
 0x101   :  { %v2665_v34 = vpop.f32.mrb[10].mxu0  ;;  %v2667_v35 = vpop.f32.mrb[10].mxu1 }
 0x102   :  { %v2669_v36 = vpop.f32.mrb[11].mxu0  ;;  %v2671_v37 = vpop.f32.mrb[11].mxu1 }
 0x107   :  { %v2673_v38 = vpop.f32.mrb[12].mxu0  ;;  %v2675_v39 = vpop.f32.mrb[12].mxu1 }
 0x108   :  { %v2677_v40 = vpop.f32.mrb[13].mxu0  ;;  %v2679_v41 = vpop.f32.mrb[13].mxu1 }
 0x109   :  { %v2681_v42 = vpop.f32.mrb[14].mxu0  ;;  %v2683_v43 = vpop.f32.mrb[14].mxu1 }
 0x10a   :  { %v2685_v44 = vpop.f32.mrb[15].mxu0  ;;  %v2687_v45 = vpop.f32.mrb[15].mxu1 }
 0x10f   :  { %v2689_v46 = vpop.f32.mrb[16].mxu0  ;;  %v2691_v47 = vpop.f32.mrb[16].mxu1 }
 0x110   :  { %v2693_v48 = vpop.f32.mrb[17].mxu0  ;;  %v2695_v49 = vpop.f32.mrb[17].mxu1 }
 0x111   :  { %v2697_v50 = vpop.f32.mrb[18].mxu0  ;;  %v2699_v51 = vpop.f32.mrb[18].mxu1 }
 0x112   :  { %v2701_v52 = vpop.f32.mrb[19].mxu0  ;;  %v2703_v53 = vpop.f32.mrb[19].mxu1 }
 0x117   :  { %v2705_v54 = vpop.f32.mrb[20].mxu0  ;;  %v2707_v55 = vpop.f32.mrb[20].mxu1 }
 0x118   :  { %v2709_v56 = vpop.f32.mrb[21].mxu0  ;;  %v2711_v57 = vpop.f32.mrb[21].mxu1 }
 0x119   :  { %v2713_v58 = vpop.f32.mrb[22].mxu0  ;;  %v2715_v59 = vpop.f32.mrb[22].mxu1 }
 0x11a   :  { %v2717_v60 = vpop.f32.mrb[23].mxu0  ;;  %v2719_v61 = vpop.f32.mrb[23].mxu1 }
 0x11b   :  { %3027 = vst [vmem:[#allocation5_spill] sm:$0xff] %v2719_v61 }
 0x11f   :  { %v2721_v62 = vpop.f32.mrb[24].mxu0  ;;  %v2723_v63 = vpop.f32.mrb[24].mxu1 }
 0x120   :  { %3028 = vst [vmem:[#allocation6_spill] sm:$0xff] %v2721_v62  ;;  %3029 = vst [vmem:[#allocation7_spill] sm:$0xff] %v2723_v63  ;;  %v2725_v0 = vpop.f32.mrb[25].mxu0  ;;  %v2727_v1 = vpop.f32.mrb[25].mxu1 }
 0x121   :  { %3030 = vst [vmem:[#allocation8_spill] sm:$0xff] %v2725_v0  ;;  %3031 = vst [vmem:[#allocation9_spill] sm:$0xff] %v2727_v1  ;;  %v2729_v2 = vpop.f32.mrb[26].mxu0  ;;  %v2731_v3 = vpop.f32.mrb[26].mxu1  ;;  %v2771_v1 = vld [vmem:[#allocation2] ss:$0 sm:$0xff] }
 0x122   :  { %3032 = vst [vmem:[#allocation10_spill] sm:$0xff] %v2729_v2  ;;  %3033 = vst [vmem:[#allocation11_spill] sm:$0xff] %v2731_v3  ;;  %v2733_v4 = vpop.f32.mrb[27].mxu0  ;;  %v2735_v5 = vpop.f32.mrb[27].mxu1 }
 0x123   :  { %3034 = vst [vmem:[#allocation12_spill] sm:$0xff] %v2733_v4  ;;  %3035 = vst [vmem:[#allocation13_spill] sm:$0xff] %v2735_v5 }
 0x127   :  { %v2737_v6 = vpop.f32.mrb[28].mxu0  ;;  %v2739_v7 = vpop.f32.mrb[28].mxu1 }
 0x128   :  { %3036 = vst [vmem:[#allocation14_spill] sm:$0xff] %v2737_v6  ;;  %3037 = vst [vmem:[#allocation15_spill] sm:$0xff] %v2739_v7  ;;  %v2741_v8 = vpop.f32.mrb[29].mxu0  ;;  %v2743_v9 = vpop.f32.mrb[29].mxu1 }
 0x129   :  { %3038 = vst [vmem:[#allocation16_spill] sm:$0xff] %v2741_v8  ;;  %3039 = vst [vmem:[#allocation17_spill] sm:$0xff] %v2743_v9  ;;  %v2745_v10 = vpop.f32.mrb[30].mxu0  ;;  %v2747_v11 = vpop.f32.mrb[30].mxu1 }
 0x12a   :  { %3040 = vst [vmem:[#allocation18_spill] sm:$0xff] %v2745_v10  ;;  %3041 = vst [vmem:[#allocation19_spill] sm:$0xff] %v2747_v11  ;;  %v2749_v12 = vpop.f32.mrb[31].mxu0  ;;  %v2751_v13 = vpop.f32.mrb[31].mxu1 }
 0x12b   :  { %3042 = vst [vmem:[#allocation20_spill] sm:$0xff] %v2749_v12  ;;  %3043 = vst [vmem:[#allocation21_spill] sm:$0xff] %v2751_v13 }
 0x12f   :  { %v2753_v3 = vpop.f32.mrb[32].mxu0  ;;  %v2755_v4 = vpop.f32.mrb[32].mxu1 }
 0x130   :  { %3044 = vst [vmem:[#allocation22_spill] sm:$0xff] %v2753_v3  ;;  %3045 = vst [vmem:[#allocation23_spill] sm:$0xff] %v2755_v4  ;;  %v2757_v5 = vpop.f32.mrb[33].mxu0  ;;  %v2759_v6 = vpop.f32.mrb[33].mxu1 }
 0x131   :  { %3046 = vst [vmem:[#allocation24_spill] sm:$0xff] %v2757_v5  ;;  %3047 = vst [vmem:[#allocation25_spill] sm:$0xff] %v2759_v6  ;;  %v2761_v7 = vpop.f32.mrb[34].mxu0  ;;  %v2763_v8 = vpop.f32.mrb[34].mxu1 }
 0x132   :  { %3048 = vst [vmem:[#allocation26_spill] sm:$0xff] %v2761_v7  ;;  %3049 = vst [vmem:[#allocation27_spill] sm:$0xff] %v2763_v8  ;;  %v2765_v9 = vpop.f32.mrb[35].mxu0  ;;  %v2767_v10 = vpop.f32.mrb[35].mxu1 }
 0x133   :  { %3050 = vst [vmem:[#allocation28_spill] sm:$0xff] %v2765_v9  ;;  %3051 = vst [vmem:[#allocation29_spill] sm:$0xff] %v2767_v10 }
 0x137   :  { %v2087_v11 = vpop.f32.mrb[36].mxu0  ;;  %v2159_v12 = vpop.f32.mrb[36].mxu1 }
 0x138   :  { %v1381_v13 = vmax.f32 %v2625_v14, %v2087_v11  ;;  %v1417_v3 = vmax.f32 %v2627_v15, %v2159_v12  ;;  %v948_v2 = vpop.f32.mrb[37].mxu0  ;;  %v1236_v4 = vpop.f32.mrb[37].mxu1 }
 0x139   :  { %v1379_v6 = vmax.f32 %v2629_v16, %v948_v2  ;;  %v1415_v7 = vmax.f32 %v2631_v17, %v1236_v4  ;;  %v2088_v5 = vpop.f32.mrb[38].mxu0  ;;  %v2160_v8 = vpop.f32.mrb[38].mxu1 }
 0x13a   :  { %v1453_v0 = vmax.f32 %v1381_v13, %v1417_v3  ;;  %v1382_v9 = vmax.f32 %v2633_v18, %v2088_v5  ;;  %v1418_v10 = vmax.f32 %v2635_v19, %v2160_v8  ;;  %v951_v63 = vpop.f32.mrb[39].mxu0  ;;  %v1239_v62 = vpop.f32.mrb[39].mxu1 }
 0x13b   :  { %v1451_v14 = vmax.f32 %v1379_v6, %v1415_v7  ;;  %v1380_v15 = vmax.f32 %v2637_v20, %v951_v63  ;;  %v1416_v11 = vmax.f32 %v2639_v21, %v1239_v62 }
 0x13c   :  { %v1496_v12 = vadd.f32 %v2771_v1, %v1453_v0  ;;  %v1454_v61 = vmax.f32 %v1382_v9, %v1418_v10 }
 0x13d   :  { %v1494_v16 = vadd.f32 %v2771_v1, %v1451_v14  ;;  %v1452_v17 = vmax.f32 %v1380_v15, %v1416_v11 }
 0x13e   :  { %v1532_v2 = vmax.f32 %v1496_v12, 0.0  ;;  %v1497_v3 = vadd.f32 %v2771_v1, %v1454_v61 }
 0x13f   :  { %v1530_v18 = vmax.f32 %v1494_v16, 0.0  ;;  %v1495_v19 = vadd.f32 %v2771_v1, %v1452_v17  ;;  %v2091_v4 = vpop.f32.mrb[40].mxu0  ;;  %v2163_v5 = vpop.f32.mrb[40].mxu1 }
 0x140   :  { %v1937_v6 = vpack.c.bf16 %v1532_v2, %v1532_v2  ;;  %v1533_v7 = vmax.f32 %v1497_v3, 0.0  ;;  %v1385_v20 = vmax.f32 %v2641_v22, %v2091_v4  ;;  %v1421_v21 = vmax.f32 %v2643_v23, %v2163_v5  ;;  %v964_v62 = vpop.f32.mrb[41].mxu0  ;;  %v1252_v63 = vpop.f32.mrb[41].mxu1 }
 0x141   :  { %v1935_v0 = vpack.c.bf16 %v1530_v18, %v1530_v18  ;;  %v1531_v8 = vmax.f32 %v1495_v19, 0.0  ;;  %v1383_v9 = vmax.f32 %v2645_v24, %v964_v62  ;;  %v1419_v61 = vmax.f32 %v2647_v25, %v1252_v63  ;;  %v2092_v10 = vpop.f32.mrb[42].mxu0  ;;  %v2164_v13 = vpop.f32.mrb[42].mxu1 }
 0x142   :  { %1713 = vst.msk [vmem:[%s3026_s3 + $0x8] sm:$0xf] %vm1710_vm3, %v1937_v6  ;;  %v1938_v14 = vpack.c.bf16 %v1533_v7, %v1533_v7  ;;  %v1457_v15 = vmax.f32 %v1385_v20, %v1421_v21  ;;  %v1386_v22 = vmax.f32 %v2649_v26, %v2092_v10  ;;  %v1422_v23 = vmax.f32 %v2651_v27, %v2164_v13  ;;  %v967_v11 = vpop.f32.mrb[43].mxu0  ;;  %v1255_v12 = vpop.f32.mrb[43].mxu1 }
 0x143   :  { %1711 = vst.msk [vmem:[%s3026_s3] sm:$0xf] %vm1710_vm3, %v1935_v0  ;;  %v1936_v24 = vpack.c.bf16 %v1531_v8, %v1531_v8  ;;  %v1455_v25 = vmax.f32 %v1383_v9, %v1419_v61  ;;  %v1384_v16 = vmax.f32 %v2653_v28, %v967_v11  ;;  %v1420_v17 = vmax.f32 %v2655_v29, %v1255_v12 }
 0x144   :  { %1714 = vst.msk [vmem:[%s3026_s3 + $0xc] sm:$0xf] %vm1710_vm3, %v1938_v14  ;;  %v1500_v26 = vadd.f32 %v2771_v1, %v1457_v15  ;;  %v1458_v27 = vmax.f32 %v1386_v22, %v1422_v23 }
 0x145   :  { %1712 = vst.msk [vmem:[%s3026_s3 + $0x4] sm:$0xf] %vm1710_vm3, %v1936_v24  ;;  %v1498_v2 = vadd.f32 %v2771_v1, %v1455_v25  ;;  %v1456_v3 = vmax.f32 %v1384_v16, %v1420_v17 }
 0x146   :  { %v1536_v18 = vmax.f32 %v1500_v26, 0.0  ;;  %v1501_v28 = vadd.f32 %v2771_v1, %v1458_v27 }
 0x147   :  { %v1534_v29 = vmax.f32 %v1498_v2, 0.0  ;;  %v1499_v19 = vadd.f32 %v2771_v1, %v1456_v3  ;;  %v2095_v4 = vpop.f32.mrb[44].mxu0  ;;  %v2167_v5 = vpop.f32.mrb[44].mxu1 }
 0x148   :  { %v1941_v6 = vpack.c.bf16 %v1536_v18, %v1536_v18  ;;  %v1537_v7 = vmax.f32 %v1501_v28, 0.0  ;;  %v1389_v20 = vmax.f32 %v2657_v30, %v2095_v4  ;;  %v1425_v21 = vmax.f32 %v2659_v31, %v2167_v5  ;;  %v980_v62 = vpop.f32.mrb[45].mxu0  ;;  %v1268_v63 = vpop.f32.mrb[45].mxu1 }
 0x149   :  { %v1939_v0 = vpack.c.bf16 %v1534_v29, %v1534_v29  ;;  %v1535_v8 = vmax.f32 %v1499_v19, 0.0  ;;  %v1387_v9 = vmax.f32 %v2661_v32, %v980_v62  ;;  %v1423_v61 = vmax.f32 %v2663_v33, %v1268_v63  ;;  %v2096_v10 = vpop.f32.mrb[46].mxu0  ;;  %v2168_v13 = vpop.f32.mrb[46].mxu1 }
 0x14a   :  { %1717 = vst.msk [vmem:[%s3026_s3 + $0x18] sm:$0xf] %vm1710_vm3, %v1941_v6  ;;  %v1942_v14 = vpack.c.bf16 %v1537_v7, %v1537_v7  ;;  %v1461_v15 = vmax.f32 %v1389_v20, %v1425_v21  ;;  %v1390_v30 = vmax.f32 %v2665_v34, %v2096_v10  ;;  %v1426_v31 = vmax.f32 %v2667_v35, %v2168_v13  ;;  %v983_v22 = vpop.f32.mrb[47].mxu0  ;;  %v1271_v23 = vpop.f32.mrb[47].mxu1 }
 0x14b   :  { %1715 = vst.msk [vmem:[%s3026_s3 + $0x10] sm:$0xf] %vm1710_vm3, %v1939_v0  ;;  %v1940_v32 = vpack.c.bf16 %v1535_v8, %v1535_v8  ;;  %v1459_v33 = vmax.f32 %v1387_v9, %v1423_v61  ;;  %v1388_v11 = vmax.f32 %v2669_v36, %v983_v22  ;;  %v1424_v12 = vmax.f32 %v2671_v37, %v1271_v23 }
 0x14c   :  { %1718 = vst.msk [vmem:[%s3026_s3 + $0x1c] sm:$0xf] %vm1710_vm3, %v1942_v14  ;;  %v1504_v34 = vadd.f32 %v2771_v1, %v1461_v15  ;;  %v1462_v35 = vmax.f32 %v1390_v30, %v1426_v31 }
 0x14d   :  { %1716 = vst.msk [vmem:[%s3026_s3 + $0x14] sm:$0xf] %vm1710_vm3, %v1940_v32  ;;  %v1502_v24 = vadd.f32 %v2771_v1, %v1459_v33  ;;  %v1460_v25 = vmax.f32 %v1388_v11, %v1424_v12 }
 0x14e   :  { %v1540_v16 = vmax.f32 %v1504_v34, 0.0  ;;  %v1505_v36 = vadd.f32 %v2771_v1, %v1462_v35 }
 0x14f   :  { %v1538_v37 = vmax.f32 %v1502_v24, 0.0  ;;  %v1503_v17 = vadd.f32 %v2771_v1, %v1460_v25  ;;  %v2099_v26 = vpop.f32.mrb[48].mxu0  ;;  %v2171_v27 = vpop.f32.mrb[48].mxu1 }
 0x150   :  { %v1945_v2 = vpack.c.bf16 %v1540_v16, %v1540_v16  ;;  %v1541_v3 = vmax.f32 %v1505_v36, 0.0  ;;  %v1393_v18 = vmax.f32 %v2673_v38, %v2099_v26  ;;  %v1429_v28 = vmax.f32 %v2675_v39, %v2171_v27  ;;  %v996_v29 = vpop.f32.mrb[49].mxu0  ;;  %v1284_v19 = vpop.f32.mrb[49].mxu1 }
 0x151   :  { %v1943_v4 = vpack.c.bf16 %v1538_v37, %v1538_v37  ;;  %v1539_v5 = vmax.f32 %v1503_v17, 0.0  ;;  %v1391_v6 = vmax.f32 %v2677_v40, %v996_v29  ;;  %v1427_v7 = vmax.f32 %v2679_v41, %v1284_v19  ;;  %v2100_v20 = vpop.f32.mrb[50].mxu0  ;;  %v2172_v21 = vpop.f32.mrb[50].mxu1 }
 0x152   :  { %1721 = vst.msk [vmem:[%s3026_s3 + $0x28] sm:$0xf] %vm1710_vm3, %v1945_v2  ;;  %v1946_v62 = vpack.c.bf16 %v1541_v3, %v1541_v3  ;;  %v1465_v63 = vmax.f32 %v1393_v18, %v1429_v28  ;;  %v1394_v38 = vmax.f32 %v2681_v42, %v2100_v20  ;;  %v1430_v39 = vmax.f32 %v2683_v43, %v2172_v21  ;;  %v999_v0 = vpop.f32.mrb[51].mxu0  ;;  %v1287_v8 = vpop.f32.mrb[51].mxu1 }
 0x153   :  { %1719 = vst.msk [vmem:[%s3026_s3 + $0x20] sm:$0xf] %vm1710_vm3, %v1943_v4  ;;  %v1944_v40 = vpack.c.bf16 %v1539_v5, %v1539_v5  ;;  %v1463_v41 = vmax.f32 %v1391_v6, %v1427_v7  ;;  %v1392_v9 = vmax.f32 %v2685_v44, %v999_v0  ;;  %v1428_v61 = vmax.f32 %v2687_v45, %v1287_v8 }
 0x154   :  { %1722 = vst.msk [vmem:[%s3026_s3 + $0x2c] sm:$0xf] %vm1710_vm3, %v1946_v62  ;;  %v1508_v42 = vadd.f32 %v2771_v1, %v1465_v63  ;;  %v1466_v43 = vmax.f32 %v1394_v38, %v1430_v39 }
 0x155   :  { %1720 = vst.msk [vmem:[%s3026_s3 + $0x24] sm:$0xf] %vm1710_vm3, %v1944_v40  ;;  %v1506_v10 = vadd.f32 %v2771_v1, %v1463_v41  ;;  %v1464_v13 = vmax.f32 %v1392_v9, %v1428_v61 }
 0x156   :  { %v1544_v14 = vmax.f32 %v1508_v42, 0.0  ;;  %v1509_v44 = vadd.f32 %v2771_v1, %v1466_v43 }
 0x157   :  { %v1542_v45 = vmax.f32 %v1506_v10, 0.0  ;;  %v1507_v15 = vadd.f32 %v2771_v1, %v1464_v13  ;;  %v2103_v30 = vpop.f32.mrb[52].mxu0  ;;  %v2175_v31 = vpop.f32.mrb[52].mxu1  ;;  %v3052_v13 = vld [vmem:[#allocation5_spill] sm:$0xff] }
 0x158   :  { %v1949_v22 = vpack.c.bf16 %v1544_v14, %v1544_v14  ;;  %v1545_v23 = vmax.f32 %v1509_v44, 0.0  ;;  %v1397_v32 = vmax.f32 %v2689_v46, %v2103_v30  ;;  %v1433_v33 = vmax.f32 %v2691_v47, %v2175_v31  ;;  %v1012_v11 = vpop.f32.mrb[53].mxu0  ;;  %v1300_v12 = vpop.f32.mrb[53].mxu1 }
 0x159   :  { %v1947_v34 = vpack.c.bf16 %v1542_v45, %v1542_v45  ;;  %v1543_v35 = vmax.f32 %v1507_v15, 0.0  ;;  %v1395_v24 = vmax.f32 %v2693_v48, %v1012_v11  ;;  %v1431_v25 = vmax.f32 %v2695_v49, %v1300_v12  ;;  %v2104_v16 = vpop.f32.mrb[54].mxu0  ;;  %v2176_v36 = vpop.f32.mrb[54].mxu1  ;;  %v3053_v11 = vld [vmem:[#allocation6_spill] sm:$0xff] }
 0x15a   :  { %1725 = vst.msk [vmem:[%s3026_s3 + $0x38] sm:$0xf] %vm1710_vm3, %v1949_v22  ;;  %v1950_v37 = vpack.c.bf16 %v1545_v23, %v1545_v23  ;;  %v1469_v17 = vmax.f32 %v1397_v32, %v1433_v33  ;;  %v1398_v46 = vmax.f32 %v2697_v50, %v2104_v16  ;;  %v1434_v47 = vmax.f32 %v2699_v51, %v2176_v36  ;;  %v1015_v26 = vpop.f32.mrb[55].mxu0  ;;  %v1303_v27 = vpop.f32.mrb[55].mxu1 }
 0x15b   :  { %1723 = vst.msk [vmem:[%s3026_s3 + $0x30] sm:$0xf] %vm1710_vm3, %v1947_v34  ;;  %v1948_v48 = vpack.c.bf16 %v1543_v35, %v1543_v35  ;;  %v1467_v49 = vmax.f32 %v1395_v24, %v1431_v25  ;;  %v1396_v2 = vmax.f32 %v2701_v52, %v1015_v26  ;;  %v1432_v3 = vmax.f32 %v2703_v53, %v1303_v27  ;;  %v3054_v34 = vld [vmem:[#allocation7_spill] sm:$0xff] }
 0x15c   :  { %1726 = vst.msk [vmem:[%s3026_s3 + $0x3c] sm:$0xf] %vm1710_vm3, %v1950_v37  ;;  %v1512_v50 = vadd.f32 %v2771_v1, %v1469_v17  ;;  %v1470_v51 = vmax.f32 %v1398_v46, %v1434_v47  ;;  %v3055_v37 = vld [vmem:[#allocation8_spill] sm:$0xff]  ;;  %v3056_v46 = vld [vmem:[#allocation9_spill] sm:$0xff] }
 0x15d   :  { %1724 = vst.msk [vmem:[%s3026_s3 + $0x34] sm:$0xf] %vm1710_vm3, %v1948_v48  ;;  %v1510_v18 = vadd.f32 %v2771_v1, %v1467_v49  ;;  %v1468_v28 = vmax.f32 %v1396_v2, %v1432_v3  ;;  %v3057_v2 = vld [vmem:[#allocation10_spill] sm:$0xff] }
 0x15e   :  { %v1548_v29 = vmax.f32 %v1512_v50, 0.0  ;;  %v1513_v52 = vadd.f32 %v2771_v1, %v1470_v51  ;;  %v3058_v50 = vld [vmem:[#allocation11_spill] sm:$0xff] }
 0x15f   :  { %v1546_v53 = vmax.f32 %v1510_v18, 0.0  ;;  %v1511_v19 = vadd.f32 %v2771_v1, %v1468_v28  ;;  %v2107_v4 = vpop.f32.mrb[56].mxu0  ;;  %v2179_v5 = vpop.f32.mrb[56].mxu1 }
 0x160   :  { %v1953_v6 = vpack.c.bf16 %v1548_v29, %v1548_v29  ;;  %v1549_v7 = vmax.f32 %v1513_v52, 0.0  ;;  %v1401_v20 = vmax.f32 %v2705_v54, %v2107_v4  ;;  %v1437_v21 = vmax.f32 %v2707_v55, %v2179_v5  ;;  %v1028_v62 = vpop.f32.mrb[57].mxu0  ;;  %v1316_v63 = vpop.f32.mrb[57].mxu1  ;;  %v3060_v4 = vld [vmem:[#allocation13_spill] sm:$0xff] }
 0x161   :  { %v1951_v38 = vpack.c.bf16 %v1546_v53, %v1546_v53  ;;  %v1547_v39 = vmax.f32 %v1511_v19, 0.0  ;;  %v1399_v0 = vmax.f32 %v2709_v56, %v1028_v62  ;;  %v1435_v8 = vmax.f32 %v2711_v57, %v1316_v63  ;;  %v2108_v40 = vpop.f32.mrb[58].mxu0  ;;  %v2180_v41 = vpop.f32.mrb[58].mxu1  ;;  %v3059_v53 = vld [vmem:[#allocation12_spill] sm:$0xff] }
 0x162   :  { %1729 = vst.msk [vmem:[%s3026_s3 + $0x48] sm:$0xf] %vm1710_vm3, %v1953_v6  ;;  %v1954_v9 = vpack.c.bf16 %v1549_v7, %v1549_v7  ;;  %v1473_v61 = vmax.f32 %v1401_v20, %v1437_v21  ;;  %v1402_v54 = vmax.f32 %v2713_v58, %v2108_v40  ;;  %v1438_v55 = vmax.f32 %v2715_v59, %v2180_v41  ;;  %v1031_v42 = vpop.f32.mrb[59].mxu0  ;;  %v1319_v43 = vpop.f32.mrb[59].mxu1 }
 0x163   :  { %1727 = vst.msk [vmem:[%s3026_s3 + $0x40] sm:$0xf] %vm1710_vm3, %v1951_v38  ;;  %v1952_v56 = vpack.c.bf16 %v1547_v39, %v1547_v39  ;;  %v1471_v57 = vmax.f32 %v1399_v0, %v1435_v8  ;;  %v1400_v10 = vmax.f32 %v2717_v60, %v1031_v42  ;;  %v1436_v14 = vmax.f32 %v3052_v13, %v1319_v43 }
 0x164   :  { %1730 = vst.msk [vmem:[%s3026_s3 + $0x4c] sm:$0xf] %vm1710_vm3, %v1954_v9  ;;  %v1516_v58 = vadd.f32 %v2771_v1, %v1473_v61  ;;  %v1474_v59 = vmax.f32 %v1402_v54, %v1438_v55  ;;  %v3061_v9 = vld [vmem:[#allocation14_spill] sm:$0xff]  ;;  %v3062_v54 = vld [vmem:[#allocation15_spill] sm:$0xff] }
 0x165   :  { %1728 = vst.msk [vmem:[%s3026_s3 + $0x44] sm:$0xf] %vm1710_vm3, %v1952_v56  ;;  %v1514_v44 = vadd.f32 %v2771_v1, %v1471_v57  ;;  %v1472_v45 = vmax.f32 %v1400_v10, %v1436_v14  ;;  %v3063_v10 = vld [vmem:[#allocation16_spill] sm:$0xff]  ;;  %v3064_v14 = vld [vmem:[#allocation17_spill] sm:$0xff] }
 0x166   :  { %v1552_v15 = vmax.f32 %v1516_v58, 0.0  ;;  %v1517_v60 = vadd.f32 %v2771_v1, %v1474_v59 }
 0x167   :  { %v1550_v30 = vmax.f32 %v1514_v44, 0.0  ;;  %v1515_v31 = vadd.f32 %v2771_v1, %v1472_v45  ;;  %v2111_v22 = vpop.f32.mrb[60].mxu0  ;;  %v2183_v23 = vpop.f32.mrb[60].mxu1 }
 0x168   :  { %v1957_v32 = vpack.c.bf16 %v1552_v15, %v1552_v15  ;;  %v1553_v33 = vmax.f32 %v1517_v60, 0.0  ;;  %v1405_v12 = vmax.f32 %v3053_v11, %v2111_v22  ;;  %v1441_v35 = vmax.f32 %v3054_v34, %v2183_v23  ;;  %v1044_v24 = vpop.f32.mrb[61].mxu0  ;;  %v1332_v25 = vpop.f32.mrb[61].mxu1  ;;  %v3065_v60 = vld [vmem:[#allocation18_spill] sm:$0xff] }
 0x169   :  { %v1955_v16 = vpack.c.bf16 %v1550_v30, %v1550_v30  ;;  %v1551_v36 = vmax.f32 %v1515_v31, 0.0  ;;  %v1403_v17 = vmax.f32 %v3055_v37, %v1044_v24  ;;  %v1439_v47 = vmax.f32 %v3056_v46, %v1332_v25  ;;  %v2112_v26 = vpop.f32.mrb[62].mxu0  ;;  %v2184_v27 = vpop.f32.mrb[62].mxu1  ;;  %v3066_v31 = vld [vmem:[#allocation19_spill] sm:$0xff] }
 0x16a   :  { %1733 = vst.msk [vmem:[%s3026_s3 + $0x58] sm:$0xf] %vm1710_vm3, %v1957_v32  ;;  %v1958_v48 = vpack.c.bf16 %v1553_v33, %v1553_v33  ;;  %v1477_v49 = vmax.f32 %v1405_v12, %v1441_v35  ;;  %v1406_v3 = vmax.f32 %v3057_v2, %v2112_v26  ;;  %v1442_v51 = vmax.f32 %v3058_v50, %v2184_v27  ;;  %v1047_v18 = vpop.f32.mrb[63].mxu0  ;;  %v1335_v28 = vpop.f32.mrb[63].mxu1  ;;  %v3067_v12 = vld [vmem:[#allocation20_spill] sm:$0xff]  ;;  %v3068_v35 = vld [vmem:[#allocation21_spill] sm:$0xff] }
 0x16b   :  { %1731 = vst.msk [vmem:[%s3026_s3 + $0x50] sm:$0xf] %vm1710_vm3, %v1955_v16  ;;  %v1956_v29 = vpack.c.bf16 %v1551_v36, %v1551_v36  ;;  %v1475_v52 = vmax.f32 %v1403_v17, %v1439_v47  ;;  %v1404_v19 = vmax.f32 %v3059_v53, %v1047_v18  ;;  %v1440_v5 = vmax.f32 %v3060_v4, %v1335_v28 }
 0x16c   :  { %1734 = vst.msk [vmem:[%s3026_s3 + $0x5c] sm:$0xf] %vm1710_vm3, %v1958_v48  ;;  %v1520_v6 = vadd.f32 %v2771_v1, %v1477_v49  ;;  %v1478_v7 = vmax.f32 %v1406_v3, %v1442_v51  ;;  %v3069_v3 = vld [vmem:[#allocation22_spill] sm:$0xff]  ;;  %v3070_v51 = vld [vmem:[#allocation23_spill] sm:$0xff] }
 0x16d   :  { %1732 = vst.msk [vmem:[%s3026_s3 + $0x54] sm:$0xf] %vm1710_vm3, %v1956_v29  ;;  %v1518_v20 = vadd.f32 %v2771_v1, %v1475_v52  ;;  %v1476_v21 = vmax.f32 %v1404_v19, %v1440_v5  ;;  %v3071_v19 = vld [vmem:[#allocation24_spill] sm:$0xff]  ;;  %v3072_v5 = vld [vmem:[#allocation25_spill] sm:$0xff] }
 0x16e   :  { %v1556_v62 = vmax.f32 %v1520_v6, 0.0  ;;  %v1521_v63 = vadd.f32 %v2771_v1, %v1478_v7 }
 0x16f   :  { %v1554_v38 = vmax.f32 %v1518_v20, 0.0  ;;  %v1519_v39 = vadd.f32 %v2771_v1, %v1476_v21  ;;  %v2115_v0 = vpop.f32.mrb[64].mxu0  ;;  %v2187_v8 = vpop.f32.mrb[64].mxu1 }
 0x170   :  { %v1961_v40 = vpack.c.bf16 %v1556_v62, %v1556_v62  ;;  %v1557_v41 = vmax.f32 %v1521_v63, 0.0  ;;  %v1409_v61 = vmax.f32 %v3061_v9, %v2115_v0  ;;  %v1445_v55 = vmax.f32 %v3062_v54, %v2187_v8  ;;  %v1060_v42 = vpop.f32.mrb[65].mxu0  ;;  %v1348_v43 = vpop.f32.mrb[65].mxu1  ;;  %v3073_v63 = vld [vmem:[#allocation26_spill] sm:$0xff] }
 0x171   :  { %v1959_v56 = vpack.c.bf16 %v1554_v38, %v1554_v38  ;;  %v1555_v57 = vmax.f32 %v1519_v39, 0.0  ;;  %v1407_v13 = vmax.f32 %v3063_v10, %v1060_v42  ;;  %v1443_v58 = vmax.f32 %v3064_v14, %v1348_v43  ;;  %v2116_v59 = vpop.f32.mrb[66].mxu0  ;;  %v2188_v44 = vpop.f32.mrb[66].mxu1  ;;  %v3074_v39 = vld [vmem:[#allocation27_spill] sm:$0xff] }
 0x172   :  { %1737 = vst.msk [vmem:[%s3026_s3 + $0x68] sm:$0xf] %vm1710_vm3, %v1961_v40  ;;  %v1962_v45 = vpack.c.bf16 %v1557_v41, %v1557_v41  ;;  %v1481_v15 = vmax.f32 %v1409_v61, %v1445_v55  ;;  %v1410_v30 = vmax.f32 %v3065_v60, %v2116_v59  ;;  %v1446_v22 = vmax.f32 %v3066_v31, %v2188_v44  ;;  %v1063_v23 = vpop.f32.mrb[67].mxu0  ;;  %v1351_v32 = vpop.f32.mrb[67].mxu1  ;;  %v3075_v61 = vld [vmem:[#allocation28_spill] sm:$0xff]  ;;  %v3076_v55 = vld [vmem:[#allocation29_spill] sm:$0xff] }
 0x173   :  { %1735 = vst.msk [vmem:[%s3026_s3 + $0x60] sm:$0xf] %vm1710_vm3, %v1959_v56  ;;  %v1960_v33 = vpack.c.bf16 %v1555_v57, %v1555_v57  ;;  %v1479_v11 = vmax.f32 %v1407_v13, %v1443_v58  ;;  %v1408_v34 = vmax.f32 %v3067_v12, %v1063_v23  ;;  %v1444_v24 = vmax.f32 %v3068_v35, %v1351_v32 }
 0x174   :  { %1738 = vst.msk [vmem:[%s3026_s3 + $0x6c] sm:$0xf] %vm1710_vm3, %v1962_v45  ;;  %v1524_v25 = vadd.f32 %v2771_v1, %v1481_v15  ;;  %v1482_v16 = vmax.f32 %v1410_v30, %v1446_v22 }
 0x175   :  { %1736 = vst.msk [vmem:[%s3026_s3 + $0x64] sm:$0xf] %vm1710_vm3, %v1960_v33  ;;  %v1522_v36 = vadd.f32 %v2771_v1, %v1479_v11  ;;  %v1480_v37 = vmax.f32 %v1408_v34, %v1444_v24 }
 0x176   :  { %v1560_v17 = vmax.f32 %v1524_v25, 0.0  ;;  %v1525_v46 = vadd.f32 %v2771_v1, %v1482_v16 }
 0x177   :  { %v1558_v47 = vmax.f32 %v1522_v36, 0.0  ;;  %v1523_v26 = vadd.f32 %v2771_v1, %v1480_v37  ;;  %v2119_v27 = vpop.f32.mrb[68].mxu0  ;;  %v2191_v48 = vpop.f32.mrb[68].mxu1 }
 0x178   :  { %v1965_v49 = vpack.c.bf16 %v1560_v17, %v1560_v17  ;;  %v1561_v2 = vmax.f32 %v1525_v46, 0.0  ;;  %v1413_v50 = vmax.f32 %v3069_v3, %v2119_v27  ;;  %v1449_v18 = vmax.f32 %v3070_v51, %v2191_v48  ;;  %v1076_v28 = vpop.f32.mrb[69].mxu0  ;;  %v1364_v29 = vpop.f32.mrb[69].mxu1 }
 0x179   :  { %v1963_v52 = vpack.c.bf16 %v1558_v47, %v1558_v47  ;;  %v1559_v53 = vmax.f32 %v1523_v26, 0.0  ;;  %v1411_v4 = vmax.f32 %v3071_v19, %v1076_v28  ;;  %v1447_v6 = vmax.f32 %v3072_v5, %v1364_v29  ;;  %v2120_v7 = vpop.f32.mrb[70].mxu0  ;;  %v2192_v20 = vpop.f32.mrb[70].mxu1 }
 0x17a   :  { %1741 = vst.msk [vmem:[%s3026_s3 + $0x78] sm:$0xf] %vm1710_vm3, %v1965_v49  ;;  %v1966_v21 = vpack.c.bf16 %v1561_v2, %v1561_v2  ;;  %v1485_v62 = vmax.f32 %v1413_v50, %v1449_v18  ;;  %v1414_v38 = vmax.f32 %v3073_v63, %v2120_v7  ;;  %v1450_v0 = vmax.f32 %v3074_v39, %v2192_v20  ;;  %v1079_v8 = vpop.f32.mrb[71].mxu0  ;;  %v1367_v40 = vpop.f32.mrb[71].mxu1 }
 0x17b   :  { %1739 = vst.msk [vmem:[%s3026_s3 + $0x70] sm:$0xf] %vm1710_vm3, %v1963_v52  ;;  %v1964_v41 = vpack.c.bf16 %v1559_v53, %v1559_v53  ;;  %v1483_v9 = vmax.f32 %v1411_v4, %v1447_v6  ;;  %v1412_v54 = vmax.f32 %v3075_v61, %v1079_v8  ;;  %v1448_v42 = vmax.f32 %v3076_v55, %v1367_v40 }
 0x17c   :  { %1742 = vst.msk [vmem:[%s3026_s3 + $0x7c] sm:$0xf] %vm1710_vm3, %v1966_v21  ;;  %v1528_v43 = vadd.f32 %v2771_v1, %v1485_v62  ;;  %v1486_v56 = vmax.f32 %v1414_v38, %v1450_v0 }
 0x17d   :  { %1740 = vst.msk [vmem:[%s3026_s3 + $0x74] sm:$0xf] %vm1710_vm3, %v1964_v41  ;;  %v1526_v57 = vadd.f32 %v2771_v1, %v1483_v9  ;;  %v1484_v10 = vmax.f32 %v1412_v54, %v1448_v42 }
 0x17e   :  { %v1564_v13 = vmax.f32 %v1528_v43, 0.0  ;;  %v1529_v14 = vadd.f32 %v2771_v1, %v1486_v56 }
 0x17f   :  { %v1562_v58 = vmax.f32 %v1526_v57, 0.0  ;;  %v1527_v59 = vadd.f32 %v2771_v1, %v1484_v10 }
 0x180   :  { %v1969_v44 = vpack.c.bf16 %v1564_v13, %v1564_v13  ;;  %v1565_v45 = vmax.f32 %v1529_v14, 0.0 }
 0x181   :  { %v1967_v15 = vpack.c.bf16 %v1562_v58, %v1562_v58  ;;  %v1563_v60 = vmax.f32 %v1527_v59, 0.0 }
 0x182   :  { %1745 = vst.msk [vmem:[%s3026_s3 + $0x88] sm:$0xf] %vm1710_vm3, %v1969_v44  ;;  %v1970_v30 = vpack.c.bf16 %v1565_v45, %v1565_v45 }
 0x183   :  { %1743 = vst.msk [vmem:[%s3026_s3 + $0x80] sm:$0xf] %vm1710_vm3, %v1967_v15  ;;  %v1968_v31 = vpack.c.bf16 %v1563_v60, %v1563_v60 }
 0x184   :  { %1746 = vst.msk [vmem:[%s3026_s3 + $0x8c] sm:$0xf] %vm1710_vm3, %v1970_v30 }
 0x185   :  { %1744 = vst.msk [vmem:[%s3026_s3 + $0x84] sm:$0xf] %vm1710_vm3, %v1968_v31 }
 0x186   :  { %1751 = vsyncpa [#allocation3], 1 }

// kernel: fwd.4
= control target key start
LH: loop header
LB: loop body
LE: loop exit
PB: predicated region body
PF: predicated region fallthrough
CT: control target
= control target key end

     0   :  { %vm759_vm0 = vcmask 261120   ;;  %vm1215_vm1 = vcmask 519168   ;;  %s2130_s1 = inlined_call_operand.vmem [shape: bf16[800,64], index: 1, kind: input, shape index: {}]   ;;  %s2131_s0 = inlined_call_operand.vmem [shape: bf16[128,800], index: 0, kind: input, shape index: {}]   ;;  %s2132_s2 = inlined_call_operand.vmem [shape: f32[1,64], index: 2, kind: input, shape index: {}]   ;;  %s2133_s3 = inlined_call_operand.vmem [shape: bf16[32,64], index: 3, kind: output, shape index: {}]  }
   0x1   :  { %v1585_v0 = vld [vmem:[%s2130_s1 + $0x40] sm:$0xff]   ;;  %v1589_v4 = vld [vmem:[%s2130_s1 + $0x48] sm:$0xff]   ;;  %v1593_v8 = vld [vmem:[%s2130_s1 + $0x50] sm:$0xff]  }
   0x2   :  { %v1586_v1 = vld [vmem:[%s2130_s1 + $0xc0] sm:$0xff]   ;;  %1347 = vmatprep.subr.bf16.mxu0 %v1585_v0  ;;  %v1590_v5 = vld [vmem:[%s2130_s1 + $0xc8] sm:$0xff]   ;;  %v1594_v9 = vld [vmem:[%s2130_s1 + $0xd0] sm:$0xff]  }
   0x3   :  { %v1587_v2 = vld [vmem:[%s2130_s1] sm:$0xff]   ;;  %1411 = vmatprep.subr.bf16.mxu1 %v1586_v1  ;;  %v1591_v6 = vld [vmem:[%s2130_s1 + $0x8] sm:$0xff]   ;;  %v1595_v10 = vld [vmem:[%s2130_s1 + $0x10] sm:$0xff]  }
   0x4   :  { %v1588_v3 = vld [vmem:[%s2130_s1 + $0x80] sm:$0xff]   ;;  %1348 = vmatpush3.bf16.msra.mxu0 %v1587_v2  ;;  %v1592_v7 = vld [vmem:[%s2130_s1 + $0x88] sm:$0xff]   ;;  %v1596_v11 = vld [vmem:[%s2130_s1 + $0x90] sm:$0xff]  }
   0x5   :  { %1412 = vmatpush3.bf16.msra.mxu1 %v1588_v3  ;;  %1349 = vmatprep.subr.bf16.mxu0 %v1589_v4  ;;  %v1597_v12 = vld [vmem:[%s2130_s1 + $0x58] sm:$0xff]   ;;  %v1601_v16 = vld [vmem:[%s2130_s1 + $0x60] sm:$0xff]   ;;  %v1605_v20 = vld [vmem:[%s2130_s1 + $0x68] sm:$0xff]  }
   0x6   :  { %1413 = vmatprep.subr.bf16.mxu1 %v1590_v5  ;;  %v1598_v13 = vld [vmem:[%s2130_s1 + $0xd8] sm:$0xff]   ;;  %v1602_v17 = vld [vmem:[%s2130_s1 + $0xe0] sm:$0xff]   ;;  %v1606_v21 = vld [vmem:[%s2130_s1 + $0xe8] sm:$0xff]  }
   0x7   :  { %v1599_v14 = vld [vmem:[%s2130_s1 + $0x18] sm:$0xff]   ;;  %v1603_v18 = vld [vmem:[%s2130_s1 + $0x20] sm:$0xff]   ;;  %v1607_v22 = vld [vmem:[%s2130_s1 + $0x28] sm:$0xff]  }
   0x8   :  { %1350 = vmatpush3.bf16.msra.mxu0 %v1591_v6  ;;  %v1600_v15 = vld [vmem:[%s2130_s1 + $0x98] sm:$0xff]   ;;  %v1604_v19 = vld [vmem:[%s2130_s1 + $0xa0] sm:$0xff]   ;;  %v1608_v23 = vld [vmem:[%s2130_s1 + $0xa8] sm:$0xff]  }
   0x9   :  { %1414 = vmatpush3.bf16.msra.mxu1 %v1592_v7  ;;  %1351 = vmatprep.subr.bf16.mxu0 %v1593_v8  ;;  %v1609_v24 = vld [vmem:[%s2130_s1 + $0x70] sm:$0xff]   ;;  %v1613_v28 = vld [vmem:[%s2130_s1 + $0x78] sm:$0xff]   ;;  %v1619_v33 = vld [vmem:[%s2131_s0 + $0x4] ss:$28 sps:$4 sm:$0xff]  }
   0xa   :  { %1415 = vmatprep.subr.bf16.mxu1 %v1594_v9  ;;  %v1610_v25 = vld [vmem:[%s2130_s1 + $0xf0] sm:$0xff]   ;;  %v1614_v29 = vld [vmem:[%s2130_s1 + $0xf8] sm:$0xff]   ;;  %v1620_v34 = vld [vmem:[%s2131_s0 + $0x8] ss:$28 sps:$4 sm:$0xff]   ;;  %816 = vmatprep.mubr.bf16.mxu0 %v1619_v33 }
   0xb   :  { %v1611_v26 = vld [vmem:[%s2130_s1 + $0x30] sm:$0xff]   ;;  %v1615_v30 = vld [vmem:[%s2130_s1 + $0x38] sm:$0xff]   ;;  %v1622_v35 = vld [vmem:[%s2131_s0 + $0xc] ss:$28 sps:$4 sm:$0xff]  }
   0xc   :  { %1352 = vmatpush3.bf16.msra.mxu0 %v1595_v10  ;;  %v1612_v27 = vld [vmem:[%s2130_s1 + $0xb0] sm:$0xff]   ;;  %v1616_v31 = vld [vmem:[%s2130_s1 + $0xb8] sm:$0xff]   ;;  %v1623_v36 = vld [vmem:[%s2130_s1 + $0x140] sm:$0xff]   ;;  %913 = vmatprep.mubr.bf16.mxu1 %v1622_v35 }
   0xd   :  { %1416 = vmatpush3.bf16.msra.mxu1 %v1596_v11  ;;  %1353 = vmatprep.subr.bf16.mxu0 %v1597_v12  ;;  %v1617_v32 = vld [vmem:[%s2131_s0] ss:$28 sps:$4 sm:$0xff]   ;;  %v1629_v40 = vld [vmem:[%s2131_s0 + $0x38] ss:$28 sps:$4 sm:$0xff]   ;;  %v1631_v42 = vld [vmem:[%s2130_s1 + $0x148] sm:$0xff]  }
   0xe   :  { %1417 = vmatprep.subr.bf16.mxu1 %v1598_v13  ;;  %v1624_v37 = vld [vmem:[%s2130_s1 + $0x100] sm:$0xff]   ;;  %v1625_v38 = vld [vmem:[%s2131_s0 + $0x3c] ss:$28 sps:$4 sm:$0xff]   ;;  %v1632_v43 = vld [vmem:[%s2130_s1 + $0x108] sm:$0xff]  }
   0xf   :  { %v1627_v39 = vld [vmem:[%s2131_s0 + $0x44] ss:$28 sps:$4 sm:$0xff]   ;;  %v1633_v44 = vld [vmem:[%s2131_s0 + $0x74] ss:$28 sps:$4 sm:$0xff]   ;;  %v1635_v45 = vld [vmem:[%s2131_s0 + $0x7c] ss:$28 sps:$4 sm:$0xff]  }
  0x10   :  { %1354 = vmatpush3.bf16.msra.mxu0 %v1599_v14  ;;  %v1630_v41 = vld [vmem:[%s2131_s0 + $0x40] ss:$28 sps:$4 sm:$0xff]   ;;  %v1639_v46 = vld [vmem:[%s2130_s1 + $0x150] sm:$0xff]   ;;  %v1641_v50 = vld [vmem:[%s2131_s0 + $0xac] ss:$28 sps:$4 sm:$0xff]  }
  0x11   :  { %1418 = vmatpush3.bf16.msra.mxu1 %v1600_v15  ;;  %1355 = vmatprep.subr.bf16.mxu0 %v1601_v16  ;;  %v1640_v47 = vld [vmem:[%s2130_s1 + $0x110] sm:$0xff]   ;;  %v1647_v52 = vld [vmem:[%s2130_s1 + $0x158] sm:$0xff]   ;;  %v1655_v54 = vld [vmem:[%s2130_s1 + $0x160] sm:$0xff]  }
  0x12   :  { %1419 = vmatprep.subr.bf16.mxu1 %v1602_v17  ;;  %v1637_v48 = vld [vmem:[%s2131_s0 + $0x70] ss:$28 sps:$4 sm:$0xff]   ;;  %v1638_v49 = vld [vmem:[%s2131_s0 + $0x78] ss:$28 sps:$4 sm:$0xff]   ;;  %v1656_v55 = vld [vmem:[%s2130_s1 + $0x120] sm:$0xff]  }
  0x13   :  { %v1643_v51 = vld [vmem:[%s2131_s0 + $0xb4] ss:$28 sps:$4 sm:$0xff]   ;;  %v1648_v53 = vld [vmem:[%s2130_s1 + $0x118] sm:$0xff]   ;;  %v1645_v56 = vld [vmem:[%s2131_s0 + $0xa8] ss:$28 sps:$4 sm:$0xff]  }
  0x14   :  { %1356 = vmatpush3.bf16.msra.mxu0 %v1603_v18  ;;  %v1646_v57 = vld [vmem:[%s2131_s0 + $0xb0] ss:$28 sps:$4 sm:$0xff]   ;;  %v1649_v58 = vld [vmem:[%s2131_s0 + $0xe4] ss:$28 sps:$4 sm:$0xff]   ;;  %v1657_v2 = vld [vmem:[%s2131_s0 + $0x11c] ss:$28 sps:$4 sm:$0xff]  }
  0x15   :  { %1420 = vmatpush3.bf16.msra.mxu1 %v1604_v19  ;;  %1357 = vmatprep.subr.bf16.mxu0 %v1605_v20  ;;  %v1651_v59 = vld [vmem:[%s2131_s0 + $0xec] ss:$28 sps:$4 sm:$0xff]   ;;  %v1653_v62 = vld [vmem:[%s2131_s0 + $0xe0] ss:$28 sps:$4 sm:$0xff]   ;;  %v1671_v0 = vld [vmem:[%s2130_s1 + $0x170] sm:$0xff]  }
  0x16   :  { %1421 = vmatprep.subr.bf16.mxu1 %v1606_v21  ;;  %v1663_v60 = vld [vmem:[%s2130_s1 + $0x168] sm:$0xff]   ;;  %v1672_v1 = vld [vmem:[%s2130_s1 + $0x130] sm:$0xff]   ;;  %v1659_v3 = vld [vmem:[%s2131_s0 + $0x124] ss:$28 sps:$4 sm:$0xff]  }
  0x17   :  { %v1664_v61 = vld [vmem:[%s2130_s1 + $0x128] sm:$0xff]   ;;  %v1679_v4 = vld [vmem:[%s2130_s1 + $0x178] sm:$0xff]   ;;  %v1687_v8 = vld [vmem:[%s2130_s1 + $0x180] sm:$0xff]  }
  0x18   :  { %1358 = vmatpush3.bf16.msra.mxu0 %v1607_v22  ;;  %v1654_v63 = vld [vmem:[%s2131_s0 + $0xe8] ss:$28 sps:$4 sm:$0xff]   ;;  %v1680_v5 = vld [vmem:[%s2130_s1 + $0x138] sm:$0xff]   ;;  %v1665_v9 = vld [vmem:[%s2131_s0 + $0x154] ss:$28 sps:$4 sm:$0xff]  }
  0x19   :  { %1422 = vmatpush3.bf16.msra.mxu1 %v1608_v23  ;;  %1359 = vmatprep.subr.bf16.mxu0 %v1609_v24  ;;  %v1661_v6 = vld [vmem:[%s2131_s0 + $0x118] ss:$28 sps:$4 sm:$0xff]   ;;  %v1662_v7 = vld [vmem:[%s2131_s0 + $0x120] ss:$28 sps:$4 sm:$0xff]   ;;  %v1669_v11 = vld [vmem:[%s2131_s0 + $0x150] ss:$28 sps:$4 sm:$0xff]  }
  0x1a   :  { %1423 = vmatprep.subr.bf16.mxu1 %v1610_v25  ;;  %v1667_v10 = vld [vmem:[%s2131_s0 + $0x15c] ss:$28 sps:$4 sm:$0xff]   ;;  %v1673_v13 = vld [vmem:[%s2131_s0 + $0x18c] ss:$28 sps:$4 sm:$0xff]   ;;  %v1675_v14 = vld [vmem:[%s2131_s0 + $0x194] ss:$28 sps:$4 sm:$0xff]  }
  0x1b   :  { %v1670_v12 = vld [vmem:[%s2131_s0 + $0x158] ss:$28 sps:$4 sm:$0xff]   ;;  %v1677_v15 = vld [vmem:[%s2131_s0 + $0x188] ss:$28 sps:$4 sm:$0xff]   ;;  %v1678_v16 = vld [vmem:[%s2131_s0 + $0x190] ss:$28 sps:$4 sm:$0xff]  }
  0x1c   :  { %1360 = vmatpush3.bf16.msra.mxu0 %v1611_v26  ;;  %v1683_v17 = vld [vmem:[%s2131_s0 + $0x14] ss:$28 sps:$4 sm:$0xff]   ;;  %v1686_v18 = vld [vmem:[%s2131_s0 + $0x164] ss:$28 sps:$4 sm:$0xff]   ;;  %v1688_v21 = vld [vmem:[%s2131_s0 + $0x4c] ss:$28 sps:$4 sm:$0xff]  }
  0x1d   :  { %1424 = vmatpush3.bf16.msra.mxu1 %v1612_v27  ;;  %1361 = vmatprep.subr.bf16.mxu0 %v1613_v28  ;;  %v1681_v19 = vld [vmem:[%s2131_s0 + $0x10] ss:$28 sps:$4 sm:$0xff]   ;;  %v1684_v20 = vld [vmem:[%s2131_s0 + $0x160] ss:$28 sps:$4 sm:$0xff]   ;;  %v1692_v24 = vld [vmem:[%s2131_s0 + $0x48] ss:$28 sps:$4 sm:$0xff]  }
  0x1e   :  { %1425 = vmatprep.subr.bf16.mxu1 %v1614_v29  ;;  %v1690_v22 = vld [vmem:[%s2131_s0 + $0x19c] ss:$28 sps:$4 sm:$0xff]   ;;  %v1694_v23 = vld [vmem:[%s2130_s1 + $0x188] sm:$0xff]   ;;  %v1695_v26 = vld [vmem:[%s2131_s0 + $0x84] ss:$28 sps:$4 sm:$0xff]  }
  0x1f   :  { %v1693_v25 = vld [vmem:[%s2131_s0 + $0x198] ss:$28 sps:$4 sm:$0xff]   ;;  %v1698_v28 = vld [vmem:[%s2131_s0 + $0x80] ss:$28 sps:$4 sm:$0xff]   ;;  %v1699_v29 = vld [vmem:[%s2131_s0 + $0x50] ss:$28 sps:$4 sm:$0xff]  }
  0x20   :  { %1362 = vmatpush3.bf16.msra.mxu0 %v1615_v30  ;;  %v1697_v27 = vld [vmem:[%s2131_s0 + $0x18] ss:$28 sps:$4 sm:$0xff]   ;;  %v1704_v33 = vld [vmem:[%s2131_s0 + $0xc0] ss:$28 sps:$4 sm:$0xff]  }
  0x21   :  { %1426 = vmatpush3.bf16.msra.mxu1 %v1616_v31  ;;  %1475 = vmatprep.subr.bf16.mxu0 %v1623_v36  ;;  %v1700_v30 = vld [vmem:[%s2131_s0 + $0xbc] ss:$28 sps:$4 sm:$0xff]   ;;  %v1702_v31 = vld [vmem:[%s2131_s0 + $0x88] ss:$28 sps:$4 sm:$0xff]  }
  0x22   :  { %1569 = vmatprep.subr.bf16.mxu1 %v1623_v36  ;;  %v1707_v35 = vld [vmem:[%s2131_s0 + $0xf8] ss:$28 sps:$4 sm:$0xff]   ;;  %v1708_v36 = vld [vmem:[%s2131_s0 + $0xf0] ss:$28 sps:$4 sm:$0xff]  }
  0x23   :  { %817 = vmatmul.mubr.bf16.vlgmr.msra.gmra.mrb[0].mxu0 %v1617_v32  ;;  %v1703_v32 = vld [vmem:[%s2131_s0 + $0xb8] ss:$28 sps:$4 sm:$0xff]  }
  0x24   :  { %914 = vmatmul.mubr.bf16.vlgmr.msra.gmra.mrb[0].mxu1 %v1620_v34  ;;  %1476 = vmatpush3.bf16.msra.mxu0 %v1624_v37  ;;  %v1705_v34 = vld [vmem:[%s2131_s0 + $0xf4] ss:$28 sps:$4 sm:$0xff]  }
  0x25   :  { %1577 = vmatpush3.bf16.msra.mxu1 %v1624_v37  ;;  %824 = vmatprep.mubr.bf16.mxu0 %v1625_v38  ;;  %v1709_v37 = vld [vmem:[%s2131_s0 + $0x130] ss:$28 sps:$4 sm:$0xff]  }
  0x26   :  { %921 = vmatprep.mubr.bf16.mxu1 %v1627_v39  ;;  %1477 = vmatprep.subr.bf16.mxu0 %v1631_v42  ;;  %v1710_v38 = vld [vmem:[%s2131_s0 + $0x12c] ss:$28 sps:$4 sm:$0xff]  }
  0x27   :  { %1570 = vmatprep.subr.bf16.mxu1 %v1631_v42  ;;  %v1712_v39 = vld [vmem:[%s2131_s0 + $0x168] ss:$28 sps:$4 sm:$0xff]  }
  0x28   :  { %1478 = vmatpush3.bf16.msra.mxu0 %v1632_v43 }
  0x29   :  { %1578 = vmatpush3.bf16.msra.mxu1 %v1632_v43  ;;  %1479 = vmatprep.subr.bf16.mxu0 %v1639_v46 }
  0x2a   :  { %1571 = vmatprep.subr.bf16.mxu1 %v1639_v46 }
  0x2b   :  { %825 = vmatmul.mubr.bf16.gmra.mrb[4].mxu0 %v1629_v40  ;;  %v1713_v40 = vld [vmem:[%s2131_s0 + $0x128] ss:$28 sps:$4 sm:$0xff]  }
  0x2c   :  { %922 = vmatmul.mubr.bf16.gmra.mrb[4].mxu1 %v1630_v41  ;;  %832 = vmatprep.mubr.bf16.mxu0 %v1633_v44  ;;  %v1714_v41 = vld [vmem:[%s2131_s0 + $0x1a0] ss:$28 sps:$4 sm:$0xff]  }
  0x2d   :  { %929 = vmatprep.mubr.bf16.mxu1 %v1635_v45  ;;  %1480 = vmatpush3.bf16.msra.mxu0 %v1640_v47 }
  0x2e   :  { %1579 = vmatpush3.bf16.msra.mxu1 %v1640_v47  ;;  %1481 = vmatprep.subr.bf16.mxu0 %v1647_v52 }
  0x2f   :  { %1572 = vmatprep.subr.bf16.mxu1 %v1647_v52 }
  0x31   :  { %1482 = vmatpush3.bf16.msra.mxu0 %v1648_v53 }
  0x32   :  { %1580 = vmatpush3.bf16.msra.mxu1 %v1648_v53  ;;  %1483 = vmatprep.subr.bf16.mxu0 %v1655_v54 }
  0x33   :  { %833 = vmatmul.mubr.bf16.gmra.mrb[8].mxu0 %v1637_v48  ;;  %1573 = vmatprep.subr.bf16.mxu1 %v1655_v54 }
  0x34   :  { %930 = vmatmul.mubr.bf16.gmra.mrb[8].mxu1 %v1638_v49  ;;  %840 = vmatprep.mubr.bf16.mxu0 %v1641_v50 }
  0x35   :  { %937 = vmatprep.mubr.bf16.mxu1 %v1643_v51  ;;  %1484 = vmatpush3.bf16.msra.mxu0 %v1656_v55 }
  0x36   :  { %1581 = vmatpush3.bf16.msra.mxu1 %v1656_v55  ;;  %1485 = vmatprep.subr.bf16.mxu0 %v1663_v60 }
  0x37   :  { %1574 = vmatprep.subr.bf16.mxu1 %v1663_v60 }
  0x39   :  { %1486 = vmatpush3.bf16.msra.mxu0 %v1664_v61 }
  0x3a   :  { %1582 = vmatpush3.bf16.msra.mxu1 %v1664_v61  ;;  %1487 = vmatprep.subr.bf16.mxu0 %v1671_v0 }
  0x3b   :  { %841 = vmatmul.mubr.bf16.gmra.mrb[12].mxu0 %v1645_v56  ;;  %1575 = vmatprep.subr.bf16.mxu1 %v1671_v0 }
  0x3c   :  { %938 = vmatmul.mubr.bf16.gmra.mrb[12].mxu1 %v1646_v57  ;;  %848 = vmatprep.mubr.bf16.mxu0 %v1649_v58 }
  0x3d   :  { %945 = vmatprep.mubr.bf16.mxu1 %v1651_v59  ;;  %1488 = vmatpush3.bf16.msra.mxu0 %v1672_v1 }
  0x3e   :  { %1583 = vmatpush3.bf16.msra.mxu1 %v1672_v1  ;;  %1489 = vmatprep.subr.bf16.mxu0 %v1679_v4 }
  0x3f   :  { %1576 = vmatprep.subr.bf16.mxu1 %v1679_v4 }
  0x41   :  { %1490 = vmatpush3.bf16.msra.mxu0 %v1680_v5 }
  0x42   :  { %1584 = vmatpush3.bf16.msra.mxu1 %v1680_v5 }
  0x43   :  { %849 = vmatmul.mubr.bf16.gmra.mrb[16].mxu0 %v1653_v62  ;;  %1549 = vmatprep.subr.bf16.mxu1 %v1687_v8 }
  0x44   :  { %946 = vmatmul.mubr.bf16.gmra.mrb[16].mxu1 %v1654_v63  ;;  %856 = vmatprep.mubr.bf16.mxu0 %v1657_v2 }
  0x45   :  { %953 = vmatprep.mubr.bf16.mxu1 %v1659_v3 }
  0x4b   :  { %857 = vmatmul.mubr.bf16.gmra.mrb[20].mxu0 %v1661_v6 }
  0x4c   :  { %954 = vmatmul.mubr.bf16.gmra.mrb[20].mxu1 %v1662_v7  ;;  %864 = vmatprep.mubr.bf16.mxu0 %v1665_v9 }
  0x4d   :  { %961 = vmatprep.mubr.bf16.mxu1 %v1667_v10 }
  0x53   :  { %865 = vmatmul.mubr.bf16.gmra.mrb[24].mxu0 %v1669_v11 }
  0x54   :  { %962 = vmatmul.mubr.bf16.gmra.mrb[24].mxu1 %v1670_v12  ;;  %872 = vmatprep.mubr.bf16.mxu0 %v1673_v13 }
  0x55   :  { %969 = vmatprep.mubr.bf16.mxu1 %v1675_v14 }
  0x5b   :  { %873 = vmatmul.mubr.bf16.gmra.mrb[28].mxu0 %v1677_v15 }
  0x5c   :  { %970 = vmatmul.mubr.bf16.gmra.mrb[28].mxu1 %v1678_v16  ;;  %1010 = vmatprep.mubr.bf16.mxu0 %v1683_v17 }
  0x5d   :  { %1058 = vmatprep.mubr.bf16.mxu1 %v1686_v18 }
  0x63   :  { %1011 = vmatmul.mubr.bf16.vlgmr.msra.gmra.mrb[32].mxu0 %v1681_v19 }
  0x64   :  { %1059 = vmatmul.mubr.bf16.vlgmr.msra.gmra.mrb[32].mxu1 %v1684_v20  ;;  %1018 = vmatprep.mubr.bf16.mxu0 %v1688_v21 }
  0x65   :  { %1550 = vmatpush3.bf16.msra.mxu1 %v1687_v8  ;;  %1066 = vmatprep.mubr.bf16.mxu1 %v1690_v22 }
  0x66   :  { %1551 = vmatprep.subr.bf16.mxu1 %v1694_v23 }
  0x69   :  { %1552 = vmatpush3.bf16.msra.mxu1 %v1694_v23 }
  0x6b   :  { %1019 = vmatmul.mubr.bf16.gmra.mrb[36].mxu0 %v1692_v24 }
  0x6c   :  { %1067 = vmatmul.mubr.bf16.gmra.mrb[36].mxu1 %v1693_v25  ;;  %1026 = vmatprep.mubr.bf16.mxu0 %v1695_v26 }
  0x6d   :  { %1553 = vmatprep.mubr.msk.bf16.mxu1 %vm759_vm0, %v1697_v27 }
  0x73   :  { %1027 = vmatmul.mubr.bf16.gmra.mrb[40].mxu0 %v1698_v28 }
  0x74   :  { %1554 = vmatmul.mubr.msk.bf16.vlgmr.msra.gmra.mrb[40].mxu1 %vm759_vm0, %v1699_v29  ;;  %1034 = vmatprep.mubr.bf16.mxu0 %v1700_v30 }
  0x75   :  { %1557 = vmatprep.mubr.msk.bf16.mxu1 %vm759_vm0, %v1702_v31 }
  0x7b   :  { %1035 = vmatmul.mubr.bf16.gmra.mrb[44].mxu0 %v1703_v32 }
  0x7c   :  { %1558 = vmatmul.mubr.msk.bf16.gmra.mrb[44].mxu1 %vm759_vm0, %v1704_v33  ;;  %1042 = vmatprep.mubr.bf16.mxu0 %v1705_v34 }
  0x7d   :  { %1561 = vmatprep.mubr.msk.bf16.mxu1 %vm759_vm0, %v1707_v35 }
  0x83   :  { %1043 = vmatmul.mubr.bf16.gmra.mrb[48].mxu0 %v1708_v36 }
  0x84   :  { %1562 = vmatmul.mubr.msk.bf16.gmra.mrb[48].mxu1 %vm759_vm0, %v1709_v37  ;;  %1050 = vmatprep.mubr.bf16.mxu0 %v1710_v38 }
  0x85   :  { %1565 = vmatprep.mubr.msk.bf16.mxu1 %vm759_vm0, %v1712_v39 }
  0x8b   :  { %1051 = vmatmul.mubr.bf16.gmra.mrb[52].mxu0 %v1713_v40 }
  0x8c   :  { %1566 = vmatmul.mubr.msk.bf16.gmra.mrb[52].mxu1 %vm759_vm0, %v1714_v41 }
  0xf6   :  { %v1363_v42 = vpop.f32.mrb[0].mxu0 }
  0xf7   :  { %v1427_v43 = vpop.f32.mrb[0].mxu1  ;;  %v1364_v44 = vpop.f32.mrb[1].mxu0 }
  0xf8   :  { %v1365_v45 = vadd.f32 %v1364_v44, %v1363_v42  ;;  %v1428_v46 = vpop.f32.mrb[1].mxu1  ;;  %v1366_v47 = vpop.f32.mrb[2].mxu0 }
  0xf9   :  { %v1429_v48 = vadd.f32 %v1428_v46, %v1427_v43  ;;  %v1430_v49 = vpop.f32.mrb[2].mxu1  ;;  %v1367_v50 = vpop.f32.mrb[3].mxu0 }
  0xfa   :  { %v1368_v51 = vadd.f32 %v1367_v50, %v1366_v47  ;;  %v1431_v52 = vpop.f32.mrb[3].mxu1 }
  0xfb   :  { %v2061_v53 = vadd.f32 %v1429_v48, %v1365_v45  ;;  %v1432_v54 = vadd.f32 %v1431_v52, %v1430_v49 }
  0xfd   :  { %v2063_v55 = vadd.f32 %v1432_v54, %v1368_v51 }
  0xfe   :  { %v1369_v56 = vpop.f32.mrb[4].mxu0 }
  0xff   :  { %v1433_v57 = vpop.f32.mrb[4].mxu1  ;;  %v1370_v58 = vpop.f32.mrb[5].mxu0 }
 0x100   :  { %v1371_v59 = vadd.f32 %v1370_v58, %v1369_v56  ;;  %v1434_v60 = vpop.f32.mrb[5].mxu1  ;;  %v1372_v61 = vpop.f32.mrb[6].mxu0 }
 0x101   :  { %v1435_v62 = vadd.f32 %v1434_v60, %v1433_v57  ;;  %v1436_v63 = vpop.f32.mrb[6].mxu1  ;;  %v1373_v0 = vpop.f32.mrb[7].mxu0 }
 0x102   :  { %v1374_v1 = vadd.f32 %v1373_v0, %v1372_v61  ;;  %v1437_v2 = vpop.f32.mrb[7].mxu1 }
 0x103   :  { %v2065_v3 = vadd.f32 %v1435_v62, %v1371_v59  ;;  %v1438_v4 = vadd.f32 %v1437_v2, %v1436_v63 }
 0x105   :  { %v2067_v5 = vadd.f32 %v1438_v4, %v1374_v1 }
 0x106   :  { %v1375_v6 = vpop.f32.mrb[8].mxu0 }
 0x107   :  { %v1439_v7 = vpop.f32.mrb[8].mxu1  ;;  %v1376_v8 = vpop.f32.mrb[9].mxu0 }
 0x108   :  { %v1377_v9 = vadd.f32 %v1376_v8, %v1375_v6  ;;  %v1440_v10 = vpop.f32.mrb[9].mxu1  ;;  %v1378_v11 = vpop.f32.mrb[10].mxu0 }
 0x109   :  { %v1441_v12 = vadd.f32 %v1440_v10, %v1439_v7  ;;  %v1442_v13 = vpop.f32.mrb[10].mxu1  ;;  %v1379_v14 = vpop.f32.mrb[11].mxu0 }
 0x10a   :  { %v1380_v15 = vadd.f32 %v1379_v14, %v1378_v11  ;;  %v1443_v16 = vpop.f32.mrb[11].mxu1 }
 0x10b   :  { %v2069_v17 = vadd.f32 %v1441_v12, %v1377_v9  ;;  %v1444_v18 = vadd.f32 %v1443_v16, %v1442_v13 }
 0x10d   :  { %v2071_v19 = vadd.f32 %v1444_v18, %v1380_v15 }
 0x10e   :  { %v1381_v20 = vpop.f32.mrb[12].mxu0 }
 0x10f   :  { %v1445_v21 = vpop.f32.mrb[12].mxu1  ;;  %v1382_v22 = vpop.f32.mrb[13].mxu0 }
 0x110   :  { %v1383_v23 = vadd.f32 %v1382_v22, %v1381_v20  ;;  %v1446_v24 = vpop.f32.mrb[13].mxu1  ;;  %v1384_v25 = vpop.f32.mrb[14].mxu0 }
 0x111   :  { %v1447_v26 = vadd.f32 %v1446_v24, %v1445_v21  ;;  %v1448_v27 = vpop.f32.mrb[14].mxu1  ;;  %v1385_v28 = vpop.f32.mrb[15].mxu0 }
 0x112   :  { %v1386_v29 = vadd.f32 %v1385_v28, %v1384_v25  ;;  %v1449_v30 = vpop.f32.mrb[15].mxu1 }
 0x113   :  { %v2073_v31 = vadd.f32 %v1447_v26, %v1383_v23  ;;  %v1450_v32 = vadd.f32 %v1449_v30, %v1448_v27 }
 0x115   :  { %v2075_v33 = vadd.f32 %v1450_v32, %v1386_v29 }
 0x116   :  { %v1387_v34 = vpop.f32.mrb[16].mxu0 }
 0x117   :  { %v1451_v35 = vpop.f32.mrb[16].mxu1  ;;  %v1388_v36 = vpop.f32.mrb[17].mxu0 }
 0x118   :  { %v1389_v37 = vadd.f32 %v1388_v36, %v1387_v34  ;;  %v1452_v38 = vpop.f32.mrb[17].mxu1  ;;  %v1390_v39 = vpop.f32.mrb[18].mxu0 }
 0x119   :  { %v1453_v40 = vadd.f32 %v1452_v38, %v1451_v35  ;;  %v1454_v41 = vpop.f32.mrb[18].mxu1  ;;  %v1391_v42 = vpop.f32.mrb[19].mxu0 }
 0x11a   :  { %v1392_v43 = vadd.f32 %v1391_v42, %v1390_v39  ;;  %v1455_v44 = vpop.f32.mrb[19].mxu1 }
 0x11b   :  { %v2077_v45 = vadd.f32 %v1453_v40, %v1389_v37  ;;  %v1456_v46 = vadd.f32 %v1455_v44, %v1454_v41 }
 0x11d   :  { %v2079_v47 = vadd.f32 %v1456_v46, %v1392_v43 }
 0x11e   :  { %v1393_v48 = vpop.f32.mrb[20].mxu0 }
 0x11f   :  { %v1457_v49 = vpop.f32.mrb[20].mxu1  ;;  %v1394_v50 = vpop.f32.mrb[21].mxu0 }
 0x120   :  { %v1395_v51 = vadd.f32 %v1394_v50, %v1393_v48  ;;  %v1458_v52 = vpop.f32.mrb[21].mxu1  ;;  %v1396_v54 = vpop.f32.mrb[22].mxu0 }
 0x121   :  { %v1459_v56 = vadd.f32 %v1458_v52, %v1457_v49  ;;  %v1460_v57 = vpop.f32.mrb[22].mxu1  ;;  %v1397_v58 = vpop.f32.mrb[23].mxu0 }
 0x122   :  { %v1398_v59 = vadd.f32 %v1397_v58, %v1396_v54  ;;  %v1461_v60 = vpop.f32.mrb[23].mxu1 }
 0x123   :  { %v2081_v61 = vadd.f32 %v1459_v56, %v1395_v51  ;;  %v1462_v62 = vadd.f32 %v1461_v60, %v1460_v57 }
 0x125   :  { %v2083_v63 = vadd.f32 %v1462_v62, %v1398_v59 }
 0x126   :  { %v1399_v0 = vpop.f32.mrb[24].mxu0 }
 0x127   :  { %v1463_v1 = vpop.f32.mrb[24].mxu1  ;;  %v1400_v2 = vpop.f32.mrb[25].mxu0 }
 0x128   :  { %v1401_v4 = vadd.f32 %v1400_v2, %v1399_v0  ;;  %v1464_v6 = vpop.f32.mrb[25].mxu1  ;;  %v1402_v7 = vpop.f32.mrb[26].mxu0 }
 0x129   :  { %v1465_v8 = vadd.f32 %v1464_v6, %v1463_v1  ;;  %v1466_v9 = vpop.f32.mrb[26].mxu1  ;;  %v1403_v10 = vpop.f32.mrb[27].mxu0 }
 0x12a   :  { %v1404_v11 = vadd.f32 %v1403_v10, %v1402_v7  ;;  %v1467_v12 = vpop.f32.mrb[27].mxu1 }
 0x12b   :  { %v964_v13 = vadd.f32 %v1465_v8, %v1401_v4  ;;  %v1468_v14 = vadd.f32 %v1467_v12, %v1466_v9 }
 0x12d   :  { %v967_v15 = vadd.f32 %v1468_v14, %v1404_v11 }
 0x12e   :  { %v1405_v16 = vpop.f32.mrb[28].mxu0 }
 0x12f   :  { %v1469_v18 = vpop.f32.mrb[28].mxu1  ;;  %v1406_v20 = vpop.f32.mrb[29].mxu0 }
 0x130   :  { %v1407_v21 = vadd.f32 %v1406_v20, %v1405_v16  ;;  %v1470_v22 = vpop.f32.mrb[29].mxu1  ;;  %v1408_v23 = vpop.f32.mrb[30].mxu0 }
 0x131   :  { %v1471_v24 = vadd.f32 %v1470_v22, %v1469_v18  ;;  %v1472_v25 = vpop.f32.mrb[30].mxu1  ;;  %v1409_v26 = vpop.f32.mrb[31].mxu0 }
 0x132   :  { %v1410_v27 = vadd.f32 %v1409_v26, %v1408_v23  ;;  %v1473_v28 = vpop.f32.mrb[31].mxu1 }
 0x133   :  { %v972_v29 = vadd.f32 %v1471_v24, %v1407_v21  ;;  %v1474_v30 = vadd.f32 %v1473_v28, %v1472_v25 }
 0x135   :  { %v975_v32 = vadd.f32 %v1474_v30, %v1410_v27 }
 0x136   :  { %v1491_v34 = vpop.f32.mrb[32].mxu0 }
 0x137   :  { %v1527_v35 = vpop.f32.mrb[32].mxu1  ;;  %v1492_v36 = vpop.f32.mrb[33].mxu0 }
 0x138   :  { %v1493_v37 = vadd.f32 %v1492_v36, %v1491_v34  ;;  %v1528_v38 = vpop.f32.mrb[33].mxu1  ;;  %v1494_v39 = vpop.f32.mrb[34].mxu0 }
 0x139   :  { %v1529_v40 = vadd.f32 %v1528_v38, %v1527_v35  ;;  %v1530_v41 = vpop.f32.mrb[34].mxu1  ;;  %v1495_v42 = vpop.f32.mrb[35].mxu0 }
 0x13a   :  { %v1496_v43 = vadd.f32 %v1495_v42, %v1494_v39  ;;  %v1531_v44 = vpop.f32.mrb[35].mxu1  ;;  %v1013_v46 = vadd.f32 %v1493_v37, %v2061_v53 }
 0x13b   :  { %v1532_v48 = vadd.f32 %v1531_v44, %v1530_v41  ;;  %v2086_v49 = vadd.f32 %v1529_v40, %v964_v13 }
 0x13c   :  { %v1016_v50 = vadd.f32 %v1496_v43, %v2063_v55 }
 0x13d   :  { %v2089_v51 = vadd.f32 %v1532_v48, %v967_v15 }
 0x13e   :  { %v1497_v52 = vpop.f32.mrb[36].mxu0 }
 0x13f   :  { %v1533_v54 = vpop.f32.mrb[36].mxu1  ;;  %v1498_v56 = vpop.f32.mrb[37].mxu0 }
 0x140   :  { %v1499_v57 = vadd.f32 %v1498_v56, %v1497_v52  ;;  %v1534_v58 = vpop.f32.mrb[37].mxu1  ;;  %v1500_v59 = vpop.f32.mrb[38].mxu0 }
 0x141   :  { %v1535_v60 = vadd.f32 %v1534_v58, %v1533_v54  ;;  %v1536_v62 = vpop.f32.mrb[38].mxu1  ;;  %v1501_v0 = vpop.f32.mrb[39].mxu0 }
 0x142   :  { %v1502_v1 = vadd.f32 %v1501_v0, %v1500_v59  ;;  %v1537_v2 = vpop.f32.mrb[39].mxu1  ;;  %v1021_v53 = vadd.f32 %v1499_v57, %v2065_v3 }
 0x143   :  { %v1538_v4 = vadd.f32 %v1537_v2, %v1536_v62  ;;  %v1069_v6 = vadd.f32 %v1535_v60, %v972_v29 }
 0x144   :  { %v1024_v7 = vadd.f32 %v1502_v1, %v2067_v5 }
 0x145   :  { %v2093_v55 = vadd.f32 %v1538_v4, %v975_v32 }
 0x146   :  { %v1503_v8 = vpop.f32.mrb[40].mxu0 }
 0x147   :  { %v1555_v9 = vpop.f32.mrb[40].mxu1  ;;  %v1504_v10 = vpop.f32.mrb[41].mxu0 }
 0x148   :  { %v2095_v11 = vadd.f32 %v1555_v9, %v1021_v53  ;;  %v1505_v12 = vadd.f32 %v1504_v10, %v1503_v8  ;;  %v1109_v13 = vpop.f32.mrb[41].mxu1  ;;  %v1506_v14 = vpop.f32.mrb[42].mxu0 }
 0x149   :  { %v2097_v15 = vadd.f32 %v1109_v13, %v1013_v46  ;;  %v1556_v16 = vpop.f32.mrb[42].mxu1  ;;  %v1507_v18 = vpop.f32.mrb[43].mxu0 }
 0x14a   :  { %v2099_v20 = vadd.f32 %v1556_v16, %v1024_v7  ;;  %v1508_v3 = vadd.f32 %v1507_v18, %v1506_v14  ;;  %v1112_v21 = vpop.f32.mrb[43].mxu1  ;;  %v1029_v5 = vadd.f32 %v1505_v12, %v2069_v17 }
 0x14b   :  { %v1113_v22 = vadd.f32 %v1112_v21, %v1016_v50 }
 0x14c   :  { %v1032_v23 = vadd.f32 %v1508_v3, %v2071_v19 }
 0x14e   :  { %v1509_v24 = vpop.f32.mrb[44].mxu0 }
 0x14f   :  { %v1559_v25 = vpop.f32.mrb[44].mxu1  ;;  %v1510_v26 = vpop.f32.mrb[45].mxu0 }
 0x150   :  { %v1511_v27 = vadd.f32 %v1510_v26, %v1509_v24  ;;  %v1125_v28 = vpop.f32.mrb[45].mxu1  ;;  %v1512_v29 = vpop.f32.mrb[46].mxu0 }
 0x151   :  { %v1126_v30 = vadd.f32 %v1125_v28, %v1029_v5  ;;  %v1560_v32 = vpop.f32.mrb[46].mxu1  ;;  %v1513_v34 = vpop.f32.mrb[47].mxu0 }
 0x152   :  { %v1037_v35 = vadd.f32 %v1511_v27, %v2073_v31  ;;  %v1514_v36 = vadd.f32 %v1513_v34, %v1512_v29  ;;  %v1128_v37 = vpop.f32.mrb[47].mxu1 }
 0x153   :  { %v1172_v38 = vmax.f32 %v2097_v15, %v1126_v30  ;;  %v1129_v39 = vadd.f32 %v1128_v37, %v1032_v23 }
 0x154   :  { %v1134_v17 = vadd.f32 %v1559_v25, %v1037_v35  ;;  %v1040_v40 = vadd.f32 %v1514_v36, %v2075_v33 }
 0x155   :  { %v1173_v19 = vmax.f32 %v1113_v22, %v1129_v39 }
 0x156   :  { %v1174_v41 = vmax.f32 %v2095_v11, %v1134_v17  ;;  %v1137_v42 = vadd.f32 %v1560_v32, %v1040_v40  ;;  %v1515_v43 = vpop.f32.mrb[48].mxu0 }
 0x157   :  { %v1516_v44 = vpop.f32.mrb[49].mxu0  ;;  %v1563_v46 = vpop.f32.mrb[48].mxu1 }
 0x158   :  { %v1175_v48 = vmax.f32 %v2099_v20, %v1137_v42  ;;  %v1517_v50 = vadd.f32 %v1516_v44, %v1515_v43  ;;  %v1518_v52 = vpop.f32.mrb[50].mxu0  ;;  %v1141_v31 = vpop.f32.mrb[49].mxu1 }
 0x159   :  { %v1519_v54 = vpop.f32.mrb[51].mxu0  ;;  %v1564_v56 = vpop.f32.mrb[50].mxu1 }
 0x15a   :  { %v1520_v57 = vadd.f32 %v1519_v54, %v1518_v52  ;;  %v1045_v58 = vadd.f32 %v1517_v50, %v2077_v45  ;;  %v1144_v59 = vpop.f32.mrb[51].mxu1 }
 0x15c   :  { %v1142_v60 = vadd.f32 %v1141_v31, %v1045_v58  ;;  %v1048_v33 = vadd.f32 %v1520_v57, %v2079_v47 }
 0x15e   :  { %v1145_v62 = vadd.f32 %v1144_v59, %v1048_v33  ;;  %v1521_v0 = vpop.f32.mrb[52].mxu0 }
 0x15f   :  { %v1567_v1 = vpop.f32.mrb[52].mxu1  ;;  %v1522_v2 = vpop.f32.mrb[53].mxu0 }
 0x160   :  { %v1166_v53 = vadd.f32 %v1567_v1, %v1069_v6  ;;  %v1523_v4 = vadd.f32 %v1522_v2, %v1521_v0  ;;  %v1157_v7 = vpop.f32.mrb[53].mxu1  ;;  %v1524_v8 = vpop.f32.mrb[54].mxu0  ;;  %v1338_v6 = vld [vmem:[%s2132_s2] ss:$0 sm:$0xff] }
 0x161   :  { %v1158_v9 = vadd.f32 %v1157_v7, %v2086_v49  ;;  %v1568_v10 = vpop.f32.mrb[54].mxu1  ;;  %v1525_v11 = vpop.f32.mrb[55].mxu0 }
 0x162   :  { %v1053_v12 = vadd.f32 %v1523_v4, %v2081_v61  ;;  %v1169_v45 = vadd.f32 %v1568_v10, %v2093_v55  ;;  %v1526_v13 = vadd.f32 %v1525_v11, %v1524_v8  ;;  %v1160_v14 = vpop.f32.mrb[55].mxu1 }
 0x163   :  { %v1176_v15 = vmax.f32 %v1142_v60, %v1158_v9  ;;  %v1161_v47 = vadd.f32 %v1160_v14, %v2089_v51 }
 0x164   :  { %v1150_v16 = vadd.f32 %v1563_v46, %v1053_v12  ;;  %v1056_v18 = vadd.f32 %v1526_v13, %v2083_v63 }
 0x165   :  { %v1180_v20 = vmax.f32 %v1172_v38, %v1176_v15  ;;  %v1177_v49 = vmax.f32 %v1145_v62, %v1161_v47 }
 0x166   :  { %v1178_v3 = vmax.f32 %v1150_v16, %v1166_v53  ;;  %v1153_v21 = vadd.f32 %v1564_v56, %v1056_v18 }
 0x167   :  { %v1191_v5 = vadd.f32 %v1338_v6, %v1180_v20  ;;  %v1181_v61 = vmax.f32 %v1173_v19, %v1177_v49 }
 0x168   :  { %v1182_v22 = vmax.f32 %v1174_v41, %v1178_v3  ;;  %v1179_v55 = vmax.f32 %v1153_v21, %v1169_v45 }
 0x169   :  { %v1195_v23 = vmax.f32 %v1191_v5, 0.0  ;;  %v1192_v24 = vadd.f32 %v1338_v6, %v1181_v61 }
 0x16a   :  { %v1193_v25 = vadd.f32 %v1338_v6, %v1182_v22  ;;  %v1183_v51 = vmax.f32 %v1175_v48, %v1179_v55 }
 0x16b   :  { %v1343_v26 = vpack.c.bf16 %v1195_v23, %v1195_v23  ;;  %v1196_v27 = vmax.f32 %v1192_v24, 0.0 }
 0x16c   :  { %v1197_v28 = vmax.f32 %v1193_v25, 0.0  ;;  %v1194_v29 = vadd.f32 %v1338_v6, %v1183_v51 }
 0x16d   :  { %1216 = vst.msk [vmem:[%s2133_s3] sm:$0xf] %vm1215_vm1, %v1343_v26  ;;  %v1344_v63 = vpack.c.bf16 %v1196_v27, %v1196_v27 }
 0x16e   :  { %v1345_v30 = vpack.c.bf16 %v1197_v28, %v1197_v28  ;;  %v1198_v32 = vmax.f32 %v1194_v29, 0.0 }
 0x16f   :  { %1217 = vst.msk [vmem:[%s2133_s3 + $0x4] sm:$0xf] %vm1215_vm1, %v1344_v63 }
 0x170   :  { %1218 = vst.msk [vmem:[%s2133_s3 + $0x8] sm:$0xf] %vm1215_vm1, %v1345_v30  ;;  %v1346_v34 = vpack.c.bf16 %v1198_v32, %v1198_v32 }
 0x172   :  { %1219 = vst.msk [vmem:[%s2133_s3 + $0xc] sm:$0xf] %vm1215_vm1, %v1346_v34 }

// kernel: fwd.5
= control target key start
LH: loop header
LB: loop body
LE: loop exit
PB: predicated region body
PF: predicated region fallthrough
CT: control target
= control target key end

     0   :  { %s14260_s1 = inlined_call_operand.vmem [shape: bf16[1024,2048], index: 1, kind: input, shape index: {}]   ;;  %s14261_s0 = inlined_call_operand.vmem [shape: bf16[8,1024], index: 0, kind: input, shape index: {}]   ;;  %s14262_s3 = inlined_call_operand.vmem [shape: bf16[2048,128], index: 3, kind: input, shape index: {}]   ;;  %s14263_s2 = inlined_call_operand.vmem [shape: f32[1,2048], index: 2, kind: input, shape index: {}]   ;;  %s14264_s4 = inlined_call_operand.vmem [shape: f32[1,128], index: 4, kind: input, shape index: {}]   ;;  %s14265_s5 = inlined_call_operand.vmem [shape: f32[8,128], index: 5, kind: output, shape index: {}]  }
   0x1   :  { %v25_v0 = vld [vmem:[%s14260_s1] sm:$0xff]  ;;  %v26_v2 = vld [vmem:[%s14260_s1 + $0x8] sm:$0xff] }
   0x2   :  { %v33_v1 = vld [vmem:[%s14260_s1 + $0x40] sm:$0xff]  ;;  %v34_v4 = vld [vmem:[%s14260_s1 + $0x48] sm:$0xff] }
   0x3   :  { %v8974_v3 = vcombine.high %v25_v0, %v33_v1  ;;  %v8973_v5 = vcombine.low %v25_v0, %v33_v1  ;;  %v41_v6 = vld [vmem:[%s14260_s1 + $0x80] sm:$0xff]  ;;  %v8976_v8 = vcombine.high %v26_v2, %v34_v4  ;;  %v8975_v9 = vcombine.low %v26_v2, %v34_v4  ;;  %v42_v11 = vld [vmem:[%s14260_s1 + $0x88] sm:$0xff] }
   0x4   :  { %v49_v7 = vld [vmem:[%s14260_s1 + $0xc0] sm:$0xff]  ;;  %v50_v12 = vld [vmem:[%s14260_s1 + $0xc8] sm:$0xff] }
   0x5   :  { %v8990_v10 = vcombine.high %v41_v6, %v49_v7  ;;  %v57_v13 = vld [vmem:[%s14260_s1 + $0x100] sm:$0xff]  ;;  %6281 = vmatprep.subr.bf16.mxu0 %v8974_v3  ;;  %v8992_v14 = vcombine.high %v42_v11, %v50_v12  ;;  %v58_v16 = vld [vmem:[%s14260_s1 + $0x108] sm:$0xff]  ;;  %6445 = vmatprep.subr.bf16.mxu1 %v8976_v8  ;;  %v8989_v18 = vcombine.low %v41_v6, %v49_v7 }
   0x6   :  { %v65_v15 = vld [vmem:[%s14260_s1 + $0x140] sm:$0xff]  ;;  %v66_v17 = vld [vmem:[%s14260_s1 + $0x148] sm:$0xff]  ;;  %6282 = vmatpush1.bf16.msra.mxu0 %v8973_v5  ;;  %6446 = vmatpush1.bf16.msra.mxu1 %v8975_v9  ;;  %v8991_v19 = vcombine.low %v42_v11, %v50_v12 }
   0x7   :  { %6283 = vmatprep.subr.bf16.mxu0 %v8990_v10  ;;  %v9006_v20 = vcombine.high %v57_v13, %v65_v15  ;;  %6447 = vmatprep.subr.bf16.mxu1 %v8992_v14  ;;  %v9008_v21 = vcombine.high %v58_v16, %v66_v17  ;;  %v73_v22 = vld [vmem:[%s14260_s1 + $0x180] sm:$0xff]  ;;  %v74_v24 = vld [vmem:[%s14260_s1 + $0x188] sm:$0xff]  ;;  %v9005_v26 = vcombine.low %v57_v13, %v65_v15 }
   0x8   :  { %v81_v23 = vld [vmem:[%s14260_s1 + $0x1c0] sm:$0xff]  ;;  %v82_v25 = vld [vmem:[%s14260_s1 + $0x1c8] sm:$0xff]  ;;  %v9007_v27 = vcombine.low %v58_v16, %v66_v17 }
   0x9   :  { %v9022_v28 = vcombine.high %v73_v22, %v81_v23  ;;  %v9024_v29 = vcombine.high %v74_v24, %v82_v25  ;;  %v89_v30 = vld [vmem:[%s14260_s1 + $0x200] sm:$0xff]  ;;  %v90_v32 = vld [vmem:[%s14260_s1 + $0x208] sm:$0xff]  ;;  %v9021_v34 = vcombine.low %v73_v22, %v81_v23  ;;  %v9023_v35 = vcombine.low %v74_v24, %v82_v25 }
   0xa   :  { %6284 = vmatpush1.bf16.msra.mxu0 %v8989_v18  ;;  %6448 = vmatpush1.bf16.msra.mxu1 %v8991_v19  ;;  %v97_v31 = vld [vmem:[%s14260_s1 + $0x240] sm:$0xff]  ;;  %v98_v33 = vld [vmem:[%s14260_s1 + $0x248] sm:$0xff] }
   0xb   :  { %6285 = vmatprep.subr.bf16.mxu0 %v9006_v20  ;;  %6449 = vmatprep.subr.bf16.mxu1 %v9008_v21  ;;  %v9038_v36 = vcombine.high %v89_v30, %v97_v31  ;;  %v9040_v37 = vcombine.high %v90_v32, %v98_v33  ;;  %v105_v38 = vld [vmem:[%s14260_s1 + $0x280] sm:$0xff]  ;;  %v106_v40 = vld [vmem:[%s14260_s1 + $0x288] sm:$0xff]  ;;  %v9037_v42 = vcombine.low %v89_v30, %v97_v31 }
   0xc   :  { %v113_v39 = vld [vmem:[%s14260_s1 + $0x2c0] sm:$0xff]  ;;  %v114_v41 = vld [vmem:[%s14260_s1 + $0x2c8] sm:$0xff]  ;;  %v9039_v43 = vcombine.low %v90_v32, %v98_v33 }
   0xd   :  { %v9054_v44 = vcombine.high %v105_v38, %v113_v39  ;;  %v9056_v45 = vcombine.high %v106_v40, %v114_v41  ;;  %v121_v46 = vld [vmem:[%s14260_s1 + $0x300] sm:$0xff]  ;;  %v122_v48 = vld [vmem:[%s14260_s1 + $0x308] sm:$0xff]  ;;  %v9053_v50 = vcombine.low %v105_v38, %v113_v39  ;;  %v9055_v51 = vcombine.low %v106_v40, %v114_v41 }
   0xe   :  { %6286 = vmatpush1.bf16.msra.mxu0 %v9005_v26  ;;  %6450 = vmatpush1.bf16.msra.mxu1 %v9007_v27  ;;  %v129_v47 = vld [vmem:[%s14260_s1 + $0x340] sm:$0xff]  ;;  %v130_v49 = vld [vmem:[%s14260_s1 + $0x348] sm:$0xff] }
   0xf   :  { %6287 = vmatprep.subr.bf16.mxu0 %v9022_v28  ;;  %6451 = vmatprep.subr.bf16.mxu1 %v9024_v29  ;;  %v9070_v52 = vcombine.high %v121_v46, %v129_v47  ;;  %v10668_v53 = vld [vmem:[%s14261_s0] sm:$0xff]  ;;  %v9072_v54 = vcombine.high %v122_v48, %v130_v49  ;;  %v138_v58 = vld [vmem:[%s14260_s1 + $0x388] sm:$0xff]  ;;  %v9069_v60 = vcombine.low %v121_v46, %v129_v47 }
  0x10   :  { %v137_v55 = vld [vmem:[%s14260_s1 + $0x380] sm:$0xff]  ;;  %v10678_v57 = vcombine.high %v10668_v53, %v10668_v53  ;;  %v146_v59 = vld [vmem:[%s14260_s1 + $0x3c8] sm:$0xff]  ;;  %v9071_v61 = vcombine.low %v122_v48, %v130_v49 }
  0x11   :  { %v145_v56 = vld [vmem:[%s14260_s1 + $0x3c0] sm:$0xff]  ;;  %v9088_v63 = vcombine.high %v138_v58, %v146_v59  ;;  %v154_v2 = vld [vmem:[%s14260_s1 + $0x408] sm:$0xff]  ;;  %v9087_v5 = vcombine.low %v138_v58, %v146_v59 }
  0x12   :  { %6288 = vmatpush1.bf16.msra.mxu0 %v9021_v34  ;;  %6452 = vmatpush1.bf16.msra.mxu1 %v9023_v35  ;;  %v9086_v62 = vcombine.high %v137_v55, %v145_v56  ;;  %v153_v0 = vld [vmem:[%s14260_s1 + $0x400] sm:$0xff]  ;;  %v162_v3 = vld [vmem:[%s14260_s1 + $0x448] sm:$0xff]  ;;  %v9085_v4 = vcombine.low %v137_v55, %v145_v56 }
  0x13   :  { %6289 = vmatprep.subr.bf16.mxu0 %v9038_v36  ;;  %6453 = vmatprep.subr.bf16.mxu1 %v9040_v37  ;;  %v161_v1 = vld [vmem:[%s14260_s1 + $0x440] sm:$0xff]  ;;  %v9104_v7 = vcombine.high %v154_v2, %v162_v3  ;;  %v170_v10 = vld [vmem:[%s14260_s1 + $0x488] sm:$0xff]  ;;  %v9103_v13 = vcombine.low %v154_v2, %v162_v3 }
  0x14   :  { %6313 = vmatprep.mubr.bf16.mxu0 %v10678_v57  ;;  %6477 = vmatprep.mubr.bf16.mxu1 %v10678_v57  ;;  %v9102_v6 = vcombine.high %v153_v0, %v161_v1  ;;  %v169_v8 = vld [vmem:[%s14260_s1 + $0x480] sm:$0xff]  ;;  %v178_v11 = vld [vmem:[%s14260_s1 + $0x4c8] sm:$0xff]  ;;  %v9101_v12 = vcombine.low %v153_v0, %v161_v1 }
  0x15   :  { %v177_v9 = vld [vmem:[%s14260_s1 + $0x4c0] sm:$0xff]  ;;  %v9120_v15 = vcombine.high %v170_v10, %v178_v11  ;;  %v186_v18 = vld [vmem:[%s14260_s1 + $0x508] sm:$0xff]  ;;  %v9119_v21 = vcombine.low %v170_v10, %v178_v11 }
  0x16   :  { %6290 = vmatpush1.bf16.msra.mxu0 %v9037_v42  ;;  %6454 = vmatpush1.bf16.msra.mxu1 %v9039_v43  ;;  %v9118_v14 = vcombine.high %v169_v8, %v177_v9  ;;  %v185_v16 = vld [vmem:[%s14260_s1 + $0x500] sm:$0xff]  ;;  %v194_v19 = vld [vmem:[%s14260_s1 + $0x548] sm:$0xff]  ;;  %v9117_v20 = vcombine.low %v169_v8, %v177_v9 }
  0x17   :  { %6291 = vmatprep.subr.bf16.mxu0 %v9054_v44  ;;  %6455 = vmatprep.subr.bf16.mxu1 %v9056_v45  ;;  %v193_v17 = vld [vmem:[%s14260_s1 + $0x540] sm:$0xff]  ;;  %v9136_v23 = vcombine.high %v186_v18, %v194_v19  ;;  %v202_v26 = vld [vmem:[%s14260_s1 + $0x588] sm:$0xff]  ;;  %v9135_v29 = vcombine.low %v186_v18, %v194_v19 }
  0x18   :  { %v9134_v22 = vcombine.high %v185_v16, %v193_v17  ;;  %v201_v24 = vld [vmem:[%s14260_s1 + $0x580] sm:$0xff]  ;;  %v210_v27 = vld [vmem:[%s14260_s1 + $0x5c8] sm:$0xff]  ;;  %v9133_v28 = vcombine.low %v185_v16, %v193_v17 }
  0x19   :  { %v209_v25 = vld [vmem:[%s14260_s1 + $0x5c0] sm:$0xff]  ;;  %v9152_v31 = vcombine.high %v202_v26, %v210_v27  ;;  %v218_v34 = vld [vmem:[%s14260_s1 + $0x608] sm:$0xff]  ;;  %v9151_v37 = vcombine.low %v202_v26, %v210_v27 }
  0x1a   :  { %6292 = vmatpush1.bf16.msra.mxu0 %v9053_v50  ;;  %6456 = vmatpush1.bf16.msra.mxu1 %v9055_v51  ;;  %v9150_v30 = vcombine.high %v201_v24, %v209_v25  ;;  %v217_v32 = vld [vmem:[%s14260_s1 + $0x600] sm:$0xff]  ;;  %v226_v35 = vld [vmem:[%s14260_s1 + $0x648] sm:$0xff]  ;;  %v9149_v36 = vcombine.low %v201_v24, %v209_v25 }
  0x1b   :  { %6293 = vmatprep.subr.bf16.mxu0 %v9070_v52  ;;  %6457 = vmatprep.subr.bf16.mxu1 %v9072_v54  ;;  %v225_v33 = vld [vmem:[%s14260_s1 + $0x640] sm:$0xff]  ;;  %v9168_v39 = vcombine.high %v218_v34, %v226_v35  ;;  %v234_v42 = vld [vmem:[%s14260_s1 + $0x688] sm:$0xff]  ;;  %v9167_v45 = vcombine.low %v218_v34, %v226_v35 }
  0x1c   :  { %v9166_v38 = vcombine.high %v217_v32, %v225_v33  ;;  %v233_v40 = vld [vmem:[%s14260_s1 + $0x680] sm:$0xff]  ;;  %v242_v43 = vld [vmem:[%s14260_s1 + $0x6c8] sm:$0xff]  ;;  %v9165_v44 = vcombine.low %v217_v32, %v225_v33 }
  0x1d   :  { %v241_v41 = vld [vmem:[%s14260_s1 + $0x6c0] sm:$0xff]  ;;  %v9184_v47 = vcombine.high %v234_v42, %v242_v43  ;;  %v250_v50 = vld [vmem:[%s14260_s1 + $0x708] sm:$0xff]  ;;  %v9183_v54 = vcombine.low %v234_v42, %v242_v43 }
  0x1e   :  { %6294 = vmatpush1.bf16.msra.mxu0 %v9069_v60  ;;  %6458 = vmatpush1.bf16.msra.mxu1 %v9071_v61  ;;  %v9182_v46 = vcombine.high %v233_v40, %v241_v41  ;;  %v249_v48 = vld [vmem:[%s14260_s1 + $0x700] sm:$0xff]  ;;  %v258_v51 = vld [vmem:[%s14260_s1 + $0x748] sm:$0xff]  ;;  %v9181_v52 = vcombine.low %v233_v40, %v241_v41 }
  0x1f   :  { %6295 = vmatprep.subr.bf16.mxu0 %v9086_v62  ;;  %6459 = vmatprep.subr.bf16.mxu1 %v9088_v63  ;;  %v257_v49 = vld [vmem:[%s14260_s1 + $0x740] sm:$0xff]  ;;  %v9200_v56 = vcombine.high %v250_v50, %v258_v51  ;;  %v266_v60 = vld [vmem:[%s14260_s1 + $0x788] sm:$0xff]  ;;  %v9199_v63 = vcombine.low %v250_v50, %v258_v51 }
  0x20   :  { %v9198_v55 = vcombine.high %v249_v48, %v257_v49  ;;  %v265_v58 = vld [vmem:[%s14260_s1 + $0x780] sm:$0xff]  ;;  %v274_v61 = vld [vmem:[%s14260_s1 + $0x7c8] sm:$0xff]  ;;  %v9197_v62 = vcombine.low %v249_v48, %v257_v49 }
  0x21   :  { %v273_v59 = vld [vmem:[%s14260_s1 + $0x7c0] sm:$0xff]  ;;  %v9216_v1 = vcombine.high %v266_v60, %v274_v61 }
  0x22   :  { %6296 = vmatpush1.bf16.msra.mxu0 %v9085_v4  ;;  %6460 = vmatpush1.bf16.msra.mxu1 %v9087_v5  ;;  %v9214_v0 = vcombine.high %v265_v58, %v273_v59  ;;  %v281_v2 = vld [vmem:[%s14260_s1 + $0x800] sm:$0xff]  ;;  %v282_v4 = vld [vmem:[%s14260_s1 + $0x808] sm:$0xff] }
  0x23   :  { %6297 = vmatprep.subr.bf16.mxu0 %v9102_v6  ;;  %6461 = vmatprep.subr.bf16.mxu1 %v9104_v7  ;;  %v289_v3 = vld [vmem:[%s14260_s1 + $0x840] sm:$0xff]  ;;  %v290_v5 = vld [vmem:[%s14260_s1 + $0x848] sm:$0xff]  ;;  %v9213_v6 = vcombine.low %v265_v58, %v273_v59  ;;  %v9215_v7 = vcombine.low %v266_v60, %v274_v61 }
  0x24   :  { %v9230_v8 = vcombine.high %v281_v2, %v289_v3  ;;  %v9232_v9 = vcombine.high %v282_v4, %v290_v5  ;;  %v297_v10 = vld [vmem:[%s14260_s1 + $0x880] sm:$0xff]  ;;  %v9229_v16 = vcombine.low %v281_v2, %v289_v3  ;;  %v9231_v17 = vcombine.low %v282_v4, %v290_v5 }
  0x25   :  { %v305_v11 = vld [vmem:[%s14260_s1 + $0x8c0] sm:$0xff] }
  0x26   :  { %6298 = vmatpush1.bf16.msra.mxu0 %v9101_v12  ;;  %6462 = vmatpush1.bf16.msra.mxu1 %v9103_v13  ;;  %v10804_v12 = vcombine.low %v10668_v53, %v10668_v53  ;;  %v298_v13 = vld [vmem:[%s14260_s1 + $0x888] sm:$0xff]  ;;  %v9246_v53 = vcombine.high %v297_v10, %v305_v11  ;;  %v313_v19 = vld [vmem:[%s14260_s1 + $0x900] sm:$0xff]  ;;  %v9245_v24 = vcombine.low %v297_v10, %v305_v11 }
  0x27   :  { %6299 = vmatprep.subr.bf16.mxu0 %v9118_v14  ;;  %6463 = vmatprep.subr.bf16.mxu1 %v9120_v15  ;;  %v306_v14 = vld [vmem:[%s14260_s1 + $0x8c8] sm:$0xff] }
  0x28   :  { %v10815_v15 = vld [vmem:[%s14261_s0 + $0x8] sm:$0xff]  ;;  %v9248_v18 = vcombine.high %v298_v13, %v306_v14  ;;  %v9247_v25 = vcombine.low %v298_v13, %v306_v14 }
  0x2a   :  { %6300 = vmatpush1.bf16.msra.mxu0 %v9117_v20  ;;  %6464 = vmatpush1.bf16.msra.mxu1 %v9119_v21  ;;  %v321_v20 = vld [vmem:[%s14260_s1 + $0x940] sm:$0xff]  ;;  %v10825_v21 = vcombine.high %v10815_v15, %v10815_v15 }
  0x2b   :  { %6301 = vmatprep.subr.bf16.mxu0 %v9134_v22  ;;  %6465 = vmatprep.subr.bf16.mxu1 %v9136_v23  ;;  %v314_v22 = vld [vmem:[%s14260_s1 + $0x908] sm:$0xff]  ;;  %v9262_v26 = vcombine.high %v313_v19, %v321_v20  ;;  %v9261_v32 = vcombine.low %v313_v19, %v321_v20 }
  0x2c   :  { %v322_v23 = vld [vmem:[%s14260_s1 + $0x948] sm:$0xff] }
  0x2d   :  { %v9264_v27 = vcombine.high %v314_v22, %v322_v23  ;;  %v9263_v33 = vcombine.low %v314_v22, %v322_v23 }
  0x2e   :  { %6302 = vmatpush1.bf16.msra.mxu0 %v9133_v28  ;;  %6466 = vmatpush1.bf16.msra.mxu1 %v9135_v29  ;;  %v329_v28 = vld [vmem:[%s14260_s1 + $0x980] sm:$0xff] }
  0x2f   :  { %6303 = vmatprep.subr.bf16.mxu0 %v9150_v30  ;;  %6467 = vmatprep.subr.bf16.mxu1 %v9152_v31  ;;  %v337_v29 = vld [vmem:[%s14260_s1 + $0x9c0] sm:$0xff]  ;;  %v330_v30 = vld [vmem:[%s14260_s1 + $0x988] sm:$0xff] }
  0x30   :  { %v338_v31 = vld [vmem:[%s14260_s1 + $0x9c8] sm:$0xff]  ;;  %v9278_v34 = vcombine.high %v329_v28, %v337_v29  ;;  %v9277_v40 = vcombine.low %v329_v28, %v337_v29 }
  0x31   :  { %v9280_v35 = vcombine.high %v330_v30, %v338_v31  ;;  %v9279_v41 = vcombine.low %v330_v30, %v338_v31 }
  0x32   :  { %6304 = vmatpush1.bf16.msra.mxu0 %v9149_v36  ;;  %6468 = vmatpush1.bf16.msra.mxu1 %v9151_v37  ;;  %v345_v36 = vld [vmem:[%s14260_s1 + $0xa00] sm:$0xff] }
  0x33   :  { %6305 = vmatprep.subr.bf16.mxu0 %v9166_v38  ;;  %6469 = vmatprep.subr.bf16.mxu1 %v9168_v39  ;;  %v353_v37 = vld [vmem:[%s14260_s1 + $0xa40] sm:$0xff]  ;;  %v346_v38 = vld [vmem:[%s14260_s1 + $0xa08] sm:$0xff] }
  0x34   :  { %v354_v39 = vld [vmem:[%s14260_s1 + $0xa48] sm:$0xff]  ;;  %v9294_v42 = vcombine.high %v345_v36, %v353_v37  ;;  %v9293_v48 = vcombine.low %v345_v36, %v353_v37 }
  0x35   :  { %v9296_v43 = vcombine.high %v346_v38, %v354_v39  ;;  %v9295_v49 = vcombine.low %v346_v38, %v354_v39 }
  0x36   :  { %6306 = vmatpush1.bf16.msra.mxu0 %v9165_v44  ;;  %6470 = vmatpush1.bf16.msra.mxu1 %v9167_v45  ;;  %v361_v44 = vld [vmem:[%s14260_s1 + $0xa80] sm:$0xff] }
  0x37   :  { %6307 = vmatprep.subr.bf16.mxu0 %v9182_v46  ;;  %6471 = vmatprep.subr.bf16.mxu1 %v9184_v47  ;;  %v369_v45 = vld [vmem:[%s14260_s1 + $0xac0] sm:$0xff]  ;;  %v362_v46 = vld [vmem:[%s14260_s1 + $0xa88] sm:$0xff] }
  0x38   :  { %v370_v47 = vld [vmem:[%s14260_s1 + $0xac8] sm:$0xff]  ;;  %v9310_v50 = vcombine.high %v361_v44, %v369_v45  ;;  %v9309_v58 = vcombine.low %v361_v44, %v369_v45 }
  0x39   :  { %v9312_v51 = vcombine.high %v362_v46, %v370_v47  ;;  %v9311_v59 = vcombine.low %v362_v46, %v370_v47 }
  0x3a   :  { %6308 = vmatpush1.bf16.msra.mxu0 %v9181_v52  ;;  %6472 = vmatpush1.bf16.msra.mxu1 %v9183_v54  ;;  %v377_v52 = vld [vmem:[%s14260_s1 + $0xb00] sm:$0xff] }
  0x3b   :  { %6309 = vmatprep.subr.bf16.mxu0 %v9198_v55  ;;  %6473 = vmatprep.subr.bf16.mxu1 %v9200_v56  ;;  %v385_v54 = vld [vmem:[%s14260_s1 + $0xb40] sm:$0xff]  ;;  %v378_v55 = vld [vmem:[%s14260_s1 + $0xb08] sm:$0xff] }
  0x3c   :  { %v386_v56 = vld [vmem:[%s14260_s1 + $0xb48] sm:$0xff]  ;;  %v9326_v60 = vcombine.high %v377_v52, %v385_v54  ;;  %v9325_v2 = vcombine.low %v377_v52, %v385_v54 }
  0x3d   :  { %v9328_v61 = vcombine.high %v378_v55, %v386_v56  ;;  %v9327_v3 = vcombine.low %v378_v55, %v386_v56 }
  0x3e   :  { %6310 = vmatpush1.bf16.msra.mxu0 %v9197_v62  ;;  %6474 = vmatpush1.bf16.msra.mxu1 %v9199_v63  ;;  %v393_v62 = vld [vmem:[%s14260_s1 + $0xb80] sm:$0xff] }
  0x3f   :  { %6311 = vmatprep.subr.bf16.mxu0 %v9214_v0  ;;  %6475 = vmatprep.subr.bf16.mxu1 %v9216_v1  ;;  %v401_v63 = vld [vmem:[%s14260_s1 + $0xbc0] sm:$0xff]  ;;  %v394_v0 = vld [vmem:[%s14260_s1 + $0xb88] sm:$0xff] }
  0x40   :  { %v402_v1 = vld [vmem:[%s14260_s1 + $0xbc8] sm:$0xff]  ;;  %v9342_v4 = vcombine.high %v393_v62, %v401_v63  ;;  %v9341_v10 = vcombine.low %v393_v62, %v401_v63 }
  0x41   :  { %v9344_v5 = vcombine.high %v394_v0, %v402_v1  ;;  %v9343_v11 = vcombine.low %v394_v0, %v402_v1 }
  0x42   :  { %6312 = vmatpush1.bf16.msra.mxu0 %v9213_v6  ;;  %6476 = vmatpush1.bf16.msra.mxu1 %v9215_v7  ;;  %v409_v6 = vld [vmem:[%s14260_s1 + $0xc00] sm:$0xff] }
  0x43   :  { %6322 = vmatprep.subr.bf16.mxu0 %v9230_v8  ;;  %6486 = vmatprep.subr.bf16.mxu1 %v9232_v9  ;;  %v417_v7 = vld [vmem:[%s14260_s1 + $0xc40] sm:$0xff]  ;;  %v410_v8 = vld [vmem:[%s14260_s1 + $0xc08] sm:$0xff] }
  0x44   :  { %v418_v9 = vld [vmem:[%s14260_s1 + $0xc48] sm:$0xff]  ;;  %v9358_v13 = vcombine.high %v409_v6, %v417_v7  ;;  %v9357_v19 = vcombine.low %v409_v6, %v417_v7 }
  0x45   :  { %6314 = vmatmul.mubr.bf16.vlgmr.msra.gmra.mrb[0].mxu0 %v10804_v12  ;;  %6478 = vmatmul.mubr.bf16.vlgmr.msra.gmra.mrb[0].mxu1 %v10804_v12  ;;  %v9360_v14 = vcombine.high %v410_v8, %v418_v9  ;;  %v9359_v20 = vcombine.low %v410_v8, %v418_v9 }
  0x46   :  { %6323 = vmatpush1.bf16.msra.mxu0 %v9229_v16  ;;  %6487 = vmatpush1.bf16.msra.mxu1 %v9231_v17  ;;  %v425_v16 = vld [vmem:[%s14260_s1 + $0xc80] sm:$0xff] }
  0x47   :  { %6324 = vmatprep.subr.bf16.mxu0 %v9246_v53  ;;  %6488 = vmatprep.subr.bf16.mxu1 %v9248_v18  ;;  %v433_v17 = vld [vmem:[%s14260_s1 + $0xcc0] sm:$0xff]  ;;  %v426_v53 = vld [vmem:[%s14260_s1 + $0xc88] sm:$0xff] }
  0x48   :  { %6354 = vmatprep.mubr.bf16.mxu0 %v10825_v21  ;;  %6518 = vmatprep.mubr.bf16.mxu1 %v10825_v21  ;;  %v434_v18 = vld [vmem:[%s14260_s1 + $0xcc8] sm:$0xff]  ;;  %v9374_v22 = vcombine.high %v425_v16, %v433_v17  ;;  %v9373_v28 = vcombine.low %v425_v16, %v433_v17 }
  0x49   :  { %v9376_v23 = vcombine.high %v426_v53, %v434_v18  ;;  %v9375_v29 = vcombine.low %v426_v53, %v434_v18 }
  0x4a   :  { %6325 = vmatpush1.bf16.msra.mxu0 %v9245_v24  ;;  %6489 = vmatpush1.bf16.msra.mxu1 %v9247_v25  ;;  %v441_v24 = vld [vmem:[%s14260_s1 + $0xd00] sm:$0xff] }
  0x4b   :  { %6326 = vmatprep.subr.bf16.mxu0 %v9262_v26  ;;  %6490 = vmatprep.subr.bf16.mxu1 %v9264_v27  ;;  %v449_v25 = vld [vmem:[%s14260_s1 + $0xd40] sm:$0xff]  ;;  %v442_v26 = vld [vmem:[%s14260_s1 + $0xd08] sm:$0xff] }
  0x4c   :  { %v450_v27 = vld [vmem:[%s14260_s1 + $0xd48] sm:$0xff]  ;;  %v9390_v30 = vcombine.high %v441_v24, %v449_v25  ;;  %v9389_v36 = vcombine.low %v441_v24, %v449_v25  ;;  %v11024_v25 = vld [vmem:[%s14261_s0 + $0x10] sm:$0xff] }
  0x4d   :  { %v9392_v31 = vcombine.high %v442_v26, %v450_v27  ;;  %v9391_v37 = vcombine.low %v442_v26, %v450_v27  ;;  %v562_v24 = vld [vmem:[%s14260_s1 + $0x10c8] sm:$0xff] }
  0x4e   :  { %6327 = vmatpush1.bf16.msra.mxu0 %v9261_v32  ;;  %6491 = vmatpush1.bf16.msra.mxu1 %v9263_v33  ;;  %v457_v32 = vld [vmem:[%s14260_s1 + $0xd80] sm:$0xff] }
  0x4f   :  { %6328 = vmatprep.subr.bf16.mxu0 %v9278_v34  ;;  %6492 = vmatprep.subr.bf16.mxu1 %v9280_v35  ;;  %v465_v33 = vld [vmem:[%s14260_s1 + $0xdc0] sm:$0xff]  ;;  %v458_v34 = vld [vmem:[%s14260_s1 + $0xd88] sm:$0xff] }
  0x50   :  { %v466_v35 = vld [vmem:[%s14260_s1 + $0xdc8] sm:$0xff]  ;;  %v9406_v38 = vcombine.high %v457_v32, %v465_v33  ;;  %v9405_v44 = vcombine.low %v457_v32, %v465_v33 }
  0x51   :  { %v9408_v39 = vcombine.high %v458_v34, %v466_v35  ;;  %v9407_v45 = vcombine.low %v458_v34, %v466_v35  ;;  %v570_v32 = vld [vmem:[%s14260_s1 + $0x1108] sm:$0xff] }
  0x52   :  { %6329 = vmatpush1.bf16.msra.mxu0 %v9277_v40  ;;  %6493 = vmatpush1.bf16.msra.mxu1 %v9279_v41  ;;  %v473_v40 = vld [vmem:[%s14260_s1 + $0xe00] sm:$0xff]  ;;  %v578_v33 = vld [vmem:[%s14260_s1 + $0x1148] sm:$0xff] }
  0x53   :  { %6330 = vmatprep.subr.bf16.mxu0 %v9294_v42  ;;  %6494 = vmatprep.subr.bf16.mxu1 %v9296_v43  ;;  %v481_v41 = vld [vmem:[%s14260_s1 + $0xe40] sm:$0xff]  ;;  %v474_v42 = vld [vmem:[%s14260_s1 + $0xe08] sm:$0xff] }
  0x54   :  { %v482_v43 = vld [vmem:[%s14260_s1 + $0xe48] sm:$0xff]  ;;  %v9422_v46 = vcombine.high %v473_v40, %v481_v41  ;;  %v9421_v52 = vcombine.low %v473_v40, %v481_v41 }
  0x55   :  { %v9424_v47 = vcombine.high %v474_v42, %v482_v43  ;;  %v9423_v54 = vcombine.low %v474_v42, %v482_v43  ;;  %v586_v40 = vld [vmem:[%s14260_s1 + $0x1188] sm:$0xff]  ;;  %v9519_v43 = vcombine.low %v570_v32, %v578_v33 }
  0x56   :  { %6331 = vmatpush1.bf16.msra.mxu0 %v9293_v48  ;;  %6495 = vmatpush1.bf16.msra.mxu1 %v9295_v49  ;;  %v489_v48 = vld [vmem:[%s14260_s1 + $0xe80] sm:$0xff]  ;;  %v594_v41 = vld [vmem:[%s14260_s1 + $0x11c8] sm:$0xff] }
  0x57   :  { %6332 = vmatprep.subr.bf16.mxu0 %v9310_v50  ;;  %6496 = vmatprep.subr.bf16.mxu1 %v9312_v51  ;;  %v497_v49 = vld [vmem:[%s14260_s1 + $0xec0] sm:$0xff]  ;;  %v490_v50 = vld [vmem:[%s14260_s1 + $0xe88] sm:$0xff] }
  0x58   :  { %v498_v51 = vld [vmem:[%s14260_s1 + $0xec8] sm:$0xff]  ;;  %v9438_v55 = vcombine.high %v489_v48, %v497_v49  ;;  %v9437_v62 = vcombine.low %v489_v48, %v497_v49 }
  0x59   :  { %v9440_v56 = vcombine.high %v490_v50, %v498_v51  ;;  %v9439_v63 = vcombine.low %v490_v50, %v498_v51  ;;  %v602_v48 = vld [vmem:[%s14260_s1 + $0x1208] sm:$0xff]  ;;  %v9535_v51 = vcombine.low %v586_v40, %v594_v41 }
  0x5a   :  { %6333 = vmatpush1.bf16.msra.mxu0 %v9309_v58  ;;  %6497 = vmatpush1.bf16.msra.mxu1 %v9311_v59  ;;  %v505_v58 = vld [vmem:[%s14260_s1 + $0xf00] sm:$0xff]  ;;  %v610_v49 = vld [vmem:[%s14260_s1 + $0x1248] sm:$0xff] }
  0x5b   :  { %6334 = vmatprep.subr.bf16.mxu0 %v9326_v60  ;;  %6498 = vmatprep.subr.bf16.mxu1 %v9328_v61  ;;  %v513_v59 = vld [vmem:[%s14260_s1 + $0xf40] sm:$0xff]  ;;  %v506_v60 = vld [vmem:[%s14260_s1 + $0xf08] sm:$0xff] }
  0x5c   :  { %v514_v61 = vld [vmem:[%s14260_s1 + $0xf48] sm:$0xff]  ;;  %v9454_v0 = vcombine.high %v505_v58, %v513_v59  ;;  %v9453_v6 = vcombine.low %v505_v58, %v513_v59 }
  0x5d   :  { %v9456_v1 = vcombine.high %v506_v60, %v514_v61  ;;  %v9455_v7 = vcombine.low %v506_v60, %v514_v61  ;;  %v618_v58 = vld [vmem:[%s14260_s1 + $0x1288] sm:$0xff]  ;;  %v9551_v61 = vcombine.low %v602_v48, %v610_v49 }
  0x5e   :  { %6335 = vmatpush1.bf16.msra.mxu0 %v9325_v2  ;;  %6499 = vmatpush1.bf16.msra.mxu1 %v9327_v3  ;;  %v521_v2 = vld [vmem:[%s14260_s1 + $0xf80] sm:$0xff]  ;;  %v626_v59 = vld [vmem:[%s14260_s1 + $0x12c8] sm:$0xff] }
  0x5f   :  { %6336 = vmatprep.subr.bf16.mxu0 %v9342_v4  ;;  %6500 = vmatprep.subr.bf16.mxu1 %v9344_v5  ;;  %v529_v3 = vld [vmem:[%s14260_s1 + $0xfc0] sm:$0xff]  ;;  %v522_v4 = vld [vmem:[%s14260_s1 + $0xf88] sm:$0xff] }
  0x60   :  { %v530_v5 = vld [vmem:[%s14260_s1 + $0xfc8] sm:$0xff]  ;;  %v9470_v8 = vcombine.high %v521_v2, %v529_v3  ;;  %v9469_v16 = vcombine.low %v521_v2, %v529_v3 }
  0x61   :  { %v9472_v9 = vcombine.high %v522_v4, %v530_v5  ;;  %v9471_v17 = vcombine.low %v522_v4, %v530_v5  ;;  %v634_v2 = vld [vmem:[%s14260_s1 + $0x1308] sm:$0xff]  ;;  %v9567_v5 = vcombine.low %v618_v58, %v626_v59 }
  0x62   :  { %6337 = vmatpush1.bf16.msra.mxu0 %v9341_v10  ;;  %6501 = vmatpush1.bf16.msra.mxu1 %v9343_v11  ;;  %v537_v10 = vld [vmem:[%s14260_s1 + $0x1000] sm:$0xff]  ;;  %v642_v3 = vld [vmem:[%s14260_s1 + $0x1348] sm:$0xff] }
  0x63   :  { %6338 = vmatprep.subr.bf16.mxu0 %v9358_v13  ;;  %6502 = vmatprep.subr.bf16.mxu1 %v9360_v14  ;;  %v545_v11 = vld [vmem:[%s14260_s1 + $0x1040] sm:$0xff]  ;;  %v538_v13 = vld [vmem:[%s14260_s1 + $0x1008] sm:$0xff] }
  0x64   :  { %v546_v14 = vld [vmem:[%s14260_s1 + $0x1048] sm:$0xff]  ;;  %v9486_v53 = vcombine.high %v537_v10, %v545_v11  ;;  %v9485_v26 = vcombine.low %v537_v10, %v545_v11 }
  0x65   :  { %v9488_v18 = vcombine.high %v538_v13, %v546_v14  ;;  %v9487_v27 = vcombine.low %v538_v13, %v546_v14  ;;  %v650_v10 = vld [vmem:[%s14260_s1 + $0x1388] sm:$0xff]  ;;  %v9583_v14 = vcombine.low %v634_v2, %v642_v3 }
  0x66   :  { %6339 = vmatpush1.bf16.msra.mxu0 %v9357_v19  ;;  %6503 = vmatpush1.bf16.msra.mxu1 %v9359_v20  ;;  %v553_v19 = vld [vmem:[%s14260_s1 + $0x1080] sm:$0xff]  ;;  %v658_v11 = vld [vmem:[%s14260_s1 + $0x13c8] sm:$0xff] }
  0x67   :  { %6340 = vmatprep.subr.bf16.mxu0 %v9374_v22  ;;  %6504 = vmatprep.subr.bf16.mxu1 %v9376_v23  ;;  %v561_v20 = vld [vmem:[%s14260_s1 + $0x10c0] sm:$0xff]  ;;  %v11013_v22 = vcombine.low %v10815_v15, %v10815_v15  ;;  %v554_v23 = vld [vmem:[%s14260_s1 + $0x1088] sm:$0xff] }
  0x68   :  { %v9502_v15 = vcombine.high %v553_v19, %v561_v20  ;;  %v9501_v34 = vcombine.low %v553_v19, %v561_v20  ;;  %v9503_v35 = vcombine.low %v554_v23, %v562_v24  ;;  %v666_v19 = vld [vmem:[%s14260_s1 + $0x1408] sm:$0xff] }
  0x69   :  { %v674_v20 = vld [vmem:[%s14260_s1 + $0x1448] sm:$0xff] }
  0x6a   :  { %6341 = vmatpush1.bf16.msra.mxu0 %v9373_v28  ;;  %6505 = vmatpush1.bf16.msra.mxu1 %v9375_v29  ;;  %v9504_v28 = vcombine.high %v554_v23, %v562_v24  ;;  %v569_v29 = vld [vmem:[%s14260_s1 + $0x1100] sm:$0xff]  ;;  %v9599_v24 = vcombine.low %v650_v10, %v658_v11 }
  0x6b   :  { %6342 = vmatprep.subr.bf16.mxu0 %v9390_v30  ;;  %6506 = vmatprep.subr.bf16.mxu1 %v9392_v31  ;;  %v577_v30 = vld [vmem:[%s14260_s1 + $0x1140] sm:$0xff]  ;;  %v11034_v31 = vcombine.high %v11024_v25, %v11024_v25 }
  0x6c   :  { %v9517_v42 = vcombine.low %v569_v29, %v577_v30 }
  0x6e   :  { %6343 = vmatpush1.bf16.msra.mxu0 %v9389_v36  ;;  %6507 = vmatpush1.bf16.msra.mxu1 %v9391_v37  ;;  %v9518_v36 = vcombine.high %v569_v29, %v577_v30  ;;  %v9520_v37 = vcombine.high %v570_v32, %v578_v33  ;;  %v682_v29 = vld [vmem:[%s14260_s1 + $0x1488] sm:$0xff]  ;;  %v9615_v33 = vcombine.low %v666_v19, %v674_v20 }
  0x6f   :  { %6344 = vmatprep.subr.bf16.mxu0 %v9406_v38  ;;  %6508 = vmatprep.subr.bf16.mxu1 %v9408_v39  ;;  %v585_v38 = vld [vmem:[%s14260_s1 + $0x1180] sm:$0xff]  ;;  %v690_v30 = vld [vmem:[%s14260_s1 + $0x14c8] sm:$0xff] }
  0x70   :  { %v593_v39 = vld [vmem:[%s14260_s1 + $0x11c0] sm:$0xff] }
  0x71   :  { %v9533_v50 = vcombine.low %v585_v38, %v593_v39 }
  0x72   :  { %6345 = vmatpush1.bf16.msra.mxu0 %v9405_v44  ;;  %6509 = vmatpush1.bf16.msra.mxu1 %v9407_v45  ;;  %v9534_v44 = vcombine.high %v585_v38, %v593_v39  ;;  %v9536_v45 = vcombine.high %v586_v40, %v594_v41  ;;  %v698_v38 = vld [vmem:[%s14260_s1 + $0x1508] sm:$0xff]  ;;  %v9631_v41 = vcombine.low %v682_v29, %v690_v30 }
  0x73   :  { %6346 = vmatprep.subr.bf16.mxu0 %v9422_v46  ;;  %6510 = vmatprep.subr.bf16.mxu1 %v9424_v47  ;;  %v601_v46 = vld [vmem:[%s14260_s1 + $0x1200] sm:$0xff]  ;;  %v706_v39 = vld [vmem:[%s14260_s1 + $0x1548] sm:$0xff] }
  0x74   :  { %v609_v47 = vld [vmem:[%s14260_s1 + $0x1240] sm:$0xff] }
  0x75   :  { %v9549_v60 = vcombine.low %v601_v46, %v609_v47 }
  0x76   :  { %6347 = vmatpush1.bf16.msra.mxu0 %v9421_v52  ;;  %6511 = vmatpush1.bf16.msra.mxu1 %v9423_v54  ;;  %v9550_v52 = vcombine.high %v601_v46, %v609_v47  ;;  %v9552_v54 = vcombine.high %v602_v48, %v610_v49  ;;  %v714_v46 = vld [vmem:[%s14260_s1 + $0x1588] sm:$0xff]  ;;  %v9647_v49 = vcombine.low %v698_v38, %v706_v39 }
  0x77   :  { %6348 = vmatprep.subr.bf16.mxu0 %v9438_v55  ;;  %6512 = vmatprep.subr.bf16.mxu1 %v9440_v56  ;;  %v617_v55 = vld [vmem:[%s14260_s1 + $0x1280] sm:$0xff]  ;;  %v722_v47 = vld [vmem:[%s14260_s1 + $0x15c8] sm:$0xff] }
  0x78   :  { %v625_v56 = vld [vmem:[%s14260_s1 + $0x12c0] sm:$0xff] }
  0x79   :  { %v9565_v4 = vcombine.low %v617_v55, %v625_v56 }
  0x7a   :  { %6349 = vmatpush1.bf16.msra.mxu0 %v9437_v62  ;;  %6513 = vmatpush1.bf16.msra.mxu1 %v9439_v63  ;;  %v9566_v62 = vcombine.high %v617_v55, %v625_v56  ;;  %v9568_v63 = vcombine.high %v618_v58, %v626_v59  ;;  %v730_v55 = vld [vmem:[%s14260_s1 + $0x1608] sm:$0xff]  ;;  %v9663_v59 = vcombine.low %v714_v46, %v722_v47 }
  0x7b   :  { %6350 = vmatprep.subr.bf16.mxu0 %v9454_v0  ;;  %6514 = vmatprep.subr.bf16.mxu1 %v9456_v1  ;;  %v633_v0 = vld [vmem:[%s14260_s1 + $0x1300] sm:$0xff]  ;;  %v738_v56 = vld [vmem:[%s14260_s1 + $0x1648] sm:$0xff] }
  0x7c   :  { %v641_v1 = vld [vmem:[%s14260_s1 + $0x1340] sm:$0xff] }
  0x7d   :  { %v9581_v13 = vcombine.low %v633_v0, %v641_v1 }
  0x7e   :  { %6351 = vmatpush1.bf16.msra.mxu0 %v9453_v6  ;;  %6515 = vmatpush1.bf16.msra.mxu1 %v9455_v7  ;;  %v9582_v6 = vcombine.high %v633_v0, %v641_v1  ;;  %v9584_v7 = vcombine.high %v634_v2, %v642_v3  ;;  %v746_v0 = vld [vmem:[%s14260_s1 + $0x1688] sm:$0xff]  ;;  %v9679_v3 = vcombine.low %v730_v55, %v738_v56 }
  0x7f   :  { %6352 = vmatprep.subr.bf16.mxu0 %v9470_v8  ;;  %6516 = vmatprep.subr.bf16.mxu1 %v9472_v9  ;;  %v649_v8 = vld [vmem:[%s14260_s1 + $0x1380] sm:$0xff]  ;;  %v754_v1 = vld [vmem:[%s14260_s1 + $0x16c8] sm:$0xff] }
  0x80   :  { %v657_v9 = vld [vmem:[%s14260_s1 + $0x13c0] sm:$0xff] }
  0x81   :  { %v9597_v23 = vcombine.low %v649_v8, %v657_v9 }
  0x82   :  { %6353 = vmatpush1.bf16.msra.mxu0 %v9469_v16  ;;  %6517 = vmatpush1.bf16.msra.mxu1 %v9471_v17  ;;  %v9598_v16 = vcombine.high %v649_v8, %v657_v9  ;;  %v9600_v17 = vcombine.high %v650_v10, %v658_v11  ;;  %v762_v8 = vld [vmem:[%s14260_s1 + $0x1708] sm:$0xff]  ;;  %v9695_v11 = vcombine.low %v746_v0, %v754_v1 }
  0x83   :  { %6363 = vmatprep.subr.bf16.mxu0 %v9486_v53  ;;  %6527 = vmatprep.subr.bf16.mxu1 %v9488_v18  ;;  %v665_v53 = vld [vmem:[%s14260_s1 + $0x1400] sm:$0xff]  ;;  %v770_v9 = vld [vmem:[%s14260_s1 + $0x1748] sm:$0xff] }
  0x84   :  { %v673_v18 = vld [vmem:[%s14260_s1 + $0x1440] sm:$0xff] }
  0x85   :  { %6355 = vmatmul.mubr.bf16.vlgmr.msra.gmra.mrb[0].mxu0 %v11013_v22  ;;  %6519 = vmatmul.mubr.bf16.vlgmr.msra.gmra.mrb[0].mxu1 %v11013_v22  ;;  %v9613_v32 = vcombine.low %v665_v53, %v673_v18 }
  0x86   :  { %6364 = vmatpush1.bf16.msra.mxu0 %v9485_v26  ;;  %6528 = vmatpush1.bf16.msra.mxu1 %v9487_v27  ;;  %v9614_v26 = vcombine.high %v665_v53, %v673_v18  ;;  %v9616_v27 = vcombine.high %v666_v19, %v674_v20  ;;  %v778_v53 = vld [vmem:[%s14260_s1 + $0x1788] sm:$0xff]  ;;  %v9711_v20 = vcombine.low %v762_v8, %v770_v9 }
  0x87   :  { %6365 = vmatprep.subr.bf16.mxu0 %v9502_v15  ;;  %6529 = vmatprep.subr.bf16.mxu1 %v9504_v28  ;;  %v681_v15 = vld [vmem:[%s14260_s1 + $0x1480] sm:$0xff]  ;;  %v786_v18 = vld [vmem:[%s14260_s1 + $0x17c8] sm:$0xff] }
  0x88   :  { %6395 = vmatprep.mubr.bf16.mxu0 %v11034_v31  ;;  %6559 = vmatprep.mubr.bf16.mxu1 %v11034_v31  ;;  %v689_v28 = vld [vmem:[%s14260_s1 + $0x14c0] sm:$0xff] }
  0x89   :  { %v9629_v40 = vcombine.low %v681_v15, %v689_v28 }
  0x8a   :  { %6366 = vmatpush1.bf16.msra.mxu0 %v9501_v34  ;;  %6530 = vmatpush1.bf16.msra.mxu1 %v9503_v35  ;;  %v9630_v34 = vcombine.high %v681_v15, %v689_v28  ;;  %v9632_v35 = vcombine.high %v682_v29, %v690_v30  ;;  %v794_v15 = vld [vmem:[%s14260_s1 + $0x1808] sm:$0xff]  ;;  %v9727_v30 = vcombine.low %v778_v53, %v786_v18 }
  0x8b   :  { %6367 = vmatprep.subr.bf16.mxu0 %v9518_v36  ;;  %6531 = vmatprep.subr.bf16.mxu1 %v9520_v37  ;;  %v697_v36 = vld [vmem:[%s14260_s1 + $0x1500] sm:$0xff]  ;;  %v802_v28 = vld [vmem:[%s14260_s1 + $0x1848] sm:$0xff] }
  0x8c   :  { %v705_v37 = vld [vmem:[%s14260_s1 + $0x1540] sm:$0xff] }
  0x8d   :  { %v9645_v48 = vcombine.low %v697_v36, %v705_v37 }
  0x8e   :  { %6368 = vmatpush1.bf16.msra.mxu0 %v9517_v42  ;;  %6532 = vmatpush1.bf16.msra.mxu1 %v9519_v43  ;;  %v9646_v42 = vcombine.high %v697_v36, %v705_v37  ;;  %v9648_v43 = vcombine.high %v698_v38, %v706_v39  ;;  %v11222_v36 = vcombine.low %v11024_v25, %v11024_v25  ;;  %v810_v37 = vld [vmem:[%s14260_s1 + $0x1888] sm:$0xff]  ;;  %v11233_v39 = vld [vmem:[%s14261_s0 + $0x18] sm:$0xff] }
  0x8f   :  { %6369 = vmatprep.subr.bf16.mxu0 %v9534_v44  ;;  %6533 = vmatprep.subr.bf16.mxu1 %v9536_v45  ;;  %v713_v44 = vld [vmem:[%s14260_s1 + $0x1580] sm:$0xff]  ;;  %v818_v38 = vld [vmem:[%s14260_s1 + $0x18c8] sm:$0xff] }
  0x90   :  { %v721_v45 = vld [vmem:[%s14260_s1 + $0x15c0] sm:$0xff] }
  0x91   :  { %v9661_v58 = vcombine.low %v713_v44, %v721_v45 }
  0x92   :  { %6370 = vmatpush1.bf16.msra.mxu0 %v9533_v50  ;;  %6534 = vmatpush1.bf16.msra.mxu1 %v9535_v51  ;;  %v9662_v50 = vcombine.high %v713_v44, %v721_v45  ;;  %v9664_v51 = vcombine.high %v714_v46, %v722_v47  ;;  %v833_v44 = vld [vmem:[%s14260_s1 + $0x1940] sm:$0xff]  ;;  %v11243_v45 = vcombine.high %v11233_v39, %v11233_v39  ;;  %v826_v46 = vld [vmem:[%s14260_s1 + $0x1908] sm:$0xff] }
  0x93   :  { %6371 = vmatprep.subr.bf16.mxu0 %v9550_v52  ;;  %6535 = vmatprep.subr.bf16.mxu1 %v9552_v54  ;;  %v729_v52 = vld [vmem:[%s14260_s1 + $0x1600] sm:$0xff]  ;;  %v834_v47 = vld [vmem:[%s14260_s1 + $0x1948] sm:$0xff] }
  0x94   :  { %v737_v54 = vld [vmem:[%s14260_s1 + $0x1640] sm:$0xff] }
  0x95   :  { %v9677_v2 = vcombine.low %v729_v52, %v737_v54 }
  0x96   :  { %6372 = vmatpush1.bf16.msra.mxu0 %v9549_v60  ;;  %6536 = vmatpush1.bf16.msra.mxu1 %v9551_v61  ;;  %v9678_v60 = vcombine.high %v729_v52, %v737_v54  ;;  %v9680_v61 = vcombine.high %v730_v55, %v738_v56  ;;  %v841_v52 = vld [vmem:[%s14260_s1 + $0x1980] sm:$0xff]  ;;  %v842_v55 = vld [vmem:[%s14260_s1 + $0x1988] sm:$0xff] }
  0x97   :  { %6373 = vmatprep.subr.bf16.mxu0 %v9566_v62  ;;  %6537 = vmatprep.subr.bf16.mxu1 %v9568_v63  ;;  %v745_v62 = vld [vmem:[%s14260_s1 + $0x1680] sm:$0xff]  ;;  %v850_v56 = vld [vmem:[%s14260_s1 + $0x19c8] sm:$0xff] }
  0x98   :  { %v753_v63 = vld [vmem:[%s14260_s1 + $0x16c0] sm:$0xff] }
  0x99   :  { %v9693_v10 = vcombine.low %v745_v62, %v753_v63  ;;  %v849_v54 = vld [vmem:[%s14260_s1 + $0x19c0] sm:$0xff] }
  0x9a   :  { %6374 = vmatpush1.bf16.msra.mxu0 %v9565_v4  ;;  %6538 = vmatpush1.bf16.msra.mxu1 %v9567_v5  ;;  %v9694_v4 = vcombine.high %v745_v62, %v753_v63  ;;  %v9696_v5 = vcombine.high %v746_v0, %v754_v1  ;;  %v857_v62 = vld [vmem:[%s14260_s1 + $0x1a00] sm:$0xff]  ;;  %v858_v0 = vld [vmem:[%s14260_s1 + $0x1a08] sm:$0xff] }
  0x9b   :  { %6375 = vmatprep.subr.bf16.mxu0 %v9582_v6  ;;  %6539 = vmatprep.subr.bf16.mxu1 %v9584_v7  ;;  %v761_v6 = vld [vmem:[%s14260_s1 + $0x1700] sm:$0xff]  ;;  %v866_v1 = vld [vmem:[%s14260_s1 + $0x1a48] sm:$0xff] }
  0x9c   :  { %v769_v7 = vld [vmem:[%s14260_s1 + $0x1740] sm:$0xff] }
  0x9d   :  { %v9709_v19 = vcombine.low %v761_v6, %v769_v7  ;;  %v865_v63 = vld [vmem:[%s14260_s1 + $0x1a40] sm:$0xff] }
  0x9e   :  { %6376 = vmatpush1.bf16.msra.mxu0 %v9581_v13  ;;  %6540 = vmatpush1.bf16.msra.mxu1 %v9583_v14  ;;  %v9710_v13 = vcombine.high %v761_v6, %v769_v7  ;;  %v9712_v14 = vcombine.high %v762_v8, %v770_v9  ;;  %v873_v6 = vld [vmem:[%s14260_s1 + $0x1a80] sm:$0xff]  ;;  %v874_v8 = vld [vmem:[%s14260_s1 + $0x1a88] sm:$0xff] }
  0x9f   :  { %6377 = vmatprep.subr.bf16.mxu0 %v9598_v16  ;;  %6541 = vmatprep.subr.bf16.mxu1 %v9600_v17  ;;  %v777_v16 = vld [vmem:[%s14260_s1 + $0x1780] sm:$0xff]  ;;  %v882_v9 = vld [vmem:[%s14260_s1 + $0x1ac8] sm:$0xff] }
  0xa0   :  { %v785_v17 = vld [vmem:[%s14260_s1 + $0x17c0] sm:$0xff] }
  0xa1   :  { %v9725_v29 = vcombine.low %v777_v16, %v785_v17  ;;  %v881_v7 = vld [vmem:[%s14260_s1 + $0x1ac0] sm:$0xff] }
  0xa2   :  { %6378 = vmatpush1.bf16.msra.mxu0 %v9597_v23  ;;  %6542 = vmatpush1.bf16.msra.mxu1 %v9599_v24  ;;  %v9726_v23 = vcombine.high %v777_v16, %v785_v17  ;;  %v9728_v24 = vcombine.high %v778_v53, %v786_v18  ;;  %v889_v16 = vld [vmem:[%s14260_s1 + $0x1b00] sm:$0xff]  ;;  %v890_v53 = vld [vmem:[%s14260_s1 + $0x1b08] sm:$0xff] }
  0xa3   :  { %6379 = vmatprep.subr.bf16.mxu0 %v9614_v26  ;;  %6543 = vmatprep.subr.bf16.mxu1 %v9616_v27  ;;  %v793_v26 = vld [vmem:[%s14260_s1 + $0x1800] sm:$0xff]  ;;  %v898_v18 = vld [vmem:[%s14260_s1 + $0x1b48] sm:$0xff] }
  0xa4   :  { %v801_v27 = vld [vmem:[%s14260_s1 + $0x1840] sm:$0xff] }
  0xa5   :  { %v897_v17 = vld [vmem:[%s14260_s1 + $0x1b40] sm:$0xff] }
  0xa6   :  { %6380 = vmatpush1.bf16.msra.mxu0 %v9613_v32  ;;  %6544 = vmatpush1.bf16.msra.mxu1 %v9615_v33  ;;  %v9742_v32 = vcombine.high %v793_v26, %v801_v27  ;;  %v9744_v33 = vcombine.high %v794_v15, %v802_v28 }
  0xa7   :  { %6381 = vmatprep.subr.bf16.mxu0 %v9630_v34  ;;  %6545 = vmatprep.subr.bf16.mxu1 %v9632_v35  ;;  %v809_v34 = vld [vmem:[%s14260_s1 + $0x1880] sm:$0xff] }
  0xa8   :  { %v817_v35 = vld [vmem:[%s14260_s1 + $0x18c0] sm:$0xff] }
  0xa9   :  { %v9758_v25 = vcombine.high %v809_v34, %v817_v35 }
  0xaa   :  { %6382 = vmatpush1.bf16.msra.mxu0 %v9629_v40  ;;  %6546 = vmatpush1.bf16.msra.mxu1 %v9631_v41  ;;  %v9741_v40 = vcombine.low %v793_v26, %v801_v27  ;;  %v9743_v41 = vcombine.low %v794_v15, %v802_v28  ;;  %v905_v26 = vld [vmem:[%s14260_s1 + $0x1b80] sm:$0xff]  ;;  %v906_v15 = vld [vmem:[%s14260_s1 + $0x1b88] sm:$0xff] }
  0xab   :  { %6383 = vmatprep.subr.bf16.mxu0 %v9646_v42  ;;  %6547 = vmatprep.subr.bf16.mxu1 %v9648_v43  ;;  %v9760_v42 = vcombine.high %v810_v37, %v818_v38  ;;  %v825_v43 = vld [vmem:[%s14260_s1 + $0x1900] sm:$0xff]  ;;  %v914_v28 = vld [vmem:[%s14260_s1 + $0x1bc8] sm:$0xff] }
  0xac   :  { %v913_v27 = vld [vmem:[%s14260_s1 + $0x1bc0] sm:$0xff] }
  0xae   :  { %6384 = vmatpush1.bf16.msra.mxu0 %v9645_v48  ;;  %6548 = vmatpush1.bf16.msra.mxu1 %v9647_v49  ;;  %v9757_v48 = vcombine.low %v809_v34, %v817_v35  ;;  %v9759_v49 = vcombine.low %v810_v37, %v818_v38  ;;  %v921_v34 = vld [vmem:[%s14260_s1 + $0x1c00] sm:$0xff]  ;;  %v922_v37 = vld [vmem:[%s14260_s1 + $0x1c08] sm:$0xff] }
  0xaf   :  { %6385 = vmatprep.subr.bf16.mxu0 %v9662_v50  ;;  %6549 = vmatprep.subr.bf16.mxu1 %v9664_v51  ;;  %v9774_v50 = vcombine.high %v825_v43, %v833_v44  ;;  %v9776_v51 = vcombine.high %v826_v46, %v834_v47  ;;  %v929_v35 = vld [vmem:[%s14260_s1 + $0x1c40] sm:$0xff]  ;;  %v930_v38 = vld [vmem:[%s14260_s1 + $0x1c48] sm:$0xff] }
  0xb2   :  { %6386 = vmatpush1.bf16.msra.mxu0 %v9661_v58  ;;  %6550 = vmatpush1.bf16.msra.mxu1 %v9663_v59  ;;  %v9773_v58 = vcombine.low %v825_v43, %v833_v44  ;;  %v9775_v59 = vcombine.low %v826_v46, %v834_v47  ;;  %v937_v43 = vld [vmem:[%s14260_s1 + $0x1c80] sm:$0xff]  ;;  %v938_v46 = vld [vmem:[%s14260_s1 + $0x1c88] sm:$0xff] }
  0xb3   :  { %6387 = vmatprep.subr.bf16.mxu0 %v9678_v60  ;;  %6551 = vmatprep.subr.bf16.mxu1 %v9680_v61  ;;  %v9790_v60 = vcombine.high %v841_v52, %v849_v54  ;;  %v9792_v61 = vcombine.high %v842_v55, %v850_v56  ;;  %v945_v44 = vld [vmem:[%s14260_s1 + $0x1cc0] sm:$0xff]  ;;  %v946_v47 = vld [vmem:[%s14260_s1 + $0x1cc8] sm:$0xff] }
  0xb6   :  { %6388 = vmatpush1.bf16.msra.mxu0 %v9677_v2  ;;  %6552 = vmatpush1.bf16.msra.mxu1 %v9679_v3  ;;  %v9789_v2 = vcombine.low %v841_v52, %v849_v54  ;;  %v9791_v3 = vcombine.low %v842_v55, %v850_v56  ;;  %v953_v52 = vld [vmem:[%s14260_s1 + $0x1d00] sm:$0xff]  ;;  %v954_v55 = vld [vmem:[%s14260_s1 + $0x1d08] sm:$0xff] }
  0xb7   :  { %6389 = vmatprep.subr.bf16.mxu0 %v9694_v4  ;;  %6553 = vmatprep.subr.bf16.mxu1 %v9696_v5  ;;  %v9806_v4 = vcombine.high %v857_v62, %v865_v63  ;;  %v9808_v5 = vcombine.high %v858_v0, %v866_v1  ;;  %v961_v54 = vld [vmem:[%s14260_s1 + $0x1d40] sm:$0xff]  ;;  %v962_v56 = vld [vmem:[%s14260_s1 + $0x1d48] sm:$0xff] }
  0xba   :  { %6390 = vmatpush1.bf16.msra.mxu0 %v9693_v10  ;;  %6554 = vmatpush1.bf16.msra.mxu1 %v9695_v11  ;;  %v9805_v10 = vcombine.low %v857_v62, %v865_v63  ;;  %v9807_v11 = vcombine.low %v858_v0, %v866_v1  ;;  %v969_v62 = vld [vmem:[%s14260_s1 + $0x1d80] sm:$0xff]  ;;  %v970_v0 = vld [vmem:[%s14260_s1 + $0x1d88] sm:$0xff] }
  0xbb   :  { %6391 = vmatprep.subr.bf16.mxu0 %v9710_v13  ;;  %6555 = vmatprep.subr.bf16.mxu1 %v9712_v14  ;;  %v9822_v13 = vcombine.high %v873_v6, %v881_v7  ;;  %v9824_v14 = vcombine.high %v874_v8, %v882_v9  ;;  %v977_v63 = vld [vmem:[%s14260_s1 + $0x1dc0] sm:$0xff]  ;;  %v978_v1 = vld [vmem:[%s14260_s1 + $0x1dc8] sm:$0xff] }
  0xbe   :  { %6392 = vmatpush1.bf16.msra.mxu0 %v9709_v19  ;;  %6556 = vmatpush1.bf16.msra.mxu1 %v9711_v20  ;;  %v9821_v19 = vcombine.low %v873_v6, %v881_v7  ;;  %v9823_v20 = vcombine.low %v874_v8, %v882_v9  ;;  %v985_v6 = vld [vmem:[%s14260_s1 + $0x1e00] sm:$0xff]  ;;  %v986_v8 = vld [vmem:[%s14260_s1 + $0x1e08] sm:$0xff] }
  0xbf   :  { %6393 = vmatprep.subr.bf16.mxu0 %v9726_v23  ;;  %6557 = vmatprep.subr.bf16.mxu1 %v9728_v24  ;;  %v9838_v23 = vcombine.high %v889_v16, %v897_v17  ;;  %v9840_v24 = vcombine.high %v890_v53, %v898_v18  ;;  %v993_v7 = vld [vmem:[%s14260_s1 + $0x1e40] sm:$0xff]  ;;  %v994_v9 = vld [vmem:[%s14260_s1 + $0x1e48] sm:$0xff] }
  0xc2   :  { %6394 = vmatpush1.bf16.msra.mxu0 %v9725_v29  ;;  %6558 = vmatpush1.bf16.msra.mxu1 %v9727_v30  ;;  %v9837_v29 = vcombine.low %v889_v16, %v897_v17  ;;  %v9839_v30 = vcombine.low %v890_v53, %v898_v18  ;;  %v1001_v16 = vld [vmem:[%s14260_s1 + $0x1e80] sm:$0xff]  ;;  %v1002_v53 = vld [vmem:[%s14260_s1 + $0x1e88] sm:$0xff] }
  0xc3   :  { %6404 = vmatprep.subr.bf16.mxu0 %v9742_v32  ;;  %6568 = vmatprep.subr.bf16.mxu1 %v9744_v33  ;;  %v9854_v32 = vcombine.high %v905_v26, %v913_v27  ;;  %v9856_v33 = vcombine.high %v906_v15, %v914_v28  ;;  %v1009_v17 = vld [vmem:[%s14260_s1 + $0x1ec0] sm:$0xff]  ;;  %v1010_v18 = vld [vmem:[%s14260_s1 + $0x1ec8] sm:$0xff] }
  0xc5   :  { %6396 = vmatmul.mubr.bf16.vlgmr.msra.gmra.mrb[0].mxu0 %v11222_v36  ;;  %6560 = vmatmul.mubr.bf16.vlgmr.msra.gmra.mrb[0].mxu1 %v11222_v36 }
  0xc6   :  { %6405 = vmatpush1.bf16.msra.mxu0 %v9741_v40  ;;  %6569 = vmatpush1.bf16.msra.mxu1 %v9743_v41  ;;  %v9853_v40 = vcombine.low %v905_v26, %v913_v27  ;;  %v9855_v41 = vcombine.low %v906_v15, %v914_v28  ;;  %v1017_v26 = vld [vmem:[%s14260_s1 + $0x1f00] sm:$0xff]  ;;  %v1018_v15 = vld [vmem:[%s14260_s1 + $0x1f08] sm:$0xff] }
  0xc7   :  { %6406 = vmatprep.subr.bf16.mxu0 %v9758_v25  ;;  %6570 = vmatprep.subr.bf16.mxu1 %v9760_v42  ;;  %v9870_v25 = vcombine.high %v921_v34, %v929_v35  ;;  %v9872_v42 = vcombine.high %v922_v37, %v930_v38  ;;  %v1025_v27 = vld [vmem:[%s14260_s1 + $0x1f40] sm:$0xff]  ;;  %v1026_v28 = vld [vmem:[%s14260_s1 + $0x1f48] sm:$0xff] }
  0xc8   :  { %6436 = vmatprep.mubr.bf16.mxu0 %v11243_v45  ;;  %6600 = vmatprep.mubr.bf16.mxu1 %v11243_v45 }
  0xca   :  { %6407 = vmatpush1.bf16.msra.mxu0 %v9757_v48  ;;  %6571 = vmatpush1.bf16.msra.mxu1 %v9759_v49  ;;  %v9869_v48 = vcombine.low %v921_v34, %v929_v35  ;;  %v9871_v49 = vcombine.low %v922_v37, %v930_v38  ;;  %v1033_v34 = vld [vmem:[%s14260_s1 + $0x1f80] sm:$0xff]  ;;  %v1034_v37 = vld [vmem:[%s14260_s1 + $0x1f88] sm:$0xff] }
  0xcb   :  { %6408 = vmatprep.subr.bf16.mxu0 %v9774_v50  ;;  %6572 = vmatprep.subr.bf16.mxu1 %v9776_v51  ;;  %v9886_v50 = vcombine.high %v937_v43, %v945_v44  ;;  %v9888_v51 = vcombine.high %v938_v46, %v946_v47  ;;  %v1041_v35 = vld [vmem:[%s14260_s1 + $0x1fc0] sm:$0xff]  ;;  %v1042_v38 = vld [vmem:[%s14260_s1 + $0x1fc8] sm:$0xff] }
  0xce   :  { %6409 = vmatpush1.bf16.msra.mxu0 %v9773_v58  ;;  %6573 = vmatpush1.bf16.msra.mxu1 %v9775_v59  ;;  %v9885_v58 = vcombine.low %v937_v43, %v945_v44  ;;  %v9887_v59 = vcombine.low %v938_v46, %v946_v47  ;;  %v27_v43 = vld [vmem:[%s14260_s1 + $0x10] sm:$0xff]  ;;  %v28_v46 = vld [vmem:[%s14260_s1 + $0x18] sm:$0xff] }
  0xcf   :  { %6410 = vmatprep.subr.bf16.mxu0 %v9790_v60  ;;  %6574 = vmatprep.subr.bf16.mxu1 %v9792_v61  ;;  %v9902_v60 = vcombine.high %v953_v52, %v961_v54  ;;  %v9904_v61 = vcombine.high %v954_v55, %v962_v56  ;;  %v35_v44 = vld [vmem:[%s14260_s1 + $0x50] sm:$0xff]  ;;  %v36_v47 = vld [vmem:[%s14260_s1 + $0x58] sm:$0xff] }
  0xd2   :  { %6411 = vmatpush1.bf16.msra.mxu0 %v9789_v2  ;;  %6575 = vmatpush1.bf16.msra.mxu1 %v9791_v3  ;;  %v9901_v2 = vcombine.low %v953_v52, %v961_v54  ;;  %v9903_v3 = vcombine.low %v954_v55, %v962_v56  ;;  %v43_v52 = vld [vmem:[%s14260_s1 + $0x90] sm:$0xff]  ;;  %v11431_v55 = vcombine.low %v11233_v39, %v11233_v39  ;;  %v44_v56 = vld [vmem:[%s14260_s1 + $0x98] sm:$0xff] }
  0xd3   :  { %6412 = vmatprep.subr.bf16.mxu0 %v9806_v4  ;;  %6576 = vmatprep.subr.bf16.mxu1 %v9808_v5  ;;  %v9918_v4 = vcombine.high %v969_v62, %v977_v63  ;;  %v9920_v5 = vcombine.high %v970_v0, %v978_v1  ;;  %v51_v54 = vld [vmem:[%s14260_s1 + $0xd0] sm:$0xff] }
  0xd4   :  { %v59_v39 = vld [vmem:[%s14260_s1 + $0x110] sm:$0xff] }
  0xd6   :  { %6413 = vmatpush1.bf16.msra.mxu0 %v9805_v10  ;;  %6577 = vmatpush1.bf16.msra.mxu1 %v9807_v11  ;;  %v9917_v10 = vcombine.low %v969_v62, %v977_v63  ;;  %v9919_v11 = vcombine.low %v970_v0, %v978_v1  ;;  %v67_v63 = vld [vmem:[%s14260_s1 + $0x150] sm:$0xff]  ;;  %v60_v0 = vld [vmem:[%s14260_s1 + $0x118] sm:$0xff] }
  0xd7   :  { %6414 = vmatprep.subr.bf16.mxu0 %v9822_v13  ;;  %6578 = vmatprep.subr.bf16.mxu1 %v9824_v14  ;;  %v9934_v13 = vcombine.high %v985_v6, %v993_v7  ;;  %v9936_v14 = vcombine.high %v986_v8, %v994_v9  ;;  %v68_v1 = vld [vmem:[%s14260_s1 + $0x158] sm:$0xff] }
  0xda   :  { %6415 = vmatpush1.bf16.msra.mxu0 %v9821_v19  ;;  %6579 = vmatpush1.bf16.msra.mxu1 %v9823_v20  ;;  %v9933_v19 = vcombine.low %v985_v6, %v993_v7  ;;  %v9935_v20 = vcombine.low %v986_v8, %v994_v9  ;;  %v75_v6 = vld [vmem:[%s14260_s1 + $0x190] sm:$0xff]  ;;  %v76_v8 = vld [vmem:[%s14260_s1 + $0x198] sm:$0xff] }
  0xdb   :  { %6416 = vmatprep.subr.bf16.mxu0 %v9838_v23  ;;  %6580 = vmatprep.subr.bf16.mxu1 %v9840_v24  ;;  %v9950_v23 = vcombine.high %v1001_v16, %v1009_v17  ;;  %v9952_v24 = vcombine.high %v1002_v53, %v1010_v18  ;;  %v83_v7 = vld [vmem:[%s14260_s1 + $0x1d0] sm:$0xff]  ;;  %v84_v9 = vld [vmem:[%s14260_s1 + $0x1d8] sm:$0xff] }
  0xde   :  { %6417 = vmatpush1.bf16.msra.mxu0 %v9837_v29  ;;  %6581 = vmatpush1.bf16.msra.mxu1 %v9839_v30  ;;  %v9949_v29 = vcombine.low %v1001_v16, %v1009_v17  ;;  %v9951_v30 = vcombine.low %v1002_v53, %v1010_v18  ;;  %v91_v16 = vld [vmem:[%s14260_s1 + $0x210] sm:$0xff]  ;;  %v92_v53 = vld [vmem:[%s14260_s1 + $0x218] sm:$0xff] }
  0xdf   :  { %6418 = vmatprep.subr.bf16.mxu0 %v9854_v32  ;;  %6582 = vmatprep.subr.bf16.mxu1 %v9856_v33  ;;  %v9966_v32 = vcombine.high %v1017_v26, %v1025_v27  ;;  %v9968_v33 = vcombine.high %v1018_v15, %v1026_v28  ;;  %v99_v17 = vld [vmem:[%s14260_s1 + $0x250] sm:$0xff]  ;;  %v100_v18 = vld [vmem:[%s14260_s1 + $0x258] sm:$0xff] }
  0xe2   :  { %6419 = vmatpush1.bf16.msra.mxu0 %v9853_v40  ;;  %6583 = vmatpush1.bf16.msra.mxu1 %v9855_v41  ;;  %v9965_v40 = vcombine.low %v1017_v26, %v1025_v27  ;;  %v9967_v41 = vcombine.low %v1018_v15, %v1026_v28  ;;  %v107_v26 = vld [vmem:[%s14260_s1 + $0x290] sm:$0xff]  ;;  %v108_v15 = vld [vmem:[%s14260_s1 + $0x298] sm:$0xff] }
  0xe3   :  { %6420 = vmatprep.subr.bf16.mxu0 %v9870_v25  ;;  %6584 = vmatprep.subr.bf16.mxu1 %v9872_v42  ;;  %v9982_v25 = vcombine.high %v1033_v34, %v1041_v35  ;;  %v9984_v42 = vcombine.high %v1034_v37, %v1042_v38  ;;  %v115_v27 = vld [vmem:[%s14260_s1 + $0x2d0] sm:$0xff]  ;;  %v116_v28 = vld [vmem:[%s14260_s1 + $0x2d8] sm:$0xff] }
  0xe6   :  { %6421 = vmatpush1.bf16.msra.mxu0 %v9869_v48  ;;  %6585 = vmatpush1.bf16.msra.mxu1 %v9871_v49  ;;  %v9981_v48 = vcombine.low %v1033_v34, %v1041_v35  ;;  %v9983_v49 = vcombine.low %v1034_v37, %v1042_v38  ;;  %v123_v34 = vld [vmem:[%s14260_s1 + $0x310] sm:$0xff]  ;;  %v124_v37 = vld [vmem:[%s14260_s1 + $0x318] sm:$0xff] }
  0xe7   :  { %6422 = vmatprep.subr.bf16.mxu0 %v9886_v50  ;;  %6586 = vmatprep.subr.bf16.mxu1 %v9888_v51  ;;  %v8978_v50 = vcombine.high %v27_v43, %v35_v44  ;;  %v8980_v51 = vcombine.high %v28_v46, %v36_v47  ;;  %v131_v35 = vld [vmem:[%s14260_s1 + $0x350] sm:$0xff]  ;;  %v132_v38 = vld [vmem:[%s14260_s1 + $0x358] sm:$0xff] }
  0xea   :  { %6423 = vmatpush1.bf16.msra.mxu0 %v9885_v58  ;;  %6587 = vmatpush1.bf16.msra.mxu1 %v9887_v59  ;;  %v52_v58 = vld [vmem:[%s14260_s1 + $0xd8] sm:$0xff]  ;;  %v8977_v59 = vcombine.low %v27_v43, %v35_v44  ;;  %v139_v43 = vld [vmem:[%s14260_s1 + $0x390] sm:$0xff] }
  0xeb   :  { %6424 = vmatprep.subr.bf16.mxu0 %v9902_v60  ;;  %6588 = vmatprep.subr.bf16.mxu1 %v9904_v61  ;;  %v8979_v60 = vcombine.low %v28_v46, %v36_v47  ;;  %v8994_v61 = vcombine.high %v43_v52, %v51_v54  ;;  %v8996_v62 = vcombine.high %v44_v56, %v52_v58  ;;  %v147_v44 = vld [vmem:[%s14260_s1 + $0x3d0] sm:$0xff]  ;;  %v140_v46 = vld [vmem:[%s14260_s1 + $0x398] sm:$0xff] }
  0xec   :  { %v148_v47 = vld [vmem:[%s14260_s1 + $0x3d8] sm:$0xff] }
  0xee   :  { %6425 = vmatpush1.bf16.msra.mxu0 %v9901_v2  ;;  %6589 = vmatpush1.bf16.msra.mxu1 %v9903_v3  ;;  %v8993_v2 = vcombine.low %v43_v52, %v51_v54  ;;  %v8995_v3 = vcombine.low %v44_v56, %v52_v58  ;;  %v155_v52 = vld [vmem:[%s14260_s1 + $0x410] sm:$0xff]  ;;  %v156_v56 = vld [vmem:[%s14260_s1 + $0x418] sm:$0xff] }
  0xef   :  { %6426 = vmatprep.subr.bf16.mxu0 %v9918_v4  ;;  %6590 = vmatprep.subr.bf16.mxu1 %v9920_v5  ;;  %v9010_v4 = vcombine.high %v59_v39, %v67_v63  ;;  %v9012_v5 = vcombine.high %v60_v0, %v68_v1  ;;  %v163_v54 = vld [vmem:[%s14260_s1 + $0x450] sm:$0xff]  ;;  %v164_v58 = vld [vmem:[%s14260_s1 + $0x458] sm:$0xff] }
  0xf2   :  { %6427 = vmatpush1.bf16.msra.mxu0 %v9917_v10  ;;  %6591 = vmatpush1.bf16.msra.mxu1 %v9919_v11  ;;  %v9009_v10 = vcombine.low %v59_v39, %v67_v63  ;;  %v9011_v11 = vcombine.low %v60_v0, %v68_v1  ;;  %v171_v39 = vld [vmem:[%s14260_s1 + $0x490] sm:$0xff]  ;;  %v172_v0 = vld [vmem:[%s14260_s1 + $0x498] sm:$0xff] }
  0xf3   :  { %6428 = vmatprep.subr.bf16.mxu0 %v9934_v13  ;;  %6592 = vmatprep.subr.bf16.mxu1 %v9936_v14  ;;  %v9026_v13 = vcombine.high %v75_v6, %v83_v7  ;;  %v9028_v14 = vcombine.high %v76_v8, %v84_v9  ;;  %v179_v63 = vld [vmem:[%s14260_s1 + $0x4d0] sm:$0xff]  ;;  %v180_v1 = vld [vmem:[%s14260_s1 + $0x4d8] sm:$0xff] }
  0xf6   :  { %6429 = vmatpush1.bf16.msra.mxu0 %v9933_v19  ;;  %6593 = vmatpush1.bf16.msra.mxu1 %v9935_v20  ;;  %v9025_v19 = vcombine.low %v75_v6, %v83_v7  ;;  %v9027_v20 = vcombine.low %v76_v8, %v84_v9  ;;  %v187_v6 = vld [vmem:[%s14260_s1 + $0x510] sm:$0xff]  ;;  %v188_v8 = vld [vmem:[%s14260_s1 + $0x518] sm:$0xff] }
  0xf7   :  { %6430 = vmatprep.subr.bf16.mxu0 %v9950_v23  ;;  %6594 = vmatprep.subr.bf16.mxu1 %v9952_v24  ;;  %v9042_v23 = vcombine.high %v91_v16, %v99_v17  ;;  %v9044_v24 = vcombine.high %v92_v53, %v100_v18  ;;  %v195_v7 = vld [vmem:[%s14260_s1 + $0x550] sm:$0xff]  ;;  %v196_v9 = vld [vmem:[%s14260_s1 + $0x558] sm:$0xff] }
  0xfa   :  { %6431 = vmatpush1.bf16.msra.mxu0 %v9949_v29  ;;  %6595 = vmatpush1.bf16.msra.mxu1 %v9951_v30  ;;  %v9041_v29 = vcombine.low %v91_v16, %v99_v17  ;;  %v9043_v30 = vcombine.low %v92_v53, %v100_v18  ;;  %v203_v16 = vld [vmem:[%s14260_s1 + $0x590] sm:$0xff]  ;;  %v204_v53 = vld [vmem:[%s14260_s1 + $0x598] sm:$0xff] }
  0xfb   :  { %6432 = vmatprep.subr.bf16.mxu0 %v9966_v32  ;;  %6596 = vmatprep.subr.bf16.mxu1 %v9968_v33  ;;  %v9058_v32 = vcombine.high %v107_v26, %v115_v27  ;;  %v9060_v33 = vcombine.high %v108_v15, %v116_v28  ;;  %v211_v17 = vld [vmem:[%s14260_s1 + $0x5d0] sm:$0xff]  ;;  %v212_v18 = vld [vmem:[%s14260_s1 + $0x5d8] sm:$0xff] }
  0xfe   :  { %6433 = vmatpush1.bf16.msra.mxu0 %v9965_v40  ;;  %6597 = vmatpush1.bf16.msra.mxu1 %v9967_v41  ;;  %v9057_v40 = vcombine.low %v107_v26, %v115_v27  ;;  %v9059_v41 = vcombine.low %v108_v15, %v116_v28  ;;  %v219_v26 = vld [vmem:[%s14260_s1 + $0x610] sm:$0xff]  ;;  %v220_v15 = vld [vmem:[%s14260_s1 + $0x618] sm:$0xff] }
  0xff   :  { %6434 = vmatprep.subr.bf16.mxu0 %v9982_v25  ;;  %6598 = vmatprep.subr.bf16.mxu1 %v9984_v42  ;;  %v9074_v25 = vcombine.high %v123_v34, %v131_v35  ;;  %v9076_v42 = vcombine.high %v124_v37, %v132_v38  ;;  %v227_v27 = vld [vmem:[%s14260_s1 + $0x650] sm:$0xff]  ;;  %v228_v28 = vld [vmem:[%s14260_s1 + $0x658] sm:$0xff] }
 0x102   :  { %6435 = vmatpush1.bf16.msra.mxu0 %v9981_v48  ;;  %6599 = vmatpush1.bf16.msra.mxu1 %v9983_v49  ;;  %v9073_v48 = vcombine.low %v123_v34, %v131_v35  ;;  %v9075_v49 = vcombine.low %v124_v37, %v132_v38  ;;  %v235_v34 = vld [vmem:[%s14260_s1 + $0x690] sm:$0xff]  ;;  %v236_v37 = vld [vmem:[%s14260_s1 + $0x698] sm:$0xff] }
 0x103   :  { %6609 = vmatprep.subr.bf16.mxu0 %v8978_v50  ;;  %6773 = vmatprep.subr.bf16.mxu1 %v8980_v51  ;;  %v9090_v50 = vcombine.high %v139_v43, %v147_v44  ;;  %v9092_v51 = vcombine.high %v140_v46, %v148_v47  ;;  %v243_v35 = vld [vmem:[%s14260_s1 + $0x6d0] sm:$0xff]  ;;  %v244_v38 = vld [vmem:[%s14260_s1 + $0x6d8] sm:$0xff] }
 0x105   :  { %6437 = vmatmul.mubr.bf16.vlgmr.msra.gmra.mrb[0].mxu0 %v11431_v55  ;;  %6601 = vmatmul.mubr.bf16.vlgmr.msra.gmra.mrb[0].mxu1 %v11431_v55 }
 0x106   :  { %6610 = vmatpush1.bf16.msra.mxu0 %v8977_v59  ;;  %6774 = vmatpush1.bf16.msra.mxu1 %v8979_v60  ;;  %v9089_v59 = vcombine.low %v139_v43, %v147_v44  ;;  %v9091_v60 = vcombine.low %v140_v46, %v148_v47  ;;  %v251_v43 = vld [vmem:[%s14260_s1 + $0x710] sm:$0xff]  ;;  %v252_v46 = vld [vmem:[%s14260_s1 + $0x718] sm:$0xff] }
 0x107   :  { %6611 = vmatprep.subr.bf16.mxu0 %v8994_v61  ;;  %6775 = vmatprep.subr.bf16.mxu1 %v8996_v62  ;;  %v9106_v61 = vcombine.high %v155_v52, %v163_v54  ;;  %v9108_v62 = vcombine.high %v156_v56, %v164_v58  ;;  %v259_v44 = vld [vmem:[%s14260_s1 + $0x750] sm:$0xff]  ;;  %v260_v47 = vld [vmem:[%s14260_s1 + $0x758] sm:$0xff] }
 0x108   :  { %6641 = vmatprep.mubr.bf16.mxu0 %v10678_v57  ;;  %6805 = vmatprep.mubr.bf16.mxu1 %v10678_v57 }
 0x10a   :  { %6612 = vmatpush1.bf16.msra.mxu0 %v8993_v2  ;;  %6776 = vmatpush1.bf16.msra.mxu1 %v8995_v3  ;;  %v9105_v2 = vcombine.low %v155_v52, %v163_v54  ;;  %v9107_v3 = vcombine.low %v156_v56, %v164_v58  ;;  %v267_v52 = vld [vmem:[%s14260_s1 + $0x790] sm:$0xff]  ;;  %v268_v56 = vld [vmem:[%s14260_s1 + $0x798] sm:$0xff] }
 0x10b   :  { %6613 = vmatprep.subr.bf16.mxu0 %v9010_v4  ;;  %6777 = vmatprep.subr.bf16.mxu1 %v9012_v5  ;;  %v9122_v4 = vcombine.high %v171_v39, %v179_v63  ;;  %v9124_v5 = vcombine.high %v172_v0, %v180_v1  ;;  %v275_v54 = vld [vmem:[%s14260_s1 + $0x7d0] sm:$0xff]  ;;  %v276_v58 = vld [vmem:[%s14260_s1 + $0x7d8] sm:$0xff] }
 0x10e   :  { %6614 = vmatpush1.bf16.msra.mxu0 %v9009_v10  ;;  %6778 = vmatpush1.bf16.msra.mxu1 %v9011_v11  ;;  %v9121_v10 = vcombine.low %v171_v39, %v179_v63  ;;  %v9123_v11 = vcombine.low %v172_v0, %v180_v1  ;;  %v283_v39 = vld [vmem:[%s14260_s1 + $0x810] sm:$0xff]  ;;  %v284_v0 = vld [vmem:[%s14260_s1 + $0x818] sm:$0xff] }
 0x10f   :  { %6615 = vmatprep.subr.bf16.mxu0 %v9026_v13  ;;  %6779 = vmatprep.subr.bf16.mxu1 %v9028_v14  ;;  %v9138_v13 = vcombine.high %v187_v6, %v195_v7  ;;  %v9140_v14 = vcombine.high %v188_v8, %v196_v9  ;;  %v291_v63 = vld [vmem:[%s14260_s1 + $0x850] sm:$0xff]  ;;  %v292_v1 = vld [vmem:[%s14260_s1 + $0x858] sm:$0xff] }
 0x112   :  { %6616 = vmatpush1.bf16.msra.mxu0 %v9025_v19  ;;  %6780 = vmatpush1.bf16.msra.mxu1 %v9027_v20  ;;  %v9137_v19 = vcombine.low %v187_v6, %v195_v7  ;;  %v9139_v20 = vcombine.low %v188_v8, %v196_v9  ;;  %v299_v6 = vld [vmem:[%s14260_s1 + $0x890] sm:$0xff]  ;;  %v300_v8 = vld [vmem:[%s14260_s1 + $0x898] sm:$0xff] }
 0x113   :  { %6617 = vmatprep.subr.bf16.mxu0 %v9042_v23  ;;  %6781 = vmatprep.subr.bf16.mxu1 %v9044_v24  ;;  %v9154_v23 = vcombine.high %v203_v16, %v211_v17  ;;  %v9156_v24 = vcombine.high %v204_v53, %v212_v18  ;;  %v307_v7 = vld [vmem:[%s14260_s1 + $0x8d0] sm:$0xff]  ;;  %v308_v9 = vld [vmem:[%s14260_s1 + $0x8d8] sm:$0xff] }
 0x116   :  { %6618 = vmatpush1.bf16.msra.mxu0 %v9041_v29  ;;  %6782 = vmatpush1.bf16.msra.mxu1 %v9043_v30  ;;  %v9153_v29 = vcombine.low %v203_v16, %v211_v17  ;;  %v9155_v30 = vcombine.low %v204_v53, %v212_v18  ;;  %v315_v16 = vld [vmem:[%s14260_s1 + $0x910] sm:$0xff]  ;;  %v316_v53 = vld [vmem:[%s14260_s1 + $0x918] sm:$0xff] }
 0x117   :  { %6619 = vmatprep.subr.bf16.mxu0 %v9058_v32  ;;  %6783 = vmatprep.subr.bf16.mxu1 %v9060_v33  ;;  %v9170_v32 = vcombine.high %v219_v26, %v227_v27  ;;  %v9172_v33 = vcombine.high %v220_v15, %v228_v28  ;;  %v323_v17 = vld [vmem:[%s14260_s1 + $0x950] sm:$0xff]  ;;  %v324_v18 = vld [vmem:[%s14260_s1 + $0x958] sm:$0xff] }
 0x11a   :  { %6620 = vmatpush1.bf16.msra.mxu0 %v9057_v40  ;;  %6784 = vmatpush1.bf16.msra.mxu1 %v9059_v41  ;;  %v9169_v40 = vcombine.low %v219_v26, %v227_v27  ;;  %v9171_v41 = vcombine.low %v220_v15, %v228_v28  ;;  %v331_v26 = vld [vmem:[%s14260_s1 + $0x990] sm:$0xff]  ;;  %v332_v15 = vld [vmem:[%s14260_s1 + $0x998] sm:$0xff] }
 0x11b   :  { %6621 = vmatprep.subr.bf16.mxu0 %v9074_v25  ;;  %6785 = vmatprep.subr.bf16.mxu1 %v9076_v42  ;;  %v9186_v25 = vcombine.high %v235_v34, %v243_v35  ;;  %v9188_v42 = vcombine.high %v236_v37, %v244_v38  ;;  %v339_v27 = vld [vmem:[%s14260_s1 + $0x9d0] sm:$0xff]  ;;  %v340_v28 = vld [vmem:[%s14260_s1 + $0x9d8] sm:$0xff] }
 0x11e   :  { %6622 = vmatpush1.bf16.msra.mxu0 %v9073_v48  ;;  %6786 = vmatpush1.bf16.msra.mxu1 %v9075_v49  ;;  %v9185_v48 = vcombine.low %v235_v34, %v243_v35  ;;  %v9187_v49 = vcombine.low %v236_v37, %v244_v38  ;;  %v347_v34 = vld [vmem:[%s14260_s1 + $0xa10] sm:$0xff]  ;;  %v348_v37 = vld [vmem:[%s14260_s1 + $0xa18] sm:$0xff] }
 0x11f   :  { %6623 = vmatprep.subr.bf16.mxu0 %v9090_v50  ;;  %6787 = vmatprep.subr.bf16.mxu1 %v9092_v51  ;;  %v9202_v50 = vcombine.high %v251_v43, %v259_v44  ;;  %v9204_v51 = vcombine.high %v252_v46, %v260_v47  ;;  %v355_v35 = vld [vmem:[%s14260_s1 + $0xa50] sm:$0xff]  ;;  %v356_v38 = vld [vmem:[%s14260_s1 + $0xa58] sm:$0xff] }
 0x122   :  { %6624 = vmatpush1.bf16.msra.mxu0 %v9089_v59  ;;  %6788 = vmatpush1.bf16.msra.mxu1 %v9091_v60  ;;  %v9201_v59 = vcombine.low %v251_v43, %v259_v44  ;;  %v9203_v60 = vcombine.low %v252_v46, %v260_v47  ;;  %v363_v43 = vld [vmem:[%s14260_s1 + $0xa90] sm:$0xff]  ;;  %v364_v46 = vld [vmem:[%s14260_s1 + $0xa98] sm:$0xff] }
 0x123   :  { %6625 = vmatprep.subr.bf16.mxu0 %v9106_v61  ;;  %6789 = vmatprep.subr.bf16.mxu1 %v9108_v62  ;;  %v9218_v61 = vcombine.high %v267_v52, %v275_v54  ;;  %v9220_v62 = vcombine.high %v268_v56, %v276_v58  ;;  %v371_v44 = vld [vmem:[%s14260_s1 + $0xad0] sm:$0xff]  ;;  %v372_v47 = vld [vmem:[%s14260_s1 + $0xad8] sm:$0xff] }
 0x126   :  { %6626 = vmatpush1.bf16.msra.mxu0 %v9105_v2  ;;  %6790 = vmatpush1.bf16.msra.mxu1 %v9107_v3  ;;  %v9217_v2 = vcombine.low %v267_v52, %v275_v54  ;;  %v9219_v3 = vcombine.low %v268_v56, %v276_v58  ;;  %v379_v52 = vld [vmem:[%s14260_s1 + $0xb10] sm:$0xff]  ;;  %v380_v56 = vld [vmem:[%s14260_s1 + $0xb18] sm:$0xff] }
 0x127   :  { %6627 = vmatprep.subr.bf16.mxu0 %v9122_v4  ;;  %6791 = vmatprep.subr.bf16.mxu1 %v9124_v5  ;;  %v9234_v4 = vcombine.high %v283_v39, %v291_v63  ;;  %v9236_v5 = vcombine.high %v284_v0, %v292_v1  ;;  %v387_v54 = vld [vmem:[%s14260_s1 + $0xb50] sm:$0xff]  ;;  %v388_v58 = vld [vmem:[%s14260_s1 + $0xb58] sm:$0xff] }
 0x12a   :  { %6628 = vmatpush1.bf16.msra.mxu0 %v9121_v10  ;;  %6792 = vmatpush1.bf16.msra.mxu1 %v9123_v11  ;;  %v9233_v10 = vcombine.low %v283_v39, %v291_v63  ;;  %v9235_v11 = vcombine.low %v284_v0, %v292_v1  ;;  %v395_v39 = vld [vmem:[%s14260_s1 + $0xb90] sm:$0xff]  ;;  %v396_v0 = vld [vmem:[%s14260_s1 + $0xb98] sm:$0xff] }
 0x12b   :  { %6629 = vmatprep.subr.bf16.mxu0 %v9138_v13  ;;  %6793 = vmatprep.subr.bf16.mxu1 %v9140_v14  ;;  %v9250_v13 = vcombine.high %v299_v6, %v307_v7  ;;  %v9252_v14 = vcombine.high %v300_v8, %v308_v9  ;;  %v403_v63 = vld [vmem:[%s14260_s1 + $0xbd0] sm:$0xff]  ;;  %v404_v1 = vld [vmem:[%s14260_s1 + $0xbd8] sm:$0xff] }
 0x12e   :  { %6630 = vmatpush1.bf16.msra.mxu0 %v9137_v19  ;;  %6794 = vmatpush1.bf16.msra.mxu1 %v9139_v20  ;;  %v9249_v19 = vcombine.low %v299_v6, %v307_v7  ;;  %v9251_v20 = vcombine.low %v300_v8, %v308_v9  ;;  %v411_v6 = vld [vmem:[%s14260_s1 + $0xc10] sm:$0xff]  ;;  %v412_v8 = vld [vmem:[%s14260_s1 + $0xc18] sm:$0xff] }
 0x12f   :  { %6631 = vmatprep.subr.bf16.mxu0 %v9154_v23  ;;  %6795 = vmatprep.subr.bf16.mxu1 %v9156_v24  ;;  %v9266_v23 = vcombine.high %v315_v16, %v323_v17  ;;  %v9268_v24 = vcombine.high %v316_v53, %v324_v18  ;;  %v419_v7 = vld [vmem:[%s14260_s1 + $0xc50] sm:$0xff]  ;;  %v420_v9 = vld [vmem:[%s14260_s1 + $0xc58] sm:$0xff] }
 0x132   :  { %6632 = vmatpush1.bf16.msra.mxu0 %v9153_v29  ;;  %6796 = vmatpush1.bf16.msra.mxu1 %v9155_v30  ;;  %v9265_v29 = vcombine.low %v315_v16, %v323_v17  ;;  %v9267_v30 = vcombine.low %v316_v53, %v324_v18  ;;  %v427_v16 = vld [vmem:[%s14260_s1 + $0xc90] sm:$0xff]  ;;  %v428_v53 = vld [vmem:[%s14260_s1 + $0xc98] sm:$0xff] }
 0x133   :  { %6633 = vmatprep.subr.bf16.mxu0 %v9170_v32  ;;  %6797 = vmatprep.subr.bf16.mxu1 %v9172_v33  ;;  %v9282_v32 = vcombine.high %v331_v26, %v339_v27  ;;  %v9284_v33 = vcombine.high %v332_v15, %v340_v28  ;;  %v435_v17 = vld [vmem:[%s14260_s1 + $0xcd0] sm:$0xff]  ;;  %v436_v18 = vld [vmem:[%s14260_s1 + $0xcd8] sm:$0xff] }
 0x136   :  { %6634 = vmatpush1.bf16.msra.mxu0 %v9169_v40  ;;  %6798 = vmatpush1.bf16.msra.mxu1 %v9171_v41  ;;  %v9281_v40 = vcombine.low %v331_v26, %v339_v27  ;;  %v9283_v41 = vcombine.low %v332_v15, %v340_v28  ;;  %v443_v26 = vld [vmem:[%s14260_s1 + $0xd10] sm:$0xff]  ;;  %v444_v15 = vld [vmem:[%s14260_s1 + $0xd18] sm:$0xff] }
 0x137   :  { %6635 = vmatprep.subr.bf16.mxu0 %v9186_v25  ;;  %6799 = vmatprep.subr.bf16.mxu1 %v9188_v42  ;;  %v9298_v25 = vcombine.high %v347_v34, %v355_v35  ;;  %v9300_v42 = vcombine.high %v348_v37, %v356_v38  ;;  %v451_v27 = vld [vmem:[%s14260_s1 + $0xd50] sm:$0xff]  ;;  %v452_v28 = vld [vmem:[%s14260_s1 + $0xd58] sm:$0xff] }
 0x13a   :  { %6636 = vmatpush1.bf16.msra.mxu0 %v9185_v48  ;;  %6800 = vmatpush1.bf16.msra.mxu1 %v9187_v49  ;;  %v9297_v48 = vcombine.low %v347_v34, %v355_v35  ;;  %v9299_v49 = vcombine.low %v348_v37, %v356_v38  ;;  %v459_v34 = vld [vmem:[%s14260_s1 + $0xd90] sm:$0xff]  ;;  %v460_v37 = vld [vmem:[%s14260_s1 + $0xd98] sm:$0xff] }
 0x13b   :  { %6637 = vmatprep.subr.bf16.mxu0 %v9202_v50  ;;  %6801 = vmatprep.subr.bf16.mxu1 %v9204_v51  ;;  %v9314_v50 = vcombine.high %v363_v43, %v371_v44  ;;  %v9316_v51 = vcombine.high %v364_v46, %v372_v47  ;;  %v467_v35 = vld [vmem:[%s14260_s1 + $0xdd0] sm:$0xff]  ;;  %v468_v38 = vld [vmem:[%s14260_s1 + $0xdd8] sm:$0xff] }
 0x13e   :  { %6638 = vmatpush1.bf16.msra.mxu0 %v9201_v59  ;;  %6802 = vmatpush1.bf16.msra.mxu1 %v9203_v60  ;;  %v9313_v59 = vcombine.low %v363_v43, %v371_v44  ;;  %v9315_v60 = vcombine.low %v364_v46, %v372_v47  ;;  %v475_v43 = vld [vmem:[%s14260_s1 + $0xe10] sm:$0xff]  ;;  %v476_v46 = vld [vmem:[%s14260_s1 + $0xe18] sm:$0xff] }
 0x13f   :  { %6639 = vmatprep.subr.bf16.mxu0 %v9218_v61  ;;  %6803 = vmatprep.subr.bf16.mxu1 %v9220_v62  ;;  %v9330_v61 = vcombine.high %v379_v52, %v387_v54  ;;  %v9332_v62 = vcombine.high %v380_v56, %v388_v58  ;;  %v483_v44 = vld [vmem:[%s14260_s1 + $0xe50] sm:$0xff]  ;;  %v484_v47 = vld [vmem:[%s14260_s1 + $0xe58] sm:$0xff] }
 0x142   :  { %6640 = vmatpush1.bf16.msra.mxu0 %v9217_v2  ;;  %6804 = vmatpush1.bf16.msra.mxu1 %v9219_v3  ;;  %v9329_v2 = vcombine.low %v379_v52, %v387_v54  ;;  %v9331_v3 = vcombine.low %v380_v56, %v388_v58  ;;  %v491_v52 = vld [vmem:[%s14260_s1 + $0xe90] sm:$0xff]  ;;  %v492_v56 = vld [vmem:[%s14260_s1 + $0xe98] sm:$0xff] }
 0x143   :  { %6650 = vmatprep.subr.bf16.mxu0 %v9234_v4  ;;  %6814 = vmatprep.subr.bf16.mxu1 %v9236_v5  ;;  %v9346_v4 = vcombine.high %v395_v39, %v403_v63  ;;  %v9348_v5 = vcombine.high %v396_v0, %v404_v1  ;;  %v499_v54 = vld [vmem:[%s14260_s1 + $0xed0] sm:$0xff]  ;;  %v500_v58 = vld [vmem:[%s14260_s1 + $0xed8] sm:$0xff] }
 0x145   :  { %6642 = vmatmul.mubr.bf16.vlgmr.msra.gmra.mrb[4].mxu0 %v10804_v12  ;;  %6806 = vmatmul.mubr.bf16.vlgmr.msra.gmra.mrb[4].mxu1 %v10804_v12 }
 0x146   :  { %6651 = vmatpush1.bf16.msra.mxu0 %v9233_v10  ;;  %6815 = vmatpush1.bf16.msra.mxu1 %v9235_v11  ;;  %v9345_v10 = vcombine.low %v395_v39, %v403_v63  ;;  %v9347_v11 = vcombine.low %v396_v0, %v404_v1  ;;  %v507_v39 = vld [vmem:[%s14260_s1 + $0xf10] sm:$0xff]  ;;  %v508_v0 = vld [vmem:[%s14260_s1 + $0xf18] sm:$0xff] }
 0x147   :  { %6652 = vmatprep.subr.bf16.mxu0 %v9250_v13  ;;  %6816 = vmatprep.subr.bf16.mxu1 %v9252_v14  ;;  %v9362_v13 = vcombine.high %v411_v6, %v419_v7  ;;  %v9364_v14 = vcombine.high %v412_v8, %v420_v9  ;;  %v515_v63 = vld [vmem:[%s14260_s1 + $0xf50] sm:$0xff]  ;;  %v516_v1 = vld [vmem:[%s14260_s1 + $0xf58] sm:$0xff] }
 0x148   :  { %6682 = vmatprep.mubr.bf16.mxu0 %v10825_v21  ;;  %6846 = vmatprep.mubr.bf16.mxu1 %v10825_v21 }
 0x14a   :  { %6653 = vmatpush1.bf16.msra.mxu0 %v9249_v19  ;;  %6817 = vmatpush1.bf16.msra.mxu1 %v9251_v20  ;;  %v9361_v19 = vcombine.low %v411_v6, %v419_v7  ;;  %v9363_v20 = vcombine.low %v412_v8, %v420_v9  ;;  %v523_v6 = vld [vmem:[%s14260_s1 + $0xf90] sm:$0xff]  ;;  %v524_v8 = vld [vmem:[%s14260_s1 + $0xf98] sm:$0xff] }
 0x14b   :  { %6654 = vmatprep.subr.bf16.mxu0 %v9266_v23  ;;  %6818 = vmatprep.subr.bf16.mxu1 %v9268_v24  ;;  %v9378_v23 = vcombine.high %v427_v16, %v435_v17  ;;  %v9380_v24 = vcombine.high %v428_v53, %v436_v18  ;;  %v531_v7 = vld [vmem:[%s14260_s1 + $0xfd0] sm:$0xff]  ;;  %v532_v9 = vld [vmem:[%s14260_s1 + $0xfd8] sm:$0xff] }
 0x14e   :  { %6655 = vmatpush1.bf16.msra.mxu0 %v9265_v29  ;;  %6819 = vmatpush1.bf16.msra.mxu1 %v9267_v30  ;;  %v9377_v29 = vcombine.low %v427_v16, %v435_v17  ;;  %v9379_v30 = vcombine.low %v428_v53, %v436_v18  ;;  %v539_v16 = vld [vmem:[%s14260_s1 + $0x1010] sm:$0xff]  ;;  %v540_v53 = vld [vmem:[%s14260_s1 + $0x1018] sm:$0xff] }
 0x14f   :  { %6656 = vmatprep.subr.bf16.mxu0 %v9282_v32  ;;  %6820 = vmatprep.subr.bf16.mxu1 %v9284_v33  ;;  %v9394_v32 = vcombine.high %v443_v26, %v451_v27  ;;  %v9396_v33 = vcombine.high %v444_v15, %v452_v28  ;;  %v547_v17 = vld [vmem:[%s14260_s1 + $0x1050] sm:$0xff]  ;;  %v548_v18 = vld [vmem:[%s14260_s1 + $0x1058] sm:$0xff] }
 0x152   :  { %6657 = vmatpush1.bf16.msra.mxu0 %v9281_v40  ;;  %6821 = vmatpush1.bf16.msra.mxu1 %v9283_v41  ;;  %v9393_v40 = vcombine.low %v443_v26, %v451_v27  ;;  %v9395_v41 = vcombine.low %v444_v15, %v452_v28  ;;  %v555_v26 = vld [vmem:[%s14260_s1 + $0x1090] sm:$0xff]  ;;  %v556_v15 = vld [vmem:[%s14260_s1 + $0x1098] sm:$0xff] }
 0x153   :  { %6658 = vmatprep.subr.bf16.mxu0 %v9298_v25  ;;  %6822 = vmatprep.subr.bf16.mxu1 %v9300_v42  ;;  %v9410_v25 = vcombine.high %v459_v34, %v467_v35  ;;  %v9412_v42 = vcombine.high %v460_v37, %v468_v38  ;;  %v563_v27 = vld [vmem:[%s14260_s1 + $0x10d0] sm:$0xff]  ;;  %v564_v28 = vld [vmem:[%s14260_s1 + $0x10d8] sm:$0xff] }
 0x156   :  { %6659 = vmatpush1.bf16.msra.mxu0 %v9297_v48  ;;  %6823 = vmatpush1.bf16.msra.mxu1 %v9299_v49  ;;  %v9409_v48 = vcombine.low %v459_v34, %v467_v35  ;;  %v9411_v49 = vcombine.low %v460_v37, %v468_v38  ;;  %v571_v34 = vld [vmem:[%s14260_s1 + $0x1110] sm:$0xff]  ;;  %v572_v37 = vld [vmem:[%s14260_s1 + $0x1118] sm:$0xff] }
 0x157   :  { %6660 = vmatprep.subr.bf16.mxu0 %v9314_v50  ;;  %6824 = vmatprep.subr.bf16.mxu1 %v9316_v51  ;;  %v9426_v50 = vcombine.high %v475_v43, %v483_v44  ;;  %v9428_v51 = vcombine.high %v476_v46, %v484_v47  ;;  %v579_v35 = vld [vmem:[%s14260_s1 + $0x1150] sm:$0xff]  ;;  %v580_v38 = vld [vmem:[%s14260_s1 + $0x1158] sm:$0xff] }
 0x15a   :  { %6661 = vmatpush1.bf16.msra.mxu0 %v9313_v59  ;;  %6825 = vmatpush1.bf16.msra.mxu1 %v9315_v60  ;;  %v9425_v59 = vcombine.low %v475_v43, %v483_v44  ;;  %v9427_v60 = vcombine.low %v476_v46, %v484_v47  ;;  %v587_v43 = vld [vmem:[%s14260_s1 + $0x1190] sm:$0xff]  ;;  %v588_v46 = vld [vmem:[%s14260_s1 + $0x1198] sm:$0xff] }
 0x15b   :  { %6662 = vmatprep.subr.bf16.mxu0 %v9330_v61  ;;  %6826 = vmatprep.subr.bf16.mxu1 %v9332_v62  ;;  %v9442_v61 = vcombine.high %v491_v52, %v499_v54  ;;  %v9444_v62 = vcombine.high %v492_v56, %v500_v58  ;;  %v595_v44 = vld [vmem:[%s14260_s1 + $0x11d0] sm:$0xff]  ;;  %v596_v47 = vld [vmem:[%s14260_s1 + $0x11d8] sm:$0xff] }
 0x15e   :  { %6663 = vmatpush1.bf16.msra.mxu0 %v9329_v2  ;;  %6827 = vmatpush1.bf16.msra.mxu1 %v9331_v3  ;;  %v9441_v2 = vcombine.low %v491_v52, %v499_v54  ;;  %v9443_v3 = vcombine.low %v492_v56, %v500_v58  ;;  %v603_v52 = vld [vmem:[%s14260_s1 + $0x1210] sm:$0xff]  ;;  %v604_v56 = vld [vmem:[%s14260_s1 + $0x1218] sm:$0xff] }
 0x15f   :  { %6664 = vmatprep.subr.bf16.mxu0 %v9346_v4  ;;  %6828 = vmatprep.subr.bf16.mxu1 %v9348_v5  ;;  %v9458_v4 = vcombine.high %v507_v39, %v515_v63  ;;  %v9460_v5 = vcombine.high %v508_v0, %v516_v1  ;;  %v611_v54 = vld [vmem:[%s14260_s1 + $0x1250] sm:$0xff]  ;;  %v612_v58 = vld [vmem:[%s14260_s1 + $0x1258] sm:$0xff] }
 0x162   :  { %6665 = vmatpush1.bf16.msra.mxu0 %v9345_v10  ;;  %6829 = vmatpush1.bf16.msra.mxu1 %v9347_v11  ;;  %v9457_v10 = vcombine.low %v507_v39, %v515_v63  ;;  %v9459_v11 = vcombine.low %v508_v0, %v516_v1  ;;  %v619_v39 = vld [vmem:[%s14260_s1 + $0x1290] sm:$0xff]  ;;  %v620_v0 = vld [vmem:[%s14260_s1 + $0x1298] sm:$0xff] }
 0x163   :  { %6666 = vmatprep.subr.bf16.mxu0 %v9362_v13  ;;  %6830 = vmatprep.subr.bf16.mxu1 %v9364_v14  ;;  %v9474_v13 = vcombine.high %v523_v6, %v531_v7  ;;  %v9476_v14 = vcombine.high %v524_v8, %v532_v9  ;;  %v627_v63 = vld [vmem:[%s14260_s1 + $0x12d0] sm:$0xff]  ;;  %v628_v1 = vld [vmem:[%s14260_s1 + $0x12d8] sm:$0xff] }
 0x166   :  { %6667 = vmatpush1.bf16.msra.mxu0 %v9361_v19  ;;  %6831 = vmatpush1.bf16.msra.mxu1 %v9363_v20  ;;  %v9473_v19 = vcombine.low %v523_v6, %v531_v7  ;;  %v9475_v20 = vcombine.low %v524_v8, %v532_v9  ;;  %v635_v6 = vld [vmem:[%s14260_s1 + $0x1310] sm:$0xff]  ;;  %v636_v8 = vld [vmem:[%s14260_s1 + $0x1318] sm:$0xff] }
 0x167   :  { %6668 = vmatprep.subr.bf16.mxu0 %v9378_v23  ;;  %6832 = vmatprep.subr.bf16.mxu1 %v9380_v24  ;;  %v9490_v23 = vcombine.high %v539_v16, %v547_v17  ;;  %v9492_v24 = vcombine.high %v540_v53, %v548_v18  ;;  %v643_v7 = vld [vmem:[%s14260_s1 + $0x1350] sm:$0xff]  ;;  %v644_v9 = vld [vmem:[%s14260_s1 + $0x1358] sm:$0xff] }
 0x16a   :  { %6669 = vmatpush1.bf16.msra.mxu0 %v9377_v29  ;;  %6833 = vmatpush1.bf16.msra.mxu1 %v9379_v30  ;;  %v9489_v29 = vcombine.low %v539_v16, %v547_v17  ;;  %v9491_v30 = vcombine.low %v540_v53, %v548_v18  ;;  %v651_v16 = vld [vmem:[%s14260_s1 + $0x1390] sm:$0xff]  ;;  %v652_v53 = vld [vmem:[%s14260_s1 + $0x1398] sm:$0xff] }
 0x16b   :  { %6670 = vmatprep.subr.bf16.mxu0 %v9394_v32  ;;  %6834 = vmatprep.subr.bf16.mxu1 %v9396_v33  ;;  %v9506_v32 = vcombine.high %v555_v26, %v563_v27  ;;  %v9508_v33 = vcombine.high %v556_v15, %v564_v28  ;;  %v659_v17 = vld [vmem:[%s14260_s1 + $0x13d0] sm:$0xff]  ;;  %v660_v18 = vld [vmem:[%s14260_s1 + $0x13d8] sm:$0xff] }
 0x16e   :  { %6671 = vmatpush1.bf16.msra.mxu0 %v9393_v40  ;;  %6835 = vmatpush1.bf16.msra.mxu1 %v9395_v41  ;;  %v9505_v40 = vcombine.low %v555_v26, %v563_v27  ;;  %v9507_v41 = vcombine.low %v556_v15, %v564_v28  ;;  %v667_v26 = vld [vmem:[%s14260_s1 + $0x1410] sm:$0xff]  ;;  %v668_v15 = vld [vmem:[%s14260_s1 + $0x1418] sm:$0xff] }
 0x16f   :  { %6672 = vmatprep.subr.bf16.mxu0 %v9410_v25  ;;  %6836 = vmatprep.subr.bf16.mxu1 %v9412_v42  ;;  %v9522_v25 = vcombine.high %v571_v34, %v579_v35  ;;  %v9524_v42 = vcombine.high %v572_v37, %v580_v38  ;;  %v675_v27 = vld [vmem:[%s14260_s1 + $0x1450] sm:$0xff]  ;;  %v676_v28 = vld [vmem:[%s14260_s1 + $0x1458] sm:$0xff] }
 0x172   :  { %6673 = vmatpush1.bf16.msra.mxu0 %v9409_v48  ;;  %6837 = vmatpush1.bf16.msra.mxu1 %v9411_v49  ;;  %v9521_v48 = vcombine.low %v571_v34, %v579_v35  ;;  %v9523_v49 = vcombine.low %v572_v37, %v580_v38  ;;  %v683_v34 = vld [vmem:[%s14260_s1 + $0x1490] sm:$0xff]  ;;  %v684_v37 = vld [vmem:[%s14260_s1 + $0x1498] sm:$0xff] }
 0x173   :  { %6674 = vmatprep.subr.bf16.mxu0 %v9426_v50  ;;  %6838 = vmatprep.subr.bf16.mxu1 %v9428_v51  ;;  %v9538_v50 = vcombine.high %v587_v43, %v595_v44  ;;  %v9540_v51 = vcombine.high %v588_v46, %v596_v47  ;;  %v691_v35 = vld [vmem:[%s14260_s1 + $0x14d0] sm:$0xff]  ;;  %v692_v38 = vld [vmem:[%s14260_s1 + $0x14d8] sm:$0xff] }
 0x176   :  { %6675 = vmatpush1.bf16.msra.mxu0 %v9425_v59  ;;  %6839 = vmatpush1.bf16.msra.mxu1 %v9427_v60  ;;  %v9537_v59 = vcombine.low %v587_v43, %v595_v44  ;;  %v9539_v60 = vcombine.low %v588_v46, %v596_v47  ;;  %v699_v43 = vld [vmem:[%s14260_s1 + $0x1510] sm:$0xff]  ;;  %v700_v46 = vld [vmem:[%s14260_s1 + $0x1518] sm:$0xff] }
 0x177   :  { %6676 = vmatprep.subr.bf16.mxu0 %v9442_v61  ;;  %6840 = vmatprep.subr.bf16.mxu1 %v9444_v62  ;;  %v9554_v61 = vcombine.high %v603_v52, %v611_v54  ;;  %v9556_v62 = vcombine.high %v604_v56, %v612_v58  ;;  %v707_v44 = vld [vmem:[%s14260_s1 + $0x1550] sm:$0xff]  ;;  %v708_v47 = vld [vmem:[%s14260_s1 + $0x1558] sm:$0xff] }
 0x17a   :  { %6677 = vmatpush1.bf16.msra.mxu0 %v9441_v2  ;;  %6841 = vmatpush1.bf16.msra.mxu1 %v9443_v3  ;;  %v9553_v2 = vcombine.low %v603_v52, %v611_v54  ;;  %v9555_v3 = vcombine.low %v604_v56, %v612_v58  ;;  %v715_v52 = vld [vmem:[%s14260_s1 + $0x1590] sm:$0xff]  ;;  %v716_v56 = vld [vmem:[%s14260_s1 + $0x1598] sm:$0xff] }
 0x17b   :  { %6678 = vmatprep.subr.bf16.mxu0 %v9458_v4  ;;  %6842 = vmatprep.subr.bf16.mxu1 %v9460_v5  ;;  %v9570_v4 = vcombine.high %v619_v39, %v627_v63  ;;  %v9572_v5 = vcombine.high %v620_v0, %v628_v1  ;;  %v723_v54 = vld [vmem:[%s14260_s1 + $0x15d0] sm:$0xff]  ;;  %v724_v58 = vld [vmem:[%s14260_s1 + $0x15d8] sm:$0xff] }
 0x17e   :  { %6679 = vmatpush1.bf16.msra.mxu0 %v9457_v10  ;;  %6843 = vmatpush1.bf16.msra.mxu1 %v9459_v11  ;;  %v9569_v10 = vcombine.low %v619_v39, %v627_v63  ;;  %v9571_v11 = vcombine.low %v620_v0, %v628_v1  ;;  %v731_v39 = vld [vmem:[%s14260_s1 + $0x1610] sm:$0xff]  ;;  %v732_v0 = vld [vmem:[%s14260_s1 + $0x1618] sm:$0xff] }
 0x17f   :  { %6680 = vmatprep.subr.bf16.mxu0 %v9474_v13  ;;  %6844 = vmatprep.subr.bf16.mxu1 %v9476_v14  ;;  %v9586_v13 = vcombine.high %v635_v6, %v643_v7  ;;  %v9588_v14 = vcombine.high %v636_v8, %v644_v9  ;;  %v739_v63 = vld [vmem:[%s14260_s1 + $0x1650] sm:$0xff]  ;;  %v740_v1 = vld [vmem:[%s14260_s1 + $0x1658] sm:$0xff] }
 0x182   :  { %6681 = vmatpush1.bf16.msra.mxu0 %v9473_v19  ;;  %6845 = vmatpush1.bf16.msra.mxu1 %v9475_v20  ;;  %v9585_v19 = vcombine.low %v635_v6, %v643_v7  ;;  %v9587_v20 = vcombine.low %v636_v8, %v644_v9  ;;  %v747_v6 = vld [vmem:[%s14260_s1 + $0x1690] sm:$0xff]  ;;  %v748_v8 = vld [vmem:[%s14260_s1 + $0x1698] sm:$0xff] }
 0x183   :  { %6691 = vmatprep.subr.bf16.mxu0 %v9490_v23  ;;  %6855 = vmatprep.subr.bf16.mxu1 %v9492_v24  ;;  %v9602_v23 = vcombine.high %v651_v16, %v659_v17  ;;  %v9604_v24 = vcombine.high %v652_v53, %v660_v18  ;;  %v755_v7 = vld [vmem:[%s14260_s1 + $0x16d0] sm:$0xff]  ;;  %v756_v9 = vld [vmem:[%s14260_s1 + $0x16d8] sm:$0xff] }
 0x185   :  { %6683 = vmatmul.mubr.bf16.vlgmr.msra.gmra.mrb[4].mxu0 %v11013_v22  ;;  %6847 = vmatmul.mubr.bf16.vlgmr.msra.gmra.mrb[4].mxu1 %v11013_v22 }
 0x186   :  { %6692 = vmatpush1.bf16.msra.mxu0 %v9489_v29  ;;  %6856 = vmatpush1.bf16.msra.mxu1 %v9491_v30  ;;  %v9601_v29 = vcombine.low %v651_v16, %v659_v17  ;;  %v9603_v30 = vcombine.low %v652_v53, %v660_v18  ;;  %v763_v16 = vld [vmem:[%s14260_s1 + $0x1710] sm:$0xff]  ;;  %v764_v53 = vld [vmem:[%s14260_s1 + $0x1718] sm:$0xff] }
 0x187   :  { %6693 = vmatprep.subr.bf16.mxu0 %v9506_v32  ;;  %6857 = vmatprep.subr.bf16.mxu1 %v9508_v33  ;;  %v9618_v32 = vcombine.high %v667_v26, %v675_v27  ;;  %v9620_v33 = vcombine.high %v668_v15, %v676_v28  ;;  %v771_v17 = vld [vmem:[%s14260_s1 + $0x1750] sm:$0xff]  ;;  %v772_v18 = vld [vmem:[%s14260_s1 + $0x1758] sm:$0xff] }
 0x188   :  { %6723 = vmatprep.mubr.bf16.mxu0 %v11034_v31  ;;  %6887 = vmatprep.mubr.bf16.mxu1 %v11034_v31 }
 0x18a   :  { %6694 = vmatpush1.bf16.msra.mxu0 %v9505_v40  ;;  %6858 = vmatpush1.bf16.msra.mxu1 %v9507_v41  ;;  %v9617_v40 = vcombine.low %v667_v26, %v675_v27  ;;  %v9619_v41 = vcombine.low %v668_v15, %v676_v28  ;;  %v779_v26 = vld [vmem:[%s14260_s1 + $0x1790] sm:$0xff]  ;;  %v780_v15 = vld [vmem:[%s14260_s1 + $0x1798] sm:$0xff] }
 0x18b   :  { %6695 = vmatprep.subr.bf16.mxu0 %v9522_v25  ;;  %6859 = vmatprep.subr.bf16.mxu1 %v9524_v42  ;;  %v9634_v25 = vcombine.high %v683_v34, %v691_v35  ;;  %v9636_v42 = vcombine.high %v684_v37, %v692_v38  ;;  %v787_v27 = vld [vmem:[%s14260_s1 + $0x17d0] sm:$0xff]  ;;  %v788_v28 = vld [vmem:[%s14260_s1 + $0x17d8] sm:$0xff] }
 0x18e   :  { %6696 = vmatpush1.bf16.msra.mxu0 %v9521_v48  ;;  %6860 = vmatpush1.bf16.msra.mxu1 %v9523_v49  ;;  %v9633_v48 = vcombine.low %v683_v34, %v691_v35  ;;  %v9635_v49 = vcombine.low %v684_v37, %v692_v38  ;;  %v795_v34 = vld [vmem:[%s14260_s1 + $0x1810] sm:$0xff]  ;;  %v796_v37 = vld [vmem:[%s14260_s1 + $0x1818] sm:$0xff] }
 0x18f   :  { %6697 = vmatprep.subr.bf16.mxu0 %v9538_v50  ;;  %6861 = vmatprep.subr.bf16.mxu1 %v9540_v51  ;;  %v9650_v50 = vcombine.high %v699_v43, %v707_v44  ;;  %v9652_v51 = vcombine.high %v700_v46, %v708_v47  ;;  %v803_v35 = vld [vmem:[%s14260_s1 + $0x1850] sm:$0xff]  ;;  %v804_v38 = vld [vmem:[%s14260_s1 + $0x1858] sm:$0xff] }
 0x192   :  { %6698 = vmatpush1.bf16.msra.mxu0 %v9537_v59  ;;  %6862 = vmatpush1.bf16.msra.mxu1 %v9539_v60  ;;  %v9649_v59 = vcombine.low %v699_v43, %v707_v44  ;;  %v9651_v60 = vcombine.low %v700_v46, %v708_v47  ;;  %v811_v43 = vld [vmem:[%s14260_s1 + $0x1890] sm:$0xff]  ;;  %v812_v46 = vld [vmem:[%s14260_s1 + $0x1898] sm:$0xff] }
 0x193   :  { %6699 = vmatprep.subr.bf16.mxu0 %v9554_v61  ;;  %6863 = vmatprep.subr.bf16.mxu1 %v9556_v62  ;;  %v9666_v61 = vcombine.high %v715_v52, %v723_v54  ;;  %v9668_v62 = vcombine.high %v716_v56, %v724_v58  ;;  %v819_v44 = vld [vmem:[%s14260_s1 + $0x18d0] sm:$0xff]  ;;  %v820_v47 = vld [vmem:[%s14260_s1 + $0x18d8] sm:$0xff] }
 0x196   :  { %6700 = vmatpush1.bf16.msra.mxu0 %v9553_v2  ;;  %6864 = vmatpush1.bf16.msra.mxu1 %v9555_v3  ;;  %v9665_v2 = vcombine.low %v715_v52, %v723_v54  ;;  %v9667_v3 = vcombine.low %v716_v56, %v724_v58  ;;  %v827_v52 = vld [vmem:[%s14260_s1 + $0x1910] sm:$0xff]  ;;  %v828_v56 = vld [vmem:[%s14260_s1 + $0x1918] sm:$0xff] }
 0x197   :  { %6701 = vmatprep.subr.bf16.mxu0 %v9570_v4  ;;  %6865 = vmatprep.subr.bf16.mxu1 %v9572_v5  ;;  %v9682_v4 = vcombine.high %v731_v39, %v739_v63  ;;  %v9684_v5 = vcombine.high %v732_v0, %v740_v1  ;;  %v835_v54 = vld [vmem:[%s14260_s1 + $0x1950] sm:$0xff]  ;;  %v836_v58 = vld [vmem:[%s14260_s1 + $0x1958] sm:$0xff] }
 0x19a   :  { %6702 = vmatpush1.bf16.msra.mxu0 %v9569_v10  ;;  %6866 = vmatpush1.bf16.msra.mxu1 %v9571_v11  ;;  %v9681_v10 = vcombine.low %v731_v39, %v739_v63  ;;  %v9683_v11 = vcombine.low %v732_v0, %v740_v1  ;;  %v843_v39 = vld [vmem:[%s14260_s1 + $0x1990] sm:$0xff]  ;;  %v844_v0 = vld [vmem:[%s14260_s1 + $0x1998] sm:$0xff] }
 0x19b   :  { %6703 = vmatprep.subr.bf16.mxu0 %v9586_v13  ;;  %6867 = vmatprep.subr.bf16.mxu1 %v9588_v14  ;;  %v9698_v13 = vcombine.high %v747_v6, %v755_v7  ;;  %v9700_v14 = vcombine.high %v748_v8, %v756_v9  ;;  %v851_v63 = vld [vmem:[%s14260_s1 + $0x19d0] sm:$0xff]  ;;  %v852_v1 = vld [vmem:[%s14260_s1 + $0x19d8] sm:$0xff] }
 0x19e   :  { %6704 = vmatpush1.bf16.msra.mxu0 %v9585_v19  ;;  %6868 = vmatpush1.bf16.msra.mxu1 %v9587_v20  ;;  %v9697_v19 = vcombine.low %v747_v6, %v755_v7  ;;  %v9699_v20 = vcombine.low %v748_v8, %v756_v9  ;;  %v859_v6 = vld [vmem:[%s14260_s1 + $0x1a10] sm:$0xff]  ;;  %v860_v8 = vld [vmem:[%s14260_s1 + $0x1a18] sm:$0xff] }
 0x19f   :  { %6705 = vmatprep.subr.bf16.mxu0 %v9602_v23  ;;  %6869 = vmatprep.subr.bf16.mxu1 %v9604_v24  ;;  %v9714_v23 = vcombine.high %v763_v16, %v771_v17  ;;  %v9716_v24 = vcombine.high %v764_v53, %v772_v18  ;;  %v867_v7 = vld [vmem:[%s14260_s1 + $0x1a50] sm:$0xff]  ;;  %v868_v9 = vld [vmem:[%s14260_s1 + $0x1a58] sm:$0xff] }
 0x1a2   :  { %6706 = vmatpush1.bf16.msra.mxu0 %v9601_v29  ;;  %6870 = vmatpush1.bf16.msra.mxu1 %v9603_v30  ;;  %v9713_v29 = vcombine.low %v763_v16, %v771_v17  ;;  %v9715_v30 = vcombine.low %v764_v53, %v772_v18  ;;  %v875_v16 = vld [vmem:[%s14260_s1 + $0x1a90] sm:$0xff]  ;;  %v876_v53 = vld [vmem:[%s14260_s1 + $0x1a98] sm:$0xff] }
 0x1a3   :  { %6707 = vmatprep.subr.bf16.mxu0 %v9618_v32  ;;  %6871 = vmatprep.subr.bf16.mxu1 %v9620_v33  ;;  %v9730_v32 = vcombine.high %v779_v26, %v787_v27  ;;  %v9732_v33 = vcombine.high %v780_v15, %v788_v28  ;;  %v883_v17 = vld [vmem:[%s14260_s1 + $0x1ad0] sm:$0xff]  ;;  %v884_v18 = vld [vmem:[%s14260_s1 + $0x1ad8] sm:$0xff] }
 0x1a6   :  { %6708 = vmatpush1.bf16.msra.mxu0 %v9617_v40  ;;  %6872 = vmatpush1.bf16.msra.mxu1 %v9619_v41  ;;  %v9729_v40 = vcombine.low %v779_v26, %v787_v27  ;;  %v9731_v41 = vcombine.low %v780_v15, %v788_v28  ;;  %v891_v26 = vld [vmem:[%s14260_s1 + $0x1b10] sm:$0xff]  ;;  %v892_v15 = vld [vmem:[%s14260_s1 + $0x1b18] sm:$0xff] }
 0x1a7   :  { %6709 = vmatprep.subr.bf16.mxu0 %v9634_v25  ;;  %6873 = vmatprep.subr.bf16.mxu1 %v9636_v42  ;;  %v9746_v25 = vcombine.high %v795_v34, %v803_v35  ;;  %v9748_v42 = vcombine.high %v796_v37, %v804_v38  ;;  %v899_v27 = vld [vmem:[%s14260_s1 + $0x1b50] sm:$0xff]  ;;  %v900_v28 = vld [vmem:[%s14260_s1 + $0x1b58] sm:$0xff] }
 0x1aa   :  { %6710 = vmatpush1.bf16.msra.mxu0 %v9633_v48  ;;  %6874 = vmatpush1.bf16.msra.mxu1 %v9635_v49  ;;  %v9745_v48 = vcombine.low %v795_v34, %v803_v35  ;;  %v9747_v49 = vcombine.low %v796_v37, %v804_v38  ;;  %v9844_v34 = vcombine.high %v892_v15, %v900_v28  ;;  %v907_v35 = vld [vmem:[%s14260_s1 + $0x1b90] sm:$0xff] }
 0x1ab   :  { %6711 = vmatprep.subr.bf16.mxu0 %v9650_v50  ;;  %6875 = vmatprep.subr.bf16.mxu1 %v9652_v51  ;;  %v9762_v50 = vcombine.high %v811_v43, %v819_v44  ;;  %v9764_v51 = vcombine.high %v812_v46, %v820_v47  ;;  %v915_v37 = vld [vmem:[%s14260_s1 + $0x1bd0] sm:$0xff] }
 0x1ae   :  { %6712 = vmatpush1.bf16.msra.mxu0 %v9649_v59  ;;  %6876 = vmatpush1.bf16.msra.mxu1 %v9651_v60  ;;  %v9761_v59 = vcombine.low %v811_v43, %v819_v44  ;;  %v9763_v60 = vcombine.low %v812_v46, %v820_v47  ;;  %v9841_v44 = vcombine.low %v891_v26, %v899_v27 }
 0x1af   :  { %6713 = vmatprep.subr.bf16.mxu0 %v9666_v61  ;;  %6877 = vmatprep.subr.bf16.mxu1 %v9668_v62  ;;  %v9778_v61 = vcombine.high %v827_v52, %v835_v54  ;;  %v9780_v62 = vcombine.high %v828_v56, %v836_v58 }
 0x1b2   :  { %6714 = vmatpush1.bf16.msra.mxu0 %v9665_v2  ;;  %6878 = vmatpush1.bf16.msra.mxu1 %v9667_v3  ;;  %v9777_v2 = vcombine.low %v827_v52, %v835_v54  ;;  %v9779_v3 = vcombine.low %v828_v56, %v836_v58  ;;  %v923_v52 = vld [vmem:[%s14260_s1 + $0x1c10] sm:$0xff]  ;;  %v924_v56 = vld [vmem:[%s14260_s1 + $0x1c18] sm:$0xff] }
 0x1b3   :  { %6715 = vmatprep.subr.bf16.mxu0 %v9682_v4  ;;  %6879 = vmatprep.subr.bf16.mxu1 %v9684_v5  ;;  %v9794_v4 = vcombine.high %v843_v39, %v851_v63  ;;  %v9796_v5 = vcombine.high %v844_v0, %v852_v1  ;;  %v931_v54 = vld [vmem:[%s14260_s1 + $0x1c50] sm:$0xff]  ;;  %v932_v58 = vld [vmem:[%s14260_s1 + $0x1c58] sm:$0xff] }
 0x1b6   :  { %6716 = vmatpush1.bf16.msra.mxu0 %v9681_v10  ;;  %6880 = vmatpush1.bf16.msra.mxu1 %v9683_v11  ;;  %v9793_v10 = vcombine.low %v843_v39, %v851_v63  ;;  %v9795_v11 = vcombine.low %v844_v0, %v852_v1  ;;  %v939_v39 = vld [vmem:[%s14260_s1 + $0x1c90] sm:$0xff]  ;;  %v940_v0 = vld [vmem:[%s14260_s1 + $0x1c98] sm:$0xff] }
 0x1b7   :  { %6717 = vmatprep.subr.bf16.mxu0 %v9698_v13  ;;  %6881 = vmatprep.subr.bf16.mxu1 %v9700_v14  ;;  %v9810_v13 = vcombine.high %v859_v6, %v867_v7  ;;  %v9812_v14 = vcombine.high %v860_v8, %v868_v9  ;;  %v947_v63 = vld [vmem:[%s14260_s1 + $0x1cd0] sm:$0xff]  ;;  %v948_v1 = vld [vmem:[%s14260_s1 + $0x1cd8] sm:$0xff] }
 0x1ba   :  { %6718 = vmatpush1.bf16.msra.mxu0 %v9697_v19  ;;  %6882 = vmatpush1.bf16.msra.mxu1 %v9699_v20  ;;  %v9809_v19 = vcombine.low %v859_v6, %v867_v7  ;;  %v9811_v20 = vcombine.low %v860_v8, %v868_v9  ;;  %v955_v6 = vld [vmem:[%s14260_s1 + $0x1d10] sm:$0xff]  ;;  %v956_v8 = vld [vmem:[%s14260_s1 + $0x1d18] sm:$0xff] }
 0x1bb   :  { %6719 = vmatprep.subr.bf16.mxu0 %v9714_v23  ;;  %6883 = vmatprep.subr.bf16.mxu1 %v9716_v24  ;;  %v9826_v23 = vcombine.high %v875_v16, %v883_v17  ;;  %v9828_v24 = vcombine.high %v876_v53, %v884_v18  ;;  %v963_v7 = vld [vmem:[%s14260_s1 + $0x1d50] sm:$0xff]  ;;  %v964_v9 = vld [vmem:[%s14260_s1 + $0x1d58] sm:$0xff] }
 0x1be   :  { %6720 = vmatpush1.bf16.msra.mxu0 %v9713_v29  ;;  %6884 = vmatpush1.bf16.msra.mxu1 %v9715_v30  ;;  %v9825_v29 = vcombine.low %v875_v16, %v883_v17  ;;  %v9827_v30 = vcombine.low %v876_v53, %v884_v18  ;;  %v971_v16 = vld [vmem:[%s14260_s1 + $0x1d90] sm:$0xff]  ;;  %v972_v53 = vld [vmem:[%s14260_s1 + $0x1d98] sm:$0xff] }
 0x1bf   :  { %6721 = vmatprep.subr.bf16.mxu0 %v9730_v32  ;;  %6885 = vmatprep.subr.bf16.mxu1 %v9732_v33  ;;  %v9842_v32 = vcombine.high %v891_v26, %v899_v27  ;;  %v979_v17 = vld [vmem:[%s14260_s1 + $0x1dd0] sm:$0xff]  ;;  %v980_v18 = vld [vmem:[%s14260_s1 + $0x1dd8] sm:$0xff] }
 0x1c0   :  { %v987_v26 = vld [vmem:[%s14260_s1 + $0x1e10] sm:$0xff] }
 0x1c1   :  { %v995_v27 = vld [vmem:[%s14260_s1 + $0x1e50] sm:$0xff] }
 0x1c2   :  { %6722 = vmatpush1.bf16.msra.mxu0 %v9729_v40  ;;  %6886 = vmatpush1.bf16.msra.mxu1 %v9731_v41  ;;  %v908_v41 = vld [vmem:[%s14260_s1 + $0x1b98] sm:$0xff] }
 0x1c3   :  { %6732 = vmatprep.subr.bf16.mxu0 %v9746_v25  ;;  %6896 = vmatprep.subr.bf16.mxu1 %v9748_v42  ;;  %v916_v25 = vld [vmem:[%s14260_s1 + $0x1bd8] sm:$0xff] }
 0x1c5   :  { %6724 = vmatmul.mubr.bf16.vlgmr.msra.gmra.mrb[4].mxu0 %v11222_v36  ;;  %6888 = vmatmul.mubr.bf16.vlgmr.msra.gmra.mrb[4].mxu1 %v11222_v36 }
 0x1c6   :  { %6733 = vmatpush1.bf16.msra.mxu0 %v9745_v48  ;;  %6897 = vmatpush1.bf16.msra.mxu1 %v9747_v49  ;;  %v9843_v48 = vcombine.low %v892_v15, %v900_v28  ;;  %v9858_v49 = vcombine.high %v907_v35, %v915_v37  ;;  %v988_v15 = vld [vmem:[%s14260_s1 + $0x1e18] sm:$0xff] }
 0x1c7   :  { %6734 = vmatprep.subr.bf16.mxu0 %v9762_v50  ;;  %6898 = vmatprep.subr.bf16.mxu1 %v9764_v51  ;;  %v9860_v51 = vcombine.high %v908_v41, %v916_v25  ;;  %v996_v28 = vld [vmem:[%s14260_s1 + $0x1e58] sm:$0xff] }
 0x1c8   :  { %6764 = vmatprep.mubr.bf16.mxu0 %v11243_v45  ;;  %6928 = vmatprep.mubr.bf16.mxu1 %v11243_v45 }
 0x1ca   :  { %6735 = vmatpush1.bf16.msra.mxu0 %v9761_v59  ;;  %6899 = vmatpush1.bf16.msra.mxu1 %v9763_v60  ;;  %v9857_v59 = vcombine.low %v907_v35, %v915_v37  ;;  %v9859_v60 = vcombine.low %v908_v41, %v916_v25  ;;  %v1003_v35 = vld [vmem:[%s14260_s1 + $0x1e90] sm:$0xff]  ;;  %v1004_v41 = vld [vmem:[%s14260_s1 + $0x1e98] sm:$0xff] }
 0x1cb   :  { %6736 = vmatprep.subr.bf16.mxu0 %v9778_v61  ;;  %6900 = vmatprep.subr.bf16.mxu1 %v9780_v62  ;;  %v9874_v61 = vcombine.high %v923_v52, %v931_v54  ;;  %v9876_v62 = vcombine.high %v924_v56, %v932_v58  ;;  %v1011_v37 = vld [vmem:[%s14260_s1 + $0x1ed0] sm:$0xff]  ;;  %v1012_v25 = vld [vmem:[%s14260_s1 + $0x1ed8] sm:$0xff] }
 0x1ce   :  { %6737 = vmatpush1.bf16.msra.mxu0 %v9777_v2  ;;  %6901 = vmatpush1.bf16.msra.mxu1 %v9779_v3  ;;  %v9873_v2 = vcombine.low %v923_v52, %v931_v54  ;;  %v9875_v3 = vcombine.low %v924_v56, %v932_v58  ;;  %v9953_v52 = vcombine.low %v1003_v35, %v1011_v37 }
 0x1cf   :  { %6738 = vmatprep.subr.bf16.mxu0 %v9794_v4  ;;  %6902 = vmatprep.subr.bf16.mxu1 %v9796_v5  ;;  %v9890_v4 = vcombine.high %v939_v39, %v947_v63  ;;  %v9892_v5 = vcombine.high %v940_v0, %v948_v1  ;;  %v9955_v54 = vcombine.low %v1004_v41, %v1012_v25 }
 0x1d2   :  { %6739 = vmatpush1.bf16.msra.mxu0 %v9793_v10  ;;  %6903 = vmatpush1.bf16.msra.mxu1 %v9795_v11  ;;  %v9889_v10 = vcombine.low %v939_v39, %v947_v63  ;;  %v9891_v11 = vcombine.low %v940_v0, %v948_v1 }
 0x1d3   :  { %6740 = vmatprep.subr.bf16.mxu0 %v9810_v13  ;;  %6904 = vmatprep.subr.bf16.mxu1 %v9812_v14  ;;  %v9906_v13 = vcombine.high %v955_v6, %v963_v7  ;;  %v9908_v14 = vcombine.high %v956_v8, %v964_v9 }
 0x1d6   :  { %6741 = vmatpush1.bf16.msra.mxu0 %v9809_v19  ;;  %6905 = vmatpush1.bf16.msra.mxu1 %v9811_v20  ;;  %v9905_v19 = vcombine.low %v955_v6, %v963_v7  ;;  %v9907_v20 = vcombine.low %v956_v8, %v964_v9 }
 0x1d7   :  { %6742 = vmatprep.subr.bf16.mxu0 %v9826_v23  ;;  %6906 = vmatprep.subr.bf16.mxu1 %v9828_v24  ;;  %v9922_v23 = vcombine.high %v971_v16, %v979_v17  ;;  %v9924_v24 = vcombine.high %v972_v53, %v980_v18 }
 0x1d8   :  { %v12091_v33 = vpop.f32.mrb[0].mxu0  ;;  %v12099_v38 = vpop.f32.mrb[0].mxu1 }
 0x1d9   :  { %v12101_v40 = vpop.f32.mrb[1].mxu0  ;;  %v12109_v42 = vpop.f32.mrb[1].mxu1 }
 0x1da   :  { %v6442_v43 = vpop.f32.mrb[2].mxu0  ;;  %6743 = vmatpush1.bf16.msra.mxu0 %v9825_v29  ;;  %v6606_v46 = vpop.f32.mrb[2].mxu1  ;;  %6907 = vmatpush1.bf16.msra.mxu1 %v9827_v30  ;;  %v9921_v29 = vcombine.low %v971_v16, %v979_v17  ;;  %v9923_v30 = vcombine.low %v972_v53, %v980_v18 }
 0x1db   :  { %v6443_v47 = vpop.f32.mrb[3].mxu0  ;;  %6744 = vmatprep.subr.bf16.mxu0 %v9842_v32  ;;  %v6607_v50 = vpop.f32.mrb[3].mxu1  ;;  %6908 = vmatprep.subr.bf16.mxu1 %v9844_v34  ;;  %v9938_v32 = vcombine.high %v987_v26, %v995_v27  ;;  %v9940_v34 = vcombine.high %v988_v15, %v996_v28  ;;  %v9937_v43 = vcombine.low %v987_v26, %v995_v27 }
 0x1dc   :  { %v9954_v46 = vcombine.high %v1003_v35, %v1011_v37  ;;  %v9956_v47 = vcombine.high %v1004_v41, %v1012_v25  ;;  %v1020_v50 = vld [vmem:[%s14260_s1 + $0x1f18] sm:$0xff] }
 0x1de   :  { %6745 = vmatpush1.bf16.msra.mxu0 %v9841_v44  ;;  %6909 = vmatpush1.bf16.msra.mxu1 %v9843_v48  ;;  %v9939_v44 = vcombine.low %v988_v15, %v996_v28  ;;  %v1019_v48 = vld [vmem:[%s14260_s1 + $0x1f10] sm:$0xff] }
 0x1df   :  { %6746 = vmatprep.subr.bf16.mxu0 %v9858_v49  ;;  %6910 = vmatprep.subr.bf16.mxu1 %v9860_v51  ;;  %v1027_v49 = vld [vmem:[%s14260_s1 + $0x1f50] sm:$0xff]  ;;  %v1028_v51 = vld [vmem:[%s14260_s1 + $0x1f58] sm:$0xff] }
 0x1e0   :  { %v9970_v56 = vcombine.high %v1019_v48, %v1027_v49  ;;  %v9972_v58 = vcombine.high %v1020_v50, %v1028_v51  ;;  %v9969_v39 = vcombine.low %v1019_v48, %v1027_v49  ;;  %v9971_v63 = vcombine.low %v1020_v50, %v1028_v51 }
 0x1e2   :  { %6747 = vmatpush1.bf16.msra.mxu0 %v9857_v59  ;;  %6911 = vmatpush1.bf16.msra.mxu1 %v9859_v60  ;;  %v1035_v59 = vld [vmem:[%s14260_s1 + $0x1f90] sm:$0xff] }
 0x1e3   :  { %6748 = vmatprep.subr.bf16.mxu0 %v9874_v61  ;;  %6912 = vmatprep.subr.bf16.mxu1 %v9876_v62  ;;  %v1043_v60 = vld [vmem:[%s14260_s1 + $0x1fd0] sm:$0xff]  ;;  %v1036_v61 = vld [vmem:[%s14260_s1 + $0x1f98] sm:$0xff] }
 0x1e4   :  { %v1044_v62 = vld [vmem:[%s14260_s1 + $0x1fd8] sm:$0xff]  ;;  %v9986_v0 = vcombine.high %v1035_v59, %v1043_v60  ;;  %v9985_v6 = vcombine.low %v1035_v59, %v1043_v60 }
 0x1e5   :  { %v9988_v1 = vcombine.high %v1036_v61, %v1044_v62  ;;  %v9987_v7 = vcombine.low %v1036_v61, %v1044_v62 }
 0x1e6   :  { %6749 = vmatpush1.bf16.msra.mxu0 %v9873_v2  ;;  %6913 = vmatpush1.bf16.msra.mxu1 %v9875_v3  ;;  %v29_v2 = vld [vmem:[%s14260_s1 + $0x20] sm:$0xff] }
 0x1e7   :  { %6750 = vmatprep.subr.bf16.mxu0 %v9890_v4  ;;  %6914 = vmatprep.subr.bf16.mxu1 %v9892_v5  ;;  %v37_v3 = vld [vmem:[%s14260_s1 + $0x60] sm:$0xff]  ;;  %v30_v4 = vld [vmem:[%s14260_s1 + $0x28] sm:$0xff] }
 0x1e8   :  { %v38_v5 = vld [vmem:[%s14260_s1 + $0x68] sm:$0xff]  ;;  %v8982_v8 = vcombine.high %v29_v2, %v37_v3  ;;  %v8981_v16 = vcombine.low %v29_v2, %v37_v3 }
 0x1e9   :  { %v8984_v9 = vcombine.high %v30_v4, %v38_v5  ;;  %v8983_v17 = vcombine.low %v30_v4, %v38_v5 }
 0x1ea   :  { %6751 = vmatpush1.bf16.msra.mxu0 %v9889_v10  ;;  %6915 = vmatpush1.bf16.msra.mxu1 %v9891_v11  ;;  %v45_v10 = vld [vmem:[%s14260_s1 + $0xa0] sm:$0xff] }
 0x1eb   :  { %6752 = vmatprep.subr.bf16.mxu0 %v9906_v13  ;;  %6916 = vmatprep.subr.bf16.mxu1 %v9908_v14  ;;  %v53_v11 = vld [vmem:[%s14260_s1 + $0xe0] sm:$0xff]  ;;  %v46_v13 = vld [vmem:[%s14260_s1 + $0xa8] sm:$0xff] }
 0x1ec   :  { %v54_v14 = vld [vmem:[%s14260_s1 + $0xe8] sm:$0xff]  ;;  %v8998_v53 = vcombine.high %v45_v10, %v53_v11  ;;  %v8997_v26 = vcombine.low %v45_v10, %v53_v11 }
 0x1ed   :  { %v9000_v18 = vcombine.high %v46_v13, %v54_v14  ;;  %v8999_v27 = vcombine.low %v46_v13, %v54_v14 }
 0x1ee   :  { %6753 = vmatpush1.bf16.msra.mxu0 %v9905_v19  ;;  %6917 = vmatpush1.bf16.msra.mxu1 %v9907_v20  ;;  %v61_v19 = vld [vmem:[%s14260_s1 + $0x120] sm:$0xff] }
 0x1ef   :  { %6754 = vmatprep.subr.bf16.mxu0 %v9922_v23  ;;  %6918 = vmatprep.subr.bf16.mxu1 %v9924_v24  ;;  %v69_v20 = vld [vmem:[%s14260_s1 + $0x160] sm:$0xff]  ;;  %v62_v23 = vld [vmem:[%s14260_s1 + $0x128] sm:$0xff] }
 0x1f0   :  { %v70_v24 = vld [vmem:[%s14260_s1 + $0x168] sm:$0xff]  ;;  %v9014_v15 = vcombine.high %v61_v19, %v69_v20  ;;  %v9013_v35 = vcombine.low %v61_v19, %v69_v20 }
 0x1f1   :  { %v9016_v28 = vcombine.high %v62_v23, %v70_v24  ;;  %v9015_v37 = vcombine.low %v62_v23, %v70_v24 }
 0x1f2   :  { %6755 = vmatpush1.bf16.msra.mxu0 %v9921_v29  ;;  %6919 = vmatpush1.bf16.msra.mxu1 %v9923_v30  ;;  %v77_v29 = vld [vmem:[%s14260_s1 + $0x1a0] sm:$0xff] }
 0x1f3   :  { %6756 = vmatprep.subr.bf16.mxu0 %v9938_v32  ;;  %6920 = vmatprep.subr.bf16.mxu1 %v9940_v34  ;;  %v85_v30 = vld [vmem:[%s14260_s1 + $0x1e0] sm:$0xff]  ;;  %v78_v32 = vld [vmem:[%s14260_s1 + $0x1a8] sm:$0xff] }
 0x1f4   :  { %v86_v34 = vld [vmem:[%s14260_s1 + $0x1e8] sm:$0xff]  ;;  %v9030_v41 = vcombine.high %v77_v29, %v85_v30  ;;  %v9029_v48 = vcombine.low %v77_v29, %v85_v30 }
 0x1f5   :  { %v9032_v25 = vcombine.high %v78_v32, %v86_v34  ;;  %v9031_v49 = vcombine.low %v78_v32, %v86_v34 }
 0x1f6   :  { %6757 = vmatpush1.bf16.msra.mxu0 %v9937_v43  ;;  %6921 = vmatpush1.bf16.msra.mxu1 %v9939_v44  ;;  %v93_v43 = vld [vmem:[%s14260_s1 + $0x220] sm:$0xff] }
 0x1f7   :  { %6758 = vmatprep.subr.bf16.mxu0 %v9954_v46  ;;  %6922 = vmatprep.subr.bf16.mxu1 %v9956_v47  ;;  %v101_v44 = vld [vmem:[%s14260_s1 + $0x260] sm:$0xff]  ;;  %v94_v46 = vld [vmem:[%s14260_s1 + $0x228] sm:$0xff] }
 0x1f8   :  { %v102_v47 = vld [vmem:[%s14260_s1 + $0x268] sm:$0xff]  ;;  %v9046_v50 = vcombine.high %v93_v43, %v101_v44  ;;  %v9045_v59 = vcombine.low %v93_v43, %v101_v44 }
 0x1f9   :  { %v9048_v51 = vcombine.high %v94_v46, %v102_v47  ;;  %v9047_v60 = vcombine.low %v94_v46, %v102_v47 }
 0x1fa   :  { %6759 = vmatpush1.bf16.msra.mxu0 %v9953_v52  ;;  %6923 = vmatpush1.bf16.msra.mxu1 %v9955_v54  ;;  %v109_v52 = vld [vmem:[%s14260_s1 + $0x2a0] sm:$0xff] }
 0x1fb   :  { %6760 = vmatprep.subr.bf16.mxu0 %v9970_v56  ;;  %6924 = vmatprep.subr.bf16.mxu1 %v9972_v58  ;;  %v117_v54 = vld [vmem:[%s14260_s1 + $0x2e0] sm:$0xff]  ;;  %v110_v56 = vld [vmem:[%s14260_s1 + $0x2a8] sm:$0xff] }
 0x1fc   :  { %v118_v58 = vld [vmem:[%s14260_s1 + $0x2e8] sm:$0xff]  ;;  %v9062_v61 = vcombine.high %v109_v52, %v117_v54  ;;  %v9061_v2 = vcombine.low %v109_v52, %v117_v54 }
 0x1fd   :  { %v9064_v62 = vcombine.high %v110_v56, %v118_v58  ;;  %v9063_v3 = vcombine.low %v110_v56, %v118_v58 }
 0x1fe   :  { %6761 = vmatpush1.bf16.msra.mxu0 %v9969_v39  ;;  %6925 = vmatpush1.bf16.msra.mxu1 %v9971_v63  ;;  %v125_v39 = vld [vmem:[%s14260_s1 + $0x320] sm:$0xff] }
 0x1ff   :  { %6762 = vmatprep.subr.bf16.mxu0 %v9986_v0  ;;  %6926 = vmatprep.subr.bf16.mxu1 %v9988_v1  ;;  %v133_v63 = vld [vmem:[%s14260_s1 + $0x360] sm:$0xff]  ;;  %v126_v0 = vld [vmem:[%s14260_s1 + $0x328] sm:$0xff] }
 0x200   :  { %v134_v1 = vld [vmem:[%s14260_s1 + $0x368] sm:$0xff]  ;;  %v9078_v4 = vcombine.high %v125_v39, %v133_v63  ;;  %v9077_v10 = vcombine.low %v125_v39, %v133_v63 }
 0x201   :  { %v9080_v5 = vcombine.high %v126_v0, %v134_v1  ;;  %v9079_v11 = vcombine.low %v126_v0, %v134_v1 }
 0x202   :  { %6763 = vmatpush1.bf16.msra.mxu0 %v9985_v6  ;;  %6927 = vmatpush1.bf16.msra.mxu1 %v9987_v7  ;;  %v141_v6 = vld [vmem:[%s14260_s1 + $0x3a0] sm:$0xff] }
 0x203   :  { %6937 = vmatprep.subr.bf16.mxu0 %v8982_v8  ;;  %7101 = vmatprep.subr.bf16.mxu1 %v8984_v9  ;;  %v149_v7 = vld [vmem:[%s14260_s1 + $0x3e0] sm:$0xff]  ;;  %v142_v8 = vld [vmem:[%s14260_s1 + $0x3a8] sm:$0xff] }
 0x204   :  { %v150_v9 = vld [vmem:[%s14260_s1 + $0x3e8] sm:$0xff]  ;;  %v9094_v13 = vcombine.high %v141_v6, %v149_v7  ;;  %v9093_v19 = vcombine.low %v141_v6, %v149_v7 }
 0x205   :  { %6765 = vmatmul.mubr.bf16.vlgmr.msra.gmra.mrb[4].mxu0 %v11431_v55  ;;  %6929 = vmatmul.mubr.bf16.vlgmr.msra.gmra.mrb[4].mxu1 %v11431_v55  ;;  %v9096_v14 = vcombine.high %v142_v8, %v150_v9  ;;  %v9095_v20 = vcombine.low %v142_v8, %v150_v9 }
 0x206   :  { %6938 = vmatpush1.bf16.msra.mxu0 %v8981_v16  ;;  %7102 = vmatpush1.bf16.msra.mxu1 %v8983_v17  ;;  %v157_v16 = vld [vmem:[%s14260_s1 + $0x420] sm:$0xff] }
 0x207   :  { %6939 = vmatprep.subr.bf16.mxu0 %v8998_v53  ;;  %7103 = vmatprep.subr.bf16.mxu1 %v9000_v18  ;;  %v165_v17 = vld [vmem:[%s14260_s1 + $0x460] sm:$0xff]  ;;  %v158_v53 = vld [vmem:[%s14260_s1 + $0x428] sm:$0xff] }
 0x208   :  { %6969 = vmatprep.mubr.bf16.mxu0 %v10678_v57  ;;  %7133 = vmatprep.mubr.bf16.mxu1 %v10678_v57  ;;  %v166_v18 = vld [vmem:[%s14260_s1 + $0x468] sm:$0xff]  ;;  %v9110_v23 = vcombine.high %v157_v16, %v165_v17  ;;  %v9109_v29 = vcombine.low %v157_v16, %v165_v17 }
 0x209   :  { %v9112_v24 = vcombine.high %v158_v53, %v166_v18  ;;  %v9111_v30 = vcombine.low %v158_v53, %v166_v18 }
 0x20a   :  { %6940 = vmatpush1.bf16.msra.mxu0 %v8997_v26  ;;  %7104 = vmatpush1.bf16.msra.mxu1 %v8999_v27  ;;  %v173_v26 = vld [vmem:[%s14260_s1 + $0x4a0] sm:$0xff] }
 0x20b   :  { %6941 = vmatprep.subr.bf16.mxu0 %v9014_v15  ;;  %7105 = vmatprep.subr.bf16.mxu1 %v9016_v28  ;;  %v181_v27 = vld [vmem:[%s14260_s1 + $0x4e0] sm:$0xff]  ;;  %v174_v15 = vld [vmem:[%s14260_s1 + $0x4a8] sm:$0xff] }
 0x20c   :  { %v182_v28 = vld [vmem:[%s14260_s1 + $0x4e8] sm:$0xff]  ;;  %v9126_v32 = vcombine.high %v173_v26, %v181_v27  ;;  %v9125_v43 = vcombine.low %v173_v26, %v181_v27 }
 0x20d   :  { %v9128_v34 = vcombine.high %v174_v15, %v182_v28  ;;  %v9127_v44 = vcombine.low %v174_v15, %v182_v28 }
 0x20e   :  { %6942 = vmatpush1.bf16.msra.mxu0 %v9013_v35  ;;  %7106 = vmatpush1.bf16.msra.mxu1 %v9015_v37  ;;  %v189_v35 = vld [vmem:[%s14260_s1 + $0x520] sm:$0xff] }
 0x20f   :  { %6943 = vmatprep.subr.bf16.mxu0 %v9030_v41  ;;  %7107 = vmatprep.subr.bf16.mxu1 %v9032_v25  ;;  %v197_v37 = vld [vmem:[%s14260_s1 + $0x560] sm:$0xff]  ;;  %v190_v41 = vld [vmem:[%s14260_s1 + $0x528] sm:$0xff] }
 0x210   :  { %v198_v25 = vld [vmem:[%s14260_s1 + $0x568] sm:$0xff]  ;;  %v9142_v46 = vcombine.high %v189_v35, %v197_v37  ;;  %v9141_v52 = vcombine.low %v189_v35, %v197_v37 }
 0x211   :  { %v9144_v47 = vcombine.high %v190_v41, %v198_v25  ;;  %v9143_v54 = vcombine.low %v190_v41, %v198_v25 }
 0x212   :  { %6944 = vmatpush1.bf16.msra.mxu0 %v9029_v48  ;;  %7108 = vmatpush1.bf16.msra.mxu1 %v9031_v49  ;;  %v205_v48 = vld [vmem:[%s14260_s1 + $0x5a0] sm:$0xff] }
 0x213   :  { %6945 = vmatprep.subr.bf16.mxu0 %v9046_v50  ;;  %7109 = vmatprep.subr.bf16.mxu1 %v9048_v51  ;;  %v213_v49 = vld [vmem:[%s14260_s1 + $0x5e0] sm:$0xff]  ;;  %v206_v50 = vld [vmem:[%s14260_s1 + $0x5a8] sm:$0xff] }
 0x214   :  { %v214_v51 = vld [vmem:[%s14260_s1 + $0x5e8] sm:$0xff]  ;;  %v9158_v56 = vcombine.high %v205_v48, %v213_v49  ;;  %v9157_v39 = vcombine.low %v205_v48, %v213_v49 }
 0x215   :  { %v9160_v58 = vcombine.high %v206_v50, %v214_v51  ;;  %v9159_v63 = vcombine.low %v206_v50, %v214_v51 }
 0x216   :  { %6946 = vmatpush1.bf16.msra.mxu0 %v9045_v59  ;;  %7110 = vmatpush1.bf16.msra.mxu1 %v9047_v60  ;;  %v221_v59 = vld [vmem:[%s14260_s1 + $0x620] sm:$0xff] }
 0x217   :  { %6947 = vmatprep.subr.bf16.mxu0 %v9062_v61  ;;  %7111 = vmatprep.subr.bf16.mxu1 %v9064_v62  ;;  %v229_v60 = vld [vmem:[%s14260_s1 + $0x660] sm:$0xff]  ;;  %v222_v61 = vld [vmem:[%s14260_s1 + $0x628] sm:$0xff] }
 0x218   :  { %v230_v62 = vld [vmem:[%s14260_s1 + $0x668] sm:$0xff]  ;;  %v9174_v0 = vcombine.high %v221_v59, %v229_v60  ;;  %v9173_v6 = vcombine.low %v221_v59, %v229_v60 }
 0x219   :  { %v9176_v1 = vcombine.high %v222_v61, %v230_v62  ;;  %v9175_v7 = vcombine.low %v222_v61, %v230_v62 }
 0x21a   :  { %6948 = vmatpush1.bf16.msra.mxu0 %v9061_v2  ;;  %7112 = vmatpush1.bf16.msra.mxu1 %v9063_v3  ;;  %v237_v2 = vld [vmem:[%s14260_s1 + $0x6a0] sm:$0xff] }
 0x21b   :  { %6949 = vmatprep.subr.bf16.mxu0 %v9078_v4  ;;  %7113 = vmatprep.subr.bf16.mxu1 %v9080_v5  ;;  %v245_v3 = vld [vmem:[%s14260_s1 + $0x6e0] sm:$0xff]  ;;  %v238_v4 = vld [vmem:[%s14260_s1 + $0x6a8] sm:$0xff] }
 0x21c   :  { %v246_v5 = vld [vmem:[%s14260_s1 + $0x6e8] sm:$0xff]  ;;  %v9190_v8 = vcombine.high %v237_v2, %v245_v3  ;;  %v9189_v16 = vcombine.low %v237_v2, %v245_v3 }
 0x21d   :  { %v9192_v9 = vcombine.high %v238_v4, %v246_v5  ;;  %v9191_v17 = vcombine.low %v238_v4, %v246_v5 }
 0x21e   :  { %6950 = vmatpush1.bf16.msra.mxu0 %v9077_v10  ;;  %7114 = vmatpush1.bf16.msra.mxu1 %v9079_v11  ;;  %v253_v10 = vld [vmem:[%s14260_s1 + $0x720] sm:$0xff] }
 0x21f   :  { %6951 = vmatprep.subr.bf16.mxu0 %v9094_v13  ;;  %7115 = vmatprep.subr.bf16.mxu1 %v9096_v14  ;;  %v261_v11 = vld [vmem:[%s14260_s1 + $0x760] sm:$0xff]  ;;  %v254_v13 = vld [vmem:[%s14260_s1 + $0x728] sm:$0xff] }
 0x220   :  { %v262_v14 = vld [vmem:[%s14260_s1 + $0x768] sm:$0xff]  ;;  %v9206_v53 = vcombine.high %v253_v10, %v261_v11  ;;  %v9205_v26 = vcombine.low %v253_v10, %v261_v11 }
 0x221   :  { %v9208_v18 = vcombine.high %v254_v13, %v262_v14  ;;  %v9207_v27 = vcombine.low %v254_v13, %v262_v14 }
 0x222   :  { %6952 = vmatpush1.bf16.msra.mxu0 %v9093_v19  ;;  %7116 = vmatpush1.bf16.msra.mxu1 %v9095_v20  ;;  %v269_v19 = vld [vmem:[%s14260_s1 + $0x7a0] sm:$0xff] }
 0x223   :  { %6953 = vmatprep.subr.bf16.mxu0 %v9110_v23  ;;  %7117 = vmatprep.subr.bf16.mxu1 %v9112_v24  ;;  %v277_v20 = vld [vmem:[%s14260_s1 + $0x7e0] sm:$0xff]  ;;  %v270_v23 = vld [vmem:[%s14260_s1 + $0x7a8] sm:$0xff] }
 0x224   :  { %v278_v24 = vld [vmem:[%s14260_s1 + $0x7e8] sm:$0xff]  ;;  %v9222_v15 = vcombine.high %v269_v19, %v277_v20  ;;  %v9221_v35 = vcombine.low %v269_v19, %v277_v20 }
 0x225   :  { %v9224_v28 = vcombine.high %v270_v23, %v278_v24  ;;  %v9223_v37 = vcombine.low %v270_v23, %v278_v24 }
 0x226   :  { %6954 = vmatpush1.bf16.msra.mxu0 %v9109_v29  ;;  %7118 = vmatpush1.bf16.msra.mxu1 %v9111_v30  ;;  %v285_v29 = vld [vmem:[%s14260_s1 + $0x820] sm:$0xff] }
 0x227   :  { %6955 = vmatprep.subr.bf16.mxu0 %v9126_v32  ;;  %7119 = vmatprep.subr.bf16.mxu1 %v9128_v34  ;;  %v293_v30 = vld [vmem:[%s14260_s1 + $0x860] sm:$0xff]  ;;  %v286_v32 = vld [vmem:[%s14260_s1 + $0x828] sm:$0xff] }
 0x228   :  { %v294_v34 = vld [vmem:[%s14260_s1 + $0x868] sm:$0xff]  ;;  %v9238_v41 = vcombine.high %v285_v29, %v293_v30  ;;  %v9237_v48 = vcombine.low %v285_v29, %v293_v30 }
 0x229   :  { %v9240_v25 = vcombine.high %v286_v32, %v294_v34  ;;  %v9239_v49 = vcombine.low %v286_v32, %v294_v34 }
 0x22a   :  { %6956 = vmatpush1.bf16.msra.mxu0 %v9125_v43  ;;  %7120 = vmatpush1.bf16.msra.mxu1 %v9127_v44  ;;  %v301_v43 = vld [vmem:[%s14260_s1 + $0x8a0] sm:$0xff] }
 0x22b   :  { %6957 = vmatprep.subr.bf16.mxu0 %v9142_v46  ;;  %7121 = vmatprep.subr.bf16.mxu1 %v9144_v47  ;;  %v309_v44 = vld [vmem:[%s14260_s1 + $0x8e0] sm:$0xff]  ;;  %v302_v46 = vld [vmem:[%s14260_s1 + $0x8a8] sm:$0xff] }
 0x22c   :  { %v310_v47 = vld [vmem:[%s14260_s1 + $0x8e8] sm:$0xff]  ;;  %v9254_v50 = vcombine.high %v301_v43, %v309_v44  ;;  %v9253_v59 = vcombine.low %v301_v43, %v309_v44 }
 0x22d   :  { %v9256_v51 = vcombine.high %v302_v46, %v310_v47  ;;  %v9255_v60 = vcombine.low %v302_v46, %v310_v47 }
 0x22e   :  { %6958 = vmatpush1.bf16.msra.mxu0 %v9141_v52  ;;  %7122 = vmatpush1.bf16.msra.mxu1 %v9143_v54  ;;  %v317_v52 = vld [vmem:[%s14260_s1 + $0x920] sm:$0xff] }
 0x22f   :  { %6959 = vmatprep.subr.bf16.mxu0 %v9158_v56  ;;  %7123 = vmatprep.subr.bf16.mxu1 %v9160_v58  ;;  %v325_v54 = vld [vmem:[%s14260_s1 + $0x960] sm:$0xff]  ;;  %v318_v56 = vld [vmem:[%s14260_s1 + $0x928] sm:$0xff] }
 0x230   :  { %v326_v58 = vld [vmem:[%s14260_s1 + $0x968] sm:$0xff]  ;;  %v9270_v61 = vcombine.high %v317_v52, %v325_v54  ;;  %v9269_v2 = vcombine.low %v317_v52, %v325_v54 }
 0x231   :  { %v9272_v62 = vcombine.high %v318_v56, %v326_v58  ;;  %v9271_v3 = vcombine.low %v318_v56, %v326_v58 }
 0x232   :  { %6960 = vmatpush1.bf16.msra.mxu0 %v9157_v39  ;;  %7124 = vmatpush1.bf16.msra.mxu1 %v9159_v63  ;;  %v333_v39 = vld [vmem:[%s14260_s1 + $0x9a0] sm:$0xff] }
 0x233   :  { %6961 = vmatprep.subr.bf16.mxu0 %v9174_v0  ;;  %7125 = vmatprep.subr.bf16.mxu1 %v9176_v1  ;;  %v341_v63 = vld [vmem:[%s14260_s1 + $0x9e0] sm:$0xff]  ;;  %v334_v0 = vld [vmem:[%s14260_s1 + $0x9a8] sm:$0xff] }
 0x234   :  { %v342_v1 = vld [vmem:[%s14260_s1 + $0x9e8] sm:$0xff]  ;;  %v9286_v4 = vcombine.high %v333_v39, %v341_v63  ;;  %v9285_v10 = vcombine.low %v333_v39, %v341_v63 }
 0x235   :  { %v9288_v5 = vcombine.high %v334_v0, %v342_v1  ;;  %v9287_v11 = vcombine.low %v334_v0, %v342_v1 }
 0x236   :  { %6962 = vmatpush1.bf16.msra.mxu0 %v9173_v6  ;;  %7126 = vmatpush1.bf16.msra.mxu1 %v9175_v7  ;;  %v349_v6 = vld [vmem:[%s14260_s1 + $0xa20] sm:$0xff] }
 0x237   :  { %6963 = vmatprep.subr.bf16.mxu0 %v9190_v8  ;;  %7127 = vmatprep.subr.bf16.mxu1 %v9192_v9  ;;  %v357_v7 = vld [vmem:[%s14260_s1 + $0xa60] sm:$0xff]  ;;  %v350_v8 = vld [vmem:[%s14260_s1 + $0xa28] sm:$0xff] }
 0x238   :  { %v358_v9 = vld [vmem:[%s14260_s1 + $0xa68] sm:$0xff]  ;;  %v9302_v13 = vcombine.high %v349_v6, %v357_v7  ;;  %v9301_v19 = vcombine.low %v349_v6, %v357_v7 }
 0x239   :  { %v9304_v14 = vcombine.high %v350_v8, %v358_v9  ;;  %v9303_v20 = vcombine.low %v350_v8, %v358_v9 }
 0x23a   :  { %6964 = vmatpush1.bf16.msra.mxu0 %v9189_v16  ;;  %7128 = vmatpush1.bf16.msra.mxu1 %v9191_v17  ;;  %v365_v16 = vld [vmem:[%s14260_s1 + $0xaa0] sm:$0xff] }
 0x23b   :  { %6965 = vmatprep.subr.bf16.mxu0 %v9206_v53  ;;  %7129 = vmatprep.subr.bf16.mxu1 %v9208_v18  ;;  %v373_v17 = vld [vmem:[%s14260_s1 + $0xae0] sm:$0xff]  ;;  %v366_v53 = vld [vmem:[%s14260_s1 + $0xaa8] sm:$0xff] }
 0x23c   :  { %v374_v18 = vld [vmem:[%s14260_s1 + $0xae8] sm:$0xff]  ;;  %v9318_v23 = vcombine.high %v365_v16, %v373_v17  ;;  %v9317_v29 = vcombine.low %v365_v16, %v373_v17 }
 0x23d   :  { %v9320_v24 = vcombine.high %v366_v53, %v374_v18  ;;  %v9319_v30 = vcombine.low %v366_v53, %v374_v18 }
 0x23e   :  { %6966 = vmatpush1.bf16.msra.mxu0 %v9205_v26  ;;  %7130 = vmatpush1.bf16.msra.mxu1 %v9207_v27  ;;  %v381_v26 = vld [vmem:[%s14260_s1 + $0xb20] sm:$0xff] }
 0x23f   :  { %6967 = vmatprep.subr.bf16.mxu0 %v9222_v15  ;;  %7131 = vmatprep.subr.bf16.mxu1 %v9224_v28  ;;  %v389_v27 = vld [vmem:[%s14260_s1 + $0xb60] sm:$0xff]  ;;  %v382_v15 = vld [vmem:[%s14260_s1 + $0xb28] sm:$0xff] }
 0x240   :  { %v390_v28 = vld [vmem:[%s14260_s1 + $0xb68] sm:$0xff]  ;;  %v9334_v32 = vcombine.high %v381_v26, %v389_v27  ;;  %v9333_v43 = vcombine.low %v381_v26, %v389_v27 }
 0x241   :  { %v9336_v34 = vcombine.high %v382_v15, %v390_v28  ;;  %v9335_v44 = vcombine.low %v382_v15, %v390_v28 }
 0x242   :  { %6968 = vmatpush1.bf16.msra.mxu0 %v9221_v35  ;;  %7132 = vmatpush1.bf16.msra.mxu1 %v9223_v37  ;;  %v397_v35 = vld [vmem:[%s14260_s1 + $0xba0] sm:$0xff] }
 0x243   :  { %6978 = vmatprep.subr.bf16.mxu0 %v9238_v41  ;;  %7142 = vmatprep.subr.bf16.mxu1 %v9240_v25  ;;  %v405_v37 = vld [vmem:[%s14260_s1 + $0xbe0] sm:$0xff]  ;;  %v398_v41 = vld [vmem:[%s14260_s1 + $0xba8] sm:$0xff] }
 0x244   :  { %v406_v25 = vld [vmem:[%s14260_s1 + $0xbe8] sm:$0xff]  ;;  %v9350_v46 = vcombine.high %v397_v35, %v405_v37  ;;  %v9349_v52 = vcombine.low %v397_v35, %v405_v37 }
 0x245   :  { %6970 = vmatmul.mubr.bf16.vlgmr.msra.gmra.mrb[8].mxu0 %v10804_v12  ;;  %7134 = vmatmul.mubr.bf16.vlgmr.msra.gmra.mrb[8].mxu1 %v10804_v12  ;;  %v9352_v47 = vcombine.high %v398_v41, %v406_v25  ;;  %v9351_v54 = vcombine.low %v398_v41, %v406_v25 }
 0x246   :  { %6979 = vmatpush1.bf16.msra.mxu0 %v9237_v48  ;;  %7143 = vmatpush1.bf16.msra.mxu1 %v9239_v49  ;;  %v413_v48 = vld [vmem:[%s14260_s1 + $0xc20] sm:$0xff] }
 0x247   :  { %6980 = vmatprep.subr.bf16.mxu0 %v9254_v50  ;;  %7144 = vmatprep.subr.bf16.mxu1 %v9256_v51  ;;  %v421_v49 = vld [vmem:[%s14260_s1 + $0xc60] sm:$0xff]  ;;  %v414_v50 = vld [vmem:[%s14260_s1 + $0xc28] sm:$0xff] }
 0x248   :  { %7010 = vmatprep.mubr.bf16.mxu0 %v10825_v21  ;;  %7174 = vmatprep.mubr.bf16.mxu1 %v10825_v21  ;;  %v422_v51 = vld [vmem:[%s14260_s1 + $0xc68] sm:$0xff]  ;;  %v9366_v56 = vcombine.high %v413_v48, %v421_v49  ;;  %v9365_v39 = vcombine.low %v413_v48, %v421_v49 }
 0x249   :  { %v9368_v58 = vcombine.high %v414_v50, %v422_v51  ;;  %v9367_v63 = vcombine.low %v414_v50, %v422_v51 }
 0x24a   :  { %6981 = vmatpush1.bf16.msra.mxu0 %v9253_v59  ;;  %7145 = vmatpush1.bf16.msra.mxu1 %v9255_v60  ;;  %v429_v59 = vld [vmem:[%s14260_s1 + $0xca0] sm:$0xff] }
 0x24b   :  { %6982 = vmatprep.subr.bf16.mxu0 %v9270_v61  ;;  %7146 = vmatprep.subr.bf16.mxu1 %v9272_v62  ;;  %v437_v60 = vld [vmem:[%s14260_s1 + $0xce0] sm:$0xff]  ;;  %v430_v61 = vld [vmem:[%s14260_s1 + $0xca8] sm:$0xff] }
 0x24c   :  { %v438_v62 = vld [vmem:[%s14260_s1 + $0xce8] sm:$0xff]  ;;  %v9382_v0 = vcombine.high %v429_v59, %v437_v60  ;;  %v9381_v6 = vcombine.low %v429_v59, %v437_v60 }
 0x24d   :  { %v9384_v1 = vcombine.high %v430_v61, %v438_v62  ;;  %v9383_v7 = vcombine.low %v430_v61, %v438_v62 }
 0x24e   :  { %6983 = vmatpush1.bf16.msra.mxu0 %v9269_v2  ;;  %7147 = vmatpush1.bf16.msra.mxu1 %v9271_v3  ;;  %v445_v2 = vld [vmem:[%s14260_s1 + $0xd20] sm:$0xff] }
 0x24f   :  { %6984 = vmatprep.subr.bf16.mxu0 %v9286_v4  ;;  %7148 = vmatprep.subr.bf16.mxu1 %v9288_v5  ;;  %v453_v3 = vld [vmem:[%s14260_s1 + $0xd60] sm:$0xff]  ;;  %v446_v4 = vld [vmem:[%s14260_s1 + $0xd28] sm:$0xff] }
 0x250   :  { %v454_v5 = vld [vmem:[%s14260_s1 + $0xd68] sm:$0xff]  ;;  %v9398_v8 = vcombine.high %v445_v2, %v453_v3  ;;  %v9397_v16 = vcombine.low %v445_v2, %v453_v3 }
 0x251   :  { %v9400_v9 = vcombine.high %v446_v4, %v454_v5  ;;  %v9399_v17 = vcombine.low %v446_v4, %v454_v5 }
 0x252   :  { %6985 = vmatpush1.bf16.msra.mxu0 %v9285_v10  ;;  %7149 = vmatpush1.bf16.msra.mxu1 %v9287_v11  ;;  %v461_v10 = vld [vmem:[%s14260_s1 + $0xda0] sm:$0xff] }
 0x253   :  { %6986 = vmatprep.subr.bf16.mxu0 %v9302_v13  ;;  %7150 = vmatprep.subr.bf16.mxu1 %v9304_v14  ;;  %v469_v11 = vld [vmem:[%s14260_s1 + $0xde0] sm:$0xff]  ;;  %v462_v13 = vld [vmem:[%s14260_s1 + $0xda8] sm:$0xff] }
 0x254   :  { %v470_v14 = vld [vmem:[%s14260_s1 + $0xde8] sm:$0xff]  ;;  %v9414_v53 = vcombine.high %v461_v10, %v469_v11  ;;  %v9413_v26 = vcombine.low %v461_v10, %v469_v11 }
 0x255   :  { %v9416_v18 = vcombine.high %v462_v13, %v470_v14  ;;  %v9415_v27 = vcombine.low %v462_v13, %v470_v14 }
 0x256   :  { %6987 = vmatpush1.bf16.msra.mxu0 %v9301_v19  ;;  %7151 = vmatpush1.bf16.msra.mxu1 %v9303_v20  ;;  %v477_v19 = vld [vmem:[%s14260_s1 + $0xe20] sm:$0xff] }
 0x257   :  { %6988 = vmatprep.subr.bf16.mxu0 %v9318_v23  ;;  %7152 = vmatprep.subr.bf16.mxu1 %v9320_v24  ;;  %v485_v20 = vld [vmem:[%s14260_s1 + $0xe60] sm:$0xff]  ;;  %v478_v23 = vld [vmem:[%s14260_s1 + $0xe28] sm:$0xff] }
 0x258   :  { %v486_v24 = vld [vmem:[%s14260_s1 + $0xe68] sm:$0xff]  ;;  %v9430_v15 = vcombine.high %v477_v19, %v485_v20  ;;  %v9429_v35 = vcombine.low %v477_v19, %v485_v20 }
 0x259   :  { %v9432_v28 = vcombine.high %v478_v23, %v486_v24  ;;  %v9431_v37 = vcombine.low %v478_v23, %v486_v24 }
 0x25a   :  { %6989 = vmatpush1.bf16.msra.mxu0 %v9317_v29  ;;  %7153 = vmatpush1.bf16.msra.mxu1 %v9319_v30  ;;  %v493_v29 = vld [vmem:[%s14260_s1 + $0xea0] sm:$0xff] }
 0x25b   :  { %6990 = vmatprep.subr.bf16.mxu0 %v9334_v32  ;;  %7154 = vmatprep.subr.bf16.mxu1 %v9336_v34  ;;  %v501_v30 = vld [vmem:[%s14260_s1 + $0xee0] sm:$0xff]  ;;  %v494_v32 = vld [vmem:[%s14260_s1 + $0xea8] sm:$0xff] }
 0x25c   :  { %v502_v34 = vld [vmem:[%s14260_s1 + $0xee8] sm:$0xff]  ;;  %v9446_v41 = vcombine.high %v493_v29, %v501_v30  ;;  %v9445_v48 = vcombine.low %v493_v29, %v501_v30 }
 0x25d   :  { %v9448_v25 = vcombine.high %v494_v32, %v502_v34  ;;  %v9447_v49 = vcombine.low %v494_v32, %v502_v34 }
 0x25e   :  { %6991 = vmatpush1.bf16.msra.mxu0 %v9333_v43  ;;  %7155 = vmatpush1.bf16.msra.mxu1 %v9335_v44  ;;  %v509_v43 = vld [vmem:[%s14260_s1 + $0xf20] sm:$0xff] }
 0x25f   :  { %6992 = vmatprep.subr.bf16.mxu0 %v9350_v46  ;;  %7156 = vmatprep.subr.bf16.mxu1 %v9352_v47  ;;  %v517_v44 = vld [vmem:[%s14260_s1 + $0xf60] sm:$0xff]  ;;  %v510_v46 = vld [vmem:[%s14260_s1 + $0xf28] sm:$0xff] }
 0x260   :  { %v518_v47 = vld [vmem:[%s14260_s1 + $0xf68] sm:$0xff]  ;;  %v9462_v50 = vcombine.high %v509_v43, %v517_v44  ;;  %v9461_v59 = vcombine.low %v509_v43, %v517_v44 }
 0x261   :  { %v9464_v51 = vcombine.high %v510_v46, %v518_v47  ;;  %v9463_v60 = vcombine.low %v510_v46, %v518_v47 }
 0x262   :  { %6993 = vmatpush1.bf16.msra.mxu0 %v9349_v52  ;;  %7157 = vmatpush1.bf16.msra.mxu1 %v9351_v54  ;;  %v525_v52 = vld [vmem:[%s14260_s1 + $0xfa0] sm:$0xff] }
 0x263   :  { %6994 = vmatprep.subr.bf16.mxu0 %v9366_v56  ;;  %7158 = vmatprep.subr.bf16.mxu1 %v9368_v58  ;;  %v533_v54 = vld [vmem:[%s14260_s1 + $0xfe0] sm:$0xff]  ;;  %v526_v56 = vld [vmem:[%s14260_s1 + $0xfa8] sm:$0xff] }
 0x264   :  { %v534_v58 = vld [vmem:[%s14260_s1 + $0xfe8] sm:$0xff]  ;;  %v9478_v61 = vcombine.high %v525_v52, %v533_v54  ;;  %v9477_v2 = vcombine.low %v525_v52, %v533_v54 }
 0x265   :  { %v9480_v62 = vcombine.high %v526_v56, %v534_v58  ;;  %v9479_v3 = vcombine.low %v526_v56, %v534_v58 }
 0x266   :  { %6995 = vmatpush1.bf16.msra.mxu0 %v9365_v39  ;;  %7159 = vmatpush1.bf16.msra.mxu1 %v9367_v63  ;;  %v541_v39 = vld [vmem:[%s14260_s1 + $0x1020] sm:$0xff] }
 0x267   :  { %6996 = vmatprep.subr.bf16.mxu0 %v9382_v0  ;;  %7160 = vmatprep.subr.bf16.mxu1 %v9384_v1  ;;  %v549_v63 = vld [vmem:[%s14260_s1 + $0x1060] sm:$0xff]  ;;  %v542_v0 = vld [vmem:[%s14260_s1 + $0x1028] sm:$0xff] }
 0x268   :  { %v550_v1 = vld [vmem:[%s14260_s1 + $0x1068] sm:$0xff]  ;;  %v9494_v4 = vcombine.high %v541_v39, %v549_v63  ;;  %v9493_v10 = vcombine.low %v541_v39, %v549_v63 }
 0x269   :  { %v9496_v5 = vcombine.high %v542_v0, %v550_v1  ;;  %v9495_v11 = vcombine.low %v542_v0, %v550_v1 }
 0x26a   :  { %6997 = vmatpush1.bf16.msra.mxu0 %v9381_v6  ;;  %7161 = vmatpush1.bf16.msra.mxu1 %v9383_v7  ;;  %v557_v6 = vld [vmem:[%s14260_s1 + $0x10a0] sm:$0xff] }
 0x26b   :  { %6998 = vmatprep.subr.bf16.mxu0 %v9398_v8  ;;  %7162 = vmatprep.subr.bf16.mxu1 %v9400_v9  ;;  %v565_v7 = vld [vmem:[%s14260_s1 + $0x10e0] sm:$0xff]  ;;  %v558_v8 = vld [vmem:[%s14260_s1 + $0x10a8] sm:$0xff] }
 0x26c   :  { %v566_v9 = vld [vmem:[%s14260_s1 + $0x10e8] sm:$0xff]  ;;  %v9510_v13 = vcombine.high %v557_v6, %v565_v7  ;;  %v9509_v19 = vcombine.low %v557_v6, %v565_v7 }
 0x26d   :  { %v9512_v14 = vcombine.high %v558_v8, %v566_v9  ;;  %v9511_v20 = vcombine.low %v558_v8, %v566_v9 }
 0x26e   :  { %6999 = vmatpush1.bf16.msra.mxu0 %v9397_v16  ;;  %7163 = vmatpush1.bf16.msra.mxu1 %v9399_v17  ;;  %v573_v16 = vld [vmem:[%s14260_s1 + $0x1120] sm:$0xff] }
 0x26f   :  { %7000 = vmatprep.subr.bf16.mxu0 %v9414_v53  ;;  %7164 = vmatprep.subr.bf16.mxu1 %v9416_v18  ;;  %v581_v17 = vld [vmem:[%s14260_s1 + $0x1160] sm:$0xff]  ;;  %v574_v53 = vld [vmem:[%s14260_s1 + $0x1128] sm:$0xff] }
 0x270   :  { %v582_v18 = vld [vmem:[%s14260_s1 + $0x1168] sm:$0xff]  ;;  %v9526_v23 = vcombine.high %v573_v16, %v581_v17  ;;  %v9525_v29 = vcombine.low %v573_v16, %v581_v17 }
 0x271   :  { %v9528_v24 = vcombine.high %v574_v53, %v582_v18  ;;  %v9527_v30 = vcombine.low %v574_v53, %v582_v18 }
 0x272   :  { %7001 = vmatpush1.bf16.msra.mxu0 %v9413_v26  ;;  %7165 = vmatpush1.bf16.msra.mxu1 %v9415_v27  ;;  %v589_v26 = vld [vmem:[%s14260_s1 + $0x11a0] sm:$0xff] }
 0x273   :  { %7002 = vmatprep.subr.bf16.mxu0 %v9430_v15  ;;  %7166 = vmatprep.subr.bf16.mxu1 %v9432_v28  ;;  %v597_v27 = vld [vmem:[%s14260_s1 + $0x11e0] sm:$0xff]  ;;  %v590_v15 = vld [vmem:[%s14260_s1 + $0x11a8] sm:$0xff] }
 0x274   :  { %v598_v28 = vld [vmem:[%s14260_s1 + $0x11e8] sm:$0xff]  ;;  %v9542_v32 = vcombine.high %v589_v26, %v597_v27  ;;  %v9541_v43 = vcombine.low %v589_v26, %v597_v27 }
 0x275   :  { %v9544_v34 = vcombine.high %v590_v15, %v598_v28  ;;  %v9543_v44 = vcombine.low %v590_v15, %v598_v28 }
 0x276   :  { %7003 = vmatpush1.bf16.msra.mxu0 %v9429_v35  ;;  %7167 = vmatpush1.bf16.msra.mxu1 %v9431_v37  ;;  %v605_v35 = vld [vmem:[%s14260_s1 + $0x1220] sm:$0xff] }
 0x277   :  { %7004 = vmatprep.subr.bf16.mxu0 %v9446_v41  ;;  %7168 = vmatprep.subr.bf16.mxu1 %v9448_v25  ;;  %v613_v37 = vld [vmem:[%s14260_s1 + $0x1260] sm:$0xff]  ;;  %v606_v41 = vld [vmem:[%s14260_s1 + $0x1228] sm:$0xff] }
 0x278   :  { %v614_v25 = vld [vmem:[%s14260_s1 + $0x1268] sm:$0xff]  ;;  %v9558_v46 = vcombine.high %v605_v35, %v613_v37  ;;  %v9557_v52 = vcombine.low %v605_v35, %v613_v37 }
 0x279   :  { %v9560_v47 = vcombine.high %v606_v41, %v614_v25  ;;  %v9559_v54 = vcombine.low %v606_v41, %v614_v25 }
 0x27a   :  { %7005 = vmatpush1.bf16.msra.mxu0 %v9445_v48  ;;  %7169 = vmatpush1.bf16.msra.mxu1 %v9447_v49  ;;  %v621_v48 = vld [vmem:[%s14260_s1 + $0x12a0] sm:$0xff] }
 0x27b   :  { %7006 = vmatprep.subr.bf16.mxu0 %v9462_v50  ;;  %7170 = vmatprep.subr.bf16.mxu1 %v9464_v51  ;;  %v629_v49 = vld [vmem:[%s14260_s1 + $0x12e0] sm:$0xff]  ;;  %v622_v50 = vld [vmem:[%s14260_s1 + $0x12a8] sm:$0xff] }
 0x27c   :  { %v630_v51 = vld [vmem:[%s14260_s1 + $0x12e8] sm:$0xff]  ;;  %v9574_v56 = vcombine.high %v621_v48, %v629_v49  ;;  %v9573_v39 = vcombine.low %v621_v48, %v629_v49 }
 0x27d   :  { %v9576_v58 = vcombine.high %v622_v50, %v630_v51  ;;  %v9575_v63 = vcombine.low %v622_v50, %v630_v51 }
 0x27e   :  { %7007 = vmatpush1.bf16.msra.mxu0 %v9461_v59  ;;  %7171 = vmatpush1.bf16.msra.mxu1 %v9463_v60  ;;  %v637_v59 = vld [vmem:[%s14260_s1 + $0x1320] sm:$0xff] }
 0x27f   :  { %7008 = vmatprep.subr.bf16.mxu0 %v9478_v61  ;;  %7172 = vmatprep.subr.bf16.mxu1 %v9480_v62  ;;  %v645_v60 = vld [vmem:[%s14260_s1 + $0x1360] sm:$0xff]  ;;  %v638_v61 = vld [vmem:[%s14260_s1 + $0x1328] sm:$0xff] }
 0x280   :  { %v646_v62 = vld [vmem:[%s14260_s1 + $0x1368] sm:$0xff]  ;;  %v9590_v0 = vcombine.high %v637_v59, %v645_v60  ;;  %v9589_v6 = vcombine.low %v637_v59, %v645_v60 }
 0x281   :  { %v9592_v1 = vcombine.high %v638_v61, %v646_v62  ;;  %v9591_v7 = vcombine.low %v638_v61, %v646_v62 }
 0x282   :  { %7009 = vmatpush1.bf16.msra.mxu0 %v9477_v2  ;;  %7173 = vmatpush1.bf16.msra.mxu1 %v9479_v3  ;;  %v653_v2 = vld [vmem:[%s14260_s1 + $0x13a0] sm:$0xff] }
 0x283   :  { %7019 = vmatprep.subr.bf16.mxu0 %v9494_v4  ;;  %7183 = vmatprep.subr.bf16.mxu1 %v9496_v5  ;;  %v661_v3 = vld [vmem:[%s14260_s1 + $0x13e0] sm:$0xff]  ;;  %v654_v4 = vld [vmem:[%s14260_s1 + $0x13a8] sm:$0xff] }
 0x284   :  { %v662_v5 = vld [vmem:[%s14260_s1 + $0x13e8] sm:$0xff]  ;;  %v9606_v8 = vcombine.high %v653_v2, %v661_v3  ;;  %v9605_v16 = vcombine.low %v653_v2, %v661_v3 }
 0x285   :  { %7011 = vmatmul.mubr.bf16.vlgmr.msra.gmra.mrb[8].mxu0 %v11013_v22  ;;  %7175 = vmatmul.mubr.bf16.vlgmr.msra.gmra.mrb[8].mxu1 %v11013_v22  ;;  %v9608_v9 = vcombine.high %v654_v4, %v662_v5  ;;  %v9607_v17 = vcombine.low %v654_v4, %v662_v5 }
 0x286   :  { %7020 = vmatpush1.bf16.msra.mxu0 %v9493_v10  ;;  %7184 = vmatpush1.bf16.msra.mxu1 %v9495_v11  ;;  %v669_v10 = vld [vmem:[%s14260_s1 + $0x1420] sm:$0xff] }
 0x287   :  { %7021 = vmatprep.subr.bf16.mxu0 %v9510_v13  ;;  %7185 = vmatprep.subr.bf16.mxu1 %v9512_v14  ;;  %v677_v11 = vld [vmem:[%s14260_s1 + $0x1460] sm:$0xff]  ;;  %v670_v13 = vld [vmem:[%s14260_s1 + $0x1428] sm:$0xff] }
 0x288   :  { %7051 = vmatprep.mubr.bf16.mxu0 %v11034_v31  ;;  %7215 = vmatprep.mubr.bf16.mxu1 %v11034_v31  ;;  %v678_v14 = vld [vmem:[%s14260_s1 + $0x1468] sm:$0xff]  ;;  %v9622_v53 = vcombine.high %v669_v10, %v677_v11  ;;  %v9621_v26 = vcombine.low %v669_v10, %v677_v11 }
 0x289   :  { %v9624_v18 = vcombine.high %v670_v13, %v678_v14  ;;  %v9623_v27 = vcombine.low %v670_v13, %v678_v14 }
 0x28a   :  { %7022 = vmatpush1.bf16.msra.mxu0 %v9509_v19  ;;  %7186 = vmatpush1.bf16.msra.mxu1 %v9511_v20  ;;  %v685_v19 = vld [vmem:[%s14260_s1 + $0x14a0] sm:$0xff] }
 0x28b   :  { %7023 = vmatprep.subr.bf16.mxu0 %v9526_v23  ;;  %7187 = vmatprep.subr.bf16.mxu1 %v9528_v24  ;;  %v693_v20 = vld [vmem:[%s14260_s1 + $0x14e0] sm:$0xff]  ;;  %v686_v23 = vld [vmem:[%s14260_s1 + $0x14a8] sm:$0xff] }
 0x28c   :  { %v694_v24 = vld [vmem:[%s14260_s1 + $0x14e8] sm:$0xff]  ;;  %v9638_v15 = vcombine.high %v685_v19, %v693_v20  ;;  %v9637_v35 = vcombine.low %v685_v19, %v693_v20 }
 0x28d   :  { %v9640_v28 = vcombine.high %v686_v23, %v694_v24  ;;  %v9639_v37 = vcombine.low %v686_v23, %v694_v24 }
 0x28e   :  { %7024 = vmatpush1.bf16.msra.mxu0 %v9525_v29  ;;  %7188 = vmatpush1.bf16.msra.mxu1 %v9527_v30  ;;  %v701_v29 = vld [vmem:[%s14260_s1 + $0x1520] sm:$0xff] }
 0x28f   :  { %7025 = vmatprep.subr.bf16.mxu0 %v9542_v32  ;;  %7189 = vmatprep.subr.bf16.mxu1 %v9544_v34  ;;  %v709_v30 = vld [vmem:[%s14260_s1 + $0x1560] sm:$0xff]  ;;  %v702_v32 = vld [vmem:[%s14260_s1 + $0x1528] sm:$0xff] }
 0x290   :  { %v710_v34 = vld [vmem:[%s14260_s1 + $0x1568] sm:$0xff]  ;;  %v9654_v41 = vcombine.high %v701_v29, %v709_v30  ;;  %v9653_v48 = vcombine.low %v701_v29, %v709_v30 }
 0x291   :  { %v9656_v25 = vcombine.high %v702_v32, %v710_v34  ;;  %v9655_v49 = vcombine.low %v702_v32, %v710_v34 }
 0x292   :  { %7026 = vmatpush1.bf16.msra.mxu0 %v9541_v43  ;;  %7190 = vmatpush1.bf16.msra.mxu1 %v9543_v44  ;;  %v717_v43 = vld [vmem:[%s14260_s1 + $0x15a0] sm:$0xff] }
 0x293   :  { %7027 = vmatprep.subr.bf16.mxu0 %v9558_v46  ;;  %7191 = vmatprep.subr.bf16.mxu1 %v9560_v47  ;;  %v725_v44 = vld [vmem:[%s14260_s1 + $0x15e0] sm:$0xff]  ;;  %v718_v46 = vld [vmem:[%s14260_s1 + $0x15a8] sm:$0xff] }
 0x294   :  { %v726_v47 = vld [vmem:[%s14260_s1 + $0x15e8] sm:$0xff]  ;;  %v9670_v50 = vcombine.high %v717_v43, %v725_v44  ;;  %v9669_v59 = vcombine.low %v717_v43, %v725_v44 }
 0x295   :  { %v9672_v51 = vcombine.high %v718_v46, %v726_v47  ;;  %v9671_v60 = vcombine.low %v718_v46, %v726_v47 }
 0x296   :  { %7028 = vmatpush1.bf16.msra.mxu0 %v9557_v52  ;;  %7192 = vmatpush1.bf16.msra.mxu1 %v9559_v54  ;;  %v733_v52 = vld [vmem:[%s14260_s1 + $0x1620] sm:$0xff] }
 0x297   :  { %7029 = vmatprep.subr.bf16.mxu0 %v9574_v56  ;;  %7193 = vmatprep.subr.bf16.mxu1 %v9576_v58  ;;  %v741_v54 = vld [vmem:[%s14260_s1 + $0x1660] sm:$0xff]  ;;  %v734_v56 = vld [vmem:[%s14260_s1 + $0x1628] sm:$0xff] }
 0x298   :  { %v742_v58 = vld [vmem:[%s14260_s1 + $0x1668] sm:$0xff]  ;;  %v9686_v61 = vcombine.high %v733_v52, %v741_v54  ;;  %v9685_v2 = vcombine.low %v733_v52, %v741_v54 }
 0x299   :  { %v9688_v62 = vcombine.high %v734_v56, %v742_v58  ;;  %v9687_v3 = vcombine.low %v734_v56, %v742_v58 }
 0x29a   :  { %7030 = vmatpush1.bf16.msra.mxu0 %v9573_v39  ;;  %7194 = vmatpush1.bf16.msra.mxu1 %v9575_v63  ;;  %v749_v39 = vld [vmem:[%s14260_s1 + $0x16a0] sm:$0xff] }
 0x29b   :  { %7031 = vmatprep.subr.bf16.mxu0 %v9590_v0  ;;  %7195 = vmatprep.subr.bf16.mxu1 %v9592_v1  ;;  %v757_v63 = vld [vmem:[%s14260_s1 + $0x16e0] sm:$0xff]  ;;  %v750_v0 = vld [vmem:[%s14260_s1 + $0x16a8] sm:$0xff] }
 0x29c   :  { %v758_v1 = vld [vmem:[%s14260_s1 + $0x16e8] sm:$0xff]  ;;  %v9702_v4 = vcombine.high %v749_v39, %v757_v63  ;;  %v9701_v10 = vcombine.low %v749_v39, %v757_v63 }
 0x29d   :  { %v9704_v5 = vcombine.high %v750_v0, %v758_v1  ;;  %v9703_v11 = vcombine.low %v750_v0, %v758_v1 }
 0x29e   :  { %7032 = vmatpush1.bf16.msra.mxu0 %v9589_v6  ;;  %7196 = vmatpush1.bf16.msra.mxu1 %v9591_v7  ;;  %v765_v6 = vld [vmem:[%s14260_s1 + $0x1720] sm:$0xff] }
 0x29f   :  { %7033 = vmatprep.subr.bf16.mxu0 %v9606_v8  ;;  %7197 = vmatprep.subr.bf16.mxu1 %v9608_v9  ;;  %v773_v7 = vld [vmem:[%s14260_s1 + $0x1760] sm:$0xff]  ;;  %v766_v8 = vld [vmem:[%s14260_s1 + $0x1728] sm:$0xff] }
 0x2a0   :  { %v774_v9 = vld [vmem:[%s14260_s1 + $0x1768] sm:$0xff]  ;;  %v9718_v13 = vcombine.high %v765_v6, %v773_v7  ;;  %v9717_v19 = vcombine.low %v765_v6, %v773_v7 }
 0x2a1   :  { %v9720_v14 = vcombine.high %v766_v8, %v774_v9  ;;  %v9719_v20 = vcombine.low %v766_v8, %v774_v9 }
 0x2a2   :  { %7034 = vmatpush1.bf16.msra.mxu0 %v9605_v16  ;;  %7198 = vmatpush1.bf16.msra.mxu1 %v9607_v17  ;;  %v781_v16 = vld [vmem:[%s14260_s1 + $0x17a0] sm:$0xff] }
 0x2a3   :  { %7035 = vmatprep.subr.bf16.mxu0 %v9622_v53  ;;  %7199 = vmatprep.subr.bf16.mxu1 %v9624_v18  ;;  %v789_v17 = vld [vmem:[%s14260_s1 + $0x17e0] sm:$0xff]  ;;  %v782_v53 = vld [vmem:[%s14260_s1 + $0x17a8] sm:$0xff] }
 0x2a4   :  { %v790_v18 = vld [vmem:[%s14260_s1 + $0x17e8] sm:$0xff]  ;;  %v9734_v23 = vcombine.high %v781_v16, %v789_v17  ;;  %v9733_v29 = vcombine.low %v781_v16, %v789_v17 }
 0x2a5   :  { %v9736_v24 = vcombine.high %v782_v53, %v790_v18  ;;  %v9735_v30 = vcombine.low %v782_v53, %v790_v18 }
 0x2a6   :  { %7036 = vmatpush1.bf16.msra.mxu0 %v9621_v26  ;;  %7200 = vmatpush1.bf16.msra.mxu1 %v9623_v27  ;;  %v797_v26 = vld [vmem:[%s14260_s1 + $0x1820] sm:$0xff] }
 0x2a7   :  { %7037 = vmatprep.subr.bf16.mxu0 %v9638_v15  ;;  %7201 = vmatprep.subr.bf16.mxu1 %v9640_v28  ;;  %v805_v27 = vld [vmem:[%s14260_s1 + $0x1860] sm:$0xff]  ;;  %v798_v15 = vld [vmem:[%s14260_s1 + $0x1828] sm:$0xff] }
 0x2a8   :  { %v806_v28 = vld [vmem:[%s14260_s1 + $0x1868] sm:$0xff]  ;;  %v9750_v32 = vcombine.high %v797_v26, %v805_v27  ;;  %v9749_v43 = vcombine.low %v797_v26, %v805_v27 }
 0x2a9   :  { %v9752_v34 = vcombine.high %v798_v15, %v806_v28  ;;  %v9751_v44 = vcombine.low %v798_v15, %v806_v28 }
 0x2aa   :  { %7038 = vmatpush1.bf16.msra.mxu0 %v9637_v35  ;;  %7202 = vmatpush1.bf16.msra.mxu1 %v9639_v37  ;;  %v813_v35 = vld [vmem:[%s14260_s1 + $0x18a0] sm:$0xff] }
 0x2ab   :  { %7039 = vmatprep.subr.bf16.mxu0 %v9654_v41  ;;  %7203 = vmatprep.subr.bf16.mxu1 %v9656_v25  ;;  %v821_v37 = vld [vmem:[%s14260_s1 + $0x18e0] sm:$0xff]  ;;  %v814_v41 = vld [vmem:[%s14260_s1 + $0x18a8] sm:$0xff] }
 0x2ac   :  { %v822_v25 = vld [vmem:[%s14260_s1 + $0x18e8] sm:$0xff]  ;;  %v9766_v46 = vcombine.high %v813_v35, %v821_v37  ;;  %v9765_v52 = vcombine.low %v813_v35, %v821_v37 }
 0x2ad   :  { %v9768_v47 = vcombine.high %v814_v41, %v822_v25  ;;  %v9767_v54 = vcombine.low %v814_v41, %v822_v25  ;;  %v910_v37 = vld [vmem:[%s14260_s1 + $0x1ba8] sm:$0xff] }
 0x2ae   :  { %7040 = vmatpush1.bf16.msra.mxu0 %v9653_v48  ;;  %7204 = vmatpush1.bf16.msra.mxu1 %v9655_v49  ;;  %v829_v48 = vld [vmem:[%s14260_s1 + $0x1920] sm:$0xff]  ;;  %v918_v41 = vld [vmem:[%s14260_s1 + $0x1be8] sm:$0xff] }
 0x2af   :  { %7041 = vmatprep.subr.bf16.mxu0 %v9670_v50  ;;  %7205 = vmatprep.subr.bf16.mxu1 %v9672_v51  ;;  %v837_v49 = vld [vmem:[%s14260_s1 + $0x1960] sm:$0xff]  ;;  %v830_v50 = vld [vmem:[%s14260_s1 + $0x1928] sm:$0xff] }
 0x2b0   :  { %v838_v51 = vld [vmem:[%s14260_s1 + $0x1968] sm:$0xff]  ;;  %v9782_v56 = vcombine.high %v829_v48, %v837_v49  ;;  %v9781_v39 = vcombine.low %v829_v48, %v837_v49 }
 0x2b1   :  { %v9784_v58 = vcombine.high %v830_v50, %v838_v51  ;;  %v9783_v63 = vcombine.low %v830_v50, %v838_v51  ;;  %v9864_v51 = vcombine.high %v910_v37, %v918_v41 }
 0x2b2   :  { %7042 = vmatpush1.bf16.msra.mxu0 %v9669_v59  ;;  %7206 = vmatpush1.bf16.msra.mxu1 %v9671_v60  ;;  %v845_v59 = vld [vmem:[%s14260_s1 + $0x19a0] sm:$0xff] }
 0x2b3   :  { %7043 = vmatprep.subr.bf16.mxu0 %v9686_v61  ;;  %7207 = vmatprep.subr.bf16.mxu1 %v9688_v62  ;;  %v853_v60 = vld [vmem:[%s14260_s1 + $0x19e0] sm:$0xff]  ;;  %v846_v61 = vld [vmem:[%s14260_s1 + $0x19a8] sm:$0xff] }
 0x2b4   :  { %v854_v62 = vld [vmem:[%s14260_s1 + $0x19e8] sm:$0xff]  ;;  %v9798_v0 = vcombine.high %v845_v59, %v853_v60  ;;  %v9797_v6 = vcombine.low %v845_v59, %v853_v60  ;;  %v9863_v60 = vcombine.low %v910_v37, %v918_v41 }
 0x2b5   :  { %v9800_v1 = vcombine.high %v846_v61, %v854_v62  ;;  %v9799_v7 = vcombine.low %v846_v61, %v854_v62 }
 0x2b6   :  { %7044 = vmatpush1.bf16.msra.mxu0 %v9685_v2  ;;  %7208 = vmatpush1.bf16.msra.mxu1 %v9687_v3  ;;  %v861_v2 = vld [vmem:[%s14260_s1 + $0x1a20] sm:$0xff] }
 0x2b7   :  { %7045 = vmatprep.subr.bf16.mxu0 %v9702_v4  ;;  %7209 = vmatprep.subr.bf16.mxu1 %v9704_v5  ;;  %v869_v3 = vld [vmem:[%s14260_s1 + $0x1a60] sm:$0xff]  ;;  %v862_v4 = vld [vmem:[%s14260_s1 + $0x1a28] sm:$0xff] }
 0x2b8   :  { %v870_v5 = vld [vmem:[%s14260_s1 + $0x1a68] sm:$0xff]  ;;  %v9814_v8 = vcombine.high %v861_v2, %v869_v3  ;;  %v9813_v16 = vcombine.low %v861_v2, %v869_v3 }
 0x2b9   :  { %v9816_v9 = vcombine.high %v862_v4, %v870_v5  ;;  %v9815_v17 = vcombine.low %v862_v4, %v870_v5 }
 0x2ba   :  { %7046 = vmatpush1.bf16.msra.mxu0 %v9701_v10  ;;  %7210 = vmatpush1.bf16.msra.mxu1 %v9703_v11  ;;  %v877_v10 = vld [vmem:[%s14260_s1 + $0x1aa0] sm:$0xff] }
 0x2bb   :  { %7047 = vmatprep.subr.bf16.mxu0 %v9718_v13  ;;  %7211 = vmatprep.subr.bf16.mxu1 %v9720_v14  ;;  %v885_v11 = vld [vmem:[%s14260_s1 + $0x1ae0] sm:$0xff]  ;;  %v878_v13 = vld [vmem:[%s14260_s1 + $0x1aa8] sm:$0xff] }
 0x2bc   :  { %v886_v14 = vld [vmem:[%s14260_s1 + $0x1ae8] sm:$0xff]  ;;  %v9830_v53 = vcombine.high %v877_v10, %v885_v11  ;;  %v9829_v26 = vcombine.low %v877_v10, %v885_v11 }
 0x2bd   :  { %v9832_v18 = vcombine.high %v878_v13, %v886_v14  ;;  %v9831_v27 = vcombine.low %v878_v13, %v886_v14 }
 0x2be   :  { %7048 = vmatpush1.bf16.msra.mxu0 %v9717_v19  ;;  %7212 = vmatpush1.bf16.msra.mxu1 %v9719_v20  ;;  %v893_v19 = vld [vmem:[%s14260_s1 + $0x1b20] sm:$0xff] }
 0x2bf   :  { %7049 = vmatprep.subr.bf16.mxu0 %v9734_v23  ;;  %7213 = vmatprep.subr.bf16.mxu1 %v9736_v24  ;;  %v901_v20 = vld [vmem:[%s14260_s1 + $0x1b60] sm:$0xff]  ;;  %v894_v23 = vld [vmem:[%s14260_s1 + $0x1b28] sm:$0xff] }
 0x2c0   :  { %v902_v24 = vld [vmem:[%s14260_s1 + $0x1b68] sm:$0xff]  ;;  %v9846_v15 = vcombine.high %v893_v19, %v901_v20 }
 0x2c1   :  { %v9847_v48 = vcombine.low %v894_v23, %v902_v24 }
 0x2c2   :  { %7050 = vmatpush1.bf16.msra.mxu0 %v9733_v29  ;;  %7214 = vmatpush1.bf16.msra.mxu1 %v9735_v30  ;;  %v9848_v29 = vcombine.high %v894_v23, %v902_v24  ;;  %v909_v30 = vld [vmem:[%s14260_s1 + $0x1ba0] sm:$0xff] }
 0x2c3   :  { %7060 = vmatprep.subr.bf16.mxu0 %v9750_v32  ;;  %7224 = vmatprep.subr.bf16.mxu1 %v9752_v34  ;;  %v917_v32 = vld [vmem:[%s14260_s1 + $0x1be0] sm:$0xff] }
 0x2c4   :  { %v9862_v49 = vcombine.high %v909_v30, %v917_v32  ;;  %v9861_v59 = vcombine.low %v909_v30, %v917_v32 }
 0x2c5   :  { %7052 = vmatmul.mubr.bf16.vlgmr.msra.gmra.mrb[8].mxu0 %v11222_v36  ;;  %7216 = vmatmul.mubr.bf16.vlgmr.msra.gmra.mrb[8].mxu1 %v11222_v36 }
 0x2c6   :  { %7061 = vmatpush1.bf16.msra.mxu0 %v9749_v43  ;;  %7225 = vmatpush1.bf16.msra.mxu1 %v9751_v44  ;;  %v9845_v44 = vcombine.low %v893_v19, %v901_v20 }
 0x2c7   :  { %7062 = vmatprep.subr.bf16.mxu0 %v9766_v46  ;;  %7226 = vmatprep.subr.bf16.mxu1 %v9768_v47 }
 0x2c8   :  { %7092 = vmatprep.mubr.bf16.mxu0 %v11243_v45  ;;  %7256 = vmatprep.mubr.bf16.mxu1 %v11243_v45 }
 0x2ca   :  { %7063 = vmatpush1.bf16.msra.mxu0 %v9765_v52  ;;  %7227 = vmatpush1.bf16.msra.mxu1 %v9767_v54  ;;  %v925_v52 = vld [vmem:[%s14260_s1 + $0x1c20] sm:$0xff] }
 0x2cb   :  { %7064 = vmatprep.subr.bf16.mxu0 %v9782_v56  ;;  %7228 = vmatprep.subr.bf16.mxu1 %v9784_v58  ;;  %v933_v54 = vld [vmem:[%s14260_s1 + $0x1c60] sm:$0xff]  ;;  %v926_v56 = vld [vmem:[%s14260_s1 + $0x1c28] sm:$0xff] }
 0x2cc   :  { %v934_v58 = vld [vmem:[%s14260_s1 + $0x1c68] sm:$0xff]  ;;  %v9878_v61 = vcombine.high %v925_v52, %v933_v54  ;;  %v9877_v2 = vcombine.low %v925_v52, %v933_v54  ;;  %v1021_v52 = vld [vmem:[%s14260_s1 + $0x1f20] sm:$0xff] }
 0x2cd   :  { %v9880_v62 = vcombine.high %v926_v56, %v934_v58  ;;  %v9879_v3 = vcombine.low %v926_v56, %v934_v58  ;;  %v1029_v54 = vld [vmem:[%s14260_s1 + $0x1f60] sm:$0xff]  ;;  %v1022_v56 = vld [vmem:[%s14260_s1 + $0x1f28] sm:$0xff] }
 0x2ce   :  { %7065 = vmatpush1.bf16.msra.mxu0 %v9781_v39  ;;  %7229 = vmatpush1.bf16.msra.mxu1 %v9783_v63  ;;  %v941_v39 = vld [vmem:[%s14260_s1 + $0x1ca0] sm:$0xff]  ;;  %v1030_v58 = vld [vmem:[%s14260_s1 + $0x1f68] sm:$0xff] }
 0x2cf   :  { %7066 = vmatprep.subr.bf16.mxu0 %v9798_v0  ;;  %7230 = vmatprep.subr.bf16.mxu1 %v9800_v1  ;;  %v949_v63 = vld [vmem:[%s14260_s1 + $0x1ce0] sm:$0xff]  ;;  %v942_v0 = vld [vmem:[%s14260_s1 + $0x1ca8] sm:$0xff] }
 0x2d0   :  { %v950_v1 = vld [vmem:[%s14260_s1 + $0x1ce8] sm:$0xff]  ;;  %v9894_v4 = vcombine.high %v941_v39, %v949_v63  ;;  %v9893_v10 = vcombine.low %v941_v39, %v949_v63  ;;  %v1037_v39 = vld [vmem:[%s14260_s1 + $0x1fa0] sm:$0xff] }
 0x2d1   :  { %v9896_v5 = vcombine.high %v942_v0, %v950_v1  ;;  %v9895_v11 = vcombine.low %v942_v0, %v950_v1  ;;  %v1045_v63 = vld [vmem:[%s14260_s1 + $0x1fe0] sm:$0xff]  ;;  %v1038_v0 = vld [vmem:[%s14260_s1 + $0x1fa8] sm:$0xff] }
 0x2d2   :  { %7067 = vmatpush1.bf16.msra.mxu0 %v9797_v6  ;;  %7231 = vmatpush1.bf16.msra.mxu1 %v9799_v7  ;;  %v957_v6 = vld [vmem:[%s14260_s1 + $0x1d20] sm:$0xff]  ;;  %v1046_v1 = vld [vmem:[%s14260_s1 + $0x1fe8] sm:$0xff] }
 0x2d3   :  { %7068 = vmatprep.subr.bf16.mxu0 %v9814_v8  ;;  %7232 = vmatprep.subr.bf16.mxu1 %v9816_v9  ;;  %v965_v7 = vld [vmem:[%s14260_s1 + $0x1d60] sm:$0xff]  ;;  %v958_v8 = vld [vmem:[%s14260_s1 + $0x1d28] sm:$0xff] }
 0x2d4   :  { %v966_v9 = vld [vmem:[%s14260_s1 + $0x1d68] sm:$0xff]  ;;  %v9910_v13 = vcombine.high %v957_v6, %v965_v7  ;;  %v9909_v19 = vcombine.low %v957_v6, %v965_v7  ;;  %v31_v6 = vld [vmem:[%s14260_s1 + $0x30] sm:$0xff] }
 0x2d5   :  { %v9912_v14 = vcombine.high %v958_v8, %v966_v9  ;;  %v9911_v20 = vcombine.low %v958_v8, %v966_v9  ;;  %v39_v7 = vld [vmem:[%s14260_s1 + $0x70] sm:$0xff]  ;;  %v32_v8 = vld [vmem:[%s14260_s1 + $0x38] sm:$0xff] }
 0x2d6   :  { %7069 = vmatpush1.bf16.msra.mxu0 %v9813_v16  ;;  %7233 = vmatpush1.bf16.msra.mxu1 %v9815_v17  ;;  %v973_v16 = vld [vmem:[%s14260_s1 + $0x1da0] sm:$0xff]  ;;  %v40_v9 = vld [vmem:[%s14260_s1 + $0x78] sm:$0xff] }
 0x2d7   :  { %7070 = vmatprep.subr.bf16.mxu0 %v9830_v53  ;;  %7234 = vmatprep.subr.bf16.mxu1 %v9832_v18  ;;  %v981_v17 = vld [vmem:[%s14260_s1 + $0x1de0] sm:$0xff]  ;;  %v974_v53 = vld [vmem:[%s14260_s1 + $0x1da8] sm:$0xff] }
 0x2d8   :  { %v12883_v28 = vpop.f32.mrb[4].mxu0  ;;  %v12891_v34 = vpop.f32.mrb[4].mxu1  ;;  %v982_v18 = vld [vmem:[%s14260_s1 + $0x1de8] sm:$0xff]  ;;  %v9926_v23 = vcombine.high %v973_v16, %v981_v17  ;;  %v9925_v30 = vcombine.low %v973_v16, %v981_v17  ;;  %v47_v16 = vld [vmem:[%s14260_s1 + $0xb0] sm:$0xff] }
 0x2d9   :  { %v12893_v35 = vpop.f32.mrb[5].mxu0  ;;  %v12901_v25 = vpop.f32.mrb[5].mxu1  ;;  %v9928_v24 = vcombine.high %v974_v53, %v982_v18  ;;  %v9927_v32 = vcombine.low %v974_v53, %v982_v18  ;;  %v55_v17 = vld [vmem:[%s14260_s1 + $0xf0] sm:$0xff]  ;;  %v48_v53 = vld [vmem:[%s14260_s1 + $0xb8] sm:$0xff] }
 0x2da   :  { %v6770_v43 = vpop.f32.mrb[6].mxu0  ;;  %7071 = vmatpush1.bf16.msra.mxu0 %v9829_v26  ;;  %v6934_v46 = vpop.f32.mrb[6].mxu1  ;;  %7235 = vmatpush1.bf16.msra.mxu1 %v9831_v27  ;;  %v989_v26 = vld [vmem:[%s14260_s1 + $0x1e20] sm:$0xff]  ;;  %v56_v18 = vld [vmem:[%s14260_s1 + $0xf8] sm:$0xff] }
 0x2db   :  { %v6771_v47 = vpop.f32.mrb[7].mxu0  ;;  %7072 = vmatprep.subr.bf16.mxu0 %v9846_v15  ;;  %v6935_v50 = vpop.f32.mrb[7].mxu1  ;;  %7236 = vmatprep.subr.bf16.mxu1 %v9848_v29  ;;  %v997_v27 = vld [vmem:[%s14260_s1 + $0x1e60] sm:$0xff]  ;;  %v990_v15 = vld [vmem:[%s14260_s1 + $0x1e28] sm:$0xff] }
 0x2dc   :  { %v998_v29 = vld [vmem:[%s14260_s1 + $0x1e68] sm:$0xff]  ;;  %v9942_v37 = vcombine.high %v989_v26, %v997_v27  ;;  %v1005_v43 = vld [vmem:[%s14260_s1 + $0x1ea0] sm:$0xff] }
 0x2dd   :  { %v9944_v41 = vcombine.high %v990_v15, %v998_v29  ;;  %v1006_v46 = vld [vmem:[%s14260_s1 + $0x1ea8] sm:$0xff] }
 0x2de   :  { %7073 = vmatpush1.bf16.msra.mxu0 %v9845_v44  ;;  %7237 = vmatpush1.bf16.msra.mxu1 %v9847_v48  ;;  %v1013_v44 = vld [vmem:[%s14260_s1 + $0x1ee0] sm:$0xff]  ;;  %v1014_v47 = vld [vmem:[%s14260_s1 + $0x1ee8] sm:$0xff]  ;;  %v9941_v48 = vcombine.low %v989_v26, %v997_v27  ;;  %v63_v26 = vld [vmem:[%s14260_s1 + $0x130] sm:$0xff] }
 0x2df   :  { %7074 = vmatprep.subr.bf16.mxu0 %v9862_v49  ;;  %7238 = vmatprep.subr.bf16.mxu1 %v9864_v51  ;;  %v9943_v49 = vcombine.low %v990_v15, %v998_v29  ;;  %v9958_v50 = vcombine.high %v1005_v43, %v1013_v44  ;;  %v9960_v51 = vcombine.high %v1006_v46, %v1014_v47  ;;  %v71_v27 = vld [vmem:[%s14260_s1 + $0x170] sm:$0xff]  ;;  %v64_v15 = vld [vmem:[%s14260_s1 + $0x138] sm:$0xff] }
 0x2e0   :  { %v72_v29 = vld [vmem:[%s14260_s1 + $0x178] sm:$0xff] }
 0x2e2   :  { %7075 = vmatpush1.bf16.msra.mxu0 %v9861_v59  ;;  %7239 = vmatpush1.bf16.msra.mxu1 %v9863_v60  ;;  %v9957_v59 = vcombine.low %v1005_v43, %v1013_v44  ;;  %v9959_v60 = vcombine.low %v1006_v46, %v1014_v47  ;;  %v79_v43 = vld [vmem:[%s14260_s1 + $0x1b0] sm:$0xff]  ;;  %v80_v46 = vld [vmem:[%s14260_s1 + $0x1b8] sm:$0xff] }
 0x2e3   :  { %7076 = vmatprep.subr.bf16.mxu0 %v9878_v61  ;;  %7240 = vmatprep.subr.bf16.mxu1 %v9880_v62  ;;  %v9974_v61 = vcombine.high %v1021_v52, %v1029_v54  ;;  %v9976_v62 = vcombine.high %v1022_v56, %v1030_v58  ;;  %v87_v44 = vld [vmem:[%s14260_s1 + $0x1f0] sm:$0xff]  ;;  %v88_v47 = vld [vmem:[%s14260_s1 + $0x1f8] sm:$0xff] }
 0x2e6   :  { %7077 = vmatpush1.bf16.msra.mxu0 %v9877_v2  ;;  %7241 = vmatpush1.bf16.msra.mxu1 %v9879_v3  ;;  %v9973_v2 = vcombine.low %v1021_v52, %v1029_v54  ;;  %v9975_v3 = vcombine.low %v1022_v56, %v1030_v58  ;;  %v95_v52 = vld [vmem:[%s14260_s1 + $0x230] sm:$0xff]  ;;  %v104_v56 = vld [vmem:[%s14260_s1 + $0x278] sm:$0xff]  ;;  %v9033_v58 = vcombine.low %v79_v43, %v87_v44 }
 0x2e7   :  { %7078 = vmatprep.subr.bf16.mxu0 %v9894_v4  ;;  %7242 = vmatprep.subr.bf16.mxu1 %v9896_v5  ;;  %v9990_v4 = vcombine.high %v1037_v39, %v1045_v63  ;;  %v9992_v5 = vcombine.high %v1038_v0, %v1046_v1  ;;  %v103_v54 = vld [vmem:[%s14260_s1 + $0x270] sm:$0xff] }
 0x2ea   :  { %7079 = vmatpush1.bf16.msra.mxu0 %v9893_v10  ;;  %7243 = vmatpush1.bf16.msra.mxu1 %v9895_v11  ;;  %v9989_v10 = vcombine.low %v1037_v39, %v1045_v63  ;;  %v9991_v11 = vcombine.low %v1038_v0, %v1046_v1  ;;  %v119_v39 = vld [vmem:[%s14260_s1 + $0x2f0] sm:$0xff]  ;;  %v112_v63 = vld [vmem:[%s14260_s1 + $0x2b8] sm:$0xff]  ;;  %v9049_v1 = vcombine.low %v95_v52, %v103_v54 }
 0x2eb   :  { %7080 = vmatprep.subr.bf16.mxu0 %v9910_v13  ;;  %7244 = vmatprep.subr.bf16.mxu1 %v9912_v14  ;;  %v8986_v13 = vcombine.high %v31_v6, %v39_v7  ;;  %v8988_v14 = vcombine.high %v32_v8, %v40_v9  ;;  %v120_v0 = vld [vmem:[%s14260_s1 + $0x2f8] sm:$0xff] }
 0x2ee   :  { %7081 = vmatpush1.bf16.msra.mxu0 %v9909_v19  ;;  %7245 = vmatpush1.bf16.msra.mxu1 %v9911_v20  ;;  %v8985_v19 = vcombine.low %v31_v6, %v39_v7  ;;  %v8987_v20 = vcombine.low %v32_v8, %v40_v9  ;;  %v135_v6 = vld [vmem:[%s14260_s1 + $0x370] sm:$0xff]  ;;  %v128_v7 = vld [vmem:[%s14260_s1 + $0x338] sm:$0xff] }
 0x2ef   :  { %7082 = vmatprep.subr.bf16.mxu0 %v9926_v23  ;;  %7246 = vmatprep.subr.bf16.mxu1 %v9928_v24  ;;  %v9002_v23 = vcombine.high %v47_v16, %v55_v17  ;;  %v9004_v24 = vcombine.high %v48_v53, %v56_v18  ;;  %v136_v8 = vld [vmem:[%s14260_s1 + $0x378] sm:$0xff] }
 0x2f2   :  { %7083 = vmatpush1.bf16.msra.mxu0 %v9925_v30  ;;  %7247 = vmatpush1.bf16.msra.mxu1 %v9927_v32  ;;  %v9001_v30 = vcombine.low %v47_v16, %v55_v17  ;;  %v9003_v32 = vcombine.low %v48_v53, %v56_v18  ;;  %v151_v16 = vld [vmem:[%s14260_s1 + $0x3f0] sm:$0xff]  ;;  %v144_v17 = vld [vmem:[%s14260_s1 + $0x3b8] sm:$0xff] }
 0x2f3   :  { %7084 = vmatprep.subr.bf16.mxu0 %v9942_v37  ;;  %7248 = vmatprep.subr.bf16.mxu1 %v9944_v41  ;;  %v9018_v37 = vcombine.high %v63_v26, %v71_v27  ;;  %v9020_v41 = vcombine.high %v64_v15, %v72_v29  ;;  %v152_v53 = vld [vmem:[%s14260_s1 + $0x3f8] sm:$0xff] }
 0x2f6   :  { %7085 = vmatpush1.bf16.msra.mxu0 %v9941_v48  ;;  %7249 = vmatpush1.bf16.msra.mxu1 %v9943_v49  ;;  %v9017_v48 = vcombine.low %v63_v26, %v71_v27  ;;  %v9019_v49 = vcombine.low %v64_v15, %v72_v29  ;;  %v167_v26 = vld [vmem:[%s14260_s1 + $0x470] sm:$0xff]  ;;  %v160_v27 = vld [vmem:[%s14260_s1 + $0x438] sm:$0xff] }
 0x2f7   :  { %7086 = vmatprep.subr.bf16.mxu0 %v9958_v50  ;;  %7250 = vmatprep.subr.bf16.mxu1 %v9960_v51  ;;  %v9034_v50 = vcombine.high %v79_v43, %v87_v44  ;;  %v9036_v51 = vcombine.high %v80_v46, %v88_v47  ;;  %v168_v15 = vld [vmem:[%s14260_s1 + $0x478] sm:$0xff]  ;;  %v183_v43 = vld [vmem:[%s14260_s1 + $0x4f0] sm:$0xff] }
 0x2f8   :  { %v176_v44 = vld [vmem:[%s14260_s1 + $0x4b8] sm:$0xff] }
 0x2fa   :  { %7087 = vmatpush1.bf16.msra.mxu0 %v9957_v59  ;;  %7251 = vmatpush1.bf16.msra.mxu1 %v9959_v60  ;;  %v9035_v59 = vcombine.low %v80_v46, %v88_v47  ;;  %v9050_v60 = vcombine.high %v95_v52, %v103_v54  ;;  %v184_v46 = vld [vmem:[%s14260_s1 + $0x4f8] sm:$0xff]  ;;  %v199_v52 = vld [vmem:[%s14260_s1 + $0x570] sm:$0xff] }
 0x2fb   :  { %7088 = vmatprep.subr.bf16.mxu0 %v9974_v61  ;;  %7252 = vmatprep.subr.bf16.mxu1 %v9976_v62  ;;  %v111_v62 = vld [vmem:[%s14260_s1 + $0x2b0] sm:$0xff]  ;;  %v192_v54 = vld [vmem:[%s14260_s1 + $0x538] sm:$0xff] }
 0x2fc   :  { %v9065_v9 = vcombine.low %v111_v62, %v119_v39 }
 0x2fe   :  { %7089 = vmatpush1.bf16.msra.mxu0 %v9973_v2  ;;  %7253 = vmatpush1.bf16.msra.mxu1 %v9975_v3  ;;  %v9066_v3 = vcombine.high %v111_v62, %v119_v39  ;;  %v215_v62 = vld [vmem:[%s14260_s1 + $0x5f0] sm:$0xff]  ;;  %v208_v39 = vld [vmem:[%s14260_s1 + $0x5b8] sm:$0xff] }
 0x2ff   :  { %7090 = vmatprep.subr.bf16.mxu0 %v9990_v4  ;;  %7254 = vmatprep.subr.bf16.mxu1 %v9992_v5  ;;  %v9068_v4 = vcombine.high %v112_v63, %v120_v0  ;;  %v127_v5 = vld [vmem:[%s14260_s1 + $0x330] sm:$0xff] }
 0x300   :  { %v9081_v18 = vcombine.low %v127_v5, %v135_v6 }
 0x302   :  { %7091 = vmatpush1.bf16.msra.mxu0 %v9989_v10  ;;  %7255 = vmatpush1.bf16.msra.mxu1 %v9991_v11  ;;  %v9067_v10 = vcombine.low %v112_v63, %v120_v0  ;;  %v9082_v11 = vcombine.high %v127_v5, %v135_v6  ;;  %v216_v63 = vld [vmem:[%s14260_s1 + $0x5f8] sm:$0xff]  ;;  %v231_v5 = vld [vmem:[%s14260_s1 + $0x670] sm:$0xff] }
 0x303   :  { %7265 = vmatprep.subr.bf16.mxu0 %v8986_v13  ;;  %7429 = vmatprep.subr.bf16.mxu1 %v8988_v14  ;;  %v9084_v13 = vcombine.high %v128_v7, %v136_v8  ;;  %v143_v14 = vld [vmem:[%s14260_s1 + $0x3b0] sm:$0xff]  ;;  %v224_v6 = vld [vmem:[%s14260_s1 + $0x638] sm:$0xff] }
 0x304   :  { %v9097_v29 = vcombine.low %v143_v14, %v151_v16 }
 0x305   :  { %7093 = vmatmul.mubr.bf16.vlgmr.msra.gmra.mrb[8].mxu0 %v11431_v55  ;;  %7257 = vmatmul.mubr.bf16.vlgmr.msra.gmra.mrb[8].mxu1 %v11431_v55 }
 0x306   :  { %7266 = vmatpush1.bf16.msra.mxu0 %v8985_v19  ;;  %7430 = vmatpush1.bf16.msra.mxu1 %v8987_v20  ;;  %v9083_v19 = vcombine.low %v128_v7, %v136_v8  ;;  %v9098_v20 = vcombine.high %v143_v14, %v151_v16  ;;  %v232_v7 = vld [vmem:[%s14260_s1 + $0x678] sm:$0xff]  ;;  %v247_v14 = vld [vmem:[%s14260_s1 + $0x6f0] sm:$0xff] }
 0x307   :  { %7267 = vmatprep.subr.bf16.mxu0 %v9002_v23  ;;  %7431 = vmatprep.subr.bf16.mxu1 %v9004_v24  ;;  %v9100_v23 = vcombine.high %v144_v17, %v152_v53  ;;  %v159_v24 = vld [vmem:[%s14260_s1 + $0x430] sm:$0xff]  ;;  %v240_v16 = vld [vmem:[%s14260_s1 + $0x6b8] sm:$0xff] }
 0x308   :  { %7297 = vmatprep.mubr.bf16.mxu0 %v10678_v57  ;;  %7461 = vmatprep.mubr.bf16.mxu1 %v10678_v57  ;;  %v96_v57 = vld [vmem:[%s14260_s1 + $0x238] sm:$0xff]  ;;  %v9113_v47 = vcombine.low %v159_v24, %v167_v26 }
 0x309   :  { %v9052_v61 = vcombine.high %v96_v57, %v104_v56  ;;  %v9051_v2 = vcombine.low %v96_v57, %v104_v56  ;;  %v200_v57 = vld [vmem:[%s14260_s1 + $0x578] sm:$0xff] }
 0x30a   :  { %7268 = vmatpush1.bf16.msra.mxu0 %v9001_v30  ;;  %7432 = vmatpush1.bf16.msra.mxu1 %v9003_v32  ;;  %v9099_v30 = vcombine.low %v144_v17, %v152_v53  ;;  %v9114_v32 = vcombine.high %v159_v24, %v167_v26  ;;  %v248_v17 = vld [vmem:[%s14260_s1 + $0x6f8] sm:$0xff]  ;;  %v263_v24 = vld [vmem:[%s14260_s1 + $0x770] sm:$0xff] }
 0x30b   :  { %7269 = vmatprep.subr.bf16.mxu0 %v9018_v37  ;;  %7433 = vmatprep.subr.bf16.mxu1 %v9020_v41  ;;  %v9116_v37 = vcombine.high %v160_v27, %v168_v15  ;;  %v175_v41 = vld [vmem:[%s14260_s1 + $0x4b0] sm:$0xff]  ;;  %v256_v26 = vld [vmem:[%s14260_s1 + $0x738] sm:$0xff] }
 0x30c   :  { %v9129_v56 = vcombine.low %v175_v41, %v183_v43 }
 0x30e   :  { %7270 = vmatpush1.bf16.msra.mxu0 %v9017_v48  ;;  %7434 = vmatpush1.bf16.msra.mxu1 %v9019_v49  ;;  %v9115_v48 = vcombine.low %v160_v27, %v168_v15  ;;  %v9130_v49 = vcombine.high %v175_v41, %v183_v43  ;;  %v264_v27 = vld [vmem:[%s14260_s1 + $0x778] sm:$0xff]  ;;  %v279_v41 = vld [vmem:[%s14260_s1 + $0x7f0] sm:$0xff] }
 0x30f   :  { %7271 = vmatprep.subr.bf16.mxu0 %v9034_v50  ;;  %7435 = vmatprep.subr.bf16.mxu1 %v9036_v51  ;;  %v9132_v50 = vcombine.high %v176_v44, %v184_v46  ;;  %v191_v51 = vld [vmem:[%s14260_s1 + $0x530] sm:$0xff]  ;;  %v272_v43 = vld [vmem:[%s14260_s1 + $0x7b8] sm:$0xff] }
 0x310   :  { %v9145_v0 = vcombine.low %v191_v51, %v199_v52 }
 0x312   :  { %7272 = vmatpush1.bf16.msra.mxu0 %v9033_v58  ;;  %7436 = vmatpush1.bf16.msra.mxu1 %v9035_v59  ;;  %v9131_v58 = vcombine.low %v176_v44, %v184_v46  ;;  %v9146_v59 = vcombine.high %v191_v51, %v199_v52  ;;  %v280_v44 = vld [vmem:[%s14260_s1 + $0x7f8] sm:$0xff]  ;;  %v295_v51 = vld [vmem:[%s14260_s1 + $0x870] sm:$0xff] }
 0x313   :  { %7273 = vmatprep.subr.bf16.mxu0 %v9050_v60  ;;  %7437 = vmatprep.subr.bf16.mxu1 %v9052_v61  ;;  %v9148_v60 = vcombine.high %v192_v54, %v200_v57  ;;  %v207_v61 = vld [vmem:[%s14260_s1 + $0x5b0] sm:$0xff]  ;;  %v288_v52 = vld [vmem:[%s14260_s1 + $0x838] sm:$0xff] }
 0x314   :  { %v9161_v8 = vcombine.low %v207_v61, %v215_v62 }
 0x316   :  { %7274 = vmatpush1.bf16.msra.mxu0 %v9049_v1  ;;  %7438 = vmatpush1.bf16.msra.mxu1 %v9051_v2  ;;  %v9147_v1 = vcombine.low %v192_v54, %v200_v57  ;;  %v9162_v2 = vcombine.high %v207_v61, %v215_v62  ;;  %v296_v54 = vld [vmem:[%s14260_s1 + $0x878] sm:$0xff]  ;;  %v311_v61 = vld [vmem:[%s14260_s1 + $0x8f0] sm:$0xff] }
 0x317   :  { %7275 = vmatprep.subr.bf16.mxu0 %v9066_v3  ;;  %7439 = vmatprep.subr.bf16.mxu1 %v9068_v4  ;;  %v9164_v3 = vcombine.high %v208_v39, %v216_v63  ;;  %v223_v4 = vld [vmem:[%s14260_s1 + $0x630] sm:$0xff]  ;;  %v304_v62 = vld [vmem:[%s14260_s1 + $0x8b8] sm:$0xff] }
 0x318   :  { %v9177_v53 = vcombine.low %v223_v4, %v231_v5 }
 0x31a   :  { %7276 = vmatpush1.bf16.msra.mxu0 %v9065_v9  ;;  %7440 = vmatpush1.bf16.msra.mxu1 %v9067_v10  ;;  %v9163_v9 = vcombine.low %v208_v39, %v216_v63  ;;  %v9178_v10 = vcombine.high %v223_v4, %v231_v5  ;;  %v312_v39 = vld [vmem:[%s14260_s1 + $0x8f8] sm:$0xff]  ;;  %v327_v4 = vld [vmem:[%s14260_s1 + $0x970] sm:$0xff] }
 0x31b   :  { %7277 = vmatprep.subr.bf16.mxu0 %v9082_v11  ;;  %7441 = vmatprep.subr.bf16.mxu1 %v9084_v13  ;;  %v9180_v11 = vcombine.high %v224_v6, %v232_v7  ;;  %v239_v13 = vld [vmem:[%s14260_s1 + $0x6b0] sm:$0xff]  ;;  %v320_v5 = vld [vmem:[%s14260_s1 + $0x938] sm:$0xff] }
 0x31c   :  { %v9193_v15 = vcombine.low %v239_v13, %v247_v14 }
 0x31e   :  { %7278 = vmatpush1.bf16.msra.mxu0 %v9081_v18  ;;  %7442 = vmatpush1.bf16.msra.mxu1 %v9083_v19  ;;  %v9179_v18 = vcombine.low %v224_v6, %v232_v7  ;;  %v9194_v19 = vcombine.high %v239_v13, %v247_v14  ;;  %v328_v6 = vld [vmem:[%s14260_s1 + $0x978] sm:$0xff]  ;;  %v343_v13 = vld [vmem:[%s14260_s1 + $0x9f0] sm:$0xff] }
 0x31f   :  { %7279 = vmatprep.subr.bf16.mxu0 %v9098_v20  ;;  %7443 = vmatprep.subr.bf16.mxu1 %v9100_v23  ;;  %v9196_v20 = vcombine.high %v240_v16, %v248_v17  ;;  %v255_v23 = vld [vmem:[%s14260_s1 + $0x730] sm:$0xff]  ;;  %v344_v14 = vld [vmem:[%s14260_s1 + $0x9f8] sm:$0xff] }
 0x320   :  { %v9209_v46 = vcombine.low %v255_v23, %v263_v24 }
 0x322   :  { %7280 = vmatpush1.bf16.msra.mxu0 %v9097_v29  ;;  %7444 = vmatpush1.bf16.msra.mxu1 %v9099_v30  ;;  %v9195_v29 = vcombine.low %v240_v16, %v248_v17  ;;  %v9210_v30 = vcombine.high %v255_v23, %v263_v24  ;;  %v9275_v17 = vcombine.low %v320_v5, %v328_v6  ;;  %v360_v23 = vld [vmem:[%s14260_s1 + $0xa78] sm:$0xff] }
 0x323   :  { %7281 = vmatprep.subr.bf16.mxu0 %v9114_v32  ;;  %7445 = vmatprep.subr.bf16.mxu1 %v9116_v37  ;;  %v9212_v32 = vcombine.high %v256_v26, %v264_v27  ;;  %v271_v37 = vld [vmem:[%s14260_s1 + $0x7b0] sm:$0xff] }
 0x324   :  { %v9225_v57 = vcombine.low %v271_v37, %v279_v41 }
 0x326   :  { %7282 = vmatpush1.bf16.msra.mxu0 %v9113_v47  ;;  %7446 = vmatpush1.bf16.msra.mxu1 %v9115_v48  ;;  %v9211_v47 = vcombine.low %v256_v26, %v264_v27  ;;  %v9226_v48 = vcombine.high %v271_v37, %v279_v41  ;;  %v376_v37 = vld [vmem:[%s14260_s1 + $0xaf8] sm:$0xff] }
 0x327   :  { %7283 = vmatprep.subr.bf16.mxu0 %v9130_v49  ;;  %7447 = vmatprep.subr.bf16.mxu1 %v9132_v50  ;;  %v9228_v49 = vcombine.high %v272_v43, %v280_v44  ;;  %v287_v50 = vld [vmem:[%s14260_s1 + $0x830] sm:$0xff] }
 0x328   :  { %v9241_v63 = vcombine.low %v287_v50, %v295_v51 }
 0x32a   :  { %7284 = vmatpush1.bf16.msra.mxu0 %v9129_v56  ;;  %7448 = vmatpush1.bf16.msra.mxu1 %v9131_v58  ;;  %v9227_v56 = vcombine.low %v272_v43, %v280_v44  ;;  %v9242_v58 = vcombine.high %v287_v50, %v295_v51  ;;  %v392_v50 = vld [vmem:[%s14260_s1 + $0xb78] sm:$0xff] }
 0x32b   :  { %7285 = vmatprep.subr.bf16.mxu0 %v9146_v59  ;;  %7449 = vmatprep.subr.bf16.mxu1 %v9148_v60  ;;  %v9244_v59 = vcombine.high %v288_v52, %v296_v54  ;;  %v303_v60 = vld [vmem:[%s14260_s1 + $0x8b0] sm:$0xff] }
 0x32c   :  { %v9257_v7 = vcombine.low %v303_v60, %v311_v61 }
 0x32e   :  { %7286 = vmatpush1.bf16.msra.mxu0 %v9145_v0  ;;  %7450 = vmatpush1.bf16.msra.mxu1 %v9147_v1  ;;  %v9243_v0 = vcombine.low %v288_v52, %v296_v54  ;;  %v9258_v1 = vcombine.high %v303_v60, %v311_v61  ;;  %v408_v60 = vld [vmem:[%s14260_s1 + $0xbf8] sm:$0xff] }
 0x32f   :  { %7287 = vmatprep.subr.bf16.mxu0 %v9162_v2  ;;  %7451 = vmatprep.subr.bf16.mxu1 %v9164_v3  ;;  %v9260_v2 = vcombine.high %v304_v62, %v312_v39  ;;  %v319_v3 = vld [vmem:[%s14260_s1 + $0x930] sm:$0xff] }
 0x330   :  { %v9273_v16 = vcombine.low %v319_v3, %v327_v4 }
 0x332   :  { %7288 = vmatpush1.bf16.msra.mxu0 %v9161_v8  ;;  %7452 = vmatpush1.bf16.msra.mxu1 %v9163_v9  ;;  %v9259_v8 = vcombine.low %v304_v62, %v312_v39  ;;  %v9274_v9 = vcombine.high %v319_v3, %v327_v4  ;;  %v424_v3 = vld [vmem:[%s14260_s1 + $0xc78] sm:$0xff] }
 0x333   :  { %7289 = vmatprep.subr.bf16.mxu0 %v9178_v10  ;;  %7453 = vmatprep.subr.bf16.mxu1 %v9180_v11  ;;  %v9276_v10 = vcombine.high %v320_v5, %v328_v6  ;;  %v335_v11 = vld [vmem:[%s14260_s1 + $0x9b0] sm:$0xff] }
 0x334   :  { %v9289_v24 = vcombine.low %v335_v11, %v343_v13 }
 0x336   :  { %7290 = vmatpush1.bf16.msra.mxu0 %v9177_v53  ;;  %7454 = vmatpush1.bf16.msra.mxu1 %v9179_v18  ;;  %v9290_v53 = vcombine.high %v335_v11, %v343_v13  ;;  %v440_v11 = vld [vmem:[%s14260_s1 + $0xcf8] sm:$0xff] }
 0x337   :  { %7291 = vmatprep.subr.bf16.mxu0 %v9194_v19  ;;  %7455 = vmatprep.subr.bf16.mxu1 %v9196_v20  ;;  %v351_v19 = vld [vmem:[%s14260_s1 + $0xa30] sm:$0xff] }
 0x338   :  { %v359_v20 = vld [vmem:[%s14260_s1 + $0xa70] sm:$0xff] }
 0x339   :  { %v9306_v27 = vcombine.high %v351_v19, %v359_v20  ;;  %v9305_v41 = vcombine.low %v351_v19, %v359_v20  ;;  %v456_v19 = vld [vmem:[%s14260_s1 + $0xd78] sm:$0xff] }
 0x33a   :  { %7292 = vmatpush1.bf16.msra.mxu0 %v9193_v15  ;;  %7456 = vmatpush1.bf16.msra.mxu1 %v9195_v29  ;;  %v367_v29 = vld [vmem:[%s14260_s1 + $0xab0] sm:$0xff] }
 0x33b   :  { %7293 = vmatprep.subr.bf16.mxu0 %v9210_v30  ;;  %7457 = vmatprep.subr.bf16.mxu1 %v9212_v32  ;;  %v375_v30 = vld [vmem:[%s14260_s1 + $0xaf0] sm:$0xff]  ;;  %v368_v32 = vld [vmem:[%s14260_s1 + $0xab8] sm:$0xff] }
 0x33c   :  { %v9322_v44 = vcombine.high %v367_v29, %v375_v30  ;;  %v9321_v51 = vcombine.low %v367_v29, %v375_v30  ;;  %v9323_v52 = vcombine.low %v368_v32, %v376_v37  ;;  %v472_v29 = vld [vmem:[%s14260_s1 + $0xdf8] sm:$0xff] }
 0x33e   :  { %7294 = vmatpush1.bf16.msra.mxu0 %v9209_v46  ;;  %7458 = vmatpush1.bf16.msra.mxu1 %v9211_v47  ;;  %v9324_v46 = vcombine.high %v368_v32, %v376_v37  ;;  %v383_v47 = vld [vmem:[%s14260_s1 + $0xb30] sm:$0xff] }
 0x33f   :  { %7295 = vmatprep.subr.bf16.mxu0 %v9226_v48  ;;  %7459 = vmatprep.subr.bf16.mxu1 %v9228_v49  ;;  %v391_v48 = vld [vmem:[%s14260_s1 + $0xb70] sm:$0xff]  ;;  %v384_v49 = vld [vmem:[%s14260_s1 + $0xb38] sm:$0xff] }
 0x340   :  { %v9338_v54 = vcombine.high %v383_v47, %v391_v48  ;;  %v9337_v61 = vcombine.low %v383_v47, %v391_v48  ;;  %v9339_v62 = vcombine.low %v384_v49, %v392_v50  ;;  %v488_v47 = vld [vmem:[%s14260_s1 + $0xe78] sm:$0xff] }
 0x342   :  { %7296 = vmatpush1.bf16.msra.mxu0 %v9225_v57  ;;  %7460 = vmatpush1.bf16.msra.mxu1 %v9227_v56  ;;  %v9340_v57 = vcombine.high %v384_v49, %v392_v50  ;;  %v399_v56 = vld [vmem:[%s14260_s1 + $0xbb0] sm:$0xff] }
 0x343   :  { %7306 = vmatprep.subr.bf16.mxu0 %v9242_v58  ;;  %7470 = vmatprep.subr.bf16.mxu1 %v9244_v59  ;;  %v407_v58 = vld [vmem:[%s14260_s1 + $0xbf0] sm:$0xff]  ;;  %v400_v59 = vld [vmem:[%s14260_s1 + $0xbb8] sm:$0xff] }
 0x344   :  { %v9354_v39 = vcombine.high %v399_v56, %v407_v58  ;;  %v9353_v4 = vcombine.low %v399_v56, %v407_v58  ;;  %v9355_v5 = vcombine.low %v400_v59, %v408_v60  ;;  %v504_v56 = vld [vmem:[%s14260_s1 + $0xef8] sm:$0xff] }
 0x345   :  { %7298 = vmatmul.mubr.bf16.vlgmr.msra.gmra.mrb[12].mxu0 %v10804_v12  ;;  %7462 = vmatmul.mubr.bf16.vlgmr.msra.gmra.mrb[12].mxu1 %v10804_v12  ;;  %v336_v12 = vld [vmem:[%s14260_s1 + $0x9b8] sm:$0xff] }
 0x346   :  { %7307 = vmatpush1.bf16.msra.mxu0 %v9241_v63  ;;  %7471 = vmatpush1.bf16.msra.mxu1 %v9243_v0  ;;  %v9292_v18 = vcombine.high %v336_v12, %v344_v14  ;;  %v9291_v26 = vcombine.low %v336_v12, %v344_v14  ;;  %v9356_v63 = vcombine.high %v400_v59, %v408_v60  ;;  %v415_v0 = vld [vmem:[%s14260_s1 + $0xc30] sm:$0xff] }
 0x347   :  { %7308 = vmatprep.subr.bf16.mxu0 %v9258_v1  ;;  %7472 = vmatprep.subr.bf16.mxu1 %v9260_v2  ;;  %v423_v1 = vld [vmem:[%s14260_s1 + $0xc70] sm:$0xff]  ;;  %v416_v2 = vld [vmem:[%s14260_s1 + $0xc38] sm:$0xff] }
 0x348   :  { %7338 = vmatprep.mubr.bf16.mxu0 %v10825_v21  ;;  %7502 = vmatprep.mubr.bf16.mxu1 %v10825_v21  ;;  %v352_v21 = vld [vmem:[%s14260_s1 + $0xa38] sm:$0xff]  ;;  %v9370_v6 = vcombine.high %v415_v0, %v423_v1  ;;  %v9369_v13 = vcombine.low %v415_v0, %v423_v1  ;;  %v9371_v12 = vcombine.low %v416_v2, %v424_v3 }
 0x349   :  { %v9308_v15 = vcombine.high %v352_v21, %v360_v23  ;;  %v9307_v43 = vcombine.low %v352_v21, %v360_v23  ;;  %v520_v0 = vld [vmem:[%s14260_s1 + $0xf78] sm:$0xff] }
 0x34a   :  { %7309 = vmatpush1.bf16.msra.mxu0 %v9257_v7  ;;  %7473 = vmatpush1.bf16.msra.mxu1 %v9259_v8  ;;  %v9372_v7 = vcombine.high %v416_v2, %v424_v3  ;;  %v431_v8 = vld [vmem:[%s14260_s1 + $0xcb0] sm:$0xff] }
 0x34b   :  { %7310 = vmatprep.subr.bf16.mxu0 %v9274_v9  ;;  %7474 = vmatprep.subr.bf16.mxu1 %v9276_v10  ;;  %v439_v9 = vld [vmem:[%s14260_s1 + $0xcf0] sm:$0xff]  ;;  %v432_v10 = vld [vmem:[%s14260_s1 + $0xcb8] sm:$0xff] }
 0x34c   :  { %v9386_v14 = vcombine.high %v431_v8, %v439_v9  ;;  %v9385_v20 = vcombine.low %v431_v8, %v439_v9  ;;  %v9387_v21 = vcombine.low %v432_v10, %v440_v11  ;;  %v536_v8 = vld [vmem:[%s14260_s1 + $0xff8] sm:$0xff] }
 0x34e   :  { %7311 = vmatpush1.bf16.msra.mxu0 %v9273_v16  ;;  %7475 = vmatpush1.bf16.msra.mxu1 %v9275_v17  ;;  %v9388_v16 = vcombine.high %v432_v10, %v440_v11  ;;  %v447_v17 = vld [vmem:[%s14260_s1 + $0xd30] sm:$0xff] }
 0x34f   :  { %7312 = vmatprep.subr.bf16.mxu0 %v9290_v53  ;;  %7476 = vmatprep.subr.bf16.mxu1 %v9292_v18  ;;  %v455_v53 = vld [vmem:[%s14260_s1 + $0xd70] sm:$0xff]  ;;  %v448_v18 = vld [vmem:[%s14260_s1 + $0xd38] sm:$0xff] }
 0x350   :  { %v9402_v23 = vcombine.high %v447_v17, %v455_v53  ;;  %v9401_v30 = vcombine.low %v447_v17, %v455_v53  ;;  %v9403_v32 = vcombine.low %v448_v18, %v456_v19  ;;  %v552_v17 = vld [vmem:[%s14260_s1 + $0x1078] sm:$0xff] }
 0x352   :  { %7313 = vmatpush1.bf16.msra.mxu0 %v9289_v24  ;;  %7477 = vmatpush1.bf16.msra.mxu1 %v9291_v26  ;;  %v9404_v24 = vcombine.high %v448_v18, %v456_v19  ;;  %v463_v26 = vld [vmem:[%s14260_s1 + $0xdb0] sm:$0xff] }
 0x353   :  { %7314 = vmatprep.subr.bf16.mxu0 %v9306_v27  ;;  %7478 = vmatprep.subr.bf16.mxu1 %v9308_v15  ;;  %v471_v27 = vld [vmem:[%s14260_s1 + $0xdf0] sm:$0xff]  ;;  %v464_v15 = vld [vmem:[%s14260_s1 + $0xdb8] sm:$0xff] }
 0x354   :  { %v9418_v37 = vcombine.high %v463_v26, %v471_v27  ;;  %v9417_v48 = vcombine.low %v463_v26, %v471_v27  ;;  %v9419_v49 = vcombine.low %v464_v15, %v472_v29  ;;  %v568_v26 = vld [vmem:[%s14260_s1 + $0x10f8] sm:$0xff] }
 0x356   :  { %7315 = vmatpush1.bf16.msra.mxu0 %v9305_v41  ;;  %7479 = vmatpush1.bf16.msra.mxu1 %v9307_v43  ;;  %v9420_v41 = vcombine.high %v464_v15, %v472_v29  ;;  %v479_v43 = vld [vmem:[%s14260_s1 + $0xe30] sm:$0xff] }
 0x357   :  { %7316 = vmatprep.subr.bf16.mxu0 %v9322_v44  ;;  %7480 = vmatprep.subr.bf16.mxu1 %v9324_v46  ;;  %v487_v44 = vld [vmem:[%s14260_s1 + $0xe70] sm:$0xff]  ;;  %v480_v46 = vld [vmem:[%s14260_s1 + $0xe38] sm:$0xff] }
 0x358   :  { %v9434_v50 = vcombine.high %v479_v43, %v487_v44  ;;  %v9433_v58 = vcombine.low %v479_v43, %v487_v44  ;;  %v9435_v59 = vcombine.low %v480_v46, %v488_v47  ;;  %v584_v43 = vld [vmem:[%s14260_s1 + $0x1178] sm:$0xff] }
 0x35a   :  { %7317 = vmatpush1.bf16.msra.mxu0 %v9321_v51  ;;  %7481 = vmatpush1.bf16.msra.mxu1 %v9323_v52  ;;  %v9436_v51 = vcombine.high %v480_v46, %v488_v47  ;;  %v495_v52 = vld [vmem:[%s14260_s1 + $0xeb0] sm:$0xff] }
 0x35b   :  { %7318 = vmatprep.subr.bf16.mxu0 %v9338_v54  ;;  %7482 = vmatprep.subr.bf16.mxu1 %v9340_v57  ;;  %v503_v54 = vld [vmem:[%s14260_s1 + $0xef0] sm:$0xff]  ;;  %v496_v57 = vld [vmem:[%s14260_s1 + $0xeb8] sm:$0xff] }
 0x35c   :  { %v9450_v60 = vcombine.high %v495_v52, %v503_v54  ;;  %v9449_v1 = vcombine.low %v495_v52, %v503_v54  ;;  %v9451_v2 = vcombine.low %v496_v57, %v504_v56  ;;  %v591_v46 = vld [vmem:[%s14260_s1 + $0x11b0] sm:$0xff] }
 0x35d   :  { %v607_v54 = vld [vmem:[%s14260_s1 + $0x1230] sm:$0xff] }
 0x35e   :  { %7319 = vmatpush1.bf16.msra.mxu0 %v9337_v61  ;;  %7483 = vmatpush1.bf16.msra.mxu1 %v9339_v62  ;;  %v9452_v61 = vcombine.high %v496_v57, %v504_v56  ;;  %v511_v62 = vld [vmem:[%s14260_s1 + $0xf30] sm:$0xff] }
 0x35f   :  { %7320 = vmatprep.subr.bf16.mxu0 %v9354_v39  ;;  %7484 = vmatprep.subr.bf16.mxu1 %v9356_v63  ;;  %v519_v39 = vld [vmem:[%s14260_s1 + $0xf70] sm:$0xff]  ;;  %v512_v63 = vld [vmem:[%s14260_s1 + $0xf38] sm:$0xff] }
 0x360   :  { %v9466_v3 = vcombine.high %v511_v62, %v519_v39  ;;  %v9465_v9 = vcombine.low %v511_v62, %v519_v39  ;;  %v9467_v10 = vcombine.low %v512_v63, %v520_v0  ;;  %v623_v62 = vld [vmem:[%s14260_s1 + $0x12b0] sm:$0xff] }
 0x362   :  { %7321 = vmatpush1.bf16.msra.mxu0 %v9353_v4  ;;  %7485 = vmatpush1.bf16.msra.mxu1 %v9355_v5  ;;  %v9468_v4 = vcombine.high %v512_v63, %v520_v0  ;;  %v527_v5 = vld [vmem:[%s14260_s1 + $0xfb0] sm:$0xff] }
 0x363   :  { %7322 = vmatprep.subr.bf16.mxu0 %v9370_v6  ;;  %7486 = vmatprep.subr.bf16.mxu1 %v9372_v7  ;;  %v535_v6 = vld [vmem:[%s14260_s1 + $0xff0] sm:$0xff]  ;;  %v528_v7 = vld [vmem:[%s14260_s1 + $0xfb8] sm:$0xff] }
 0x364   :  { %v9482_v11 = vcombine.high %v527_v5, %v535_v6  ;;  %v9481_v53 = vcombine.low %v527_v5, %v535_v6  ;;  %v9483_v18 = vcombine.low %v528_v7, %v536_v8  ;;  %v631_v0 = vld [vmem:[%s14260_s1 + $0x12f0] sm:$0xff] }
 0x365   :  { %v639_v5 = vld [vmem:[%s14260_s1 + $0x1330] sm:$0xff] }
 0x366   :  { %7323 = vmatpush1.bf16.msra.mxu0 %v9369_v13  ;;  %7487 = vmatpush1.bf16.msra.mxu1 %v9371_v12  ;;  %v9484_v13 = vcombine.high %v528_v7, %v536_v8  ;;  %v543_v12 = vld [vmem:[%s14260_s1 + $0x1030] sm:$0xff]  ;;  %v9578_v7 = vcombine.high %v623_v62, %v631_v0 }
 0x367   :  { %7324 = vmatprep.subr.bf16.mxu0 %v9386_v14  ;;  %7488 = vmatprep.subr.bf16.mxu1 %v9388_v16  ;;  %v551_v14 = vld [vmem:[%s14260_s1 + $0x1070] sm:$0xff]  ;;  %v544_v16 = vld [vmem:[%s14260_s1 + $0x1038] sm:$0xff] }
 0x368   :  { %v9498_v19 = vcombine.high %v543_v12, %v551_v14  ;;  %v9497_v27 = vcombine.low %v543_v12, %v551_v14  ;;  %v9499_v15 = vcombine.low %v544_v16, %v552_v17  ;;  %v647_v8 = vld [vmem:[%s14260_s1 + $0x1370] sm:$0xff] }
 0x369   :  { %v655_v12 = vld [vmem:[%s14260_s1 + $0x13b0] sm:$0xff] }
 0x36a   :  { %7325 = vmatpush1.bf16.msra.mxu0 %v9385_v20  ;;  %7489 = vmatpush1.bf16.msra.mxu1 %v9387_v21  ;;  %v9500_v20 = vcombine.high %v544_v16, %v552_v17  ;;  %v559_v21 = vld [vmem:[%s14260_s1 + $0x10b0] sm:$0xff]  ;;  %v9594_v16 = vcombine.high %v639_v5, %v647_v8 }
 0x36b   :  { %7326 = vmatprep.subr.bf16.mxu0 %v9402_v23  ;;  %7490 = vmatprep.subr.bf16.mxu1 %v9404_v24  ;;  %v567_v23 = vld [vmem:[%s14260_s1 + $0x10f0] sm:$0xff]  ;;  %v560_v24 = vld [vmem:[%s14260_s1 + $0x10b8] sm:$0xff] }
 0x36c   :  { %v9514_v29 = vcombine.high %v559_v21, %v567_v23  ;;  %v9513_v44 = vcombine.low %v559_v21, %v567_v23  ;;  %v9515_v47 = vcombine.low %v560_v24, %v568_v26  ;;  %v663_v17 = vld [vmem:[%s14260_s1 + $0x13f0] sm:$0xff] }
 0x36d   :  { %v671_v21 = vld [vmem:[%s14260_s1 + $0x1430] sm:$0xff] }
 0x36e   :  { %7327 = vmatpush1.bf16.msra.mxu0 %v9401_v30  ;;  %7491 = vmatpush1.bf16.msra.mxu1 %v9403_v32  ;;  %v575_v30 = vld [vmem:[%s14260_s1 + $0x1130] sm:$0xff] }
 0x36f   :  { %7328 = vmatprep.subr.bf16.mxu0 %v9418_v37  ;;  %7492 = vmatprep.subr.bf16.mxu1 %v9420_v41  ;;  %v583_v32 = vld [vmem:[%s14260_s1 + $0x1170] sm:$0xff]  ;;  %v9516_v37 = vcombine.high %v560_v24, %v568_v26  ;;  %v576_v41 = vld [vmem:[%s14260_s1 + $0x1138] sm:$0xff]  ;;  %v9610_v24 = vcombine.high %v655_v12, %v663_v17 }
 0x370   :  { %v9529_v52 = vcombine.low %v575_v30, %v583_v32  ;;  %v9531_v57 = vcombine.low %v576_v41, %v584_v43  ;;  %v679_v26 = vld [vmem:[%s14260_s1 + $0x1470] sm:$0xff] }
 0x372   :  { %7329 = vmatpush1.bf16.msra.mxu0 %v9417_v48  ;;  %7493 = vmatpush1.bf16.msra.mxu1 %v9419_v49  ;;  %v9530_v48 = vcombine.high %v575_v30, %v583_v32  ;;  %v599_v49 = vld [vmem:[%s14260_s1 + $0x11f0] sm:$0xff]  ;;  %v9609_v30 = vcombine.low %v655_v12, %v663_v17  ;;  %v752_v12 = vld [vmem:[%s14260_s1 + $0x16b8] sm:$0xff] }
 0x373   :  { %7330 = vmatprep.subr.bf16.mxu0 %v9434_v50  ;;  %7494 = vmatprep.subr.bf16.mxu1 %v9436_v51  ;;  %v9532_v50 = vcombine.high %v576_v41, %v584_v43  ;;  %v592_v51 = vld [vmem:[%s14260_s1 + $0x11b8] sm:$0xff]  ;;  %v9546_v56 = vcombine.high %v591_v46, %v599_v49  ;;  %v687_v32 = vld [vmem:[%s14260_s1 + $0x14b0] sm:$0xff]  ;;  %v9626_v41 = vcombine.high %v671_v21, %v679_v26 }
 0x374   :  { %v695_v43 = vld [vmem:[%s14260_s1 + $0x14f0] sm:$0xff] }
 0x375   :  { %v767_v17 = vld [vmem:[%s14260_s1 + $0x1730] sm:$0xff] }
 0x376   :  { %7331 = vmatpush1.bf16.msra.mxu0 %v9433_v58  ;;  %7495 = vmatpush1.bf16.msra.mxu1 %v9435_v59  ;;  %v615_v58 = vld [vmem:[%s14260_s1 + $0x1270] sm:$0xff] }
 0x377   :  { %7332 = vmatprep.subr.bf16.mxu0 %v9450_v60  ;;  %7496 = vmatprep.subr.bf16.mxu1 %v9452_v61  ;;  %v616_v60 = vld [vmem:[%s14260_s1 + $0x1278] sm:$0xff]  ;;  %v9545_v61 = vcombine.low %v591_v46, %v599_v49  ;;  %v9562_v63 = vcombine.high %v607_v54, %v615_v58  ;;  %v703_v49 = vld [vmem:[%s14260_s1 + $0x1530] sm:$0xff] }
 0x378   :  { %v688_v46 = vld [vmem:[%s14260_s1 + $0x14b8] sm:$0xff] }
 0x37a   :  { %7333 = vmatpush1.bf16.msra.mxu0 %v9449_v1  ;;  %7497 = vmatpush1.bf16.msra.mxu1 %v9451_v2  ;;  %v624_v2 = vld [vmem:[%s14260_s1 + $0x12b8] sm:$0xff] }
 0x37b   :  { %7334 = vmatprep.subr.bf16.mxu0 %v9466_v3  ;;  %7498 = vmatprep.subr.bf16.mxu1 %v9468_v4  ;;  %v632_v3 = vld [vmem:[%s14260_s1 + $0x12f8] sm:$0xff]  ;;  %v9561_v4 = vcombine.low %v607_v54, %v615_v58  ;;  %v719_v58 = vld [vmem:[%s14260_s1 + $0x15b0] sm:$0xff] }
 0x37c   :  { %v9579_v14 = vcombine.low %v624_v2, %v632_v3  ;;  %v704_v54 = vld [vmem:[%s14260_s1 + $0x1538] sm:$0xff] }
 0x37e   :  { %7335 = vmatpush1.bf16.msra.mxu0 %v9465_v9  ;;  %7499 = vmatpush1.bf16.msra.mxu1 %v9467_v10  ;;  %v9580_v9 = vcombine.high %v624_v2, %v632_v3  ;;  %v640_v10 = vld [vmem:[%s14260_s1 + $0x1338] sm:$0xff]  ;;  %v743_v3 = vld [vmem:[%s14260_s1 + $0x1670] sm:$0xff] }
 0x37f   :  { %7336 = vmatprep.subr.bf16.mxu0 %v9482_v11  ;;  %7500 = vmatprep.subr.bf16.mxu1 %v9484_v13  ;;  %v648_v11 = vld [vmem:[%s14260_s1 + $0x1378] sm:$0xff]  ;;  %v9577_v13 = vcombine.low %v623_v62, %v631_v0  ;;  %v735_v0 = vld [vmem:[%s14260_s1 + $0x1630] sm:$0xff] }
 0x380   :  { %v9595_v23 = vcombine.low %v640_v10, %v648_v11  ;;  %v720_v62 = vld [vmem:[%s14260_s1 + $0x15b8] sm:$0xff] }
 0x382   :  { %7337 = vmatpush1.bf16.msra.mxu0 %v9481_v53  ;;  %7501 = vmatpush1.bf16.msra.mxu1 %v9483_v18  ;;  %v9596_v53 = vcombine.high %v640_v10, %v648_v11  ;;  %v656_v18 = vld [vmem:[%s14260_s1 + $0x13b8] sm:$0xff]  ;;  %v9690_v10 = vcombine.high %v735_v0, %v743_v3  ;;  %v759_v11 = vld [vmem:[%s14260_s1 + $0x16f0] sm:$0xff] }
 0x383   :  { %7347 = vmatprep.subr.bf16.mxu0 %v9498_v19  ;;  %7511 = vmatprep.subr.bf16.mxu1 %v9500_v20  ;;  %v664_v19 = vld [vmem:[%s14260_s1 + $0x13f8] sm:$0xff]  ;;  %v9593_v20 = vcombine.low %v639_v5, %v647_v8  ;;  %v751_v8 = vld [vmem:[%s14260_s1 + $0x16b0] sm:$0xff] }
 0x384   :  { %v736_v5 = vld [vmem:[%s14260_s1 + $0x1638] sm:$0xff] }
 0x385   :  { %7339 = vmatmul.mubr.bf16.vlgmr.msra.gmra.mrb[12].mxu0 %v11013_v22  ;;  %7503 = vmatmul.mubr.bf16.vlgmr.msra.gmra.mrb[12].mxu1 %v11013_v22  ;;  %v600_v22 = vld [vmem:[%s14260_s1 + $0x11f8] sm:$0xff] }
 0x386   :  { %7348 = vmatpush1.bf16.msra.mxu0 %v9497_v27  ;;  %7512 = vmatpush1.bf16.msra.mxu1 %v9499_v15  ;;  %v9548_v59 = vcombine.high %v592_v51, %v600_v22  ;;  %v9547_v39 = vcombine.low %v592_v51, %v600_v22  ;;  %v9612_v27 = vcombine.high %v656_v18, %v664_v19  ;;  %v672_v15 = vld [vmem:[%s14260_s1 + $0x1438] sm:$0xff]  ;;  %v711_v22 = vld [vmem:[%s14260_s1 + $0x1570] sm:$0xff] }
 0x387   :  { %7349 = vmatprep.subr.bf16.mxu0 %v9514_v29  ;;  %7513 = vmatprep.subr.bf16.mxu1 %v9516_v37  ;;  %v680_v29 = vld [vmem:[%s14260_s1 + $0x1478] sm:$0xff]  ;;  %v9611_v37 = vcombine.low %v656_v18, %v664_v19  ;;  %v9642_v51 = vcombine.high %v687_v32, %v695_v43  ;;  %v9706_v18 = vcombine.high %v751_v8, %v759_v11  ;;  %v775_v19 = vld [vmem:[%s14260_s1 + $0x1770] sm:$0xff] }
 0x388   :  { %7379 = vmatprep.mubr.bf16.mxu0 %v11034_v31  ;;  %7543 = vmatprep.mubr.bf16.mxu1 %v11034_v31  ;;  %v608_v31 = vld [vmem:[%s14260_s1 + $0x1238] sm:$0xff] }
 0x389   :  { %v9564_v1 = vcombine.high %v608_v31, %v616_v60  ;;  %v9563_v6 = vcombine.low %v608_v31, %v616_v60  ;;  %v9658_v31 = vcombine.high %v703_v49, %v711_v22  ;;  %v727_v60 = vld [vmem:[%s14260_s1 + $0x15f0] sm:$0xff] }
 0x38a   :  { %7350 = vmatpush1.bf16.msra.mxu0 %v9513_v44  ;;  %7514 = vmatpush1.bf16.msra.mxu1 %v9515_v47  ;;  %v9628_v44 = vcombine.high %v672_v15, %v680_v29  ;;  %v696_v47 = vld [vmem:[%s14260_s1 + $0x14f8] sm:$0xff]  ;;  %v9674_v2 = vcombine.high %v719_v58, %v727_v60 }
 0x38b   :  { %7351 = vmatprep.subr.bf16.mxu0 %v9530_v48  ;;  %7515 = vmatprep.subr.bf16.mxu1 %v9532_v50  ;;  %v9625_v48 = vcombine.low %v671_v21, %v679_v26  ;;  %v9627_v50 = vcombine.low %v672_v15, %v680_v29  ;;  %v768_v21 = vld [vmem:[%s14260_s1 + $0x1738] sm:$0xff]  ;;  %v783_v26 = vld [vmem:[%s14260_s1 + $0x17b0] sm:$0xff]  ;;  %v9722_v15 = vcombine.high %v767_v17, %v775_v19 }
 0x38c   :  { %v791_v29 = vld [vmem:[%s14260_s1 + $0x17f0] sm:$0xff] }
 0x38e   :  { %7352 = vmatpush1.bf16.msra.mxu0 %v9529_v52  ;;  %7516 = vmatpush1.bf16.msra.mxu1 %v9531_v57  ;;  %v9644_v52 = vcombine.high %v688_v46, %v696_v47  ;;  %v712_v57 = vld [vmem:[%s14260_s1 + $0x1578] sm:$0xff] }
 0x38f   :  { %7353 = vmatprep.subr.bf16.mxu0 %v9546_v56  ;;  %7517 = vmatprep.subr.bf16.mxu1 %v9548_v59  ;;  %v9641_v56 = vcombine.low %v687_v32, %v695_v43  ;;  %v9643_v59 = vcombine.low %v688_v46, %v696_v47  ;;  %v784_v32 = vld [vmem:[%s14260_s1 + $0x17b8] sm:$0xff]  ;;  %v799_v43 = vld [vmem:[%s14260_s1 + $0x1830] sm:$0xff]  ;;  %v9738_v46 = vcombine.high %v783_v26, %v791_v29 }
 0x390   :  { %v807_v47 = vld [vmem:[%s14260_s1 + $0x1870] sm:$0xff] }
 0x392   :  { %7354 = vmatpush1.bf16.msra.mxu0 %v9545_v61  ;;  %7518 = vmatpush1.bf16.msra.mxu1 %v9547_v39  ;;  %v9660_v61 = vcombine.high %v704_v54, %v712_v57  ;;  %v728_v39 = vld [vmem:[%s14260_s1 + $0x15f8] sm:$0xff] }
 0x393   :  { %7355 = vmatprep.subr.bf16.mxu0 %v9562_v63  ;;  %7519 = vmatprep.subr.bf16.mxu1 %v9564_v1  ;;  %v9657_v63 = vcombine.low %v703_v49, %v711_v22  ;;  %v9659_v1 = vcombine.low %v704_v54, %v712_v57  ;;  %v800_v49 = vld [vmem:[%s14260_s1 + $0x1838] sm:$0xff]  ;;  %v815_v22 = vld [vmem:[%s14260_s1 + $0x18b0] sm:$0xff]  ;;  %v9754_v54 = vcombine.high %v799_v43, %v807_v47 }
 0x394   :  { %v823_v57 = vld [vmem:[%s14260_s1 + $0x18f0] sm:$0xff] }
 0x396   :  { %7356 = vmatpush1.bf16.msra.mxu0 %v9561_v4  ;;  %7520 = vmatpush1.bf16.msra.mxu1 %v9563_v6  ;;  %v9676_v4 = vcombine.high %v720_v62, %v728_v39  ;;  %v744_v6 = vld [vmem:[%s14260_s1 + $0x1678] sm:$0xff] }
 0x397   :  { %7357 = vmatprep.subr.bf16.mxu0 %v9578_v7  ;;  %7521 = vmatprep.subr.bf16.mxu1 %v9580_v9  ;;  %v9673_v7 = vcombine.low %v719_v58, %v727_v60  ;;  %v9675_v9 = vcombine.low %v720_v62, %v728_v39  ;;  %v816_v58 = vld [vmem:[%s14260_s1 + $0x18b8] sm:$0xff]  ;;  %v831_v60 = vld [vmem:[%s14260_s1 + $0x1930] sm:$0xff]  ;;  %v9770_v62 = vcombine.high %v815_v22, %v823_v57 }
 0x398   :  { %v839_v39 = vld [vmem:[%s14260_s1 + $0x1970] sm:$0xff] }
 0x39a   :  { %7358 = vmatpush1.bf16.msra.mxu0 %v9577_v13  ;;  %7522 = vmatpush1.bf16.msra.mxu1 %v9579_v14  ;;  %v9692_v13 = vcombine.high %v736_v5, %v744_v6  ;;  %v760_v14 = vld [vmem:[%s14260_s1 + $0x16f8] sm:$0xff] }
 0x39b   :  { %7359 = vmatprep.subr.bf16.mxu0 %v9594_v16  ;;  %7523 = vmatprep.subr.bf16.mxu1 %v9596_v53  ;;  %v9689_v16 = vcombine.low %v735_v0, %v743_v3  ;;  %v9691_v53 = vcombine.low %v736_v5, %v744_v6  ;;  %v832_v0 = vld [vmem:[%s14260_s1 + $0x1938] sm:$0xff]  ;;  %v847_v3 = vld [vmem:[%s14260_s1 + $0x19b0] sm:$0xff]  ;;  %v9786_v5 = vcombine.high %v831_v60, %v839_v39 }
 0x39c   :  { %v855_v6 = vld [vmem:[%s14260_s1 + $0x19f0] sm:$0xff] }
 0x39e   :  { %7360 = vmatpush1.bf16.msra.mxu0 %v9593_v20  ;;  %7524 = vmatpush1.bf16.msra.mxu1 %v9595_v23  ;;  %v9708_v20 = vcombine.high %v752_v12, %v760_v14  ;;  %v776_v23 = vld [vmem:[%s14260_s1 + $0x1778] sm:$0xff] }
 0x39f   :  { %7361 = vmatprep.subr.bf16.mxu0 %v9610_v24  ;;  %7525 = vmatprep.subr.bf16.mxu1 %v9612_v27  ;;  %v9705_v24 = vcombine.low %v751_v8, %v759_v11  ;;  %v9707_v27 = vcombine.low %v752_v12, %v760_v14  ;;  %v848_v8 = vld [vmem:[%s14260_s1 + $0x19b8] sm:$0xff]  ;;  %v863_v11 = vld [vmem:[%s14260_s1 + $0x1a30] sm:$0xff]  ;;  %v9802_v12 = vcombine.high %v847_v3, %v855_v6 }
 0x3a0   :  { %v871_v14 = vld [vmem:[%s14260_s1 + $0x1a70] sm:$0xff] }
 0x3a2   :  { %7362 = vmatpush1.bf16.msra.mxu0 %v9609_v30  ;;  %7526 = vmatpush1.bf16.msra.mxu1 %v9611_v37  ;;  %v9724_v30 = vcombine.high %v768_v21, %v776_v23  ;;  %v792_v37 = vld [vmem:[%s14260_s1 + $0x17f8] sm:$0xff] }
 0x3a3   :  { %7363 = vmatprep.subr.bf16.mxu0 %v9626_v41  ;;  %7527 = vmatprep.subr.bf16.mxu1 %v9628_v44  ;;  %v9721_v41 = vcombine.low %v767_v17, %v775_v19  ;;  %v9723_v44 = vcombine.low %v768_v21, %v776_v23  ;;  %v872_v17 = vld [vmem:[%s14260_s1 + $0x1a78] sm:$0xff]  ;;  %v879_v19 = vld [vmem:[%s14260_s1 + $0x1ab0] sm:$0xff]  ;;  %v9818_v21 = vcombine.high %v863_v11, %v871_v14 }
 0x3a4   :  { %v887_v23 = vld [vmem:[%s14260_s1 + $0x1af0] sm:$0xff] }
 0x3a6   :  { %7364 = vmatpush1.bf16.msra.mxu0 %v9625_v48  ;;  %7528 = vmatpush1.bf16.msra.mxu1 %v9627_v50  ;;  %v9740_v48 = vcombine.high %v784_v32, %v792_v37  ;;  %v808_v50 = vld [vmem:[%s14260_s1 + $0x1878] sm:$0xff] }
 0x3a7   :  { %7365 = vmatprep.subr.bf16.mxu0 %v9642_v51  ;;  %7529 = vmatprep.subr.bf16.mxu1 %v9644_v52  ;;  %v9737_v51 = vcombine.low %v783_v26, %v791_v29  ;;  %v9739_v52 = vcombine.low %v784_v32, %v792_v37  ;;  %v1050_v26 = vld [vmem:[%s14263_s2 + $0x8] sm:$0xff]  ;;  %v895_v32 = vld [vmem:[%s14260_s1 + $0x1b30] sm:$0xff] }
 0x3aa   :  { %7366 = vmatpush1.bf16.msra.mxu0 %v9641_v56  ;;  %7530 = vmatpush1.bf16.msra.mxu1 %v9643_v59  ;;  %v9756_v56 = vcombine.high %v800_v49, %v808_v50  ;;  %v824_v59 = vld [vmem:[%s14260_s1 + $0x18f8] sm:$0xff] }
 0x3ab   :  { %7367 = vmatprep.subr.bf16.mxu0 %v9658_v31  ;;  %7531 = vmatprep.subr.bf16.mxu1 %v9660_v61  ;;  %v9753_v31 = vcombine.low %v799_v43, %v807_v47  ;;  %v9755_v61 = vcombine.low %v800_v49, %v808_v50  ;;  %v9834_v43 = vcombine.high %v879_v19, %v887_v23 }
 0x3ae   :  { %7368 = vmatpush1.bf16.msra.mxu0 %v9657_v63  ;;  %7532 = vmatpush1.bf16.msra.mxu1 %v9659_v1  ;;  %v9772_v63 = vcombine.high %v816_v58, %v824_v59  ;;  %v840_v1 = vld [vmem:[%s14260_s1 + $0x1978] sm:$0xff] }
 0x3af   :  { %7369 = vmatprep.subr.bf16.mxu0 %v9674_v2  ;;  %7533 = vmatprep.subr.bf16.mxu1 %v9676_v4  ;;  %v9769_v2 = vcombine.low %v815_v22, %v823_v57  ;;  %v9771_v4 = vcombine.low %v816_v58, %v824_v59  ;;  %v911_v57 = vld [vmem:[%s14260_s1 + $0x1bb0] sm:$0xff] }
 0x3b2   :  { %7370 = vmatpush1.bf16.msra.mxu0 %v9673_v7  ;;  %7534 = vmatpush1.bf16.msra.mxu1 %v9675_v9  ;;  %v9788_v7 = vcombine.high %v832_v0, %v840_v1  ;;  %v1053_v9 = vlaneseq }
 0x3b3   :  { %7371 = vmatprep.subr.bf16.mxu0 %v9690_v10  ;;  %7535 = vmatprep.subr.bf16.mxu1 %v9692_v13  ;;  %v9785_v10 = vcombine.low %v831_v60, %v839_v39  ;;  %v9787_v13 = vcombine.low %v832_v0, %v840_v1  ;;  %v912_v60 = vld [vmem:[%s14260_s1 + $0x1bb8] sm:$0xff] }
 0x3b4   :  { %v920_v39 = vld [vmem:[%s14260_s1 + $0x1bf8] sm:$0xff] }
 0x3b6   :  { %7372 = vmatpush1.bf16.msra.mxu0 %v9689_v16  ;;  %7536 = vmatpush1.bf16.msra.mxu1 %v9691_v53  ;;  %v13651_v53 = vshrl.u32 %v1053_v9, 7 }
 0x3b7   :  { %7373 = vmatprep.subr.bf16.mxu0 %v9706_v18  ;;  %7537 = vmatprep.subr.bf16.mxu1 %v9708_v20  ;;  %v9801_v18 = vcombine.low %v847_v3, %v855_v6 }
 0x3b8   :  { %v1055_v29 = vsub.s32 0, %v13651_v53  ;;  %v1063_v37 = vsub.s32 2, %v13651_v53  ;;  %v1067_v49 = vsub.s32 3, %v13651_v53 }
 0x3ba   :  { %7374 = vmatpush1.bf16.msra.mxu0 %v9705_v24  ;;  %7538 = vmatpush1.bf16.msra.mxu1 %v9707_v27  ;;  %v880_v27 = vld [vmem:[%s14260_s1 + $0x1ab8] sm:$0xff]  ;;  %v1088_v50 = vrot.slane %v1050_v26, %v1055_v29  ;;  %v1096_v22 = vrot.slane %v1050_v26, %v1063_v37  ;;  %v1100_v58 = vrot.slane %v1050_v26, %v1067_v49 }
 0x3bb   :  { %7375 = vmatprep.subr.bf16.mxu0 %v9722_v15  ;;  %7539 = vmatprep.subr.bf16.mxu1 %v9724_v30  ;;  %v888_v15 = vld [vmem:[%s14260_s1 + $0x1af8] sm:$0xff]  ;;  %v9817_v30 = vcombine.low %v863_v11, %v871_v14  ;;  %v9868_v14 = vcombine.high %v912_v60, %v920_v39 }
 0x3bc   :  { %v9836_v47 = vcombine.high %v880_v27, %v888_v15  ;;  %v9835_v59 = vcombine.low %v880_v27, %v888_v15  ;;  %v959_v15 = vld [vmem:[%s14260_s1 + $0x1d30] sm:$0xff] }
 0x3be   :  { %7376 = vmatpush1.bf16.msra.mxu0 %v9721_v41  ;;  %7540 = vmatpush1.bf16.msra.mxu1 %v9723_v44  ;;  %v903_v44 = vld [vmem:[%s14260_s1 + $0x1b70] sm:$0xff] }
 0x3bf   :  { %7377 = vmatprep.subr.bf16.mxu0 %v9738_v46  ;;  %7541 = vmatprep.subr.bf16.mxu1 %v9740_v48  ;;  %v1059_v46 = vsub.s32 1, %v13651_v53  ;;  %v896_v48 = vld [vmem:[%s14260_s1 + $0x1b38] sm:$0xff]  ;;  %v9849_v6 = vcombine.low %v895_v32, %v903_v44 }
 0x3c2   :  { %7378 = vmatpush1.bf16.msra.mxu0 %v9737_v51  ;;  %7542 = vmatpush1.bf16.msra.mxu1 %v9739_v52  ;;  %v904_v51 = vld [vmem:[%s14260_s1 + $0x1b78] sm:$0xff]  ;;  %v1092_v52 = vrot.slane %v1050_v26, %v1059_v46 }
 0x3c3   :  { %7388 = vmatprep.subr.bf16.mxu0 %v9754_v54  ;;  %7552 = vmatprep.subr.bf16.mxu1 %v9756_v56  ;;  %v9833_v54 = vcombine.low %v879_v19, %v887_v23  ;;  %v919_v56 = vld [vmem:[%s14260_s1 + $0x1bf0] sm:$0xff]  ;;  %v9851_v11 = vcombine.low %v896_v48, %v904_v51  ;;  %v9867_v19 = vcombine.low %v912_v60, %v920_v39  ;;  %v952_v26 = vld [vmem:[%s14260_s1 + $0x1cf8] sm:$0xff] }
 0x3c4   :  { %v992_v39 = vld [vmem:[%s14260_s1 + $0x1e38] sm:$0xff] }
 0x3c5   :  { %7380 = vmatmul.mubr.bf16.vlgmr.msra.gmra.mrb[12].mxu0 %v11222_v36  ;;  %7544 = vmatmul.mubr.bf16.vlgmr.msra.gmra.mrb[12].mxu1 %v11222_v36  ;;  %v856_v36 = vld [vmem:[%s14260_s1 + $0x19f8] sm:$0xff] }
 0x3c6   :  { %7389 = vmatpush1.bf16.msra.mxu0 %v9753_v31  ;;  %7553 = vmatpush1.bf16.msra.mxu1 %v9755_v61  ;;  %v9804_v16 = vcombine.high %v848_v8, %v856_v36  ;;  %v9803_v20 = vcombine.low %v848_v8, %v856_v36  ;;  %v9850_v31 = vcombine.high %v895_v32, %v903_v44  ;;  %v935_v8 = vld [vmem:[%s14260_s1 + $0x1c70] sm:$0xff] }
 0x3c7   :  { %7390 = vmatprep.subr.bf16.mxu0 %v9770_v62  ;;  %7554 = vmatprep.subr.bf16.mxu1 %v9772_v63  ;;  %v9852_v62 = vcombine.high %v896_v48, %v904_v51 }
 0x3c8   :  { %7420 = vmatprep.mubr.bf16.mxu0 %v11243_v45  ;;  %7584 = vmatprep.mubr.bf16.mxu1 %v11243_v45  ;;  %v864_v45 = vld [vmem:[%s14260_s1 + $0x1a38] sm:$0xff] }
 0x3c9   :  { %v9820_v24 = vcombine.high %v864_v45, %v872_v17  ;;  %v9819_v41 = vcombine.low %v864_v45, %v872_v17  ;;  %v936_v45 = vld [vmem:[%s14260_s1 + $0x1c78] sm:$0xff]  ;;  %v9865_v17 = vcombine.low %v911_v57, %v919_v56 }
 0x3ca   :  { %7391 = vmatpush1.bf16.msra.mxu0 %v9769_v2  ;;  %7555 = vmatpush1.bf16.msra.mxu1 %v9771_v4 }
 0x3cb   :  { %7392 = vmatprep.subr.bf16.mxu0 %v9786_v5  ;;  %7556 = vmatprep.subr.bf16.mxu1 %v9788_v7  ;;  %v927_v7 = vld [vmem:[%s14260_s1 + $0x1c30] sm:$0xff] }
 0x3cc   :  { %v9881_v27 = vcombine.low %v927_v7, %v935_v8 }
 0x3ce   :  { %7393 = vmatpush1.bf16.msra.mxu0 %v9785_v10  ;;  %7557 = vmatpush1.bf16.msra.mxu1 %v9787_v13  ;;  %v9866_v13 = vcombine.high %v911_v57, %v919_v56  ;;  %v976_v57 = vld [vmem:[%s14260_s1 + $0x1db8] sm:$0xff] }
 0x3cf   :  { %7394 = vmatprep.subr.bf16.mxu0 %v9802_v12  ;;  %7558 = vmatprep.subr.bf16.mxu1 %v9804_v16  ;;  %v928_v16 = vld [vmem:[%s14260_s1 + $0x1c38] sm:$0xff] }
 0x3d0   :  { %v9884_v23 = vcombine.high %v928_v16, %v936_v45  ;;  %v9883_v32 = vcombine.low %v928_v16, %v936_v45  ;;  %v984_v56 = vld [vmem:[%s14260_s1 + $0x1df8] sm:$0xff]  ;;  %v1031_v16 = vld [vmem:[%s14260_s1 + $0x1f70] sm:$0xff] }
 0x3d2   :  { %7395 = vmatpush1.bf16.msra.mxu0 %v9801_v18  ;;  %7559 = vmatpush1.bf16.msra.mxu1 %v9803_v20  ;;  %v943_v18 = vld [vmem:[%s14260_s1 + $0x1cb0] sm:$0xff]  ;;  %v9882_v20 = vcombine.high %v927_v7, %v935_v8 }
 0x3d3   :  { %7396 = vmatprep.subr.bf16.mxu0 %v9818_v21  ;;  %7560 = vmatprep.subr.bf16.mxu1 %v9820_v24  ;;  %v951_v21 = vld [vmem:[%s14260_s1 + $0x1cf0] sm:$0xff]  ;;  %v944_v24 = vld [vmem:[%s14260_s1 + $0x1cb8] sm:$0xff] }
 0x3d4   :  { %v9900_v44 = vcombine.high %v944_v24, %v952_v26  ;;  %v9897_v48 = vcombine.low %v943_v18, %v951_v21  ;;  %v9899_v51 = vcombine.low %v944_v24, %v952_v26  ;;  %v1015_v7 = vld [vmem:[%s14260_s1 + $0x1ef0] sm:$0xff] }
 0x3d5   :  { %v1047_v24 = vld [vmem:[%s14260_s1 + $0x1ff0] sm:$0xff] }
 0x3d6   :  { %7397 = vmatpush1.bf16.msra.mxu0 %v9817_v30  ;;  %7561 = vmatpush1.bf16.msra.mxu1 %v9819_v41  ;;  %v967_v30 = vld [vmem:[%s14260_s1 + $0x1d70] sm:$0xff]  ;;  %v9898_v41 = vcombine.high %v943_v18, %v951_v21  ;;  %v1032_v18 = vld [vmem:[%s14260_s1 + $0x1f78] sm:$0xff] }
 0x3d7   :  { %7398 = vmatprep.subr.bf16.mxu0 %v9834_v43  ;;  %7562 = vmatprep.subr.bf16.mxu1 %v9836_v47  ;;  %v960_v43 = vld [vmem:[%s14260_s1 + $0x1d38] sm:$0xff] }
 0x3d8   :  { %v7094_v61 = vpop.f32.mrb[8].mxu0  ;;  %v7258_v0 = vpop.f32.mrb[8].mxu1  ;;  %v968_v47 = vld [vmem:[%s14260_s1 + $0x1d78] sm:$0xff] }
 0x3d9   :  { %v13704_v63 = vadd.f32 %v7094_v61, %v1088_v50  ;;  %v7096_v1 = vpop.f32.mrb[9].mxu0  ;;  %v13706_v2 = vadd.f32 %v7258_v0, %v1096_v22  ;;  %v7260_v4 = vpop.f32.mrb[9].mxu1  ;;  %v975_v50 = vld [vmem:[%s14260_s1 + $0x1db0] sm:$0xff]  ;;  %v9914_v22 = vcombine.high %v959_v15, %v967_v30  ;;  %v1000_v0 = vld [vmem:[%s14260_s1 + $0x1e78] sm:$0xff] }
 0x3da   :  { %v13708_v3 = vadd.f32 %v7096_v1, %v1092_v52  ;;  %v7098_v5 = vpop.f32.mrb[10].mxu0  ;;  %7399 = vmatpush1.bf16.msra.mxu0 %v9833_v54  ;;  %v13716_v36 = vadd.f32 %v7260_v4, %v1100_v58  ;;  %v7262_v9 = vpop.f32.mrb[10].mxu1  ;;  %7563 = vmatpush1.bf16.msra.mxu1 %v9835_v59  ;;  %v983_v52 = vld [vmem:[%s14260_s1 + $0x1df0] sm:$0xff]  ;;  %v9916_v54 = vcombine.high %v960_v43, %v968_v47 }
 0x3db   :  { %v7099_v10 = vpop.f32.mrb[11].mxu0  ;;  %7400 = vmatprep.subr.bf16.mxu0 %v9850_v31  ;;  %v7263_v12 = vpop.f32.mrb[11].mxu1  ;;  %7564 = vmatprep.subr.bf16.mxu1 %v9852_v62  ;;  %v9913_v58 = vcombine.low %v959_v15, %v967_v30  ;;  %v991_v59 = vld [vmem:[%s14260_s1 + $0x1e30] sm:$0xff]  ;;  %v9915_v31 = vcombine.low %v960_v43, %v968_v47  ;;  %v9930_v60 = vcombine.high %v975_v50, %v983_v52  ;;  %v1008_v9 = vld [vmem:[%s14260_s1 + $0x1eb8] sm:$0xff]  ;;  %v13811_v30 = vld [vmem:[%s14263_s2] sm:$0xff] }
 0x3dc   :  { %v999_v61 = vld [vmem:[%s14260_s1 + $0x1e70] sm:$0xff]  ;;  %v9932_v62 = vcombine.high %v976_v57, %v984_v56  ;;  %v9929_v1 = vcombine.low %v975_v50, %v983_v52  ;;  %v9931_v5 = vcombine.low %v976_v57, %v984_v56  ;;  %v9948_v8 = vcombine.high %v992_v39, %v1000_v0  ;;  %v1016_v10 = vld [vmem:[%s14260_s1 + $0x1ef8] sm:$0xff]  ;;  %v10424_v57 = vld [vmem:[%s14262_s3] sm:$0xff]  }
 0x3dd   :  { %v1007_v4 = vld [vmem:[%s14260_s1 + $0x1eb0] sm:$0xff]  ;;  %v9947_v12 = vcombine.low %v992_v39, %v1000_v0  ;;  %v9964_v45 = vcombine.high %v1008_v9, %v1016_v10  ;;  %v9963_v21 = vcombine.low %v1008_v9, %v1016_v10  ;;  %v1048_v15 = vld [vmem:[%s14260_s1 + $0x1ff8] sm:$0xff]  ;;  %v1060_v47 = vrot.slane %v13811_v30, %v1059_v46  ;;  %v10426_v56 = vld [vmem:[%s14262_s3 + $0x48] sm:$0xff]  }
 0x3de   :  { %7401 = vmatpush1.bf16.msra.mxu0 %v9849_v6  ;;  %7565 = vmatpush1.bf16.msra.mxu1 %v9851_v11  ;;  %v9946_v6 = vcombine.high %v991_v59, %v999_v61  ;;  %v9945_v11 = vcombine.low %v991_v59, %v999_v61  ;;  %v1068_v50 = vrot.slane %v13811_v30, %v1067_v49  ;;  %v10425_v49 = vld [vmem:[%s14262_s3 + $0x80] sm:$0xff]   ;;  %v10428_v59 = vld [vmem:[%s14262_s3 + $0x8] sm:$0xff]   ;;  %v10432_v61 = vld [vmem:[%s14262_s3 + $0x10] sm:$0xff]  }
 0x3df   :  { %7402 = vmatprep.subr.bf16.mxu0 %v9866_v13  ;;  %7566 = vmatprep.subr.bf16.mxu1 %v9868_v14  ;;  %v1023_v13 = vld [vmem:[%s14260_s1 + $0x1f30] sm:$0xff]  ;;  %v9962_v14 = vcombine.high %v1007_v4, %v1015_v7  ;;  %v10303_v46 = vadd.f32 %v12101_v40, %v1060_v47  ;;  %v10427_v40 = vld [vmem:[%s14262_s3 + $0xc8] sm:$0xff]   ;;  %v10434_v39 = vld [vmem:[%s14262_s3 + $0x58] sm:$0xff]  }
 0x3e0   :  { %v10435_v0 = vld [vmem:[%s14262_s3 + $0xd8] sm:$0xff]   ;;  %v10442_v9 = vld [vmem:[%s14262_s3 + $0x68] sm:$0xff]  }
 0x3e1   :  { %v10443_v10 = vld [vmem:[%s14262_s3 + $0xe8] sm:$0xff]  }
 0x3e2   :  { %7403 = vmatpush1.bf16.msra.mxu0 %v9865_v17  ;;  %7567 = vmatpush1.bf16.msra.mxu1 %v9867_v19  ;;  %v1024_v17 = vld [vmem:[%s14260_s1 + $0x1f38] sm:$0xff]  ;;  %v9961_v19 = vcombine.low %v1007_v4, %v1015_v7  ;;  %v10440_v7 = vld [vmem:[%s14262_s3 + $0x20] sm:$0xff]  }
 0x3e3   :  { %7404 = vmatprep.subr.bf16.mxu0 %v9882_v20  ;;  %7568 = vmatprep.subr.bf16.mxu1 %v9884_v23  ;;  %v1039_v20 = vld [vmem:[%s14260_s1 + $0x1fb0] sm:$0xff]  ;;  %v9978_v23 = vcombine.high %v1023_v13, %v1031_v16  ;;  %v9980_v26 = vcombine.high %v1024_v17, %v1032_v18  ;;  %v10437_v4 = vld [vmem:[%s14262_s3 + $0x98] sm:$0xff]  }
 0x3e4   :  { %v9994_v43 = vcombine.high %v1039_v20, %v1047_v24 }
 0x3e6   :  { %7405 = vmatpush1.bf16.msra.mxu0 %v9881_v27  ;;  %7569 = vmatpush1.bf16.msra.mxu1 %v9883_v32  ;;  %v1040_v27 = vld [vmem:[%s14260_s1 + $0x1fb8] sm:$0xff]  ;;  %v9977_v32 = vcombine.low %v1023_v13, %v1031_v16  ;;  %v10445_v13 = vld [vmem:[%s14262_s3 + $0xa8] sm:$0xff]   ;;  %v1075_v16 = vsub.s32 5, %v13651_v53 }
 0x3e7   :  { %7406 = vmatprep.subr.bf16.mxu0 %v9898_v41  ;;  %7570 = vmatprep.subr.bf16.mxu1 %v9900_v44  ;;  %v9979_v41 = vcombine.low %v1024_v17, %v1032_v18  ;;  %v9996_v44 = vcombine.high %v1040_v27, %v1048_v15  ;;  %v9995_v52 = vcombine.low %v1040_v27, %v1048_v15  ;;  %v10448_v17 = vld [vmem:[%s14262_s3 + $0x30] sm:$0xff]   ;;  %v10453_v27 = vld [vmem:[%s14262_s3 + $0xb8] sm:$0xff]   ;;  %v10454_v15 = vld [vmem:[%s14262_s3 + $0x140] sm:$0xff]  }
 0x3e8   :  { %v1056_v18 = vrot.slane %v13811_v30, %v1055_v29  ;;  %v1076_v29 = vrot.slane %v13811_v30, %v1075_v16 }
 0x3ea   :  { %7407 = vmatpush1.bf16.msra.mxu0 %v9897_v48  ;;  %7571 = vmatpush1.bf16.msra.mxu1 %v9899_v51  ;;  %v10422_v48 = vld [vmem:[%s14262_s3 + $0x40] sm:$0xff]   ;;  %v9993_v51 = vcombine.low %v1039_v20, %v1047_v24  ;;  %v10450_v20 = vld [vmem:[%s14262_s3 + $0x78] sm:$0xff]  }
 0x3eb   :  { %7408 = vmatprep.subr.bf16.mxu0 %v9914_v22  ;;  %7572 = vmatprep.subr.bf16.mxu1 %v9916_v54  ;;  %v10423_v22 = vld [vmem:[%s14262_s3 + $0xc0] sm:$0xff]   ;;  %v10305_v54 = vadd.f32 %v12109_v42, %v1068_v50 }
 0x3ed   :  { %v7596_v42 = vpack.c.bf16 %v10305_v54, %v10305_v54  ;;  %v10463_v54 = vld [vmem:[%s14262_s3 + $0x1d0] sm:$0xff]  }
 0x3ee   :  { %7409 = vmatpush1.bf16.msra.mxu0 %v9913_v58  ;;  %7573 = vmatpush1.bf16.msra.mxu1 %v9915_v31  ;;  %v7594_v58 = vpack.c.bf16 %v10303_v46, %v10303_v46  ;;  %v10429_v31 = vld [vmem:[%s14262_s3 + $0x88] sm:$0xff]   ;;  %v10462_v46 = vld [vmem:[%s14262_s3 + $0x150] sm:$0xff]  }
 0x3ef   :  { %7410 = vmatprep.subr.bf16.mxu0 %v9930_v60  ;;  %7574 = vmatprep.subr.bf16.mxu1 %v9932_v62  ;;  %v10430_v60 = vld [vmem:[%s14262_s3 + $0x50] sm:$0xff]  }
 0x3f0   :  { %v10433_v62 = vld [vmem:[%s14262_s3 + $0x90] sm:$0xff]  }
 0x3f2   :  { %7411 = vmatpush1.bf16.msra.mxu0 %v9929_v1  ;;  %7575 = vmatpush1.bf16.msra.mxu1 %v9931_v5  ;;  %v10436_v1 = vld [vmem:[%s14262_s3 + $0x18] sm:$0xff]   ;;  %v10438_v5 = vld [vmem:[%s14262_s3 + $0x60] sm:$0xff]  }
 0x3f3   :  { %7412 = vmatprep.subr.bf16.mxu0 %v9946_v6  ;;  %7576 = vmatprep.subr.bf16.mxu1 %v9948_v8  ;;  %v10439_v6 = vld [vmem:[%s14262_s3 + $0xe0] sm:$0xff]  }
 0x3f4   :  { %v10441_v8 = vld [vmem:[%s14262_s3 + $0xa0] sm:$0xff]  }
 0x3f6   :  { %7413 = vmatpush1.bf16.msra.mxu0 %v9945_v11  ;;  %7577 = vmatpush1.bf16.msra.mxu1 %v9947_v12  ;;  %v10444_v11 = vld [vmem:[%s14262_s3 + $0x28] sm:$0xff]   ;;  %v10446_v12 = vld [vmem:[%s14262_s3 + $0x70] sm:$0xff]  }
 0x3f7   :  { %7414 = vmatprep.subr.bf16.mxu0 %v9962_v14  ;;  %7578 = vmatprep.subr.bf16.mxu1 %v9964_v45  ;;  %v10447_v14 = vld [vmem:[%s14262_s3 + $0xf0] sm:$0xff]   ;;  %v1083_v45 = vsub.s32 7, %v13651_v53 }
 0x3f9   :  { %v1084_v24 = vrot.slane %v13811_v30, %v1083_v45 }
 0x3fa   :  { %7415 = vmatpush1.bf16.msra.mxu0 %v9961_v19  ;;  %7579 = vmatpush1.bf16.msra.mxu1 %v9963_v21  ;;  %v10449_v19 = vld [vmem:[%s14262_s3 + $0xb0] sm:$0xff]   ;;  %v1064_v21 = vrot.slane %v13811_v30, %v1063_v37  ;;  %v10302_v37 = vadd.f32 %v12091_v33, %v1056_v18 }
 0x3fb   :  { %7416 = vmatprep.subr.bf16.mxu0 %v9978_v23  ;;  %7580 = vmatprep.subr.bf16.mxu1 %v9980_v26  ;;  %v10451_v23 = vld [vmem:[%s14262_s3 + $0xf8] sm:$0xff]   ;;  %v10309_v33 = vadd.f32 %v12901_v25, %v1084_v24  ;;  %v10459_v25 = vld [vmem:[%s14262_s3 + $0x1c8] sm:$0xff]  }
 0x3fc   :  { %v10452_v26 = vld [vmem:[%s14262_s3 + $0x38] sm:$0xff]   ;;  %v7593_v47 = vpack.c.bf16 %v10302_v37, %v10302_v37  ;;  %v10491_v24 = vld [vmem:[%s14262_s3 + $0x2c8] sm:$0xff]  }
 0x3fd   :  { %v10492_v37 = vld [vmem:[%s14262_s3 + $0x208] sm:$0xff]  }
 0x3fe   :  { %7417 = vmatpush1.bf16.msra.mxu0 %v9977_v32  ;;  %7581 = vmatpush1.bf16.msra.mxu1 %v9979_v41  ;;  %v10304_v32 = vadd.f32 %v12099_v38, %v1064_v21  ;;  %v10455_v41 = vld [vmem:[%s14262_s3 + $0x1c0] sm:$0xff]  }
 0x3ff   :  { %7418 = vmatprep.subr.bf16.mxu0 %v9994_v43  ;;  %7582 = vmatprep.subr.bf16.mxu1 %v9996_v44  ;;  %v10307_v43 = vadd.f32 %v12893_v35, %v1076_v29  ;;  %v10456_v44 = vld [vmem:[%s14262_s3 + $0x100] sm:$0xff]   ;;  %v10458_v35 = vld [vmem:[%s14262_s3 + $0x148] sm:$0xff]   ;;  %v7602_v29 = vpack.c.bf16 %v13708_v3, %v13708_v3 }
 0x400   :  { %v10457_v38 = vld [vmem:[%s14262_s3 + $0x180] sm:$0xff]   ;;  %v10493_v3 = vld [vmem:[%s14262_s3 + $0x288] sm:$0xff]  }
 0x401   :  { %v7598_v50 = vpack.c.bf16 %v10307_v43, %v10307_v43  ;;  %v10489_v21 = vld [vmem:[%s14262_s3 + $0x280] sm:$0xff]   ;;  %v10499_v43 = vld [vmem:[%s14262_s3 + $0x2d8] sm:$0xff]  }
 0x402   :  { %7419 = vmatpush1.bf16.msra.mxu0 %v9993_v51  ;;  %7583 = vmatpush1.bf16.msra.mxu1 %v9995_v52  ;;  %v7600_v51 = vpack.c.bf16 %v10309_v33, %v10309_v33  ;;  %v10461_v52 = vld [vmem:[%s14262_s3 + $0x188] sm:$0xff]   ;;  %v10500_v33 = vld [vmem:[%s14262_s3 + $0x218] sm:$0xff]  }
 0x403   :  { %10126 = vmatprep.subr.bf16.mxu0 %v10422_v48  ;;  %10148 = vmatprep.subr.bf16.mxu1 %v10423_v22  ;;  %v7595_v48 = vpack.c.bf16 %v10304_v32, %v10304_v32  ;;  %v10460_v22 = vld [vmem:[%s14262_s3 + $0x108] sm:$0xff]   ;;  %v10497_v32 = vld [vmem:[%s14262_s3 + $0x290] sm:$0xff]  }
 0x405   :  { %7421 = vmatmul.mubr.bf16.vlgmr.msra.gmra.mrb[12].mxu0 %v11431_v55  ;;  %7585 = vmatmul.mubr.bf16.vlgmr.msra.gmra.mrb[12].mxu1 %v11431_v55  ;;  %v10431_v55 = vld [vmem:[%s14262_s3 + $0xd0] sm:$0xff]  }
 0x406   :  { %10127 = vmatpush3.bf16.msra.mxu0 %v10424_v57  ;;  %8672 = vmatprep.mubr.bf16.mxu0 %v7594_v58  ;;  %v10464_v57 = vld [vmem:[%s14262_s3 + $0x110] sm:$0xff]   ;;  %v10467_v58 = vld [vmem:[%s14262_s3 + $0x1d8] sm:$0xff]  }
 0x407   :  { %10149 = vmatpush3.bf16.msra.mxu1 %v10425_v49  ;;  %8712 = vmatprep.mubr.bf16.mxu1 %v7596_v42  ;;  %v10465_v49 = vld [vmem:[%s14262_s3 + $0x190] sm:$0xff]   ;;  %v10469_v42 = vld [vmem:[%s14262_s3 + $0x198] sm:$0xff]  }
 0x408   :  { %10128 = vmatprep.subr.bf16.mxu0 %v10426_v56  ;;  %10150 = vmatprep.subr.bf16.mxu1 %v10427_v40  ;;  %v10466_v56 = vld [vmem:[%s14262_s3 + $0x158] sm:$0xff]  }
 0x409   :  { %v10468_v40 = vld [vmem:[%s14262_s3 + $0x118] sm:$0xff]  }
 0x40a   :  { %10129 = vmatpush3.bf16.msra.mxu0 %v10428_v59  ;;  %v10470_v59 = vld [vmem:[%s14262_s3 + $0x160] sm:$0xff]  }
 0x40b   :  { %10151 = vmatpush3.bf16.msra.mxu1 %v10429_v31  ;;  %10130 = vmatprep.subr.bf16.mxu0 %v10430_v60  ;;  %v10471_v31 = vld [vmem:[%s14262_s3 + $0x1e0] sm:$0xff]  }
 0x40c   :  { %10152 = vmatprep.subr.bf16.mxu1 %v10431_v55  ;;  %v10472_v60 = vld [vmem:[%s14262_s3 + $0x120] sm:$0xff]  }
 0x40d   :  { %v10473_v55 = vld [vmem:[%s14262_s3 + $0x1a0] sm:$0xff]  }
 0x40e   :  { %10131 = vmatpush3.bf16.msra.mxu0 %v10432_v61  ;;  %v10474_v61 = vld [vmem:[%s14262_s3 + $0x168] sm:$0xff]  }
 0x40f   :  { %10153 = vmatpush3.bf16.msra.mxu1 %v10433_v62  ;;  %10132 = vmatprep.subr.bf16.mxu0 %v10434_v39  ;;  %v10475_v62 = vld [vmem:[%s14262_s3 + $0x1e8] sm:$0xff]  }
 0x410   :  { %10154 = vmatprep.subr.bf16.mxu1 %v10435_v0  ;;  %v10476_v39 = vld [vmem:[%s14262_s3 + $0x128] sm:$0xff]   ;;  %v1071_v0 = vsub.s32 4, %v13651_v53 }
 0x412   :  { %10133 = vmatpush3.bf16.msra.mxu0 %v10436_v1  ;;  %v10477_v1 = vld [vmem:[%s14262_s3 + $0x1a8] sm:$0xff]  }
 0x413   :  { %10155 = vmatpush3.bf16.msra.mxu1 %v10437_v4  ;;  %10134 = vmatprep.subr.bf16.mxu0 %v10438_v5  ;;  %v10478_v4 = vld [vmem:[%s14262_s3 + $0x170] sm:$0xff]   ;;  %v1079_v5 = vsub.s32 6, %v13651_v53 }
 0x414   :  { %10156 = vmatprep.subr.bf16.mxu1 %v10439_v6  ;;  %v10479_v6 = vld [vmem:[%s14262_s3 + $0x1f0] sm:$0xff]  }
 0x416   :  { %10135 = vmatpush3.bf16.msra.mxu0 %v10440_v7  ;;  %v10480_v7 = vld [vmem:[%s14262_s3 + $0x130] sm:$0xff]  }
 0x417   :  { %10157 = vmatpush3.bf16.msra.mxu1 %v10441_v8  ;;  %10136 = vmatprep.subr.bf16.mxu0 %v10442_v9  ;;  %v1072_v8 = vrot.slane %v13811_v30, %v1071_v0  ;;  %v10481_v9 = vld [vmem:[%s14262_s3 + $0x1b0] sm:$0xff]  }
 0x418   :  { %10158 = vmatprep.subr.bf16.mxu1 %v10443_v10  ;;  %v10482_v10 = vld [vmem:[%s14262_s3 + $0x178] sm:$0xff]  }
 0x41a   :  { %10137 = vmatpush3.bf16.msra.mxu0 %v10444_v11  ;;  %v1080_v11 = vrot.slane %v13811_v30, %v1079_v5  ;;  %v10486_v30 = vld [vmem:[%s14262_s3 + $0x240] sm:$0xff]  }
 0x41b   :  { %10159 = vmatpush3.bf16.msra.mxu1 %v10445_v13  ;;  %10138 = vmatprep.subr.bf16.mxu0 %v10446_v12  ;;  %v10483_v13 = vld [vmem:[%s14262_s3 + $0x1f8] sm:$0xff]  }
 0x41c   :  { %10160 = vmatprep.subr.bf16.mxu1 %v10447_v14  ;;  %v10484_v12 = vld [vmem:[%s14262_s3 + $0x138] sm:$0xff]   ;;  %v10306_v14 = vadd.f32 %v12883_v28, %v1072_v8  ;;  %v10308_v18 = vadd.f32 %v12891_v34, %v1080_v11  ;;  %v10488_v28 = vld [vmem:[%s14262_s3 + $0x200] sm:$0xff]   ;;  %v10490_v34 = vld [vmem:[%s14262_s3 + $0x248] sm:$0xff]  }
 0x41d   :  { %v10530_v8 = vld [vmem:[%s14262_s3 + $0x358] sm:$0xff]  }
 0x41e   :  { %10139 = vmatpush3.bf16.msra.mxu0 %v10448_v17  ;;  %v10485_v17 = vld [vmem:[%s14262_s3 + $0x1b8] sm:$0xff]  }
 0x41f   :  { %10161 = vmatpush3.bf16.msra.mxu1 %v10449_v19  ;;  %10140 = vmatprep.subr.bf16.mxu0 %v10450_v20  ;;  %v10487_v19 = vld [vmem:[%s14262_s3 + $0x2c0] sm:$0xff]   ;;  %v7597_v20 = vpack.c.bf16 %v10306_v14, %v10306_v14  ;;  %v10533_v11 = vld [vmem:[%s14262_s3 + $0x398] sm:$0xff]  }
 0x420   :  { %10162 = vmatprep.subr.bf16.mxu1 %v10451_v23  ;;  %v7599_v23 = vpack.c.bf16 %v10308_v18, %v10308_v18  ;;  %v10536_v14 = vld [vmem:[%s14262_s3 + $0x320] sm:$0xff]   ;;  %v10539_v18 = vld [vmem:[%s14262_s3 + $0x3e8] sm:$0xff]  }
 0x422   :  { %10141 = vmatpush3.bf16.msra.mxu0 %v10452_v26  ;;  %v7604_v26 = vpack.c.bf16 %v13716_v36, %v13716_v36  ;;  %v10495_v36 = vld [vmem:[%s14262_s3 + $0x2d0] sm:$0xff]  }
 0x423   :  { %10163 = vmatpush3.bf16.msra.mxu1 %v10453_v27  ;;  %10170 = vmatprep.subr.bf16.mxu0 %v10454_v15  ;;  %v10494_v27 = vld [vmem:[%s14262_s3 + $0x250] sm:$0xff]  }
 0x424   :  { %10192 = vmatprep.subr.bf16.mxu1 %v10455_v41  ;;  %v10496_v15 = vld [vmem:[%s14262_s3 + $0x210] sm:$0xff]   ;;  %v10498_v41 = vld [vmem:[%s14262_s3 + $0x258] sm:$0xff]  }
 0x425   :  { %8673 = vmatmul.mubr.bf16.vlgmr.msra.gmra.mrb[16].mxu0 %v7593_v47  ;;  %v10502_v47 = vld [vmem:[%s14262_s3 + $0x260] sm:$0xff]  }
 0x426   :  { %8713 = vmatmul.mubr.bf16.vlgmr.msra.gmra.mrb[16].mxu1 %v7595_v48  ;;  %10171 = vmatpush3.bf16.msra.mxu0 %v10456_v44  ;;  %v10501_v44 = vld [vmem:[%s14262_s3 + $0x298] sm:$0xff]   ;;  %v10504_v48 = vld [vmem:[%s14262_s3 + $0x220] sm:$0xff]  }
 0x427   :  { %8752 = vmatprep.mubr.bf16.mxu0 %v7598_v50  ;;  %10193 = vmatpush3.bf16.msra.mxu1 %v10457_v38  ;;  %v10503_v38 = vld [vmem:[%s14262_s3 + $0x2e0] sm:$0xff]   ;;  %v10506_v50 = vld [vmem:[%s14262_s3 + $0x268] sm:$0xff]  }
 0x428   :  { %8792 = vmatprep.mubr.bf16.mxu1 %v7600_v51  ;;  %10172 = vmatprep.subr.bf16.mxu0 %v10458_v35  ;;  %v10505_v35 = vld [vmem:[%s14262_s3 + $0x2a0] sm:$0xff]   ;;  %v10508_v51 = vld [vmem:[%s14262_s3 + $0x228] sm:$0xff]  }
 0x429   :  { %10194 = vmatprep.subr.bf16.mxu1 %v10459_v25  ;;  %v10507_v25 = vld [vmem:[%s14262_s3 + $0x2e8] sm:$0xff]  }
 0x42a   :  { %10173 = vmatpush3.bf16.msra.mxu0 %v10460_v22  ;;  %v10509_v22 = vld [vmem:[%s14262_s3 + $0x2a8] sm:$0xff]  }
 0x42b   :  { %10195 = vmatpush3.bf16.msra.mxu1 %v10461_v52  ;;  %10174 = vmatprep.subr.bf16.mxu0 %v10462_v46  ;;  %v10510_v52 = vld [vmem:[%s14262_s3 + $0x270] sm:$0xff]  }
 0x42c   :  { %10196 = vmatprep.subr.bf16.mxu1 %v10463_v54  ;;  %v10511_v46 = vld [vmem:[%s14262_s3 + $0x2f0] sm:$0xff]  }
 0x42d   :  { %v10512_v54 = vld [vmem:[%s14262_s3 + $0x230] sm:$0xff]  }
 0x42e   :  { %10175 = vmatpush3.bf16.msra.mxu0 %v10464_v57  ;;  %v10513_v57 = vld [vmem:[%s14262_s3 + $0x2b0] sm:$0xff]  }
 0x42f   :  { %10197 = vmatpush3.bf16.msra.mxu1 %v10465_v49  ;;  %10176 = vmatprep.subr.bf16.mxu0 %v10466_v56  ;;  %v10514_v49 = vld [vmem:[%s14262_s3 + $0x278] sm:$0xff]  }
 0x430   :  { %10198 = vmatprep.subr.bf16.mxu1 %v10467_v58  ;;  %v10515_v56 = vld [vmem:[%s14262_s3 + $0x2f8] sm:$0xff]  }
 0x431   :  { %v10516_v58 = vld [vmem:[%s14262_s3 + $0x238] sm:$0xff]  }
 0x432   :  { %10177 = vmatpush3.bf16.msra.mxu0 %v10468_v40  ;;  %v10517_v40 = vld [vmem:[%s14262_s3 + $0x2b8] sm:$0xff]  }
 0x433   :  { %10199 = vmatpush3.bf16.msra.mxu1 %v10469_v42  ;;  %10178 = vmatprep.subr.bf16.mxu0 %v10470_v59  ;;  %v10518_v42 = vld [vmem:[%s14262_s3 + $0x340] sm:$0xff]  }
 0x434   :  { %10200 = vmatprep.subr.bf16.mxu1 %v10471_v31  ;;  %v10519_v59 = vld [vmem:[%s14262_s3 + $0x3c0] sm:$0xff]  }
 0x435   :  { %v10520_v31 = vld [vmem:[%s14262_s3 + $0x300] sm:$0xff]  }
 0x436   :  { %10179 = vmatpush3.bf16.msra.mxu0 %v10472_v60  ;;  %v7601_v60 = vpack.c.bf16 %v13704_v63, %v13704_v63  ;;  %v10524_v63 = vld [vmem:[%s14262_s3 + $0x308] sm:$0xff]  }
 0x437   :  { %10201 = vmatpush3.bf16.msra.mxu1 %v10473_v55  ;;  %10180 = vmatprep.subr.bf16.mxu0 %v10474_v61  ;;  %v10521_v55 = vld [vmem:[%s14262_s3 + $0x380] sm:$0xff]   ;;  %v10522_v61 = vld [vmem:[%s14262_s3 + $0x348] sm:$0xff]  }
 0x438   :  { %10202 = vmatprep.subr.bf16.mxu1 %v10475_v62  ;;  %v7603_v62 = vpack.c.bf16 %v13706_v2, %v13706_v2  ;;  %v10526_v2 = vld [vmem:[%s14262_s3 + $0x350] sm:$0xff]  }
 0x43a   :  { %10181 = vmatpush3.bf16.msra.mxu0 %v10476_v39  ;;  %v10523_v39 = vld [vmem:[%s14262_s3 + $0x3c8] sm:$0xff]  }
 0x43b   :  { %10203 = vmatpush3.bf16.msra.mxu1 %v10477_v1  ;;  %10182 = vmatprep.subr.bf16.mxu0 %v10478_v4  ;;  %v10525_v1 = vld [vmem:[%s14262_s3 + $0x388] sm:$0xff]   ;;  %v10527_v4 = vld [vmem:[%s14262_s3 + $0x3d0] sm:$0xff]  }
 0x43c   :  { %10204 = vmatprep.subr.bf16.mxu1 %v10479_v6  ;;  %v10528_v6 = vld [vmem:[%s14262_s3 + $0x310] sm:$0xff]  }
 0x43e   :  { %10183 = vmatpush3.bf16.msra.mxu0 %v10480_v7  ;;  %v10529_v7 = vld [vmem:[%s14262_s3 + $0x390] sm:$0xff]  }
 0x43f   :  { %10205 = vmatpush3.bf16.msra.mxu1 %v10481_v9  ;;  %10184 = vmatprep.subr.bf16.mxu0 %v10482_v10  ;;  %v10531_v9 = vld [vmem:[%s14262_s3 + $0x3d8] sm:$0xff]  }
 0x440   :  { %10206 = vmatprep.subr.bf16.mxu1 %v10483_v13  ;;  %v10532_v10 = vld [vmem:[%s14262_s3 + $0x318] sm:$0xff]   ;;  %v10534_v13 = vld [vmem:[%s14262_s3 + $0x360] sm:$0xff]  }
 0x442   :  { %10185 = vmatpush3.bf16.msra.mxu0 %v10484_v12  ;;  %v10535_v12 = vld [vmem:[%s14262_s3 + $0x3e0] sm:$0xff]  }
 0x443   :  { %10207 = vmatpush3.bf16.msra.mxu1 %v10485_v17  ;;  %10214 = vmatprep.subr.bf16.mxu0 %v10486_v30  ;;  %v10537_v17 = vld [vmem:[%s14262_s3 + $0x3a0] sm:$0xff]   ;;  %v10538_v30 = vld [vmem:[%s14262_s3 + $0x368] sm:$0xff]  }
 0x444   :  { %10236 = vmatprep.subr.bf16.mxu1 %v10487_v19  ;;  %v10540_v19 = vld [vmem:[%s14262_s3 + $0x328] sm:$0xff]  }
 0x445   :  { %8753 = vmatmul.mubr.bf16.vlgmr.msra.gmra.mrb[20].mxu0 %v7597_v20  ;;  %v10542_v20 = vld [vmem:[%s14262_s3 + $0x370] sm:$0xff]  }
 0x446   :  { %8793 = vmatmul.mubr.bf16.vlgmr.msra.gmra.mrb[20].mxu1 %v7599_v23  ;;  %10215 = vmatpush3.bf16.msra.mxu0 %v10488_v28  ;;  %v10541_v28 = vld [vmem:[%s14262_s3 + $0x3a8] sm:$0xff]   ;;  %v10544_v23 = vld [vmem:[%s14262_s3 + $0x330] sm:$0xff]  }
 0x447   :  { %8832 = vmatprep.mubr.bf16.mxu0 %v7602_v29  ;;  %10237 = vmatpush3.bf16.msra.mxu1 %v10489_v21  ;;  %v10543_v21 = vld [vmem:[%s14262_s3 + $0x3f0] sm:$0xff]   ;;  %v10546_v29 = vld [vmem:[%s14262_s3 + $0x378] sm:$0xff]  }
 0x448   :  { %8872 = vmatprep.mubr.bf16.mxu1 %v7604_v26  ;;  %10216 = vmatprep.subr.bf16.mxu0 %v10490_v34  ;;  %v10545_v34 = vld [vmem:[%s14262_s3 + $0x3b0] sm:$0xff]   ;;  %v10548_v26 = vld [vmem:[%s14262_s3 + $0x338] sm:$0xff]  }
 0x449   :  { %10238 = vmatprep.subr.bf16.mxu1 %v10491_v24  ;;  %v10547_v24 = vld [vmem:[%s14262_s3 + $0x3f8] sm:$0xff]  }
 0x44a   :  { %10217 = vmatpush3.bf16.msra.mxu0 %v10492_v37  ;;  %v10549_v37 = vld [vmem:[%s14262_s3 + $0x3b8] sm:$0xff]  }
 0x44b   :  { %10239 = vmatpush3.bf16.msra.mxu1 %v10493_v3  ;;  %10218 = vmatprep.subr.bf16.mxu0 %v10494_v27  ;;  %v10550_v3 = vld [vmem:[%s14263_s2 + $0x8] sm:$0xff] }
 0x44c   :  { %10240 = vmatprep.subr.bf16.mxu1 %v10495_v36  ;;  %v1104_v27 = vrot.slane %v10550_v3, %v1071_v0  ;;  %v1112_v36 = vrot.slane %v10550_v3, %v1079_v5 }
 0x44e   :  { %10219 = vmatpush3.bf16.msra.mxu0 %v10496_v15  ;;  %v1108_v15 = vrot.slane %v10550_v3, %v1075_v16 }
 0x44f   :  { %10241 = vmatpush3.bf16.msra.mxu1 %v10497_v32  ;;  %10220 = vmatprep.subr.bf16.mxu0 %v10498_v41  ;;  %v1116_v32 = vrot.slane %v10550_v3, %v1083_v45  ;;  %v9997_v45 = vld [vmem:[%s14264_s4] ss:$0 sm:$0xff] }
 0x450   :  { %10242 = vmatprep.subr.bf16.mxu1 %v10499_v43 }
 0x452   :  { %10221 = vmatpush3.bf16.msra.mxu0 %v10500_v33 }
 0x453   :  { %10243 = vmatpush3.bf16.msra.mxu1 %v10501_v44  ;;  %10222 = vmatprep.subr.bf16.mxu0 %v10502_v47 }
 0x454   :  { %10244 = vmatprep.subr.bf16.mxu1 %v10503_v38 }
 0x456   :  { %10223 = vmatpush3.bf16.msra.mxu0 %v10504_v48 }
 0x457   :  { %10245 = vmatpush3.bf16.msra.mxu1 %v10505_v35  ;;  %10224 = vmatprep.subr.bf16.mxu0 %v10506_v50 }
 0x458   :  { %10246 = vmatprep.subr.bf16.mxu1 %v10507_v25 }
 0x45a   :  { %10225 = vmatpush3.bf16.msra.mxu0 %v10508_v51 }
 0x45b   :  { %10247 = vmatpush3.bf16.msra.mxu1 %v10509_v22  ;;  %10226 = vmatprep.subr.bf16.mxu0 %v10510_v52 }
 0x45c   :  { %10248 = vmatprep.subr.bf16.mxu1 %v10511_v46 }
 0x45e   :  { %10227 = vmatpush3.bf16.msra.mxu0 %v10512_v54 }
 0x45f   :  { %10249 = vmatpush3.bf16.msra.mxu1 %v10513_v57  ;;  %10228 = vmatprep.subr.bf16.mxu0 %v10514_v49 }
 0x460   :  { %10250 = vmatprep.subr.bf16.mxu1 %v10515_v56 }
 0x462   :  { %10229 = vmatpush3.bf16.msra.mxu0 %v10516_v58 }
 0x463   :  { %10251 = vmatpush3.bf16.msra.mxu1 %v10517_v40  ;;  %10258 = vmatprep.subr.bf16.mxu0 %v10518_v42 }
 0x464   :  { %10280 = vmatprep.subr.bf16.mxu1 %v10519_v59 }
 0x465   :  { %8833 = vmatmul.mubr.bf16.vlgmr.msra.gmra.mrb[24].mxu0 %v7601_v60 }
 0x466   :  { %8873 = vmatmul.mubr.bf16.vlgmr.msra.gmra.mrb[24].mxu1 %v7603_v62  ;;  %10259 = vmatpush3.bf16.msra.mxu0 %v10520_v31 }
 0x467   :  { %10281 = vmatpush3.bf16.msra.mxu1 %v10521_v55  ;;  %10260 = vmatprep.subr.bf16.mxu0 %v10522_v61 }
 0x468   :  { %10282 = vmatprep.subr.bf16.mxu1 %v10523_v39 }
 0x46a   :  { %10261 = vmatpush3.bf16.msra.mxu0 %v10524_v63 }
 0x46b   :  { %10283 = vmatpush3.bf16.msra.mxu1 %v10525_v1  ;;  %10262 = vmatprep.subr.bf16.mxu0 %v10526_v2 }
 0x46c   :  { %10284 = vmatprep.subr.bf16.mxu1 %v10527_v4 }
 0x46e   :  { %10263 = vmatpush3.bf16.msra.mxu0 %v10528_v6 }
 0x46f   :  { %10285 = vmatpush3.bf16.msra.mxu1 %v10529_v7  ;;  %10264 = vmatprep.subr.bf16.mxu0 %v10530_v8 }
 0x470   :  { %10286 = vmatprep.subr.bf16.mxu1 %v10531_v9 }
 0x472   :  { %10265 = vmatpush3.bf16.msra.mxu0 %v10532_v10 }
 0x473   :  { %10287 = vmatpush3.bf16.msra.mxu1 %v10533_v11  ;;  %10266 = vmatprep.subr.bf16.mxu0 %v10534_v13 }
 0x474   :  { %10288 = vmatprep.subr.bf16.mxu1 %v10535_v12 }
 0x476   :  { %10267 = vmatpush3.bf16.msra.mxu0 %v10536_v14 }
 0x477   :  { %10289 = vmatpush3.bf16.msra.mxu1 %v10537_v17  ;;  %10268 = vmatprep.subr.bf16.mxu0 %v10538_v30 }
 0x478   :  { %10290 = vmatprep.subr.bf16.mxu1 %v10539_v18 }
 0x47a   :  { %10269 = vmatpush3.bf16.msra.mxu0 %v10540_v19 }
 0x47b   :  { %10291 = vmatpush3.bf16.msra.mxu1 %v10541_v28  ;;  %10270 = vmatprep.subr.bf16.mxu0 %v10542_v20 }
 0x47c   :  { %10292 = vmatprep.subr.bf16.mxu1 %v10543_v21 }
 0x47e   :  { %10271 = vmatpush3.bf16.msra.mxu0 %v10544_v23 }
 0x47f   :  { %10293 = vmatpush3.bf16.msra.mxu1 %v10545_v34  ;;  %10272 = vmatprep.subr.bf16.mxu0 %v10546_v29 }
 0x480   :  { %10294 = vmatprep.subr.bf16.mxu1 %v10547_v24 }
 0x482   :  { %10273 = vmatpush3.bf16.msra.mxu0 %v10548_v26 }
 0x483   :  { %10295 = vmatpush3.bf16.msra.mxu1 %v10549_v37 }
 0x4d8   :  { %v7422_v41 = vpop.f32.mrb[12].mxu0  ;;  %v7586_v33 = vpop.f32.mrb[12].mxu1 }
 0x4d9   :  { %v10314_v43 = vadd.f32 %v7422_v41, %v1104_v27  ;;  %v7424_v44 = vpop.f32.mrb[13].mxu0  ;;  %v10316_v47 = vadd.f32 %v7586_v33, %v1112_v36  ;;  %v7588_v48 = vpop.f32.mrb[13].mxu1 }
 0x4da   :  { %v10315_v38 = vadd.f32 %v7424_v44, %v1108_v15  ;;  %v7426_v35 = vpop.f32.mrb[14].mxu0  ;;  %v10317_v50 = vadd.f32 %v7588_v48, %v1116_v32  ;;  %v7590_v25 = vpop.f32.mrb[14].mxu1 }
 0x4db   :  { %v7427_v0 = vpop.f32.mrb[15].mxu0  ;;  %v7591_v22 = vpop.f32.mrb[15].mxu1  ;;  %v7605_v5 = vpack.c.bf16 %v10314_v43, %v10314_v43  ;;  %v7607_v46 = vpack.c.bf16 %v10316_v47, %v10316_v47 }
 0x4dc   :  { %v7606_v51 = vpack.c.bf16 %v10315_v38, %v10315_v38  ;;  %v7608_v52 = vpack.c.bf16 %v10317_v50, %v10317_v50 }
 0x4de   :  { %8912 = vmatprep.mubr.bf16.mxu0 %v7606_v51  ;;  %8952 = vmatprep.mubr.bf16.mxu1 %v7608_v52 }
 0x4df   :  { %8913 = vmatmul.mubr.bf16.vlgmr.msra.gmra.mrb[28].mxu0 %v7605_v5  ;;  %8953 = vmatmul.mubr.bf16.vlgmr.msra.gmra.mrb[28].mxu1 %v7607_v46 }
 0x4f8   :  { %v10142_v53 = vpop.f32.mrb[16].mxu0 }
 0x4f9   :  { %v10164_v16 = vpop.f32.mrb[16].mxu1  ;;  %v10143_v54 = vpop.f32.mrb[17].mxu0 }
 0x4fa   :  { %v10144_v57 = vadd.f32 %v10143_v54, %v10142_v53  ;;  %v10165_v49 = vpop.f32.mrb[17].mxu1  ;;  %v10145_v56 = vpop.f32.mrb[18].mxu0 }
 0x4fb   :  { %v10166_v58 = vadd.f32 %v10165_v49, %v10164_v16  ;;  %v10167_v40 = vpop.f32.mrb[18].mxu1  ;;  %v10146_v42 = vpop.f32.mrb[19].mxu0 }
 0x4fc   :  { %v8675_v59 = vadd.f32 %v10144_v57, %v9997_v45  ;;  %v10168_v31 = vpop.f32.mrb[19].mxu1 }
 0x4fe   :  { %v8715_v60 = vadd.f32 %v10166_v58, %v8675_v59 }
 0x518   :  { %v10186_v55 = vpop.f32.mrb[20].mxu0 }
 0x519   :  { %v10208_v61 = vpop.f32.mrb[20].mxu1  ;;  %v10187_v62 = vpop.f32.mrb[21].mxu0 }
 0x51a   :  { %v10188_v39 = vadd.f32 %v10187_v62, %v10186_v55  ;;  %v10209_v63 = vpop.f32.mrb[21].mxu1  ;;  %v10189_v1 = vpop.f32.mrb[22].mxu0 }
 0x51b   :  { %v10210_v2 = vadd.f32 %v10209_v63, %v10208_v61  ;;  %v10211_v4 = vpop.f32.mrb[22].mxu1  ;;  %v10190_v6 = vpop.f32.mrb[23].mxu0 }
 0x51c   :  { %v8755_v7 = vadd.f32 %v10188_v39, %v8715_v60  ;;  %v10212_v8 = vpop.f32.mrb[23].mxu1 }
 0x51e   :  { %v8795_v9 = vadd.f32 %v10210_v2, %v8755_v7 }
 0x538   :  { %v10230_v10 = vpop.f32.mrb[24].mxu0 }
 0x539   :  { %v10252_v11 = vpop.f32.mrb[24].mxu1  ;;  %v10231_v13 = vpop.f32.mrb[25].mxu0 }
 0x53a   :  { %v10232_v12 = vadd.f32 %v10231_v13, %v10230_v10  ;;  %v10253_v14 = vpop.f32.mrb[25].mxu1  ;;  %v10233_v17 = vpop.f32.mrb[26].mxu0 }
 0x53b   :  { %v10254_v30 = vadd.f32 %v10253_v14, %v10252_v11  ;;  %v10255_v18 = vpop.f32.mrb[26].mxu1  ;;  %v10234_v19 = vpop.f32.mrb[27].mxu0 }
 0x53c   :  { %v8835_v28 = vadd.f32 %v10232_v12, %v8795_v9  ;;  %v10256_v20 = vpop.f32.mrb[27].mxu1 }
 0x53e   :  { %v8875_v21 = vadd.f32 %v10254_v30, %v8835_v28 }
 0x5b2   :  { %v10274_v23 = vpop.f32.mrb[28].mxu0  ;;  %v10296_v34 = vpop.f32.mrb[28].mxu1 }
 0x5b3   :  { %v10275_v29 = vpop.f32.mrb[29].mxu0  ;;  %v10297_v26 = vpop.f32.mrb[29].mxu1 }
 0x5b4   :  { %v10276_v24 = vadd.f32 %v10275_v29, %v10274_v23  ;;  %v10277_v37 = vpop.f32.mrb[30].mxu0  ;;  %v10298_v3 = vadd.f32 %v10297_v26, %v10296_v34  ;;  %v10299_v27 = vpop.f32.mrb[30].mxu1 }
 0x5b5   :  { %v10278_v36 = vpop.f32.mrb[31].mxu0  ;;  %v10300_v32 = vpop.f32.mrb[31].mxu1 }
 0x5b6   :  { %v8915_v15 = vadd.f32 %v10276_v24, %v8875_v21 }
 0x5b8   :  { %v8955_v41 = vadd.f32 %v10298_v3, %v8915_v15 }
 0x5ba   :  { %8960 = vst [vmem:[%s14265_s5] sm:$0xff] %v8955_v41 }

</bundles_post_ra>
